<compile_context>
chip_gen: v7x
topology: tpu7x:2x2x1
jax: 0.10.0
libtpu: 0.0.40
codegen_flags: <defaults>
</compile_context>

<pallas_src>
import numpy as np

import jax
import jax.numpy as jnp
from jax.experimental import pallas as pl
from jax.experimental.pallas import tpu as pltpu


def _round_up(n, m):
    return ((n + m - 1) // m) * m


# ---------------------------------------------------------------------------
# Kernel 1: fused conv1 -> ReLU -> pool1 -> conv2 -> ReLU -> pool2 (per image)
#
# Layout inside the kernel: 2-D slabs (rows = image row y, lanes = x*C + c).
#   h1 : (28, 28*32=896)   conv1 output
#   p1 : (18, 18*32=576)   pooled+zero-padded conv2 input
#   h2 : (14, 14*64=896)   conv2 output
#   out: ( 7,  7*64=448)   pooled, flattened in (h, w, c) order
# ---------------------------------------------------------------------------
def _conv_stack_kernel(x_ref, b1w_ref, b1b_ref, sr1_ref, sc1_ref,
                       b2w_ref, b2b_ref, sr2_ref, sc2_ref, o_ref):
    f32, bf16 = jnp.float32, jnp.bfloat16
    x = x_ref[0].astype(bf16)                      # (32, 32) zero-padded image

    # conv1 (5x5, pad 2): 5 structured matmuls, lane-dense N=896, MXU + f32 acc
    h1 = jnp.zeros((28, 896), f32)
    for ky in range(5):
        h1 = h1 + jnp.dot(x[ky:ky + 28, :], b1w_ref[ky],
                          preferred_element_type=f32)
    h1 = jnp.maximum(h1 + b1b_ref[...], 0.0)       # bias + ReLU

    # maxpool1 2x2/2: vertical max, horizontal max via 32-lane roll (even/odd
    # swizzle on the XLU), then 0/1 selection matmuls that downsample AND
    # scatter into conv2's zero-padded layout.
    v = jnp.maximum(h1[0:27, :], h1[1:28, :])                      # (27, 896)
    v = jnp.maximum(v, pltpu.roll(v, shift=896 - 32, axis=1))
    v = v.astype(bf16)
    t = jnp.dot(sr1_ref[...], v, preferred_element_type=f32)       # (18, 896)
    p1 = jnp.dot(t.astype(bf16), sc1_ref[...],
                 preferred_element_type=f32)                       # (18, 576)
    p1 = p1.astype(bf16)

    # conv2 (5x5, pad 2): 5 structured matmuls, K=576, N=896
    h2 = jnp.zeros((14, 896), f32)
    for ky in range(5):
        h2 = h2 + jnp.dot(p1[ky:ky + 14, :], b2w_ref[ky],
                          preferred_element_type=f32)
    h2 = jnp.maximum(h2 + b2b_ref[...], 0.0)

    # maxpool2 + flatten-scatter into (7, 7*64) (h, w, c) order
    v2 = jnp.maximum(h2[0:13, :], h2[1:14, :])                     # (13, 896)
    v2 = jnp.maximum(v2, pltpu.roll(v2, shift=896 - 64, axis=1))
    v2 = v2.astype(bf16)
    t2 = jnp.dot(sr2_ref[...], v2, preferred_element_type=f32)     # (7, 896)
    o = jnp.dot(t2.astype(bf16), sc2_ref[...],
                preferred_element_type=f32)                        # (7, 448)
    o_ref[0] = o.astype(bf16)


def conv_stack(xp, prep):
    B = xp.shape[0]
    return pl.pallas_call(
        _conv_stack_kernel,
        out_shape=jax.ShapeDtypeStruct((B, 7, 448), jnp.bfloat16),
        grid_spec=pltpu.PrefetchScalarGridSpec(
            num_scalar_prefetch=0,
            grid=(B,),
            in_specs=[
                pl.BlockSpec((1, 32, 32), lambda i: (i, 0, 0)),     # padded x
                pl.BlockSpec((5, 32, 896), lambda i: (0, 0, 0)),    # conv1 W
                pl.BlockSpec((1, 896), lambda i: (0, 0)),           # conv1 b
                pl.BlockSpec((18, 27), lambda i: (0, 0)),           # pool1 rowsel
                pl.BlockSpec((896, 576), lambda i: (0, 0)),         # pool1 colsel
                pl.BlockSpec((5, 576, 896), lambda i: (0, 0, 0)),   # conv2 W
                pl.BlockSpec((1, 896), lambda i: (0, 0)),           # conv2 b
                pl.BlockSpec((7, 13), lambda i: (0, 0)),            # pool2 rowsel
                pl.BlockSpec((896, 448), lambda i: (0, 0)),         # pool2 colsel
            ],
            out_specs=pl.BlockSpec((1, 7, 448), lambda i: (i, 0, 0)),
        ),
        compiler_params=pltpu.CompilerParams(
            dimension_semantics=("parallel",),
            vmem_limit_bytes=32 * 1024 * 1024,
        ),
    )(xp, prep["B1"], prep["b1L"], prep["Sr1"], prep["Sc1"],
      prep["B2"], prep["b2L"], prep["Sr2"], prep["Sc2"])


# ---------------------------------------------------------------------------
# Kernel 2: fused fc1(+bias+ReLU) + fc2(+bias).  bf16 matmuls, f32 accumulate.
# ---------------------------------------------------------------------------
def _fc_kernel(x_ref, w1_ref, b1_ref, w2_ref, b2_ref, o_ref):
    h = jnp.dot(x_ref[...], w1_ref[...], preferred_element_type=jnp.float32)
    h = jnp.maximum(h + b1_ref[...], 0.0).astype(jnp.bfloat16)
    o = jnp.dot(h, w2_ref[...], preferred_element_type=jnp.float32)
    o_ref[...] = o + b2_ref[...]


def fc_head(feat, prep):
    B = feat.shape[0]
    tm = min(256, _round_up(B, 8))          # keeps blocks well inside 16 MiB
    Bp = _round_up(B, tm)
    if Bp != B:
        feat = jnp.pad(feat, ((0, Bp - B), (0, 0)))
    out = pl.pallas_call(
        _fc_kernel,
        out_shape=jax.ShapeDtypeStruct((Bp, 10), jnp.float32),
        grid_spec=pltpu.PrefetchScalarGridSpec(
            num_scalar_prefetch=0,
            grid=(Bp // tm,),
            in_specs=[
                pl.BlockSpec((tm, 3136), lambda i: (i, 0)),
                pl.BlockSpec((3136, 512), lambda i: (0, 0)),
                pl.BlockSpec((1, 512), lambda i: (0, 0)),
                pl.BlockSpec((512, 10), lambda i: (0, 0)),
                pl.BlockSpec((1, 10), lambda i: (0, 0)),
            ],
            out_specs=pl.BlockSpec((tm, 10), lambda i: (i, 0)),
        ),
        compiler_params=pltpu.CompilerParams(
            dimension_semantics=("parallel",),
            vmem_limit_bytes=32 * 1024 * 1024,
        ),
    )(feat, prep["W1"], prep["b1"], prep["W2"], prep["b2"])
    return out[:B]


# ---------------------------------------------------------------------------
# One-time parameter prep (host side): build the structured conv weights,
# pooling selection matrices and the flatten-order-permuted fc1 weight.
# ---------------------------------------------------------------------------
def prepare_params(params):
    w1 = np.asarray(params["conv1_w"], np.float32)   # (32, 1, 5, 5)
    b1 = np.asarray(params["conv1_b"], np.float32)
    w2 = np.asarray(params["conv2_w"], np.float32)   # (64, 32, 5, 5)
    b2 = np.asarray(params["conv2_b"], np.float32)
    fw1 = np.asarray(params["fc1_w"], np.float32)    # (512, 3136)
    fb1 = np.asarray(params["fc1_b"], np.float32)
    fw2 = np.asarray(params["fc2_w"], np.float32)    # (10, 512)
    fb2 = np.asarray(params["fc2_b"], np.float32)

    # conv1 structured weight: B1[ky][xi, x*32+c] = w1[c, 0, ky, xi-x]
    B1 = np.zeros((5, 32, 28 * 32), np.float32)
    for ky in range(5):
        for x in range(28):
            for kx in range(5):
                B1[ky, x + kx, x * 32:(x + 1) * 32] = w1[:, 0, ky, kx]
    b1L = np.tile(b1, 28)[None, :]                   # (1, 896)

    # pool1 selection: rows (y -> yo+2) and lanes (x -> xo+2), zero-padding the
    # border rows/lane-groups that conv2's pad=2 needs.
    Sr1 = np.zeros((18, 27), np.float32)
    Sc1 = np.zeros((28 * 32, 18 * 32), np.float32)
    eye32 = np.eye(32, dtype=np.float32)
    for o in range(14):
        Sr1[o + 2, 2 * o] = 1.0
        Sc1[2 * o * 32:(2 * o + 1) * 32, (o + 2) * 32:(o + 3) * 32] = eye32

    # conv2 structured weight: B2[ky][xi*32+ci, x*64+co] = w2[co, ci, ky, xi-x]
    w2t = np.transpose(w2, (2, 3, 1, 0))             # (ky, kx, ci, co)
    B2 = np.zeros((5, 18 * 32, 14 * 64), np.float32)
    for ky in range(5):
        for x in range(14):
            for kx in range(5):
                xi = x + kx
                B2[ky, xi * 32:(xi + 1) * 32, x * 64:(x + 1) * 64] = w2t[ky, kx]
    b2L = np.tile(b2, 14)[None, :]                   # (1, 896)

    Sr2 = np.zeros((7, 13), np.float32)
    Sc2 = np.zeros((14 * 64, 7 * 64), np.float32)
    eye64 = np.eye(64, dtype=np.float32)
    for o in range(7):
        Sr2[o, 2 * o] = 1.0
        Sc2[2 * o * 64:(2 * o + 1) * 64, o * 64:(o + 1) * 64] = eye64

    # Fold PyTorch's NCHW flatten order (c*49 + h*7 + w) into fc1's weight so
    # the kernel-1 output (h, w, c order) feeds fc1 directly (no runtime
    # transpose of the activation).
    W1p = fw1.reshape(512, 64, 7, 7).transpose(2, 3, 1, 0).reshape(3136, 512)
    W2p = fw2.T                                      # (512, 10)

    bf = jnp.bfloat16
    return {
        "B1": jnp.asarray(B1, bf), "b1L": jnp.asarray(b1L, jnp.float32),
        "Sr1": jnp.asarray(Sr1, bf), "Sc1": jnp.asarray(Sc1, bf),
        "B2": jnp.asarray(B2, bf), "b2L": jnp.asarray(b2L, jnp.float32),
        "Sr2": jnp.asarray(Sr2, bf), "Sc2": jnp.asarray(Sc2, bf),
        "W1": jnp.asarray(W1p, bf), "b1": jnp.asarray(fb1[None, :], jnp.float32),
        "W2": jnp.asarray(W2p, bf), "b2": jnp.asarray(fb2[None, :], jnp.float32),
    }


# ---------------------------------------------------------------------------
# ConcatModel.forward (unused submodules resnet50/glove/cnn/fc3/fc4 never run)
# ---------------------------------------------------------------------------
def concat_model_forward(prep, inputs):
    x = inputs.reshape(-1, 28, 28).astype(jnp.float32)       # torch .view
    xp = jnp.pad(x, ((0, 0), (2, 2), (2, 2)))                # pad=2 for conv1
    feat = conv_stack(xp, prep)                              # (B, 7, 448) bf16
    feat = feat.reshape(feat.shape[0], 7 * 448)              # (B, 3136), free
    return fc_head(feat, prep)                               # (B, 10) f32


def init_params(key):
    ks = jax.random.split(key, 8)
    s = 0.05
    return {
        "conv1_w": jax.random.normal(ks[0], (32, 1, 5, 5), jnp.float32) * s,
        "conv1_b": jax.random.normal(ks[1], (32,), jnp.float32) * s,
        "conv2_w": jax.random.normal(ks[2], (64, 32, 5, 5), jnp.float32) * s,
        "conv2_b": jax.random.normal(ks[3], (64,), jnp.float32) * s,
        "fc1_w": jax.random.normal(ks[4], (512, 3136), jnp.float32) * s,
        "fc1_b": jax.random.normal(ks[5], (512,), jnp.float32) * s,
        "fc2_w": jax.random.normal(ks[6], (10, 512), jnp.float32) * s,
        "fc2_b": jax.random.normal(ks[7], (10,), jnp.float32) * s,
    }


if __name__ == "__main__":
    key = jax.random.PRNGKey(0)
    pkey, xkey = jax.random.split(key)
    params = init_params(pkey)
    prep = prepare_params(params)
    x = jax.random.normal(xkey, (2, 1, 28, 28), jnp.float32)

    out = concat_model_forward(prep, x)
    out = jax.block_until_ready(out)
    assert out.shape == (2, 10), out.shape
    assert bool(jnp.all(jnp.isfinite(out)))
    print("KERNEL_OK")
</pallas_src>

<mosaic_0001>
module attributes {stable_mosaic.version = 11 : i64} {
  func.func @_conv_stack_kernel(%arg0: i32, %arg1: memref<1x32x32xf32, #tpu.memory_space<vmem>>, %arg2: memref<5x32x896xbf16, #tpu.memory_space<vmem>>, %arg3: memref<1x896xf32, #tpu.memory_space<vmem>>, %arg4: memref<18x27xbf16, #tpu.memory_space<vmem>>, %arg5: memref<896x576xbf16, #tpu.memory_space<vmem>>, %arg6: memref<5x576x896xbf16, #tpu.memory_space<vmem>>, %arg7: memref<1x896xf32, #tpu.memory_space<vmem>>, %arg8: memref<7x13xbf16, #tpu.memory_space<vmem>>, %arg9: memref<896x448xbf16, #tpu.memory_space<vmem>>, %arg10: memref<1x7x448xbf16, #tpu.memory_space<vmem>>) attributes {dimension_semantics = [#tpu.dimension_semantics<parallel>], iteration_bounds = array<i64: 2>, scalar_prefetch = 0 : i64, scratch_operands = 0 : i64, tpu.core_type = #tpu.core_type<tc>, window_params = [{transform_indices = @transform_0, window_bounds = array<i64: 1, 32, 32>}, {pipeline_mode = #tpu.pipeline_mode<synchronous>, transform_indices = @transform_1, window_bounds = array<i64: 5, 32, 896>}, {pipeline_mode = #tpu.pipeline_mode<synchronous>, transform_indices = @transform_2, window_bounds = array<i64: 1, 896>}, {pipeline_mode = #tpu.pipeline_mode<synchronous>, transform_indices = @transform_3, window_bounds = array<i64: 18, 27>}, {pipeline_mode = #tpu.pipeline_mode<synchronous>, transform_indices = @transform_4, window_bounds = array<i64: 896, 576>}, {pipeline_mode = #tpu.pipeline_mode<synchronous>, transform_indices = @transform_5, window_bounds = array<i64: 5, 576, 896>}, {pipeline_mode = #tpu.pipeline_mode<synchronous>, transform_indices = @transform_6, window_bounds = array<i64: 1, 896>}, {pipeline_mode = #tpu.pipeline_mode<synchronous>, transform_indices = @transform_7, window_bounds = array<i64: 7, 13>}, {pipeline_mode = #tpu.pipeline_mode<synchronous>, transform_indices = @transform_8, window_bounds = array<i64: 896, 448>}, {transform_indices = @transform_9, window_bounds = array<i64: 1, 7, 448>}]} {
    %c0 = arith.constant 0 : index
    %c0_0 = arith.constant 0 : index
    %c0_1 = arith.constant 0 : index
    %0 = vector.load %arg1[%c0, %c0_0, %c0_1] : memref<1x32x32xf32, #tpu.memory_space<vmem>>, vector<1x32x32xf32>
    %1 = vector.shape_cast %0 : vector<1x32x32xf32> to vector<32x32xf32>
    %2 = arith.truncf %1 : vector<32x32xf32> to vector<32x32xbf16>
    %cst = arith.constant 0.000000e+00 : f32
    %3 = vector.broadcast %cst : f32 to vector<28x896xf32>
    %4 = vector.extract_strided_slice %2 {offsets = [0, 0], sizes = [28, 32], strides = [1, 1]} : vector<32x32xbf16> to vector<28x32xbf16>
    %c0_2 = arith.constant 0 : index
    %c0_3 = arith.constant 0 : index
    %c0_4 = arith.constant 0 : index
    %5 = vector.load %arg2[%c0_2, %c0_3, %c0_4] : memref<5x32x896xbf16, #tpu.memory_space<vmem>>, vector<1x32x896xbf16>
    %6 = vector.shape_cast %5 : vector<1x32x896xbf16> to vector<32x896xbf16>
    %cst_5 = arith.constant dense<0.000000e+00> : vector<28x896xf32>
    %7 = tpu.matmul %4, %6, %cst_5 {dimension_numbers = #tpu.dot_dimension_numbers<[1], [0], [0], [1], [0, 0, 1, 1], [], []>} : vector<28x32xbf16>, vector<32x896xbf16>, vector<28x896xf32> -> vector<28x896xf32>
    %8 = arith.addf %3, %7 : vector<28x896xf32>
    %9 = vector.extract_strided_slice %2 {offsets = [1, 0], sizes = [28, 32], strides = [1, 1]} : vector<32x32xbf16> to vector<28x32xbf16>
    %c1 = arith.constant 1 : index
    %c0_6 = arith.constant 0 : index
    %c0_7 = arith.constant 0 : index
    %10 = vector.load %arg2[%c1, %c0_6, %c0_7] : memref<5x32x896xbf16, #tpu.memory_space<vmem>>, vector<1x32x896xbf16>
    %11 = vector.shape_cast %10 : vector<1x32x896xbf16> to vector<32x896xbf16>
    %cst_8 = arith.constant dense<0.000000e+00> : vector<28x896xf32>
    %12 = tpu.matmul %9, %11, %cst_8 {dimension_numbers = #tpu.dot_dimension_numbers<[1], [0], [0], [1], [0, 0, 1, 1], [], []>} : vector<28x32xbf16>, vector<32x896xbf16>, vector<28x896xf32> -> vector<28x896xf32>
    %13 = arith.addf %8, %12 : vector<28x896xf32>
    %14 = vector.extract_strided_slice %2 {offsets = [2, 0], sizes = [28, 32], strides = [1, 1]} : vector<32x32xbf16> to vector<28x32xbf16>
    %c2 = arith.constant 2 : index
    %c0_9 = arith.constant 0 : index
    %c0_10 = arith.constant 0 : index
    %15 = vector.load %arg2[%c2, %c0_9, %c0_10] : memref<5x32x896xbf16, #tpu.memory_space<vmem>>, vector<1x32x896xbf16>
    %16 = vector.shape_cast %15 : vector<1x32x896xbf16> to vector<32x896xbf16>
    %cst_11 = arith.constant dense<0.000000e+00> : vector<28x896xf32>
    %17 = tpu.matmul %14, %16, %cst_11 {dimension_numbers = #tpu.dot_dimension_numbers<[1], [0], [0], [1], [0, 0, 1, 1], [], []>} : vector<28x32xbf16>, vector<32x896xbf16>, vector<28x896xf32> -> vector<28x896xf32>
    %18 = arith.addf %13, %17 : vector<28x896xf32>
    %19 = vector.extract_strided_slice %2 {offsets = [3, 0], sizes = [28, 32], strides = [1, 1]} : vector<32x32xbf16> to vector<28x32xbf16>
    %c3 = arith.constant 3 : index
    %c0_12 = arith.constant 0 : index
    %c0_13 = arith.constant 0 : index
    %20 = vector.load %arg2[%c3, %c0_12, %c0_13] : memref<5x32x896xbf16, #tpu.memory_space<vmem>>, vector<1x32x896xbf16>
    %21 = vector.shape_cast %20 : vector<1x32x896xbf16> to vector<32x896xbf16>
    %cst_14 = arith.constant dense<0.000000e+00> : vector<28x896xf32>
    %22 = tpu.matmul %19, %21, %cst_14 {dimension_numbers = #tpu.dot_dimension_numbers<[1], [0], [0], [1], [0, 0, 1, 1], [], []>} : vector<28x32xbf16>, vector<32x896xbf16>, vector<28x896xf32> -> vector<28x896xf32>
    %23 = arith.addf %18, %22 : vector<28x896xf32>
    %24 = vector.extract_strided_slice %2 {offsets = [4, 0], sizes = [28, 32], strides = [1, 1]} : vector<32x32xbf16> to vector<28x32xbf16>
    %c4 = arith.constant 4 : index
    %c0_15 = arith.constant 0 : index
    %c0_16 = arith.constant 0 : index
    %25 = vector.load %arg2[%c4, %c0_15, %c0_16] : memref<5x32x896xbf16, #tpu.memory_space<vmem>>, vector<1x32x896xbf16>
    %26 = vector.shape_cast %25 : vector<1x32x896xbf16> to vector<32x896xbf16>
    %cst_17 = arith.constant dense<0.000000e+00> : vector<28x896xf32>
    %27 = tpu.matmul %24, %26, %cst_17 {dimension_numbers = #tpu.dot_dimension_numbers<[1], [0], [0], [1], [0, 0, 1, 1], [], []>} : vector<28x32xbf16>, vector<32x896xbf16>, vector<28x896xf32> -> vector<28x896xf32>
    %28 = arith.addf %23, %27 : vector<28x896xf32>
    %c0_18 = arith.constant 0 : index
    %c0_19 = arith.constant 0 : index
    %29 = vector.load %arg3[%c0_18, %c0_19] : memref<1x896xf32, #tpu.memory_space<vmem>>, vector<1x896xf32>
    %30 = vector.broadcast %29 : vector<1x896xf32> to vector<28x896xf32>
    %31 = arith.addf %28, %30 : vector<28x896xf32>
    %cst_20 = arith.constant 0.000000e+00 : f32
    %32 = vector.broadcast %cst_20 : f32 to vector<28x896xf32>
    %33 = arith.maximumf %31, %32 : vector<28x896xf32>
    %34 = vector.extract_strided_slice %33 {offsets = [0, 0], sizes = [27, 896], strides = [1, 1]} : vector<28x896xf32> to vector<27x896xf32>
    %35 = vector.extract_strided_slice %33 {offsets = [1, 0], sizes = [27, 896], strides = [1, 1]} : vector<28x896xf32> to vector<27x896xf32>
    %36 = arith.maximumf %34, %35 : vector<27x896xf32>
    %c864_i32 = arith.constant 864 : i32
    %37 = tpu.dynamic_rotate %36 by %c864_i32 dim 1 : vector<27x896xf32>, i32 -> vector<27x896xf32>
    %38 = arith.maximumf %36, %37 : vector<27x896xf32>
    %39 = arith.truncf %38 : vector<27x896xf32> to vector<27x896xbf16>
    %c0_21 = arith.constant 0 : index
    %c0_22 = arith.constant 0 : index
    %40 = vector.load %arg4[%c0_21, %c0_22] : memref<18x27xbf16, #tpu.memory_space<vmem>>, vector<18x27xbf16>
    %cst_23 = arith.constant dense<0.000000e+00> : vector<18x896xf32>
    %41 = tpu.matmul %40, %39, %cst_23 {dimension_numbers = #tpu.dot_dimension_numbers<[1], [0], [0], [1], [0, 0, 1, 1], [], []>} : vector<18x27xbf16>, vector<27x896xbf16>, vector<18x896xf32> -> vector<18x896xf32>
    %42 = arith.truncf %41 : vector<18x896xf32> to vector<18x896xbf16>
    %c0_24 = arith.constant 0 : index
    %c0_25 = arith.constant 0 : index
    %43 = vector.load %arg5[%c0_24, %c0_25] : memref<896x576xbf16, #tpu.memory_space<vmem>>, vector<896x576xbf16>
    %cst_26 = arith.constant dense<0.000000e+00> : vector<18x576xf32>
    %44 = tpu.matmul %42, %43, %cst_26 {dimension_numbers = #tpu.dot_dimension_numbers<[1], [0], [0], [1], [0, 0, 1, 1], [], []>} : vector<18x896xbf16>, vector<896x576xbf16>, vector<18x576xf32> -> vector<18x576xf32>
    %45 = arith.truncf %44 : vector<18x576xf32> to vector<18x576xbf16>
    %cst_27 = arith.constant 0.000000e+00 : f32
    %46 = vector.broadcast %cst_27 : f32 to vector<14x896xf32>
    %47 = vector.extract_strided_slice %45 {offsets = [0, 0], sizes = [14, 576], strides = [1, 1]} : vector<18x576xbf16> to vector<14x576xbf16>
    %c0_28 = arith.constant 0 : index
    %c0_29 = arith.constant 0 : index
    %c0_30 = arith.constant 0 : index
    %48 = vector.load %arg6[%c0_28, %c0_29, %c0_30] : memref<5x576x896xbf16, #tpu.memory_space<vmem>>, vector<1x576x896xbf16>
    %49 = vector.shape_cast %48 : vector<1x576x896xbf16> to vector<576x896xbf16>
    %cst_31 = arith.constant dense<0.000000e+00> : vector<14x896xf32>
    %50 = tpu.matmul %47, %49, %cst_31 {dimension_numbers = #tpu.dot_dimension_numbers<[1], [0], [0], [1], [0, 0, 1, 1], [], []>} : vector<14x576xbf16>, vector<576x896xbf16>, vector<14x896xf32> -> vector<14x896xf32>
    %51 = arith.addf %46, %50 : vector<14x896xf32>
    %52 = vector.extract_strided_slice %45 {offsets = [1, 0], sizes = [14, 576], strides = [1, 1]} : vector<18x576xbf16> to vector<14x576xbf16>
    %c1_32 = arith.constant 1 : index
    %c0_33 = arith.constant 0 : index
    %c0_34 = arith.constant 0 : index
    %53 = vector.load %arg6[%c1_32, %c0_33, %c0_34] : memref<5x576x896xbf16, #tpu.memory_space<vmem>>, vector<1x576x896xbf16>
    %54 = vector.shape_cast %53 : vector<1x576x896xbf16> to vector<576x896xbf16>
    %cst_35 = arith.constant dense<0.000000e+00> : vector<14x896xf32>
    %55 = tpu.matmul %52, %54, %cst_35 {dimension_numbers = #tpu.dot_dimension_numbers<[1], [0], [0], [1], [0, 0, 1, 1], [], []>} : vector<14x576xbf16>, vector<576x896xbf16>, vector<14x896xf32> -> vector<14x896xf32>
    %56 = arith.addf %51, %55 : vector<14x896xf32>
    %57 = vector.extract_strided_slice %45 {offsets = [2, 0], sizes = [14, 576], strides = [1, 1]} : vector<18x576xbf16> to vector<14x576xbf16>
    %c2_36 = arith.constant 2 : index
    %c0_37 = arith.constant 0 : index
    %c0_38 = arith.constant 0 : index
    %58 = vector.load %arg6[%c2_36, %c0_37, %c0_38] : memref<5x576x896xbf16, #tpu.memory_space<vmem>>, vector<1x576x896xbf16>
    %59 = vector.shape_cast %58 : vector<1x576x896xbf16> to vector<576x896xbf16>
    %cst_39 = arith.constant dense<0.000000e+00> : vector<14x896xf32>
    %60 = tpu.matmul %57, %59, %cst_39 {dimension_numbers = #tpu.dot_dimension_numbers<[1], [0], [0], [1], [0, 0, 1, 1], [], []>} : vector<14x576xbf16>, vector<576x896xbf16>, vector<14x896xf32> -> vector<14x896xf32>
    %61 = arith.addf %56, %60 : vector<14x896xf32>
    %62 = vector.extract_strided_slice %45 {offsets = [3, 0], sizes = [14, 576], strides = [1, 1]} : vector<18x576xbf16> to vector<14x576xbf16>
    %c3_40 = arith.constant 3 : index
    %c0_41 = arith.constant 0 : index
    %c0_42 = arith.constant 0 : index
    %63 = vector.load %arg6[%c3_40, %c0_41, %c0_42] : memref<5x576x896xbf16, #tpu.memory_space<vmem>>, vector<1x576x896xbf16>
    %64 = vector.shape_cast %63 : vector<1x576x896xbf16> to vector<576x896xbf16>
    %cst_43 = arith.constant dense<0.000000e+00> : vector<14x896xf32>
    %65 = tpu.matmul %62, %64, %cst_43 {dimension_numbers = #tpu.dot_dimension_numbers<[1], [0], [0], [1], [0, 0, 1, 1], [], []>} : vector<14x576xbf16>, vector<576x896xbf16>, vector<14x896xf32> -> vector<14x896xf32>
    %66 = arith.addf %61, %65 : vector<14x896xf32>
    %67 = vector.extract_strided_slice %45 {offsets = [4, 0], sizes = [14, 576], strides = [1, 1]} : vector<18x576xbf16> to vector<14x576xbf16>
    %c4_44 = arith.constant 4 : index
    %c0_45 = arith.constant 0 : index
    %c0_46 = arith.constant 0 : index
    %68 = vector.load %arg6[%c4_44, %c0_45, %c0_46] : memref<5x576x896xbf16, #tpu.memory_space<vmem>>, vector<1x576x896xbf16>
    %69 = vector.shape_cast %68 : vector<1x576x896xbf16> to vector<576x896xbf16>
    %cst_47 = arith.constant dense<0.000000e+00> : vector<14x896xf32>
    %70 = tpu.matmul %67, %69, %cst_47 {dimension_numbers = #tpu.dot_dimension_numbers<[1], [0], [0], [1], [0, 0, 1, 1], [], []>} : vector<14x576xbf16>, vector<576x896xbf16>, vector<14x896xf32> -> vector<14x896xf32>
    %71 = arith.addf %66, %70 : vector<14x896xf32>
    %c0_48 = arith.constant 0 : index
    %c0_49 = arith.constant 0 : index
    %72 = vector.load %arg7[%c0_48, %c0_49] : memref<1x896xf32, #tpu.memory_space<vmem>>, vector<1x896xf32>
    %73 = vector.broadcast %72 : vector<1x896xf32> to vector<14x896xf32>
    %74 = arith.addf %71, %73 : vector<14x896xf32>
    %cst_50 = arith.constant 0.000000e+00 : f32
    %75 = vector.broadcast %cst_50 : f32 to vector<14x896xf32>
    %76 = arith.maximumf %74, %75 : vector<14x896xf32>
    %77 = vector.extract_strided_slice %76 {offsets = [0, 0], sizes = [13, 896], strides = [1, 1]} : vector<14x896xf32> to vector<13x896xf32>
    %78 = vector.extract_strided_slice %76 {offsets = [1, 0], sizes = [13, 896], strides = [1, 1]} : vector<14x896xf32> to vector<13x896xf32>
    %79 = arith.maximumf %77, %78 : vector<13x896xf32>
    %c832_i32 = arith.constant 832 : i32
    %80 = tpu.dynamic_rotate %79 by %c832_i32 dim 1 : vector<13x896xf32>, i32 -> vector<13x896xf32>
    %81 = arith.maximumf %79, %80 : vector<13x896xf32>
    %82 = arith.truncf %81 : vector<13x896xf32> to vector<13x896xbf16>
    %c0_51 = arith.constant 0 : index
    %c0_52 = arith.constant 0 : index
    %83 = vector.load %arg8[%c0_51, %c0_52] : memref<7x13xbf16, #tpu.memory_space<vmem>>, vector<7x13xbf16>
    %cst_53 = arith.constant dense<0.000000e+00> : vector<7x896xf32>
    %84 = tpu.matmul %83, %82, %cst_53 {dimension_numbers = #tpu.dot_dimension_numbers<[1], [0], [0], [1], [0, 0, 1, 1], [], []>} : vector<7x13xbf16>, vector<13x896xbf16>, vector<7x896xf32> -> vector<7x896xf32>
    %85 = arith.truncf %84 : vector<7x896xf32> to vector<7x896xbf16>
    %c0_54 = arith.constant 0 : index
    %c0_55 = arith.constant 0 : index
    %86 = vector.load %arg9[%c0_54, %c0_55] : memref<896x448xbf16, #tpu.memory_space<vmem>>, vector<896x448xbf16>
    %cst_56 = arith.constant dense<0.000000e+00> : vector<7x448xf32>
    %87 = tpu.matmul %85, %86, %cst_56 {dimension_numbers = #tpu.dot_dimension_numbers<[1], [0], [0], [1], [0, 0, 1, 1], [], []>} : vector<7x896xbf16>, vector<896x448xbf16>, vector<7x448xf32> -> vector<7x448xf32>
    %88 = arith.truncf %87 : vector<7x448xf32> to vector<7x448xbf16>
    %c0_57 = arith.constant 0 : index
    %c0_58 = arith.constant 0 : index
    %c0_59 = arith.constant 0 : index
    %89 = vector.load %arg10[%c0_57, %c0_58, %c0_59] : memref<1x7x448xbf16, #tpu.memory_space<vmem>>, vector<1x7x448xbf16>
    %90 = vector.shape_cast %89 : vector<1x7x448xbf16> to vector<7x448xbf16>
    %91 = vector.shape_cast %88 : vector<7x448xbf16> to vector<1x7x448xbf16>
    tpu.vector_store %arg10[%c0_57, %c0_58, %c0_59], %91 {strides = array<i32>} : memref<1x7x448xbf16, #tpu.memory_space<vmem>>, vector<1x7x448xbf16>,
    return
  }
  func.func @transform_0(%arg0: i32) -> (i32, i32, i32) {
    %c0_i32 = arith.constant 0 : i32
    %c0_i32_0 = arith.constant 0 : i32
    %c0_i32_1 = arith.constant 0 : i32
    return %arg0, %c0_i32, %c0_i32_0 : i32, i32, i32
  }
  func.func @transform_1(%arg0: i32) -> (i32, i32, i32) {
    %c0_i32 = arith.constant 0 : i32
    %c0_i32_0 = arith.constant 0 : i32
    %c0_i32_1 = arith.constant 0 : i32
    %c0_i32_2 = arith.constant 0 : i32
    return %c0_i32, %c0_i32_0, %c0_i32_1 : i32, i32, i32
  }
  func.func @transform_2(%arg0: i32) -> (i32, i32) {
    %c0_i32 = arith.constant 0 : i32
    %c0_i32_0 = arith.constant 0 : i32
    %c0_i32_1 = arith.constant 0 : i32
    return %c0_i32, %c0_i32_0 : i32, i32
  }
  func.func @transform_3(%arg0: i32) -> (i32, i32) {
    %c0_i32 = arith.constant 0 : i32
    %c0_i32_0 = arith.constant 0 : i32
    %c0_i32_1 = arith.constant 0 : i32
    return %c0_i32, %c0_i32_0 : i32, i32
  }
  func.func @transform_4(%arg0: i32) -> (i32, i32) {
    %c0_i32 = arith.constant 0 : i32
    %c0_i32_0 = arith.constant 0 : i32
    %c0_i32_1 = arith.constant 0 : i32
    return %c0_i32, %c0_i32_0 : i32, i32
  }
  func.func @transform_5(%arg0: i32) -> (i32, i32, i32) {
    %c0_i32 = arith.constant 0 : i32
    %c0_i32_0 = arith.constant 0 : i32
    %c0_i32_1 = arith.constant 0 : i32
    %c0_i32_2 = arith.constant 0 : i32
    return %c0_i32, %c0_i32_0, %c0_i32_1 : i32, i32, i32
  }
  func.func @transform_6(%arg0: i32) -> (i32, i32) {
    %c0_i32 = arith.constant 0 : i32
    %c0_i32_0 = arith.constant 0 : i32
    %c0_i32_1 = arith.constant 0 : i32
    return %c0_i32, %c0_i32_0 : i32, i32
  }
  func.func @transform_7(%arg0: i32) -> (i32, i32) {
    %c0_i32 = arith.constant 0 : i32
    %c0_i32_0 = arith.constant 0 : i32
    %c0_i32_1 = arith.constant 0 : i32
    return %c0_i32, %c0_i32_0 : i32, i32
  }
  func.func @transform_8(%arg0: i32) -> (i32, i32) {
    %c0_i32 = arith.constant 0 : i32
    %c0_i32_0 = arith.constant 0 : i32
    %c0_i32_1 = arith.constant 0 : i32
    return %c0_i32, %c0_i32_0 : i32, i32
  }
  func.func @transform_9(%arg0: i32) -> (i32, i32, i32) {
    %c0_i32 = arith.constant 0 : i32
    %c0_i32_0 = arith.constant 0 : i32
    %c0_i32_1 = arith.constant 0 : i32
    return %arg0, %c0_i32, %c0_i32_0 : i32, i32, i32
  }
}

</mosaic_0001>

<bundles_post_ra>
// kernel: tpu_custom_call.1
= control target key start
LH: loop header
LB: loop body
LE: loop exit
PB: predicated region body
PF: predicated region fallthrough
CT: control target
= control target key end

     0   :  { %s26966_s0 = inlined_call_operand.hbm [shape: f32[2,32,32], index: 0, kind: input, shape index: {}]   ;;  %s26967_s1 = inlined_call_operand.hbm [shape: bf16[5,32,896], index: 1, kind: input, shape index: {}]   ;;  %s26968_s2 = inlined_call_operand.hbm [shape: f32[1,896], index: 2, kind: input, shape index: {}]   ;;  %s26969_s3 = inlined_call_operand.hbm [shape: bf16[18,27], index: 3, kind: input, shape index: {}]   ;;  %s26970_s4 = inlined_call_operand.vmem [shape: bf16[896,576], index: 4, kind: input, shape index: {}]   ;;  %s26971_s5 = inlined_call_operand.hbm [shape: bf16[5,576,896], index: 5, kind: input, shape index: {}]   ;;  %s26972_s6 = inlined_call_operand.hbm [shape: f32[1,896], index: 6, kind: input, shape index: {}]   ;;  %s26973_s7 = inlined_call_operand.hbm [shape: bf16[7,13], index: 7, kind: input, shape index: {}]   ;;  %s26974_s8 = inlined_call_operand.vmem [shape: bf16[896,448], index: 8, kind: input, shape index: {}]   ;;  %s26975_s9 = inlined_call_operand.vmem [shape: bf16[2,7,448], index: 9, kind: output, shape index: {}]  }
   0x1   :  { %26996 = sst [smem:[#allocation17_spill]] %s26975_s9 }
   0x2   :  { %14 = vsyncpa [#allocation3], 0 }
   0x3   :  { %16 = vsyncpa [#allocation3 + $0x1], 0 }
   0x4   :  { %17 = vsyncpa [#allocation5], 0 }
   0x5   :  { %18 = vsyncpa [#allocation8], 0 }
   0x6   :  { %19 = vsyncpa [#allocation11], 0  ;;  %s23907_s30 = smov 0   ;;  %s23909_s10 = smov 0  }
   0x7   :  { %s23911_s11 = smov 0   ;;  %s23913_s12 = smov 0  }
   0x8 LB: > { %s23838_s13 = smov [#allocation4]   ;;  %s23928_s15 = sadd.s32 4294967295, %s23836_s12   ;;  %s23836_s12 = sphi %s23913_s12, %s27037_s12   ;;  %s23832_s11 = sphi %s23911_s11, %s27036_s11   ;;  %s23828_s10 = sphi %s23909_s10, %s27035_s10   ;;  %s23824_s30 = sphi %s23907_s30, %s27034_s30  }
   0x9   : > { %s262_s14 = sshll.u32 %s23838_s13, 4  ;;  %p17958_p0 = scmp.ge.s32.totalorder %s23836_s12, 1  ;;  %s23933_s14 = int_to_ptr.vmem [resolvable:$true] %s262_s14 }
   0xa   : > { %p26977_p1 = scmp.eq.s32.totalorder %s23928_s15, 0  ;;  %p250_p2 = scmp.lt.s32.totalorder %s23836_s12, 3 }
   0xb   : > { %s23839_s17 = smov [#allocation7]   ;;  %s23840_s20 = smov [#allocation10]  }
   0xc   : > { %p23935_p3 = pnand %p17958_p0, %p250_p2  ;;  %s286_s18 = sshll.u32 %s23839_s17, 4  ;;  %s23947_s18 = int_to_ptr.vmem [resolvable:$true] %s286_s18 }
   0xd   : > { %s23949_s21 = sshll.u32 %s23840_s20, 4  ;;  %s23592_s24 = scalar_lea.hbm %s26967_s1, 8960  ;;  %s317_s21 = int_to_ptr.vmem [resolvable:$true] %s23949_s21 }
   0xe   : > { %s26997_s16 = scalar_select %p23935_p3, 1, 0 }
   0xf   : > { %p20770_p4 = pneg %p23935_p3  ;;  %p23593_p6 = scmp.ne.s32.totalorder %s26967_s1, %s23592_s24 }
  0x10   : > { %p23599_p10 = scmp.lt.u32.totalorder %s23592_s24, %s26967_s1 }
  0x11   : > { %p23943_p5 = pnand %p20770_p4, %p26977_p1 }
  0x13   : > { %p23959_p7 = pneg %p23943_p5 }
  0x15   : > { %p23595_p8 = pnand %p23959_p7, %p23593_p6 }
  0x17   : > { %p23596_p9 = pneg %p23595_p8 }
  0x19   : > { %p23601_p11 = pnand %p23599_p10, %p23596_p9 }
  0x1b   : > { %23604 = shalt.err (!%p23601_p11)
}
  0x1c   : > { %s23605_s13 = scalar_lea.vmem %s23933_s14, 8960  ;;  %p23613_p2 = scmp.lt.s32.totalorder %s23933_s14, %s23933_s14 }
  0x1d   : > { %p23606_p12 = scmp.ne.s32.totalorder %s23933_s14, %s23605_s13  ;;  %p23614_p4 = scmp.lt.s32.totalorder %s23605_s13, %s23605_s13 }
  0x1f   : > { %p23608_p13 = pnand %p23606_p12, %p23959_p7  ;;  %p23615_p6 = por %p23614_p4, %p23613_p2 }
  0x21   : > { %p23609_p0 = pneg %p23608_p13 }
  0x23   : > { %p23616_p8 = pnand %p23615_p6, %p23609_p0 }
  0x25   : > { %23619 = shalt.err (!%p23616_p8)
}
  0x26   : > { %s26976_s17 = smov 448   ;;  %s23842_s20 = smov 28  }
  0x27   : > { %20773 = dma.hbm_to_vmem [thread:$0]  (!%p23943_p5), %s26967_s1, 8960, %s23933_s14, [#allocation5], %s26976_s17, %s26976_s17, %s23842_s20  }
  0x28   : > { %s23620_s26 = scalar_lea.hbm %s26969_s3, 192 }
  0x29   : > { %p23621_p9 = scmp.ne.s32.totalorder %s26969_s3, %s23620_s26  ;;  %p23627_p12 = scmp.lt.u32.totalorder %s23620_s26, %s26969_s3 }
  0x2b   : > { %p23623_p10 = pnand %p23621_p9, %p23959_p7 }
  0x2d   : > { %p23624_p11 = pneg %p23623_p10 }
  0x2f   : > { %p23629_p13 = pnand %p23627_p12, %p23624_p11 }
  0x31   : > { %23632 = shalt.err (!%p23629_p13)
}
  0x32   : > { %s23633_s14 = scalar_lea.vmem %s23947_s18, 192  ;;  %p23641_p6 = scmp.lt.s32.totalorder %s23947_s18, %s23947_s18 }
  0x33   : > { %p23634_p0 = scmp.ne.s32.totalorder %s23947_s18, %s23633_s14  ;;  %p23642_p8 = scmp.lt.s32.totalorder %s23633_s14, %s23633_s14 }
  0x35   : > { %p23636_p2 = pnand %p23634_p0, %p23959_p7  ;;  %p23643_p9 = por %p23642_p8, %p23641_p6 }
  0x37   : > { %p23637_p4 = pneg %p23636_p2 }
  0x39   : > { %p23644_p10 = pnand %p23643_p9, %p23637_p4 }
  0x3b   : > { %23647 = shalt.err (!%p23644_p10)
}
  0x3c   : > { %s23843_s22 = smov 64   ;;  %s23844_s9 = smov 4  }
  0x3d   : > { %20779 = dma.hbm_to_vmem [thread:$0]  (!%p23943_p5), %s26969_s3, 192, %s23947_s18, [#allocation8], %s23843_s22, %s23843_s22, %s23844_s9  }
  0x3e   : > { %s23648_s28 = scalar_lea.hbm %s26972_s6, 112 }
  0x3f   : > { %p23649_p11 = scmp.ne.s32.totalorder %s26972_s6, %s23648_s28  ;;  %p23655_p0 = scmp.lt.u32.totalorder %s23648_s28, %s26972_s6 }
  0x41   : > { %p23651_p12 = pnand %p23649_p11, %p23959_p7 }
  0x43   : > { %p23652_p13 = pneg %p23651_p12 }
  0x45   : > { %p23657_p2 = pnand %p23655_p0, %p23652_p13 }
  0x47   : > { %23660 = shalt.err (!%p23657_p2)
}
  0x48   : > { %s23661_s23 = scalar_lea.vmem %s317_s21, 112  ;;  %s23668_s18 = scalar_lea.vmem %s317_s21, 128 }
  0x49   : > { %p23662_p4 = scmp.ne.s32.totalorder %s317_s21, %s23661_s23  ;;  %p23669_p9 = scmp.lt.s32.totalorder %s317_s21, %s317_s21 }
  0x4a   : > { %p23670_p10 = scmp.lt.s32.totalorder %s23668_s18, %s23661_s23 }
  0x4b   : > { %p23664_p6 = pnand %p23662_p4, %p23959_p7 }
  0x4c   : > { %p23671_p1 = por %p23670_p10, %p23669_p9 }
  0x4d   : > { %p23665_p8 = pneg %p23664_p6 }
  0x4f   : > { %p23672_p3 = pnand %p23671_p1, %p23665_p8 }
  0x51   : > { %23675 = shalt.err (!%p23672_p3)
}
  0x52   : > { %20785 = dma.hbm_to_vmem [thread:$0]  (!%p23943_p5), %s26972_s6, 112, %s317_s21, [#allocation11]  }
  0x53   : > { %s23845_s17 = smov [#allocation6]   ;;  %s23846_s25 = smov [#allocation9]  }
  0x54   : > { %s276_s24 = sshll.u32 %s23845_s17, 4  ;;  %s302_s26 = sshll.u32 %s23846_s25, 4  ;;  %s277_s24 = int_to_ptr.vmem [resolvable:$true] %s276_s24  ;;  %s303_s26 = int_to_ptr.vmem [resolvable:$true] %s302_s26 }
  0x55   : > { %s23676_s13 = scalar_lea.hbm %s26968_s2, 112 }
  0x56   : > { %p23677_p1 = scmp.ne.s32.totalorder %s26968_s2, %s23676_s13  ;;  %p23683_p12 = scmp.lt.u32.totalorder %s23676_s13, %s26968_s2 }
  0x58   : > { %p23679_p3 = pnand %p23677_p1, %p23959_p7 }
  0x5a   : > { %p23680_p11 = pneg %p23679_p3 }
  0x5c   : > { %p23685_p13 = pnand %p23683_p12, %p23680_p11 }
  0x5e   : > { %23688 = shalt.err (!%p23685_p13)
}
  0x5f   : > { %s23689_s21 = scalar_lea.vmem %s277_s24, 112  ;;  %s23696_s9 = scalar_lea.vmem %s277_s24, 128 }
  0x60   : > { %p23690_p0 = scmp.ne.s32.totalorder %s277_s24, %s23689_s21  ;;  %p23697_p6 = scmp.lt.s32.totalorder %s277_s24, %s277_s24 }
  0x61   : > { %p23698_p8 = scmp.lt.s32.totalorder %s23696_s9, %s23689_s21 }
  0x62   : > { %p23692_p2 = pnand %p23690_p0, %p23959_p7 }
  0x63   : > { %p23699_p9 = por %p23698_p8, %p23697_p6 }
  0x64   : > { %p23693_p4 = pneg %p23692_p2 }
  0x66   : > { %p23700_p10 = pnand %p23699_p9, %p23693_p4 }
  0x68   : > { %23703 = shalt.err (!%p23700_p10)
}
  0x69   : > { %20776 = dma.hbm_to_vmem [thread:$0]  (!%p23943_p5), %s26968_s2, 112, %s277_s24, [#allocation5]  }
  0x6a   : > { %s23704_s13 = scalar_lea.hbm %s26971_s5, 161280 }
  0x6b   : > { %p23705_p1 = scmp.ne.s32.totalorder %s26971_s5, %s23704_s13  ;;  %p23711_p12 = scmp.lt.u32.totalorder %s23704_s13, %s26971_s5 }
  0x6d   : > { %p23707_p3 = pnand %p23705_p1, %p23959_p7 }
  0x6f   : > { %p23708_p11 = pneg %p23707_p3 }
  0x71   : > { %p23713_p13 = pnand %p23711_p12, %p23708_p11 }
  0x73   : > { %23716 = shalt.err (!%p23713_p13)
}
  0x74   : > { %s23717_s21 = scalar_lea.vmem %s303_s26, 161280  ;;  %p23725_p6 = scmp.lt.s32.totalorder %s303_s26, %s303_s26 }
  0x75   : > { %p23718_p0 = scmp.ne.s32.totalorder %s303_s26, %s23717_s21  ;;  %p23726_p8 = scmp.lt.s32.totalorder %s23717_s21, %s23717_s21 }
  0x77   : > { %p23720_p2 = pnand %p23718_p0, %p23959_p7  ;;  %p23727_p9 = por %p23726_p8, %p23725_p6 }
  0x79   : > { %p23721_p4 = pneg %p23720_p2 }
  0x7b   : > { %p23728_p10 = pnand %p23727_p9, %p23721_p4 }
  0x7d   : > { %23731 = shalt.err (!%p23728_p10)
}
  0x7e   : > { %s27000_s24 = smov 448   ;;  %s23847_s25 = smov [#allocation12]  }
  0x7f   : > { %20782 = dma.hbm_to_vmem [thread:$0]  (!%p23943_p5), %s26971_s5, 161280, %s303_s26, [#allocation8], %s27000_s24, %s27000_s24, %s23842_s20  }
  0x80   : > { %s327_s28 = sshll.u32 %s23847_s25, 4  ;;  %s23732_s14 = scalar_lea.hbm %s26973_s7, 64  ;;  %s328_s28 = int_to_ptr.vmem [resolvable:$true] %s327_s28 }
  0x81   : > { %p23733_p1 = scmp.ne.s32.totalorder %s26973_s7, %s23732_s14  ;;  %p23739_p12 = scmp.lt.u32.totalorder %s23732_s14, %s26973_s7 }
  0x83   : > { %p23735_p3 = pnand %p23733_p1, %p23959_p7 }
  0x85   : > { %p23736_p11 = pneg %p23735_p3 }
  0x87   : > { %p23741_p13 = pnand %p23739_p12, %p23736_p11 }
  0x89   : > { %23744 = shalt.err (!%p23741_p13)
}
  0x8a   : > { %s23745_s20 = scalar_lea.vmem %s328_s28, 64  ;;  %p23753_p6 = scmp.lt.s32.totalorder %s328_s28, %s328_s28 }
  0x8b   : > { %p23746_p0 = scmp.ne.s32.totalorder %s328_s28, %s23745_s20  ;;  %p23754_p8 = scmp.lt.s32.totalorder %s23745_s20, %s23745_s20 }
  0x8d   : > { %p23748_p2 = pnand %p23746_p0, %p23959_p7  ;;  %p23755_p9 = por %p23754_p8, %p23753_p6 }
  0x8f   : > { %p23749_p4 = pneg %p23748_p2 }
  0x91   : > { %p23756_p10 = pnand %p23755_p9, %p23749_p4 }
  0x93   : > { %23759 = shalt.err (!%p23756_p10)
}
  0x94   : > { %20788 = dma.hbm_to_vmem [thread:$0]  (!%p23943_p5), %s26973_s7, 64, %s328_s28, [#allocation11]  }
  0x95   : > { %s24083_s27 = sadd.s32 1, %s23836_s12   ;;  %s32_s19 = sadd.s32 1, %s23832_s11 }
  0x96   : > { %s29_s9 = ssub.s32 %s23836_s12, %s24083_s27  ;;  %p39_p7 = scmp.ne.s32.totalorder %s23832_s11, %s23828_s10 }
  0x97   : > { %p30_p1 = scmp.eq.s32.totalorder %s29_s9, 0  ;;  %p40_p3 = scmp.eq.s32.totalorder %s23836_s12, 0 }
  0x98   : > { %p45_p11 = scmp.ne.s32.totalorder %s23828_s10, %s23824_s30  ;;  %p20799_p12 = scmp.lt.s32.totalorder %s23836_s12, 2 }
  0x99   : > { %s24095_s17 = scalar_select %p30_p1, %s23832_s11, %s32_s19  }
  0x9a   : > { %p41_p13 = por %p40_p3, %p39_p7  ;;  %p27001_p0 = scmp.eq.s32.totalorder %s23928_s15, 0 }
  0x9b   : > { %s341_s29 = sand.u32 1, %s23832_s11   ;;  %s19891_s28 = sshll.u32 %s23836_s12, 9 }
  0x9c   : > { %p24099_p2 = por %p27001_p0, %p45_p11  ;;  %s17966_s13 = sshll.u32 %s341_s29, 5 }
  0x9d   : > { %s24108_s18 = scalar_lea.hbm %s26966_s0, %s19891_s28  ;;  %s345_s30 = scalar_lea.vmem [#allocation2], %s17966_s13 }
  0x9e   : > { %s352_s22 = sshll.u32 %s345_s30, 4  ;;  %p24110_p5 = pnand %p20799_p12, %p41_p13  ;;  %s24114_s22 = int_to_ptr.vmem [resolvable:$true] %s352_s22 }
  0x9f   : > { %s24116_s12 = scalar_lea.sflag [#allocation3], %s341_s29  ;;  %s23760_s20 = scalar_lea.hbm %s24108_s18, 512 }
  0xa0   : > { %p23761_p4 = scmp.ne.s32.totalorder %s24108_s18, %s23760_s20  ;;  %p23762_p6 = pneg %p24110_p5 }
  0xa1   : > { %s23765_s19 = scalar_lea.hbm %s26966_s0, 1024  ;;  %p23766_p10 = scmp.lt.u32.totalorder %s24108_s18, %s26966_s0 }
  0xa2   : > { %p23763_p8 = pnand %p23762_p6, %p23761_p4  ;;  %p23767_p7 = scmp.lt.u32.totalorder %s23765_s19, %s23760_s20 }
  0xa3   : > { %p23769_p3 = scmp.lt.u32.totalorder %s23760_s20, %s24108_s18 }
  0xa4   : > { %p23764_p9 = pneg %p23763_p8  ;;  %p23768_p1 = por %p23767_p7, %p23766_p10 }
  0xa6   : > { %p23770_p11 = por %p23769_p3, %p23768_p1 }
  0xa8   : > { %p23771_p12 = pnand %p23770_p11, %p23764_p9 }
  0xaa   : > { %23774 = shalt.err (!%p23771_p12)
}
  0xab   : > { %s23775_s29 = scalar_lea.vmem %s24114_s22, 512  ;;  %s23848_s13 = smov [#allocation2]  }
  0xac   : > { %p23776_p13 = scmp.ne.s32.totalorder %s24114_s22, %s23775_s29  ;;  %s23780_s14 = sshll.u32 %s23848_s13, 4  ;;  %s23781_s14 = int_to_ptr.vmem [resolvable:$false] %s23780_s14 }
  0xad   : > { %s23782_s23 = scalar_lea.vmem %s23781_s14, 1024  ;;  %p23783_p8 = scmp.lt.s32.totalorder %s24114_s22, %s23781_s14 }
  0xae   : > { %p23778_p0 = pnand %p23776_p13, %p23762_p6  ;;  %p23784_p10 = scmp.lt.s32.totalorder %s23782_s23, %s23775_s29 }
  0xb0   : > { %p23779_p4 = pneg %p23778_p0  ;;  %p23785_p7 = por %p23784_p10, %p23783_p8 }
  0xb2   : > { %p23786_p1 = pnand %p23785_p7, %p23779_p4 }
  0xb4   : > { %23789 = shalt.err (!%p23786_p1)
}
  0xb5   : > { %s23849_s30 = smov 128   ;;  %s23850_s20 = smov 8  }
  0xb6   : > { %20792 = dma.hbm_to_vmem [thread:$0]  (!%p24110_p5), %s24108_s18, 512, %s24114_s22, %s24116_s12, %s23849_s30, %s23849_s30, %s23850_s20  }
  0xb7   : > { %p27004_p6 = scmp.ne.s32.totalorder %s26997_s16, 0 }
  0xb8   : > { %s366_s26 = sand.u32 (!%p27004_p6), 1, %s23828_s10  }
  0xb9   : > { %364 = sbr.rel (%p27004_p6) target bundleno = 3841 (0xf01), region = 56  ;;  %s17970_s24 = sshll.u32 (!%p27004_p6), %s366_s26, 5 }
  0xba   : > { %s367_s19 = scalar_lea.sflag (!%p27004_p6), [#allocation3], %s366_s26  ;;  %s370_s9 = scalar_lea.vmem (!%p27004_p6), [#allocation2], %s17970_s24 }
  0xc0   : > { %23807 = dma.done.wait (%p24099_p2), %s367_s19, 512  }
  0xc1   : > { %23809 = vsyncadd (%p24099_p2), %s367_s19, 4294966784  ;;  %p27005_p9 = scmp.eq.s32.totalorder %s23928_s15, 0 }
  0xc3   : > { %23811 = dma.done.wait (%p27005_p9), [#allocation5], 9072   ;;  %p27006_p3 = pmov %p27005_p9 }
  0xc5   : > { %23813 = vsyncadd (%p27006_p3), [#allocation5], 4294958224  ;;  %p27007_p5 = pmov %p27006_p3 }
  0xc6   : > { %p27008_p11 = pmov %p27006_p3 }
  0xc7   : > { %23815 = dma.done.wait (%p27007_p5), [#allocation8], 161472  }
  0xc8   : > { %23817 = vsyncadd (%p27008_p11), [#allocation8], 4294805824  ;;  %p27009_p12 = pmov %p27006_p3 }
  0xc9   : > { %p27010_p13 = pmov %p27006_p3 }
  0xca   : > { %23819 = dma.done.wait (%p27009_p12), [#allocation11], 176  }
  0xcb   : > { %23821 = vsyncadd (%p27010_p13), [#allocation11], 4294967120  ;;  %v26986_v0 = vmov 0   ;;  %v20961_v1 = vld [vmem:[#allocation4 + $0x74] ss:$28 sps:$4 sm:$0xff]   ;;  %v435_v9 = vld [vmem:[%s370_s9] sm:$0xff] }
  0xcc   : > { %601 = vmatprep.mubr.bf16.mxu1 %v26986_v0  ;;  %707 = vmatprep.mubr.bf16.mxu0 %v26986_v0  ;;  %v20963_v2 = vld [vmem:[#allocation4 + $0x84] ss:$28 sps:$4 sm:$0xff]   ;;  %v20965_v3 = vld [vmem:[#allocation4 + $0x70] ss:$28 sps:$4 sm:$0xff]   ;;  %v20969_v6 = vld [vmem:[#allocation4 + $0xbc] ss:$28 sps:$4 sm:$0xff]  }
  0xcd   : > { %569 = vmatprep.subr.bf16.mxu1 %v20961_v1  ;;  %v20966_v4 = vld [vmem:[#allocation4 + $0x80] ss:$28 sps:$4 sm:$0xff]   ;;  %675 = vmatprep.subr.bf16.mxu0 %v20963_v2  ;;  %v20967_v5 = vld [vmem:[#allocation4 + $0xac] ss:$28 sps:$4 sm:$0xff]   ;;  %v20972_v8 = vld [vmem:[#allocation4 + $0xb8] ss:$28 sps:$4 sm:$0xff]  }
  0xce   : > { %570 = vmatpush1.bf16.msra.mxu1 %v20965_v3  ;;  %676 = vmatpush1.bf16.msra.mxu0 %v20966_v4  ;;  %v20971_v7 = vld [vmem:[#allocation4 + $0xa8] ss:$28 sps:$4 sm:$0xff]   ;;  %v437_v11 = vld [vmem:[%s370_s9 + $0x10] sm:$0xff]  ;;  %v438_v12 = vld [vmem:[%s370_s9 + $0x18] sm:$0xff]  ;;  %vm474_vm0 = vsmask.f32 7424 }
  0xcf   : > { %571 = vmatprep.subr.bf16.mxu1 %v20967_v5  ;;  %v436_v10 = vld [vmem:[%s370_s9 + $0x8] sm:$0xff]  ;;  %677 = vmatprep.subr.bf16.mxu0 %v20969_v6  ;;  %v24167_v14 = vpack.c.bf16 %v438_v12, %v437_v11  ;;  %v20975_v15 = vld [vmem:[#allocation4 + $0x4] ss:$28 sps:$4 sm:$0xff]   ;;  %v20978_v19 = vld [vmem:[#allocation4 + $0x7c] ss:$28 sps:$4 sm:$0xff]   ;;  %vm562_vm2 = vcmask 261120  }
  0xd0   : > { %v24165_v13 = vpack.c.bf16 %v436_v10, %v435_v9  ;;  %vm1415_vm1 = vsmask.f32 6400  ;;  %v20973_v28 = vld [vmem:[#allocation4] ss:$28 sps:$4 sm:$0xff]   ;;  %v20976_v29 = vld [vmem:[#allocation4 + $0x78] ss:$28 sps:$4 sm:$0xff]  }
  0xd1   : > { %v483_v18 = vshll.u32 %v24167_v14, 16  ;;  %v487_v20 = vshrl.u32 %v24167_v14, 16  ;;  %v20981_v32 = vld [vmem:[#allocation4 + $0xb4] ss:$28 sps:$4 sm:$0xff]   ;;  %vm1754_vm3 = vcmask 1045504   ;;  %v24184_v40 = vrot.slane %v24167_v14, 2 }
  0xd2   : > { %572 = vmatpush1.bf16.msra.mxu1 %v20971_v7  ;;  %678 = vmatpush1.bf16.msra.mxu0 %v20972_v8  ;;  %v476_v16 = vshrl.u32 %v24165_v13, 16  ;;  %v478_v17 = vshll.u32 %v24165_v13, 16  ;;  %v20979_v34 = vld [vmem:[#allocation4 + $0xb0] ss:$28 sps:$4 sm:$0xff]   ;;  %v20984_v35 = vld [vmem:[#allocation4 + $0x3c] ss:$28 sps:$4 sm:$0xff]  }
  0xd3   : > { %853 = vmatprep.subr.bf16.mxu0 %v20975_v15  ;;  %v485_v24 = vrot.slane %v483_v18, 1  ;;  %v1420_v25 = vrot.slane %v483_v18, 2  ;;  %622 = vmatprep.subr.bf16.mxu1 %v20978_v19  ;;  %v1419_v26 = vrot.slane %v487_v20, 1  ;;  %v20982_v36 = vld [vmem:[#allocation4 + $0x38] ss:$28 sps:$4 sm:$0xff]   ;;  %v1755_v39 = vrot.slane %v24165_v13, 2 }
  0xd4   : > { %v480_v21 = vrot.slane %v478_v17, 1  ;;  %v1416_v22 = vrot.slane %v476_v16, 1  ;;  %v1417_v23 = vrot.slane %v478_v17, 2  ;;  %v20987_v38 = vld [vmem:[#allocation4 + $0x14] ss:$28 sps:$4 sm:$0xff]   ;;  %v1081_v60 = vrot.slane %v24165_v13, 1 }
  0xd5   : > { %v24173_v31 = vor.u32 %v1420_v25, %v1419_v26  ;;  %v20988_v41 = vld [vmem:[#allocation4 + $0x88] ss:$28 sps:$4 sm:$0xff]   ;;  %v24190_v42 = vsel %vm1754_vm3, %v1755_v39, %v24184_v40  ;;  %v489_v43 = vor.u32 %v487_v20, %v485_v24  ;;  %v20985_v44 = vld [vmem:[#allocation4 + $0x10] ss:$28 sps:$4 sm:$0xff]   ;;  %v20989_v45 = vld [vmem:[#allocation4 + $0xc0] ss:$28 sps:$4 sm:$0xff]  }
  0xd6   : > { %v481_v27 = vor.u32 %v480_v21, %v476_v16  ;;  %v1418_v30 = vor.u32 %v1417_v23, %v1416_v22  ;;  %v20992_v46 = vld [vmem:[#allocation4 + $0x4c] ss:$28 sps:$4 sm:$0xff]   ;;  %v21001_v49 = vld [vmem:[#allocation4 + $0xe4] ss:$28 sps:$4 sm:$0xff]   ;;  %v21004_v53 = vld [vmem:[#allocation4 + $0x11c] ss:$28 sps:$4 sm:$0xff]  }
  0xd7   : > { %v20990_v47 = vld [vmem:[#allocation4 + $0x48] ss:$28 sps:$4 sm:$0xff]   ;;  %v20999_v51 = vld [vmem:[#allocation4 + $0xe0] ss:$28 sps:$4 sm:$0xff]   ;;  %v21002_v55 = vld [vmem:[#allocation4 + $0x118] ss:$28 sps:$4 sm:$0xff]  }
  0xd8   : > { %v486_v33 = vsel %vm474_vm0, %v481_v27, %v485_v24  ;;  %v24180_v37 = vsel %vm1415_vm1, %v1418_v30, %v24173_v31  ;;  %v20995_v48 = vld [vmem:[#allocation4 + $0xc] ss:$28 sps:$4 sm:$0xff]   ;;  %v20998_v52 = vld [vmem:[#allocation4 + $0x44] ss:$28 sps:$4 sm:$0xff]   ;;  %v21005_v56 = vld [vmem:[#allocation4 + $0x18] ss:$28 sps:$4 sm:$0xff]  }
  0xd9   : > { %17993 = vmatmul.mubr.msk.bf16.vlgmr.msra.gmra.mrb[0].mxu1 %vm562_vm2, %v486_v33  ;;  %17997 = vmatmul.mubr.msk.bf16.vlgmr.msra.gmra.mrb[0].mxu0 %vm562_vm2, %v486_v33  ;;  %v20993_v50 = vld [vmem:[#allocation4 + $0x8] ss:$28 sps:$4 sm:$0xff]   ;;  %v20996_v54 = vld [vmem:[#allocation4 + $0x40] ss:$28 sps:$4 sm:$0xff]   ;;  %v21009_v57 = vld [vmem:[#allocation4 + $0xf4] ss:$28 sps:$4 sm:$0xff]  }
  0xda   : > { %854 = vmatpush1.bf16.msra.mxu0 %v20973_v28  ;;  %623 = vmatpush1.bf16.msra.mxu1 %v20976_v29  ;;  %v21006_v58 = vld [vmem:[#allocation4 + $0x50] ss:$28 sps:$4 sm:$0xff]   ;;  %v1082_v61 = vrot.slane %v24167_v14, 1  ;;  %vm1080_vm4 = vcmask 1046528   ;;  %v21016_v2 = vld [vmem:[#allocation4 + $0x128] ss:$28 sps:$4 sm:$0xff]  }
  0xdb   : > { %611 = vmatprep.mubr.bf16.mxu1 %v26986_v0  ;;  %717 = vmatprep.mubr.bf16.mxu0 %v26986_v0  ;;  %v21012_v59 = vld [vmem:[#allocation4 + $0xec] ss:$28 sps:$4 sm:$0xff]   ;;  %v21021_v3 = vld [vmem:[#allocation4 + $0x154] ss:$28 sps:$4 sm:$0xff]   ;;  %v21015_v5 = vld [vmem:[#allocation4 + $0x124] ss:$28 sps:$4 sm:$0xff]  }
  0xdc   : > { %624 = vmatprep.subr.bf16.mxu1 %v20981_v32  ;;  %855 = vmatprep.subr.bf16.mxu0 %v20984_v35  ;;  %v21007_v62 = vld [vmem:[#allocation4 + $0xf0] ss:$28 sps:$4 sm:$0xff]   ;;  %v1083_v1 = vsel %vm1080_vm4, %v1081_v60, %v1082_v61  ;;  %v21010_v4 = vld [vmem:[#allocation4 + $0xe8] ss:$28 sps:$4 sm:$0xff]   ;;  %v21013_v6 = vld [vmem:[#allocation4 + $0x120] ss:$28 sps:$4 sm:$0xff]  }
  0xdd   : > { %v21018_v63 = vld [vmem:[#allocation4 + $0x12c] ss:$28 sps:$4 sm:$0xff]   ;;  %v21022_v7 = vld [vmem:[#allocation4 + $0xf8] ss:$28 sps:$4 sm:$0xff]   ;;  %v21033_v15 = vld [vmem:[#allocation4 + $0x160] ss:$28 sps:$4 sm:$0xff]  }
  0xde   : > { %625 = vmatpush1.bf16.msra.mxu1 %v20979_v34  ;;  %856 = vmatpush1.bf16.msra.mxu0 %v20982_v36  ;;  %v21019_v8 = vld [vmem:[#allocation4 + $0x150] ss:$28 sps:$4 sm:$0xff]   ;;  %v21024_v11 = vld [vmem:[#allocation4 + $0x188] ss:$28 sps:$4 sm:$0xff]   ;;  %v21029_v12 = vld [vmem:[#allocation4 + $0x15c] ss:$28 sps:$4 sm:$0xff]  }
  0xdf   : > { %959 = vmatprep.subr.bf16.mxu0 %v20987_v38  ;;  %20260 = vmatprep.subr.bf16.mxu1 %v20988_v41  ;;  %v21023_v9 = vld [vmem:[#allocation4 + $0x130] ss:$28 sps:$4 sm:$0xff]   ;;  %v21038_v17 = vld [vmem:[#allocation4 + $0x19c] ss:$28 sps:$4 sm:$0xff]   ;;  %v21039_v20 = vld [vmem:[#allocation4 + $0x168] ss:$28 sps:$4 sm:$0xff]  }
  0xe0   : > { %v21026_v10 = vld [vmem:[#allocation4 + $0x18c] ss:$28 sps:$4 sm:$0xff]   ;;  %v21032_v16 = vld [vmem:[#allocation4 + $0x194] ss:$28 sps:$4 sm:$0xff]   ;;  %v21043_v21 = vld [vmem:[#allocation4 + $0x1c4] ss:$28 sps:$4 sm:$0xff]  }
  0xe1   : > { %17994 = vmatmul.mubr.msk.bf16.gmra.mrb[4].mxu1 %vm562_vm2, %v489_v43  ;;  %17998 = vmatmul.mubr.msk.bf16.gmra.mrb[4].mxu0 %vm562_vm2, %v489_v43  ;;  %v21030_v18 = vld [vmem:[#allocation4 + $0x190] ss:$28 sps:$4 sm:$0xff]   ;;  %v21036_v19 = vld [vmem:[#allocation4 + $0x198] ss:$28 sps:$4 sm:$0xff]   ;;  %v21040_v22 = vld [vmem:[#allocation4 + $0x1a0] ss:$28 sps:$4 sm:$0xff]  }
  0xe2   : > { %654 = vmatprep.mubr.bf16.mxu1 %v26986_v0  ;;  %885 = vmatprep.mubr.bf16.mxu0 %v26986_v0  ;;  %v21046_v23 = vld [vmem:[#allocation4 + $0x1cc] ss:$28 sps:$4 sm:$0xff]   ;;  %v21041_v24 = vld [vmem:[#allocation4 + $0x1c0] ss:$28 sps:$4 sm:$0xff]   ;;  %v21047_v26 = vld [vmem:[#allocation4 + $0x1f8] ss:$28 sps:$4 sm:$0xff]  }
  0xe3   : > { %v21049_v25 = vld [vmem:[#allocation4 + $0x1fc] ss:$28 sps:$4 sm:$0xff]   ;;  %v21055_v27 = vld [vmem:[#allocation4 + $0x1d4] ss:$28 sps:$4 sm:$0xff]   ;;  %v21044_v28 = vld [vmem:[#allocation4 + $0x1c8] ss:$28 sps:$4 sm:$0xff]  }
  0xe4   : > { %v21052_v29 = vld [vmem:[#allocation4 + $0x204] ss:$28 sps:$4 sm:$0xff]   ;;  %v21056_v32 = vld [vmem:[#allocation4 + $0x1d8] ss:$28 sps:$4 sm:$0xff]   ;;  %v21059_v34 = vld [vmem:[#allocation4 + $0x20c] ss:$28 sps:$4 sm:$0xff]  }
  0xe5   : > { %v21050_v30 = vld [vmem:[#allocation4 + $0x200] ss:$28 sps:$4 sm:$0xff]   ;;  %v21060_v35 = vld [vmem:[#allocation4 + $0x210] ss:$28 sps:$4 sm:$0xff]   ;;  %v21057_v36 = vld [vmem:[#allocation4 + $0x208] ss:$28 sps:$4 sm:$0xff]  }
  0xe6   : > { %s23852_s16 = smov 96   ;;  %vm2439_vm5 = vcmask 220160   ;;  %vm2446_vm6 = vcmask 1044480   ;;  %vm7000_vm8 = vcmask 523264   ;;  %vm23855_vm9 = vmmov 0   ;;  %p429_p2 = scmp.lt.s32.totalorder %s23928_s15, 1 }
  0xe7   : > { %vm15933_vm11 = vcmask 105472   ;;  %vm17821_vm12 = vcmask 1047556   ;;  %vm17818_vm13 = vcmask 1043456   ;;  %vm17819_vm14 = vsmask.f32 3328 }
  0xe8   : > { %s27039_s15 = smov (!%p429_p2, %s23928_s15), 1  ;;  %vm26913_vm15 = vmand %vm17821_vm12, %vm474_vm0 }
  0xe9   : > { %17995 = vmatmul.mubr.msk.bf16.vlgmr.msra.gmra.mrb[8].mxu1 %vm562_vm2, %v486_v33  ;;  %18015 = vmatmul.mubr.msk.bf16.vlgmr.msra.gmra.mrb[8].mxu0 %vm562_vm2, %v24165_v13  ;;  %s19892_s20 = sshll.u32 %s27039_s15, 4 }
  0xea   : > { %960 = vmatpush1.bf16.msra.mxu0 %v20985_v44  ;;  %20261 = vmatpush3.bf16.msra.mxu1 %v20988_v41 }
  0xeb   : > { %664 = vmatprep.mubr.bf16.mxu1 %v26986_v0  ;;  %895 = vmatprep.mubr.bf16.mxu0 %v26986_v0 }
  0xec   : > { %20262 = vmatprep.subr.bf16.mxu1 %v20989_v45  ;;  %961 = vmatprep.subr.bf16.mxu0 %v20992_v46 }
  0xee   : > { %20263 = vmatpush3.bf16.msra.mxu1 %v20989_v45  ;;  %962 = vmatpush1.bf16.msra.mxu0 %v20990_v47  ;;  %v26988_v45 = vlaneseq  ;;  %v2072_v47 = vld [vmem:[#allocation6] sm:$0xff] }
  0xef   : > { %906 = vmatprep.subr.bf16.mxu1 %v20995_v48  ;;  %1162 = vmatprep.subr.bf16.mxu0 %v21001_v49 }
  0xf0   : > { %v24291_v46 = vshrl.u32 %v26988_v45, 7 }
  0xf1   : > { %17996 = vmatmul.mubr.msk.bf16.gmra.mrb[12].mxu1 %vm562_vm2, %v489_v43  ;;  %18016 = vmatmul.mubr.msk.bf16.gmra.mrb[12].mxu0 %vm562_vm2, %v24167_v14 }
  0xf2   : > { %20264 = vmatprep.mubr.msk.bf16.mxu1 %vm562_vm2, %v486_v33  ;;  %991 = vmatprep.mubr.bf16.mxu0 %v26986_v0  ;;  %v21053_v33 = vld [vmem:[#allocation4 + $0x1d0] ss:$28 sps:$4 sm:$0xff]   ;;  %v26985_v48 = vsub.s32 2, %v24291_v46  ;;  %v26982_v49 = vsub.s32 0, %v24291_v46 }
  0xf9   : > { %20265 = vmatmul.mubr.msk.bf16.vlgmr.msra.gmra.mrb[16].mxu1 %vm562_vm2, %v489_v43  ;;  %18019 = vmatmul.mubr.msk.bf16.vlgmr.msra.gmra.mrb[0].mxu0 %vm562_vm2, %v24165_v13 }
  0xfa   : > { %907 = vmatpush1.bf16.msra.mxu1 %v20993_v50  ;;  %1163 = vmatpush1.bf16.msra.mxu0 %v20999_v51  ;;  %v26981_v50 = vsub.s32 1, %v24291_v46  ;;  %v2085_v51 = vrot.slane %v2072_v47, %v26985_v48 }
  0xfb   : > { %908 = vmatprep.subr.bf16.mxu1 %v20998_v52  ;;  %938 = vmatprep.mubr.bf16.mxu1 %v26986_v0 }
  0xfc   : > { %1001 = vmatprep.mubr.bf16.mxu0 %v26986_v0  ;;  %1164 = vmatprep.subr.bf16.mxu0 %v21004_v53  ;;  %v26980_v53 = vsub.s32 4, %v24291_v46 }
  0xfe   : > { %909 = vmatpush1.bf16.msra.mxu1 %v20996_v54  ;;  %1165 = vmatpush1.bf16.msra.mxu0 %v21002_v55  ;;  %v24306_v54 = vrot.slane %v2072_v47, %v26982_v49 }
  0xff   : > { %20268 = vmatprep.subr.bf16.mxu1 %v21005_v56  ;;  %1268 = vmatprep.subr.bf16.mxu0 %v21009_v57  ;;  %v24310_v57 = vrot.slane %v2072_v47, %v26981_v50 }
 0x101   : > { %18017 = vmatmul.mubr.msk.bf16.vlgmr.msra.gmra.mrb[8].mxu1 %vm562_vm2, %v24165_v13  ;;  %18020 = vmatmul.mubr.msk.bf16.gmra.mrb[4].mxu0 %vm562_vm2, %v24167_v14 }
 0x102   : > { %20269 = vmatpush3.bf16.msra.mxu1 %v21005_v56  ;;  %948 = vmatprep.mubr.bf16.mxu1 %v26986_v0 }
 0x103   : > { %1194 = vmatprep.mubr.bf16.mxu0 %v26986_v0  ;;  %20270 = vmatprep.subr.bf16.mxu1 %v21006_v58 }
 0x106   : > { %20271 = vmatpush3.bf16.msra.mxu1 %v21006_v58 }
 0x107   : > { %1215 = vmatprep.subr.bf16.mxu1 %v21012_v59 }
 0x109   : > { %18018 = vmatmul.mubr.msk.bf16.gmra.mrb[12].mxu1 %vm562_vm2, %v24167_v14  ;;  %18037 = vmatmul.mubr.msk.bf16.vlgmr.msra.gmra.mrb[8].mxu0 %vm562_vm2, %v1083_v1 }
 0x10a   : > { %1269 = vmatpush1.bf16.msra.mxu0 %v21007_v62  ;;  %20272 = vmatprep.mubr.msk.bf16.mxu1 %vm562_vm2, %v24165_v13  ;;  %v21035_v13 = vld [vmem:[#allocation4 + $0x164] ss:$28 sps:$4 sm:$0xff]   ;;  %v26983_v62 = vsub.s32 6, %v24291_v46 }
 0x10b   : > { %1204 = vmatprep.mubr.bf16.mxu0 %v26986_v0  ;;  %1270 = vmatprep.subr.bf16.mxu0 %v21018_v63 }
 0x10e   : > { %1271 = vmatpush1.bf16.msra.mxu0 %v21016_v2 }
 0x10f   : > { %1501 = vmatprep.subr.bf16.mxu0 %v21021_v3 }
 0x111   : > { %20273 = vmatmul.mubr.msk.bf16.vlgmr.msra.gmra.mrb[16].mxu1 %vm562_vm2, %v24167_v14  ;;  %18038 = vmatmul.mubr.msk.bf16.gmra.mrb[12].mxu0 %vm562_vm2, %v1082_v61  ;;  %v21027_v14 = vld [vmem:[#allocation4 + $0x158] ss:$28 sps:$4 sm:$0xff]  }
 0x112   : > { %1216 = vmatpush1.bf16.msra.mxu1 %v21010_v4  ;;  %1247 = vmatprep.mubr.bf16.mxu1 %v26986_v0  ;;  %v24318_v4 = vrot.slane %v2072_v47, %v26980_v53 }
 0x113   : > { %1217 = vmatprep.subr.bf16.mxu1 %v21015_v5  ;;  %1300 = vmatprep.mubr.bf16.mxu0 %v26986_v0  ;;  %v26979_v5 = vsub.s32 5, %v24291_v46 }
 0x116   : > { %1218 = vmatpush1.bf16.msra.mxu1 %v21013_v6 }
 0x117   : > { %20276 = vmatprep.subr.bf16.mxu1 %v21022_v7 }
 0x119   : > { %18039 = vmatmul.mubr.msk.bf16.vlgmr.msra.gmra.mrb[8].mxu1 %vm562_vm2, %v1083_v1  ;;  %18041 = vmatmul.mubr.msk.bf16.vlgmr.msra.gmra.mrb[0].mxu0 %vm562_vm2, %v1083_v1 }
 0x11a   : > { %1502 = vmatpush1.bf16.msra.mxu0 %v21019_v8  ;;  %20277 = vmatpush3.bf16.msra.mxu1 %v21022_v7 }
 0x11b   : > { %1257 = vmatprep.mubr.bf16.mxu1 %v26986_v0  ;;  %1310 = vmatprep.mubr.bf16.mxu0 %v26986_v0 }
 0x11c   : > { %20278 = vmatprep.subr.bf16.mxu1 %v21023_v9  ;;  %1503 = vmatprep.subr.bf16.mxu0 %v21026_v10 }
 0x11e   : > { %20279 = vmatpush3.bf16.msra.mxu1 %v21023_v9  ;;  %1504 = vmatpush1.bf16.msra.mxu0 %v21024_v11 }
 0x11f   : > { %1554 = vmatprep.subr.bf16.mxu1 %v21029_v12  ;;  %1607 = vmatprep.subr.bf16.mxu0 %v21035_v13 }
 0x121   : > { %18040 = vmatmul.mubr.msk.bf16.gmra.mrb[12].mxu1 %vm562_vm2, %v1082_v61  ;;  %18042 = vmatmul.mubr.msk.bf16.gmra.mrb[4].mxu0 %vm562_vm2, %v1082_v61 }
 0x122   : > { %20280 = vmatprep.mubr.msk.bf16.mxu1 %vm562_vm2, %v1083_v1  ;;  %1533 = vmatprep.mubr.bf16.mxu0 %v26986_v0 }
 0x129   : > { %20281 = vmatmul.mubr.msk.bf16.vlgmr.msra.gmra.mrb[16].mxu1 %vm562_vm2, %v1082_v61  ;;  %18059 = vmatmul.mubr.msk.bf16.vlgmr.msra.gmra.mrb[8].mxu0 %vm562_vm2, %v24180_v37 }
 0x12a   : > { %1555 = vmatpush1.bf16.msra.mxu1 %v21027_v14  ;;  %1608 = vmatpush1.bf16.msra.mxu0 %v21033_v15 }
 0x12b   : > { %1556 = vmatprep.subr.bf16.mxu1 %v21032_v16  ;;  %1543 = vmatprep.mubr.bf16.mxu0 %v26986_v0 }
 0x12c   : > { %1586 = vmatprep.mubr.bf16.mxu1 %v26986_v0  ;;  %1609 = vmatprep.subr.bf16.mxu0 %v21038_v17 }
 0x12e   : > { %1557 = vmatpush1.bf16.msra.mxu1 %v21030_v18  ;;  %1610 = vmatpush1.bf16.msra.mxu0 %v21036_v19 }
 0x12f   : > { %20284 = vmatprep.subr.bf16.mxu1 %v21039_v20  ;;  %1836 = vmatprep.subr.bf16.mxu0 %v21043_v21 }
 0x131   : > { %18060 = vmatmul.mubr.msk.bf16.gmra.mrb[12].mxu0 %vm562_vm2, %v24173_v31  ;;  %18061 = vmatmul.mubr.msk.bf16.vlgmr.msra.gmra.mrb[8].mxu1 %vm562_vm2, %v24180_v37 }
 0x132   : > { %20285 = vmatpush3.bf16.msra.mxu1 %v21039_v20  ;;  %1596 = vmatprep.mubr.bf16.mxu1 %v26986_v0 }
 0x133   : > { %1639 = vmatprep.mubr.bf16.mxu0 %v26986_v0  ;;  %20286 = vmatprep.subr.bf16.mxu1 %v21040_v22 }
 0x136   : > { %20287 = vmatpush3.bf16.msra.mxu1 %v21040_v22 }
 0x137   : > { %1889 = vmatprep.subr.bf16.mxu1 %v21046_v23 }
 0x139   : > { %18062 = vmatmul.mubr.msk.bf16.gmra.mrb[12].mxu1 %vm562_vm2, %v24173_v31  ;;  %18063 = vmatmul.mubr.msk.bf16.vlgmr.msra.gmra.mrb[0].mxu0 %vm562_vm2, %v24180_v37 }
 0x13a   : > { %1837 = vmatpush1.bf16.msra.mxu0 %v21041_v24  ;;  %1649 = vmatprep.mubr.bf16.mxu0 %v26986_v0 }
 0x13b   : > { %20288 = vmatprep.mubr.msk.bf16.mxu1 %vm562_vm2, %v24180_v37  ;;  %1838 = vmatprep.subr.bf16.mxu0 %v21049_v25 }
 0x13e   : > { %1839 = vmatpush1.bf16.msra.mxu0 %v21047_v26 }
 0x13f   : > { %1942 = vmatprep.subr.bf16.mxu0 %v21055_v27  ;;  %v24354_v27 = vrot.slane %v2072_v47, %v26983_v62 }
 0x141   : > { %18064 = vmatmul.mubr.msk.bf16.gmra.mrb[4].mxu0 %vm562_vm2, %v24173_v31  ;;  %20289 = vmatmul.mubr.msk.bf16.vlgmr.msra.gmra.mrb[16].mxu1 %vm562_vm2, %v24173_v31 }
 0x142   : > { %1890 = vmatpush1.bf16.msra.mxu1 %v21044_v28  ;;  %1868 = vmatprep.mubr.bf16.mxu0 %v26986_v0 }
 0x143   : > { %1891 = vmatprep.subr.bf16.mxu1 %v21052_v29  ;;  %1921 = vmatprep.mubr.bf16.mxu1 %v26986_v0 }
 0x146   : > { %1892 = vmatpush1.bf16.msra.mxu1 %v21050_v30 }
 0x147   : > { %20292 = vmatprep.subr.bf16.mxu1 %v21056_v32 }
 0x149   : > { %18081 = vmatmul.mubr.msk.bf16.vlgmr.msra.gmra.mrb[8].mxu0 %vm562_vm2, %v24190_v42  ;;  %18083 = vmatmul.mubr.msk.bf16.vlgmr.msra.gmra.mrb[8].mxu1 %vm562_vm2, %v24190_v42 }
 0x14a   : > { %1878 = vmatprep.mubr.bf16.mxu0 %v26986_v0  ;;  %1931 = vmatprep.mubr.bf16.mxu1 %v26986_v0 }
 0x14b   : > { %1943 = vmatpush1.bf16.msra.mxu0 %v21053_v33  ;;  %20293 = vmatpush3.bf16.msra.mxu1 %v21056_v32 }
 0x14c   : > { %1944 = vmatprep.subr.bf16.mxu0 %v21059_v34  ;;  %20294 = vmatprep.subr.bf16.mxu1 %v21060_v35  ;;  %v24367_v34 = vrot.slane %v2072_v47, %v26979_v5 }
 0x14f   : > { %1945 = vmatpush1.bf16.msra.mxu0 %v21057_v36  ;;  %20295 = vmatpush3.bf16.msra.mxu1 %v21060_v35 }
 0x151   : > { %18082 = vmatmul.mubr.msk.bf16.gmra.mrb[12].mxu0 %vm562_vm2, %v24184_v40  ;;  %18084 = vmatmul.mubr.msk.bf16.gmra.mrb[12].mxu1 %vm562_vm2, %v24184_v40 }
 0x152   : > { %1974 = vmatprep.mubr.bf16.mxu0 %v26986_v0  ;;  %20296 = vmatprep.mubr.msk.bf16.mxu1 %vm562_vm2, %v24190_v42 }
 0x159   : > { %18085 = vmatmul.mubr.msk.bf16.vlgmr.msra.gmra.mrb[0].mxu0 %vm562_vm2, %v24190_v42  ;;  %20297 = vmatmul.mubr.msk.bf16.vlgmr.msra.gmra.mrb[16].mxu1 %vm562_vm2, %v24184_v40 }
 0x15a   : > { %1984 = vmatprep.mubr.bf16.mxu0 %v26986_v0  ;;  %2503 = vmatprep.mubr.bf16.mxu1 %v26986_v0 }
 0x161   : > { %18086 = vmatmul.mubr.msk.bf16.gmra.mrb[4].mxu0 %vm562_vm2, %v24184_v40  ;;  %v26984_v40 = vsub.s32 3, %v24291_v46 }
 0x163   : > { %v24301_v52 = vrot.slane %v2072_v47, %v26984_v40 }
 0x1ac   : > { %v603_v31 = vpop.f32.mrb[0].mxu1 }
 0x1ad   : > { %v605_v37 = vpop.f32.mrb[1].mxu1 }
 0x1ae   : > { %v607_v38 = vpop.f32.mrb[2].mxu1 }
 0x1af   : > { %v609_v39 = vpop.f32.mrb[3].mxu1 }
 0x1b4   : > { %v613_v41 = vpop.f32.mrb[4].mxu1 }
 0x1b5   : > { %v24284_v43 = vpop.f32.mrb[5].mxu1 }
 0x1b6   : > { %v24286_v44 = vpop.f32.mrb[6].mxu1 }
 0x1b7   : > { %v24288_v42 = vpop.f32.mrb[7].mxu1 }
 0x21c   : > { %v1870_v55 = vpop.f32.mrb[8].mxu0  ;;  %v1923_v56 = vpop.f32.mrb[8].mxu1 }
 0x21d   : > { %v20394_v58 = vadd.f32 %v1870_v55, %v603_v31  ;;  %v2111_v59 = vadd.f32 %v2085_v51, %v1923_v56  ;;  %v1872_v60 = vpop.f32.mrb[9].mxu0  ;;  %v1925_v61 = vpop.f32.mrb[9].mxu1 }
 0x21e   : > { %v20395_v63 = vadd.f32 %v1872_v60, %v605_v37  ;;  %v24314_v1 = vadd.f32 %v24301_v52, %v1925_v61  ;;  %v1874_v2 = vpop.f32.mrb[10].mxu0  ;;  %v1927_v3 = vpop.f32.mrb[10].mxu1 }
 0x21f   : > { %v24322_v6 = vadd.f32 %v20394_v58, %v24306_v54  ;;  %v2139_v7 = vmax.f32 %v2111_v59, 0.0  ;;  %v20396_v8 = vadd.f32 %v1874_v2, %v607_v38  ;;  %v24324_v9 = vadd.f32 %v2085_v51, %v1927_v3  ;;  %v1876_v10 = vpop.f32.mrb[11].mxu0  ;;  %v1929_v11 = vpop.f32.mrb[11].mxu1 }
 0x220   : > { %v24327_v12 = vadd.f32 %v20395_v63, %v24310_v57  ;;  %v2140_v13 = vmax.f32 %v24314_v1, 0.0  ;;  %v20397_v14 = vadd.f32 %v1876_v10, %v609_v39  ;;  %v24331_v15 = vadd.f32 %v24301_v52, %v1929_v11 }
 0x221   : > { %v2137_v16 = vmax.f32 %v24322_v6, 0.0  ;;  %v2200_v17 = vrot.slane %v2139_v7, 1  ;;  %v24335_v18 = vadd.f32 %v20396_v8, %v24306_v54  ;;  %v2146_v19 = vmax.f32 %v24324_v9, 0.0 }
 0x222   : > { %v2138_v20 = vmax.f32 %v24327_v12, 0.0  ;;  %v24341_v21 = vrot.slane %v2140_v13, 1  ;;  %v24344_v22 = vadd.f32 %v20397_v14, %v24310_v57  ;;  %v26995_v23 = vmax.f32 %v24331_v15, 0.0 }
 0x223   : > { %v24349_v24 = vrot.slane %v2137_v16, 1  ;;  %v2144_v25 = vmax.f32 %v24335_v18, 0.0  ;;  %v2201_v26 = vrot.slane %v2146_v19, 1 }
 0x224   : > { %v24358_v28 = vrot.slane %v2138_v20, 1  ;;  %v2145_v29 = vmax.f32 %v24344_v22, 0.0  ;;  %v24363_v30 = vrot.slane %v26995_v23, 1  ;;  %v1880_v32 = vpop.f32.mrb[12].mxu0  ;;  %v1933_v33 = vpop.f32.mrb[12].mxu1 }
 0x225   : > { %v24371_v35 = vrot.slane %v2144_v25, 1  ;;  %v20398_v36 = vadd.f32 %v1880_v32, %v613_v41  ;;  %v24373_v31 = vadd.f32 %v2085_v51, %v1933_v33  ;;  %v1882_v37 = vpop.f32.mrb[13].mxu0  ;;  %v1935_v38 = vpop.f32.mrb[13].mxu1  ;;  %v2202_v39 = vsel %vm1080_vm4, %v2200_v17, %v2201_v26 }
 0x226   : > { %v24378_v55 = vrot.slane %v2145_v29, 1  ;;  %v20399_v56 = vadd.f32 %v1882_v37, %v24284_v43  ;;  %v24382_v47 = vadd.f32 %v24301_v52, %v1935_v38  ;;  %v1884_v58 = vpop.f32.mrb[14].mxu0  ;;  %v1937_v59 = vpop.f32.mrb[14].mxu1  ;;  %v24384_v60 = vmax.f32 %v2139_v7, %v2202_v39 }
 0x227   : > { %v24387_v41 = vadd.f32 %v20398_v36, %v24306_v54  ;;  %v2153_v61 = vmax.f32 %v24373_v31, 0.0  ;;  %v20400_v63 = vadd.f32 %v1884_v58, %v24286_v44  ;;  %v2132_v2 = vadd.f32 %v2085_v51, %v1937_v59  ;;  %v1886_v3 = vpop.f32.mrb[15].mxu0  ;;  %v1939_v8 = vpop.f32.mrb[15].mxu1 }
 0x228   : > { %v24392_v9 = vadd.f32 %v20399_v56, %v24310_v57  ;;  %v26990_v43 = vmax.f32 %v24382_v47, 0.0  ;;  %v20401_v10 = vadd.f32 %v1886_v3, %v24288_v42  ;;  %v2133_v7 = vadd.f32 %v24301_v52, %v1939_v8 }
 0x229   : > { %v2151_v11 = vmax.f32 %v24387_v41, 0.0  ;;  %v24400_v14 = vrot.slane %v2153_v61, 1  ;;  %v2130_v44 = vadd.f32 %v20400_v63, %v24306_v54  ;;  %v2160_v51 = vmax.f32 %v2132_v2, 0.0 }
 0x22a   : > { %v2152_v17 = vmax.f32 %v24392_v9, 0.0  ;;  %v24406_v32 = vrot.slane %v26990_v43, 1  ;;  %v2131_v33 = vadd.f32 %v20401_v10, %v24310_v57  ;;  %v2161_v42 = vmax.f32 %v2133_v7, 0.0 }
 0x22b   : > { %v24411_v52 = vrot.slane %v2151_v11, 1  ;;  %v2158_v36 = vmax.f32 %v2130_v44, 0.0  ;;  %v24413_v37 = vrot.slane %v2160_v51, 1  ;;  %v2220_v54 = vsel %vm1080_vm4, %v2201_v26, %v24400_v14 }
 0x22c   : > { %v2217_v38 = vrot.slane %v2152_v17, 1  ;;  %v2159_v39 = vmax.f32 %v2131_v33, 0.0  ;;  %v24419_v56 = vrot.slane %v2161_v42, 1  ;;  %v1976_v58 = vpop.f32.mrb[0].mxu0  ;;  %v20298_v59 = vpop.f32.mrb[16].mxu1  ;;  %v24421_v57 = vmax.f32 %v2146_v19, %v2220_v54 }
 0x22d   : > { %v24423_v63 = vrot.slane %v2158_v36, 1  ;;  %v24426_v2 = vadd.f32 %v24318_v4, %v1976_v58  ;;  %v24429_v3 = vadd.f32 %v20298_v59, %v24354_v27  ;;  %v1978_v8 = vpop.f32.mrb[1].mxu0  ;;  %v2029_v26 = vpop.f32.mrb[17].mxu1  ;;  %v24443_v50 = vmax.f32 %v2160_v51, %v24413_v37 }
 0x22e   : > { %v2231_v10 = vrot.slane %v2159_v39, 1  ;;  %v24432_v7 = vadd.f32 %v24367_v34, %v1978_v8  ;;  %v24435_v44 = vadd.f32 %v24354_v27, %v2029_v26  ;;  %v1980_v33 = vpop.f32.mrb[2].mxu0  ;;  %v20299_v19 = vpop.f32.mrb[18].mxu1  ;;  %v24446_v8 = vmax.f32 %v2161_v42, %v24419_v56 }
 0x22f   : > { %v26992_v54 = vmax.f32 %v24426_v2, 0.0  ;;  %v26989_v5 = vmax.f32 %v24429_v3, 0.0  ;;  %v24440_v58 = vadd.f32 %v24318_v4, %v1980_v33  ;;  %v1982_v59 = vpop.f32.mrb[3].mxu0  ;;  %v2032_v53 = vpop.f32.mrb[19].mxu1  ;;  %v24450_v49 = vadd.f32 %v20299_v19, %v24354_v27 }
 0x230   : > { %v26991_v26 = vmax.f32 %v24432_v7, 0.0  ;;  %v24453_v62 = vmax.f32 %v2158_v36, %v24423_v63  ;;  %v24455_v40 = vmax.f32 %v2159_v39, %v2231_v10  ;;  %v24459_v48 = vadd.f32 %v24367_v34, %v1982_v59 }
 0x231   : > { %v26993_v33 = vmax.f32 %v24440_v58, 0.0  ;;  %v2206_v51 = vrot.slane %v26992_v54, 1  ;;  %v24465_v42 = vrot.slane %v26989_v5, 1  ;;  %v2143_v19 = vmax.f32 %v24435_v44, 0.0 }
 0x232   : > { %v2122_v0 = vadd.f32 %v24354_v27, %v2032_v53  ;;  %v24471_v36 = vrot.slane %v26991_v26, 1  ;;  %v26994_v39 = vmax.f32 %v24459_v48, 0.0  ;;  %v20856_v59 = vpack.i.bf16 %v24421_v57, %v24384_v60 }
 0x233   : > { %v2196_v45 = vsel %vm1080_vm4, %v24349_v24, %v24371_v35  ;;  %v2216_v53 = vsel %vm1080_vm4, %v24371_v35, %v24411_v52  ;;  %v2207_v54 = vrot.slane %v26993_v33, 1  ;;  %v2199_v35 = vsel %vm1080_vm4, %v24358_v28, %v24378_v55 }
 0x234   : > { %v2150_v43 = vmax.f32 %v2122_v0, 0.0  ;;  %v24485_v27 = vmax.f32 %v2137_v16, %v2196_v45  ;;  %v1986_v26 = vpop.f32.mrb[4].mxu0  ;;  %20857 = vrot.lane.b32.xlu0 %v20856_v59, %s23852_s16  ;;  %v24492_v24 = vmax.f32 %v2144_v25, %v2216_v53  ;;  %v2210_v45 = vrot.slane %v26994_v39, 1 }
 0x235   : > { %v2127_v0 = vadd.f32 %v24318_v4, %v1986_v26  ;;  %v1988_v6 = vpop.f32.mrb[5].mxu0  ;;  %v2218_v33 = vsel %vm1080_vm4, %v24378_v55, %v2217_v38  ;;  %v24504_v59 = vmax.f32 %v2138_v20, %v2199_v35  ;;  %v2232_v12 = vsel %vm1080_vm4, %v2217_v38, %v2231_v10 }
 0x236   : > { %v2213_v16 = vrot.slane %v2150_v43, 1  ;;  %v1990_v18 = vpop.f32.mrb[6].mxu0  ;;  %v20861_v25 = vpack.i.bf16 %v24492_v24, %v24485_v27  ;;  %v24510_v28 = vmax.f32 %v2145_v29, %v2218_v33  ;;  %v2128_v53 = vadd.f32 %v24367_v34, %v1988_v6 }
 0x237   : > { %v2155_v26 = vmax.f32 %v2127_v0, 0.0  ;;  %v1992_v39 = vpop.f32.mrb[7].mxu0  ;;  %v2134_v55 = vadd.f32 %v24318_v4, %v1990_v18  ;;  %v24525_v6 = vmax.f32 %v2152_v17, %v2232_v12  ;;  %v2234_v4 = vsel %vm1080_vm4, %v24400_v14, %v24413_v37 }
 0x238   : > { %v2228_v23 = vsel %vm1080_vm4, %v2213_v16, %v24465_v42  ;;  %v2135_v20 = vadd.f32 %v24367_v34, %v1992_v39  ;;  %20862 = vrot.lane.b32.xlu1 %v20861_v25, %s23852_s16  ;;  %v20866_v22 = vpack.i.bf16 %v24510_v28, %v24504_v59  ;;  %v2156_v29 = vmax.f32 %v2128_v53, 0.0 }
 0x239   : > { %v24518_v35 = vmax.f32 %v2150_v43, %v2228_v23  ;;  %v2223_v0 = vrot.slane %v2155_v26, 1  ;;  %v2162_v33 = vmax.f32 %v2134_v55, 0.0  ;;  %v24533_v34 = vmax.f32 %v2153_v61, %v2234_v4 }
 0x23a   : > { %v2163_v5 = vmax.f32 %v2135_v20, 0.0  ;;  %20867 = vrot.lane.b32.xlu0 %v20866_v22, %s23852_s16  ;;  %v2225_v23 = vrot.slane %v2156_v29, 1  ;;  %v2230_v43 = vsel %vm1080_vm4, %v24411_v52, %v24423_v63  ;;  %v2205_v9 = vsel %vm1080_vm4, %v24341_v21, %v24363_v30  ;;  %v24595_v22 = vld [vmem:[#allocation7] sm:$0xff]  }
 0x23b   : > { %v2237_v17 = vrot.slane %v2162_v33, 1  ;;  %v20876_v38 = vpack.i.bf16 %v24455_v40, %v24525_v6  ;;  %v24545_v37 = vmax.f32 %v2151_v11, %v2230_v43  ;;  %v20871_v31 = vpack.i.bf16 %v24443_v50, %v24533_v34  ;;  %20304 = vmatprep.mubr.msk.bf16.mxu0 %vm2439_vm5, %v24595_v22 }
 0x23c   : > { %v2239_v14 = vrot.slane %v2163_v5, 1  ;;  %v2222_v61 = vsel %vm1080_vm4, %v24363_v30, %v24406_v32  ;;  %v24554_v52 = vmax.f32 %v2140_v13, %v2205_v9  ;;  %v2208_v21 = vsel %vm1080_vm4, %v2206_v51, %v2207_v54 }
 0x23d   : > { %v2212_v63 = vrot.slane %v2143_v19, 1  ;;  %v27011_v41 = vmax.f32 %v24450_v49, 0.0  ;;  %20877 = vrot.lane.b32.xlu1 %v20876_v38, %s23852_s16  ;;  %v20881_v10 = vpack.i.bf16 %v24453_v62, %v24545_v37  ;;  %v27012_v39 = vmax.f32 %v24331_v15, 0.0 }
 0x23e   : > { %20872 = vrot.lane.b32.xlu0 %v20871_v31, %s23852_s16  ;;  %v2224_v1 = vsel %vm1080_vm4, %v2207_v54, %v2223_v0  ;;  %v27013_v13 = vmax.f32 %v24426_v2, 0.0  ;;  %v2236_v18 = vsel %vm1080_vm4, %v24406_v32, %v24419_v56  ;;  %v2238_v25 = vsel %vm1080_vm4, %v2223_v0, %v2237_v17 }
 0x23f   : > { %v2241_v11 = vrot.slane %v27011_v41, 1  ;;  %v24566_v30 = vmax.f32 %v27012_v39, %v2222_v61  ;;  %v27014_v15 = vmax.f32 %v24440_v58, 0.0  ;;  %v27015_v12 = vmax.f32 %v24382_v47, 0.0 }
 0x240   : > { %v24572_v51 = vmax.f32 %v27013_v13, %v2208_v21  ;;  %v24588_v2 = vmax.f32 %v2155_v26, %v2238_v25  ;;  %v2211_v20 = vsel %vm1080_vm4, %v24471_v36, %v2210_v45  ;;  %v2226_v32 = vsel %vm1080_vm4, %v2210_v45, %v2225_v23 }
 0x241   : > { %v20886_v53 = vpack.i.bf16 %v24566_v30, %v24554_v52  ;;  %v24582_v55 = vmax.f32 %v27014_v15, %v2224_v1  ;;  %v24586_v54 = vmax.f32 %v27015_v12, %v2236_v18  ;;  %v2240_v56 = vsel %vm1080_vm4, %v2225_v23, %v2239_v14  ;;  %20882 = vrot.lane.b32.xlu1 %v20881_v10, %s23852_s16 }
 0x242   : > { %v2214_v0 = vsel %vm1080_vm4, %v2212_v63, %v2213_v16  ;;  %v27016_v58 = vmax.f32 %v24432_v7, 0.0  ;;  %v27017_v36 = vmax.f32 %v24459_v48, 0.0  ;;  %v24609_v4 = vmax.f32 %v2156_v29, %v2240_v56 }
 0x243   : > { %v20896_v47 = vpack.i.bf16 %v24582_v55, %v24572_v51  ;;  %20887 = vrot.lane.b32.xlu0 %v20886_v53, %s23852_s16  ;;  %v24613_v16 = vmax.f32 %v2143_v19, %v2214_v0  ;;  %v2242_v23 = vsel %vm1080_vm4, %v24465_v42, %v2241_v11  ;;  %v24617_v43 = vmax.f32 %v2162_v33, %v2237_v17 }
 0x244   : > { %v24602_v26 = vmax.f32 %v27016_v58, %v2211_v20  ;;  %v24607_v45 = vmax.f32 %v27017_v36, %v2226_v32  ;;  %v27018_v7 = vmax.f32 %v24429_v3, 0.0  ;;  %v20891_v48 = vpack.i.bf16 %v24446_v8, %v24586_v54 }
 0x245   : > { %20897 = vrot.lane.b32.xlu1 %v20896_v47, %s23852_s16  ;;  %v20901_v44 = vpack.i.bf16 %v24617_v43, %v24588_v2  ;;  %v24631_v42 = vmax.f32 %v2163_v5, %v2239_v14  ;;  %v27019_v19 = vmov %v27011_v41  ;;  %v20911_v33 = vpack.i.bf16 %v24518_v35, %v24613_v16 }
 0x246   : > { %v24621_v9 = vmax.f32 %v27018_v7, %v2242_v23  ;;  %v20906_v3 = vpack.i.bf16 %v24607_v45, %v24602_v26  ;;  %v24639_v29 = vmax.f32 %v27019_v19, %v2241_v11  ;;  %v27020_v14 = vlaneseq }
 0x247   : > { %20892 = vrot.lane.b32.xlu0 %v20891_v48, %s23852_s16  ;;  %v20916_v17 = vpack.i.bf16 %v24631_v42, %v24609_v4  ;;  %v23853_v1 = vmov 65535  }
 0x248   : > { %v20921_v5 = vpack.i.bf16 %v24639_v29, %v24621_v9  ;;  %v24651_v49 = vand.u32 127, %v27020_v14  ;;  %v2448_v13 = vsel %vm2446_vm6, 4294967295, %v23853_v1 }
 0x249   : > { %20902 = vrot.lane.b32.xlu1 %v20901_v44, %s23852_s16  ;;  %v24676_v44 = vsel %vm1754_vm3, %v2448_v13, 0 }
 0x24a   : > { %vm2357_vm7 = vcmp.lt.s32.totalorder %v24651_v49, 96  ;;  %vm15896_vm10 = vcmp.lt.s32.totalorder %v24651_v49, 64 }
 0x24b   : > { %20907 = vrot.lane.b32.xlu0 %v20906_v3, %s23852_s16 }
 0x24d   : > { %20912 = vrot.lane.b32.xlu1 %v20911_v33, %s23852_s16 }
 0x24f   : > { %20917 = vrot.lane.b32.xlu0 %v20916_v17, %s23852_s16 }
 0x251   : > { %20922 = vrot.lane.b32.xlu1 %v20921_v5, %s23852_s16  ;;  %s23856_s16 = smov 64  }
 0x2a6   : > { %v20858_v38 = vpop.permute.xlu0 %20857 }
 0x2a7   : > { %v20860_v61 = vunpack.i.h.bf16 %v20858_v38  ;;  %v20859_v21 = vunpack.i.l.bf16 %v20858_v38 }
 0x2aa   : > { %v24653_v31 = vpop.permute.xlu1 %20862 }
 0x2ab   : > { %v20865_v41 = vunpack.i.h.bf16 %v24653_v31  ;;  %v20864_v11 = vunpack.i.l.bf16 %v24653_v31 }
 0x2ac   : > { %v20868_v63 = vpop.permute.xlu0 %20867 }
 0x2ad   : > { %v20870_v10 = vunpack.i.h.bf16 %v20868_v63  ;;  %v20869_v39 = vunpack.i.l.bf16 %v20868_v63 }
 0x2af   : > { %v2379_v18 = vsel %vm2357_vm7, %v20865_v41, %v20870_v10  ;;  %v2374_v25 = vsel %vm2357_vm7, %v20869_v39, %v20859_v21  ;;  %v2375_v53 = vsel %vm2357_vm7, %v20870_v10, %v20860_v61  ;;  %v2378_v15 = vsel %vm2357_vm7, %v20864_v11, %v20869_v39  ;;  %v20878_v12 = vpop.permute.xlu1 %20877 }
 0x2b0   : > { %v2393_v20 = vmax.f32 %v24492_v24, %v2379_v18  ;;  %v2386_v32 = vmax.f32 %v24485_v27, %v2378_v15  ;;  %v20880_v56 = vunpack.i.h.bf16 %v20878_v12  ;;  %v20879_v0 = vunpack.i.l.bf16 %v20878_v12  ;;  %v20873_v47 = vpop.permute.xlu0 %20872 }
 0x2b1   : > { %v20875_v58 = vunpack.i.h.bf16 %v20873_v47  ;;  %v20874_v36 = vunpack.i.l.bf16 %v20873_v47  ;;  %v2387_v23 = vmax.f32 %v24504_v59, %v2374_v25  ;;  %v2394_v7 = vmax.f32 %v24510_v28, %v2375_v53 }
 0x2b2   : > { %v2414_v48 = vpack.c.bf16 %v2393_v20, %v2386_v32 }
 0x2b3   : > { %v2377_v3 = vsel %vm2357_vm7, %v20880_v56, %v20875_v58  ;;  %v2376_v24 = vsel %vm2357_vm7, %v20879_v0, %v20874_v36  ;;  %v24682_v27 = vpop.permute.xlu1 %20882  ;;  %v2415_v19 = vpack.c.bf16 %v2394_v7, %v2387_v23 }
 0x2b4   : > { %v2408_v33 = vmax.f32 %v24455_v40, %v2377_v3  ;;  %v2401_v17 = vmax.f32 %v24525_v6, %v2376_v24  ;;  %v20885_v59 = vunpack.i.h.bf16 %v24682_v27  ;;  %v20884_v28 = vunpack.i.l.bf16 %v24682_v27 }
 0x2b5   : > { %v20888_v5 = vpop.permute.xlu0 %20887  ;;  %2471 = vmatprep.subr.bf16.mxu1 %v2415_v19 }
 0x2b6   : > { %v20890_v38 = vunpack.i.h.bf16 %v20888_v5  ;;  %v2380_v14 = vsel %vm2357_vm7, %v20884_v28, %v20879_v0  ;;  %v2381_v63 = vsel %vm2357_vm7, %v20885_v59, %v20880_v56  ;;  %v20889_v40 = vunpack.i.l.bf16 %v20888_v5  ;;  %2472 = vmatpush1.bf16.msra.mxu1 %v2414_v48 }
 0x2b7   : > { %v2422_v6 = vpack.c.bf16 %v2408_v33, %v2401_v17  ;;  %v2400_v10 = vmax.f32 %v24545_v37, %v2380_v14  ;;  %v2407_v39 = vmax.f32 %v24453_v62, %v2381_v63  ;;  %v20898_v13 = vpop.permute.xlu1 %20897 }
 0x2b8   : > { %v20900_v18 = vunpack.i.h.bf16 %v20898_v13  ;;  %v20899_v25 = vunpack.i.l.bf16 %v20898_v13  ;;  %v2371_v0 = vsel %vm2357_vm7, %v20860_v61, %v20890_v38  ;;  %v2370_v56 = vsel %vm2357_vm7, %v20859_v21, %v20889_v40 }
 0x2b9   : > { %v20893_v53 = vpop.permute.xlu0 %20892  ;;  %v2421_v15 = vpack.c.bf16 %v2407_v39, %v2400_v10  ;;  %v2454_v32 = vand.u32 %v24676_v44, %v2422_v6  ;;  %v2395_v17 = vmax.f32 %v24421_v57, %v2371_v0  ;;  %v27021_v13 = vmov 0  }
 0x2ba   : > { %v20895_v12 = vunpack.i.h.bf16 %v20893_v53  ;;  %v20894_v20 = vunpack.i.l.bf16 %v20893_v53  ;;  %v2366_v37 = vsel %vm2357_vm7, %v20889_v40, %v20899_v25  ;;  %v2367_v62 = vsel %vm2357_vm7, %v20890_v38, %v20900_v18 }
 0x2bb   : > { %2473 = vmatprep.subr.bf16.mxu1 %v2454_v32  ;;  %v20903_v7 = vpop.permute.xlu1 %20902  ;;  %v2451_v48 = vand.u32 %v24676_v44, %v2421_v15  ;;  %v2389_v61 = vmax.f32 %v24554_v52, %v2366_v37  ;;  %v24731_v15 = vld [vmem:[#allocation7 + $0x8] ss:$0 sps:$4 sm:$0x11]  }
 0x2bc   : > { %v2373_v47 = vsel %vm2357_vm7, %v20875_v58, %v20895_v12  ;;  %v2372_v23 = vsel %vm2357_vm7, %v20874_v36, %v20894_v20  ;;  %v20905_v24 = vunpack.i.h.bf16 %v20903_v7  ;;  %v20904_v19 = vunpack.i.l.bf16 %v20903_v7 }
 0x2bd   : > { %v2409_v21 = vmax.f32 %v24443_v50, %v2373_v47  ;;  %v2402_v3 = vmax.f32 %v24533_v34, %v2372_v23  ;;  %v20908_v33 = vpop.permute.xlu0 %20907  ;;  %v2388_v58 = vmax.f32 %v24384_v60, %v2370_v56  ;;  %2474 = vmatpush1.bf16.msra.mxu1 %v2451_v48  ;;  %v2396_v36 = vmax.f32 %v24566_v30, %v2367_v62 }
 0x2be   : > { %v2368_v5 = vsel %vm2357_vm7, %v20894_v20, %v20904_v19  ;;  %v2369_v52 = vsel %vm2357_vm7, %v20895_v12, %v20905_v24  ;;  %v20910_v38 = vunpack.i.h.bf16 %v20908_v33  ;;  %v20909_v14 = vunpack.i.l.bf16 %v20908_v33 }
 0x2bf   : > { %v2403_v50 = vmax.f32 %v24586_v54, %v2368_v5  ;;  %v2410_v34 = vmax.f32 %v24446_v8, %v2369_v52  ;;  %v20913_v63 = vpop.permute.xlu1 %20912  ;;  %v2423_v40 = vpack.c.bf16 %v2409_v21, %v2402_v3  ;;  %v2417_v60 = vpack.c.bf16 %v2396_v36, %v2389_v61  ;;  %v21086_v36 = vld [vmem:[%s26970_s4 + $0x2b4] ss:$20 sps:$4 sm:$0xff]   ;;  %v21084_v52 = vld [vmem:[%s26970_s4 + $0x2b0] ss:$20 sps:$4 sm:$0xff]  }
 0x2c0   : > { %18091 = vmatmul.mubr.msk.bf16.vlgmr.msra.gmra.mrb[20].mxu1 %vm2439_vm5, %v24595_v22  ;;  %v20915_v30 = vunpack.i.h.bf16 %v20913_v63  ;;  %v20914_v10 = vunpack.i.l.bf16 %v20913_v63  ;;  %v2416_v39 = vpack.c.bf16 %v2395_v17, %v2388_v58  ;;  %v2363_v54 = vsel %vm2357_vm7, %v20900_v18, %v20910_v38  ;;  %v21096_v63 = vld [vmem:[%s26970_s4 + $0x300] ss:$20 sps:$4 sm:$0xff]  }
 0x2c1   : > { %v20918_v57 = vpop.permute.xlu0 %20917  ;;  %2513 = vmatprep.mubr.bf16.mxu1 %v27021_v13  ;;  %v2424_v53 = vpack.c.bf16 %v2410_v34, %v2403_v50  ;;  %2522 = vmatprep.subr.bf16.mxu1 %v2417_v60  ;;  %v2362_v22 = vsel %vm2357_vm7, %v20899_v25, %v20909_v14  ;;  %v2457_v25 = vand.u32 %v24676_v44, %v2423_v40  ;;  %v21098_v50 = vld [vmem:[%s26970_s4 + $0x304] ss:$20 sps:$4 sm:$0xff]   ;;  %v21063_v34 = vld [vmem:[%s26970_s4] ss:$20 sps:$4 sm:$0xff]   ;;  %v21066_v60 = vld [vmem:[%s26970_s4 + $0x28] ss:$20 sps:$4 sm:$0xff]  }
 0x2c2   : > { %v20920_v6 = vunpack.i.h.bf16 %v20918_v57  ;;  %v2359_v8 = vsel %vm2357_vm7, %v20910_v38, %v20915_v30  ;;  %v20919_v12 = vunpack.i.l.bf16 %v20918_v57  ;;  %v2358_v20 = vsel %vm2357_vm7, %v20909_v14, %v20914_v10  ;;  %2523 = vmatpush1.bf16.msra.mxu1 %v2416_v39  ;;  %v21092_v38 = vld [vmem:[%s26970_s4 + $0x2dc] ss:$20 sps:$4 sm:$0xff]   ;;  %v21068_v14 = vld [vmem:[%s26970_s4 + $0x2c] ss:$20 sps:$4 sm:$0xff]   ;;  %v21071_v57 = vld [vmem:[%s26970_s4 + $0x54] ss:$20 sps:$4 sm:$0xff]  }
 0x2c3   : > { %v2382_v32 = vsel %vm2357_vm7, %v20914_v10, %v20864_v11  ;;  %v20923_v18 = vpop.permute.xlu1 %20922  ;;  %v2383_v0 = vsel %vm2357_vm7, %v20915_v30, %v20865_v41  ;;  %v2460_v47 = vand.u32 %v24676_v44, %v2424_v53  ;;  %v2391_v23 = vmax.f32 %v24602_v26, %v2358_v20  ;;  %v21104_v40 = vld [vmem:[%s26970_s4 + $0x32c] ss:$20 sps:$4 sm:$0xff]   ;;  %v21102_v30 = vld [vmem:[%s26970_s4 + $0x328] ss:$20 sps:$4 sm:$0xff]   ;;  %v21069_v10 = vld [vmem:[%s26970_s4 + $0x50] ss:$20 sps:$4 sm:$0xff]  }
 0x2c4   : > { %v20925_v56 = vunpack.i.h.bf16 %v20923_v18  ;;  %v20924_v37 = vunpack.i.l.bf16 %v20923_v18  ;;  %v2365_v62 = vsel %vm2357_vm7, %v20905_v24, %v20920_v6  ;;  %v2398_v11 = vmax.f32 %v24607_v45, %v2359_v8  ;;  %v21074_v39 = vld [vmem:[%s26970_s4 + $0x7c] ss:$20 sps:$4 sm:$0xff]   ;;  %v21072_v8 = vld [vmem:[%s26970_s4 + $0x78] ss:$20 sps:$4 sm:$0xff]   ;;  %v21120_v18 = vld [vmem:[%s26970_s4 + $0x3a0] ss:$20 sps:$4 sm:$0xff]  }
 0x2c5   : > { %v2392_v48 = vmax.f32 %v24613_v16, %v2382_v32  ;;  %v2364_v61 = vsel %vm2357_vm7, %v20904_v19, %v20919_v12  ;;  %2524 = vmatprep.subr.bf16.mxu1 %v2460_v47  ;;  %v2399_v24 = vmax.f32 %v24518_v35, %v2383_v0  ;;  %v2397_v27 = vmax.f32 %v24582_v55, %v2363_v54  ;;  %v21080_v35 = vld [vmem:[%s26970_s4 + $0x28c] ss:$20 sps:$4 sm:$0xff]   ;;  %v23591_v55 = vld [vmem:[#allocation7] sm:$0xff]   ;;  %v21108_v53 = vld [vmem:[%s26970_s4 + $0x350] ss:$20 sps:$4 sm:$0xff]  }
 0x2c6   : > { %v2361_v7 = vsel %vm2357_vm7, %v20920_v6, %v20925_v56  ;;  %v2385_v31 = vsel %vm2357_vm7, %v20925_v56, %v20885_v59  ;;  %v2360_v41 = vsel %vm2357_vm7, %v20919_v12, %v20924_v37  ;;  %v2384_v21 = vsel %vm2357_vm7, %v20924_v37, %v20884_v28  ;;  %2525 = vmatpush1.bf16.msra.mxu1 %v2457_v25  ;;  %v21110_v6 = vld [vmem:[%s26970_s4 + $0x354] ss:$20 sps:$4 sm:$0xff]   ;;  %v21116_v54 = vld [vmem:[%s26970_s4 + $0x37c] ss:$20 sps:$4 sm:$0xff]   ;;  %v21114_v12 = vld [vmem:[%s26970_s4 + $0x378] ss:$20 sps:$4 sm:$0xff]  }
 0x2c7   : > { %v2412_v26 = vmax.f32 %v24631_v42, %v2361_v7  ;;  %v2413_v45 = vmax.f32 %v24639_v29, %v2385_v31  ;;  %v2405_v59 = vmax.f32 %v24609_v4, %v2360_v41  ;;  %v2406_v3 = vmax.f32 %v24621_v9, %v2384_v21  ;;  %v21122_v20 = vld [vmem:[%s26970_s4 + $0x3a4] ss:$20 sps:$4 sm:$0xff]   ;;  %v21075_v32 = vld [vmem:[%s26970_s4 + $0xa0] ss:$20 sps:$4 sm:$0xff]   ;;  %v21081_v56 = vld [vmem:[%s26970_s4 + $0xc8] ss:$20 sps:$4 sm:$0xff]  }
 0x2c8   : > { %18092 = vmatmul.mubr.msk.bf16.gmra.mrb[24].mxu1 %vm2439_vm5, %v24731_v15  ;;  %v2419_v16 = vpack.c.bf16 %v2398_v11, %v2391_v23  ;;  %v2420_v42 = vpack.c.bf16 %v2399_v24, %v2392_v48  ;;  %v2390_v28 = vmax.f32 %v24572_v51, %v2362_v22  ;;  %v2411_v4 = vmax.f32 %v24617_v43, %v2365_v62  ;;  %v21078_v51 = vld [vmem:[%s26970_s4 + $0x288] ss:$20 sps:$4 sm:$0xff]   ;;  %v21065_v43 = vld [vmem:[%s26970_s4 + $0x4] ss:$20 sps:$4 sm:$0xff]   ;;  %v21128_v0 = vld [vmem:[%s26970_s4 + $0x3cc] ss:$20 sps:$4 sm:$0xff]  }
 0x2c9   : > { %2554 = vmatprep.mubr.bf16.mxu1 %v27021_v13  ;;  %v2427_v29 = vpack.c.bf16 %v2413_v45, %v2406_v3  ;;  %v2404_v9 = vmax.f32 %v24588_v2, %v2364_v61  ;;  %v2426_v33 = vpack.c.bf16 %v2412_v26, %v2405_v59  ;;  %v21077_v22 = vld [vmem:[%s26970_s4 + $0xa4] ss:$20 sps:$4 sm:$0xff]   ;;  %v21089_v37 = vld [vmem:[%s26970_s4 + $0xf4] ss:$20 sps:$4 sm:$0xff]   ;;  %v21095_v23 = vld [vmem:[%s26970_s4 + $0x11c] ss:$20 sps:$4 sm:$0xff]  }
 0x2ca   : > { %2573 = vmatprep.subr.bf16.mxu1 %v2419_v16  ;;  %20300 = vmatprep.subr.bf16.mxu0 %v2420_v42  ;;  %v2418_v58 = vpack.c.bf16 %v2397_v27, %v2390_v28  ;;  %v21126_v25 = vld [vmem:[%s26970_s4 + $0x3c8] ss:$20 sps:$4 sm:$0xff]   ;;  %v21087_v47 = vld [vmem:[%s26970_s4 + $0xf0] ss:$20 sps:$4 sm:$0xff]   ;;  %v21093_v31 = vld [vmem:[%s26970_s4 + $0x118] ss:$20 sps:$4 sm:$0xff]  }
 0x2cb   : > { %v2469_v19 = vand.u32 %v24676_v44, %v2427_v29  ;;  %20301 = vmatpush3.bf16.msra.mxu0 %v2420_v42  ;;  %v2425_v17 = vpack.c.bf16 %v2411_v4, %v2404_v9  ;;  %v2466_v2 = vand.u32 %v24676_v44, %v2426_v33  ;;  %v21134_v62 = vld [vmem:[%s26970_s4 + $0x3f4] ss:$20 sps:$4 sm:$0xff]   ;;  %v21132_v11 = vld [vmem:[%s26970_s4 + $0x3f0] ss:$20 sps:$4 sm:$0xff]   ;;  %v21138_v48 = vld [vmem:[%s26970_s4 + $0x418] ss:$20 sps:$4 sm:$0xff]  }
 0x2cc   : > { %v21140_v7 = vld [vmem:[%s26970_s4 + $0x41c] ss:$20 sps:$4 sm:$0xff]   ;;  %v21101_v41 = vld [vmem:[%s26970_s4 + $0x144] ss:$20 sps:$4 sm:$0xff]   ;;  %v21099_v61 = vld [vmem:[%s26970_s4 + $0x140] ss:$20 sps:$4 sm:$0xff]  }
 0x2cd   : > { %20302 = vmatprep.subr.bf16.mxu0 %v2469_v19  ;;  %v2463_v5 = vand.u32 %v24676_v44, %v2425_v17  ;;  %v21090_v44 = vld [vmem:[%s26970_s4 + $0x2d8] ss:$20 sps:$4 sm:$0xff]   ;;  %v21105_v45 = vld [vmem:[%s26970_s4 + $0x168] ss:$20 sps:$4 sm:$0xff]   ;;  %v21111_v59 = vld [vmem:[%s26970_s4 + $0x190] ss:$20 sps:$4 sm:$0xff]  }
 0x2ce   : > { %v21107_v26 = vld [vmem:[%s26970_s4 + $0x16c] ss:$20 sps:$4 sm:$0xff]   ;;  %v21113_v21 = vld [vmem:[%s26970_s4 + $0x194] ss:$20 sps:$4 sm:$0xff]   ;;  %v21119_v3 = vld [vmem:[%s26970_s4 + $0x1bc] ss:$20 sps:$4 sm:$0xff]  }
 0x2cf   : > { %20303 = vmatpush3.bf16.msra.mxu0 %v2469_v19  ;;  %v21117_v16 = vld [vmem:[%s26970_s4 + $0x1b8] ss:$20 sps:$4 sm:$0xff]   ;;  %v21123_v42 = vld [vmem:[%s26970_s4 + $0x1e0] ss:$20 sps:$4 sm:$0xff]   ;;  %v21129_v27 = vld [vmem:[%s26970_s4 + $0x208] ss:$20 sps:$4 sm:$0xff]  }
 0x2d0   : > { %18093 = vmatmul.mubr.msk.bf16.vlgmr.msra.gmra.mrb[28].mxu1 %vm2439_vm5, %v23591_v55  ;;  %4733 = vmatprep.subr.bf16.mxu0 %v21080_v35  ;;  %v21125_v24 = vld [vmem:[%s26970_s4 + $0x1e4] ss:$20 sps:$4 sm:$0xff]   ;;  %v21131_v29 = vld [vmem:[%s26970_s4 + $0x20c] ss:$20 sps:$4 sm:$0xff]   ;;  %v21137_v28 = vld [vmem:[%s26970_s4 + $0x234] ss:$20 sps:$4 sm:$0xff]  }
 0x2d1   : > { %2574 = vmatpush1.bf16.msra.mxu1 %v2418_v58  ;;  %2564 = vmatprep.mubr.bf16.mxu1 %v27021_v13  ;;  %v21135_v4 = vld [vmem:[%s26970_s4 + $0x230] ss:$20 sps:$4 sm:$0xff]   ;;  %v21144_v19 = vld [vmem:[%s26970_s4 + $0x440] ss:$20 sps:$4 sm:$0xff]   ;;  %v21141_v35 = vld [vmem:[%s26970_s4 + $0x258] ss:$20 sps:$4 sm:$0xff]  }
 0x2d2   : > { %2575 = vmatprep.subr.bf16.mxu1 %v2466_v2  ;;  %20305 = vmatmul.mubr.msk.bf16.vlgmr.msra.gmra.mrb[16].mxu0 %vm2439_vm5, %v24731_v15  ;;  %v21143_v9 = vld [vmem:[%s26970_s4 + $0x25c] ss:$20 sps:$4 sm:$0xff]   ;;  %v21146_v33 = vld [vmem:[%s26970_s4 + $0x444] ss:$20 sps:$4 sm:$0xff]   ;;  %v21158_v2 = vld [vmem:[%s26970_s4 + $0x494] ss:$20 sps:$4 sm:$0xff]  }
 0x2d3   : > { %4734 = vmatpush1.bf16.msra.mxu0 %v21078_v51  ;;  %v21149_v17 = vld [vmem:[%s26970_s4 + $0x284] ss:$20 sps:$4 sm:$0xff]   ;;  %v21150_v58 = vld [vmem:[%s26970_s4 + $0x468] ss:$20 sps:$4 sm:$0xff]   ;;  %v21152_v51 = vld [vmem:[%s26970_s4 + $0x46c] ss:$20 sps:$4 sm:$0xff]  }
 0x2d4   : > { %4735 = vmatprep.subr.bf16.mxu0 %v21086_v36  ;;  %v21164_v36 = vld [vmem:[%s26970_s4 + $0x4bc] ss:$20 sps:$4 sm:$0xff]  }
 0x2d5   : > { %2576 = vmatpush1.bf16.msra.mxu1 %v2463_v5  ;;  %v21168_v5 = vld [vmem:[%s26970_s4 + $0x4e0] ss:$20 sps:$4 sm:$0xff]  }
 0x2d6   : > { %4478 = vmatprep.subr.bf16.mxu1 %v21065_v43  ;;  %v21162_v43 = vld [vmem:[%s26970_s4 + $0x4b8] ss:$20 sps:$4 sm:$0xff]  }
 0x2d7   : > { %4736 = vmatpush1.bf16.msra.mxu0 %v21084_v52  ;;  %v21170_v52 = vld [vmem:[%s26970_s4 + $0x4e4] ss:$20 sps:$4 sm:$0xff]  }
 0x2d8   : > { %18094 = vmatmul.mubr.msk.bf16.gmra.mrb[32].mxu1 %vm2439_vm5, %v24731_v15  ;;  %4737 = vmatprep.subr.bf16.mxu0 %v21092_v38  ;;  %v21176_v38 = vld [vmem:[%s26970_s4 + $0x50c] ss:$20 sps:$4 sm:$0xff]  }
 0x2d9   : > { %2605 = vmatprep.mubr.bf16.mxu1 %v27021_v13 }
 0x2db   : > { %4738 = vmatpush1.bf16.msra.mxu0 %v21090_v44 }
 0x2dc   : > { %4739 = vmatprep.subr.bf16.mxu0 %v21098_v50 }
 0x2df   : > { %4740 = vmatpush1.bf16.msra.mxu0 %v21096_v63 }
 0x2e0   : > { %18095 = vmatmul.mubr.msk.bf16.vlgmr.msra.gmra.mrb[36].mxu1 %vm2439_vm5, %v23591_v55  ;;  %4741 = vmatprep.subr.bf16.mxu0 %v21104_v40  ;;  %v21156_v55 = vld [vmem:[%s26970_s4 + $0x490] ss:$20 sps:$4 sm:$0xff]  }
 0x2e1   : > { %2615 = vmatprep.mubr.bf16.mxu1 %v27021_v13  ;;  %4479 = vmatpush1.bf16.msra.mxu1 %v21063_v34 }
 0x2e2   : > { %4480 = vmatprep.subr.bf16.mxu1 %v21068_v14  ;;  %v21147_v14 = vld [vmem:[%s26970_s4 + $0x280] ss:$20 sps:$4 sm:$0xff]  }
 0x2e3   : > { %4742 = vmatpush1.bf16.msra.mxu0 %v21102_v30  ;;  %v21153_v30 = vld [vmem:[%s26970_s4 + $0x2a8] ss:$20 sps:$4 sm:$0xff]  }
 0x2e4   : > { %4743 = vmatprep.subr.bf16.mxu0 %v21110_v6 }
 0x2e5   : > { %4481 = vmatpush1.bf16.msra.mxu1 %v21066_v60 }
 0x2e6   : > { %4482 = vmatprep.subr.bf16.mxu1 %v21071_v57  ;;  %v21155_v57 = vld [vmem:[%s26970_s4 + $0x2ac] ss:$20 sps:$4 sm:$0xff]  }
 0x2e7   : > { %4744 = vmatpush1.bf16.msra.mxu0 %v21108_v53 }
 0x2e8   : > { %18096 = vmatmul.mubr.msk.bf16.gmra.mrb[40].mxu1 %vm2439_vm5, %v24731_v15  ;;  %4745 = vmatprep.subr.bf16.mxu0 %v21116_v54  ;;  %v21083_v15 = vld [vmem:[%s26970_s4 + $0xcc] ss:$20 sps:$4 sm:$0xff]  }
 0x2e9   : > { %4483 = vmatpush1.bf16.msra.mxu1 %v21069_v10 }
 0x2ea   : > { %4484 = vmatprep.subr.bf16.mxu1 %v21074_v39  ;;  %v21161_v39 = vld [vmem:[%s26970_s4 + $0x2d4] ss:$20 sps:$4 sm:$0xff]  }
 0x2eb   : > { %4746 = vmatpush1.bf16.msra.mxu0 %v21114_v12  ;;  %v21159_v12 = vld [vmem:[%s26970_s4 + $0x2d0] ss:$20 sps:$4 sm:$0xff]  }
 0x2ec   : > { %4747 = vmatprep.subr.bf16.mxu0 %v21122_v20  ;;  %v21167_v20 = vld [vmem:[%s26970_s4 + $0x2fc] ss:$20 sps:$4 sm:$0xff]  }
 0x2ed   : > { %4485 = vmatpush1.bf16.msra.mxu1 %v21072_v8 }
 0x2ee   : > { %4486 = vmatprep.subr.bf16.mxu1 %v21077_v22 }
 0x2ef   : > { %4748 = vmatpush1.bf16.msra.mxu0 %v21120_v18 }
 0x2f0   : > { %4749 = vmatprep.subr.bf16.mxu0 %v21128_v0  ;;  %v21173_v0 = vld [vmem:[%s26970_s4 + $0x324] ss:$20 sps:$4 sm:$0xff]  }
 0x2f1   : > { %4487 = vmatpush1.bf16.msra.mxu1 %v21075_v32 }
 0x2f2   : > { %4488 = vmatprep.subr.bf16.mxu1 %v21083_v15  ;;  %v21165_v15 = vld [vmem:[%s26970_s4 + $0x2f8] ss:$20 sps:$4 sm:$0xff]  }
 0x2f3   : > { %4750 = vmatpush1.bf16.msra.mxu0 %v21126_v25 }
 0x2f4   : > { %4751 = vmatprep.subr.bf16.mxu0 %v21134_v62 }
 0x2f5   : > { %4489 = vmatpush1.bf16.msra.mxu1 %v21081_v56 }
 0x2f6   : > { %4490 = vmatprep.subr.bf16.mxu1 %v21089_v37  ;;  %v21171_v37 = vld [vmem:[%s26970_s4 + $0x320] ss:$20 sps:$4 sm:$0xff]  }
 0x2f7   : > { %4752 = vmatpush1.bf16.msra.mxu0 %v21132_v11  ;;  %v21179_v11 = vld [vmem:[%s26970_s4 + $0x34c] ss:$20 sps:$4 sm:$0xff]  }
 0x2f8   : > { %4753 = vmatprep.subr.bf16.mxu0 %v21140_v7 }
 0x2f9   : > { %4491 = vmatpush1.bf16.msra.mxu1 %v21087_v47 }
 0x2fa   : > { %4492 = vmatprep.subr.bf16.mxu1 %v21095_v23  ;;  %v21174_v23 = vld [vmem:[%s26970_s4 + $0x508] ss:$20 sps:$4 sm:$0xff]  }
 0x2fb   : > { %4754 = vmatpush1.bf16.msra.mxu0 %v21138_v48  ;;  %v21177_v48 = vld [vmem:[%s26970_s4 + $0x348] ss:$20 sps:$4 sm:$0xff]  }
 0x2fc   : > { %4755 = vmatprep.subr.bf16.mxu0 %v21146_v33  ;;  %v21194_v33 = vld [vmem:[%s26970_s4 + $0x584] ss:$20 sps:$4 sm:$0xff]  }
 0x2fd   : > { %4493 = vmatpush1.bf16.msra.mxu1 %v21093_v31  ;;  %v21182_v31 = vld [vmem:[%s26970_s4 + $0x534] ss:$20 sps:$4 sm:$0xff]  }
 0x2fe   : > { %4494 = vmatprep.subr.bf16.mxu1 %v21101_v41 }
 0x2ff   : > { %4756 = vmatpush1.bf16.msra.mxu0 %v21144_v19  ;;  %v21191_v19 = vld [vmem:[%s26970_s4 + $0x39c] ss:$20 sps:$4 sm:$0xff]  }
 0x300   : > { %4757 = vmatprep.subr.bf16.mxu0 %v21152_v51  ;;  %v21197_v51 = vld [vmem:[%s26970_s4 + $0x3c4] ss:$20 sps:$4 sm:$0xff]  }
 0x301   : > { %4495 = vmatpush1.bf16.msra.mxu1 %v21099_v61 }
 0x302   : > { %4496 = vmatprep.subr.bf16.mxu1 %v21107_v26  ;;  %v21180_v26 = vld [vmem:[%s26970_s4 + $0x530] ss:$20 sps:$4 sm:$0xff]  }
 0x303   : > { %4758 = vmatpush1.bf16.msra.mxu0 %v21150_v58 }
 0x304   : > { %4759 = vmatprep.subr.bf16.mxu0 %v21158_v2 }
 0x305   : > { %4497 = vmatpush1.bf16.msra.mxu1 %v21105_v45 }
 0x306   : > { %4498 = vmatprep.subr.bf16.mxu1 %v21113_v21 }
 0x307   : > { %4760 = vmatpush1.bf16.msra.mxu0 %v21156_v55  ;;  %v21200_v55 = vld [vmem:[%s26970_s4 + $0x5ac] ss:$20 sps:$4 sm:$0xff]  }
 0x308   : > { %4761 = vmatprep.subr.bf16.mxu0 %v21164_v36  ;;  %v21198_v36 = vld [vmem:[%s26970_s4 + $0x5a8] ss:$20 sps:$4 sm:$0xff]  }
 0x309   : > { %4499 = vmatpush1.bf16.msra.mxu1 %v21111_v59 }
 0x30a   : > { %4500 = vmatprep.subr.bf16.mxu1 %v21119_v3  ;;  %v21185_v3 = vld [vmem:[%s26970_s4 + $0x374] ss:$20 sps:$4 sm:$0xff]  }
 0x30b   : > { %4762 = vmatpush1.bf16.msra.mxu0 %v21162_v43  ;;  %v21195_v43 = vld [vmem:[%s26970_s4 + $0x3c0] ss:$20 sps:$4 sm:$0xff]  }
 0x30c   : > { %4763 = vmatprep.subr.bf16.mxu0 %v21170_v52  ;;  %v21203_v52 = vld [vmem:[%s26970_s4 + $0x3ec] ss:$20 sps:$4 sm:$0xff]  }
 0x30d   : > { %4501 = vmatpush1.bf16.msra.mxu1 %v21117_v16  ;;  %v21188_v16 = vld [vmem:[%s26970_s4 + $0x55c] ss:$20 sps:$4 sm:$0xff]  }
 0x30e   : > { %4502 = vmatprep.subr.bf16.mxu1 %v21125_v24 }
 0x30f   : > { %4764 = vmatpush1.bf16.msra.mxu0 %v21168_v5 }
 0x310   : > { %4784 = vmatprep.subr.bf16.mxu0 %v21176_v38  ;;  %v21206_v38 = vld [vmem:[%s26970_s4 + $0x5d4] ss:$20 sps:$4 sm:$0xff]  }
 0x311   : > { %4503 = vmatpush1.bf16.msra.mxu1 %v21123_v42  ;;  %v21183_v42 = vld [vmem:[%s26970_s4 + $0x370] ss:$20 sps:$4 sm:$0xff]  }
 0x312   : > { %4504 = vmatprep.subr.bf16.mxu1 %v21131_v29  ;;  %v21186_v29 = vld [vmem:[%s26970_s4 + $0x558] ss:$20 sps:$4 sm:$0xff]  }
 0x315   : > { %4505 = vmatpush1.bf16.msra.mxu1 %v21129_v27 }
 0x316   : > { %4506 = vmatprep.subr.bf16.mxu1 %v21137_v28 }
 0x319   : > { %4507 = vmatpush1.bf16.msra.mxu1 %v21135_v4 }
 0x31a   : > { %4508 = vmatprep.subr.bf16.mxu1 %v21143_v9 }
 0x31d   : > { %4509 = vmatpush1.bf16.msra.mxu1 %v21141_v35  ;;  %v21189_v35 = vld [vmem:[%s26970_s4 + $0x398] ss:$20 sps:$4 sm:$0xff]  }
 0x31e   : > { %4529 = vmatprep.subr.bf16.mxu1 %v21149_v17  ;;  %v21192_v17 = vld [vmem:[%s26970_s4 + $0x580] ss:$20 sps:$4 sm:$0xff]  }
 0x393   : > { %v2505_v44 = vpop.f32.mrb[20].mxu1 }
 0x394   : > { %v2507_v50 = vpop.f32.mrb[21].mxu1 }
 0x395   : > { %v2509_v34 = vpop.f32.mrb[22].mxu1 }
 0x396   : > { %v24993_v63 = vpack.c.bf16 %v2509_v34, %v2505_v44  ;;  %v2511_v40 = vpop.f32.mrb[23].mxu1 }
 0x397   : > { %v24995_v60 = vpack.c.bf16 %v2511_v40, %v2507_v50  ;;  %v21204_v40 = vld [vmem:[%s26970_s4 + $0x5d0] ss:$20 sps:$4 sm:$0xff]  }
 0x399   : > { %4510 = vmatprep.mubr.bf16.mxu1 %v24995_v60 }
 0x39a   : > { %4511 = vmatmul.mubr.bf16.vlgmr.msra.gmra.mrb[44].mxu1 %v24993_v63 }
 0x39b   : > { %4530 = vmatpush1.bf16.msra.mxu1 %v21147_v14  ;;  %v2515_v6 = vpop.f32.mrb[24].mxu1  ;;  %v21201_v14 = vld [vmem:[%s26970_s4 + $0x3e8] ss:$20 sps:$4 sm:$0xff]  }
 0x39c   : > { %4531 = vmatprep.subr.bf16.mxu1 %v21155_v57  ;;  %v2517_v10 = vpop.f32.mrb[25].mxu1  ;;  %v25010_v8 = vpack.c.bf16 %v2515_v6, %v2515_v6  ;;  %v21212_v6 = vld [vmem:[%s26970_s4 + $0x5fc] ss:$20 sps:$4 sm:$0xff]  }
 0x39d   : > { %v25008_v53 = vpack.c.bf16 %v2517_v10, %v2517_v10  ;;  %v2519_v54 = vpop.f32.mrb[26].mxu1 }
 0x39e   : > { %v2520_v22 = vpop.f32.mrb[27].mxu1  ;;  %v21210_v54 = vld [vmem:[%s26970_s4 + $0x5f8] ss:$20 sps:$4 sm:$0xff]  }
 0x39f   : > { %4532 = vmatpush1.bf16.msra.mxu1 %v21153_v30  ;;  %4520 = vmatprep.mubr.bf16.mxu1 %v25008_v53  ;;  %v21209_v30 = vld [vmem:[%s26970_s4 + $0x414] ss:$20 sps:$4 sm:$0xff]  }
 0x3a0   : > { %4533 = vmatprep.subr.bf16.mxu1 %v21161_v39  ;;  %v21207_v39 = vld [vmem:[%s26970_s4 + $0x410] ss:$20 sps:$4 sm:$0xff]  }
 0x3a2   : > { %4521 = vmatmul.mubr.bf16.gmra.mrb[48].mxu1 %v25010_v8 }
 0x3a3   : > { %4534 = vmatpush1.bf16.msra.mxu1 %v21159_v12  ;;  %v2556_v32 = vpop.f32.mrb[28].mxu1  ;;  %v21215_v12 = vld [vmem:[%s26970_s4 + $0x43c] ss:$20 sps:$4 sm:$0xff]  }
 0x3a4   : > { %v2558_v18 = vpop.f32.mrb[29].mxu1  ;;  %4535 = vmatprep.subr.bf16.mxu1 %v21167_v20  ;;  %v21218_v20 = vld [vmem:[%s26970_s4 + $0x624] ss:$20 sps:$4 sm:$0xff]  }
 0x3a5   : > { %v2560_v56 = vpop.f32.mrb[30].mxu1  ;;  %v25039_v7 = vpop.f32.mrb[16].mxu0 }
 0x3a6   : > { %v25029_v25 = vpack.c.bf16 %v2560_v56, %v2556_v32  ;;  %v2562_v62 = vpop.f32.mrb[31].mxu1  ;;  %v2658_v41 = vpop.f32.mrb[17].mxu0  ;;  %v21224_v56 = vld [vmem:[%s26970_s4 + $0x64c] ss:$20 sps:$4 sm:$0xff]  }
 0x3a7   : > { %v25031_v47 = vpack.c.bf16 %v2562_v62, %v2558_v18  ;;  %4536 = vmatpush1.bf16.msra.mxu1 %v21165_v15  ;;  %v20307_v61 = vpop.f32.mrb[18].mxu0  ;;  %v21213_v15 = vld [vmem:[%s26970_s4 + $0x438] ss:$20 sps:$4 sm:$0xff]   ;;  %v21216_v18 = vld [vmem:[%s26970_s4 + $0x620] ss:$20 sps:$4 sm:$0xff]  }
 0x3a8   : > { %4537 = vmatprep.subr.bf16.mxu1 %v21173_v0  ;;  %v2661_v45 = vpop.f32.mrb[19].mxu0  ;;  %v21221_v0 = vld [vmem:[%s26970_s4 + $0x464] ss:$20 sps:$4 sm:$0xff]   ;;  %v21222_v62 = vld [vmem:[%s26970_s4 + $0x648] ss:$20 sps:$4 sm:$0xff]  }
 0x3a9   : > { %4765 = vmatprep.mubr.bf16.mxu0 %v25031_v47  ;;  %4561 = vmatprep.mubr.bf16.mxu1 %v25031_v47  ;;  %v25053_v59 = vpack.c.bf16 %v2661_v45, %v2658_v41  ;;  %v21228_v41 = vld [vmem:[%s26970_s4 + $0x670] ss:$20 sps:$4 sm:$0xff]   ;;  %v21234_v45 = vld [vmem:[%s26970_s4 + $0x698] ss:$20 sps:$4 sm:$0xff]  }
 0x3aa   : > { %4766 = vmatmul.mubr.bf16.vlgmr.msra.gmra.mrb[20].mxu0 %v25029_v25  ;;  %v21236_v61 = vld [vmem:[%s26970_s4 + $0x69c] ss:$20 sps:$4 sm:$0xff]  }
 0x3ab   : > { %4538 = vmatpush1.bf16.msra.mxu1 %v21171_v37  ;;  %4785 = vmatpush1.bf16.msra.mxu0 %v21174_v23  ;;  %v2566_v21 = vpop.f32.mrb[32].mxu1  ;;  %v21219_v37 = vld [vmem:[%s26970_s4 + $0x460] ss:$20 sps:$4 sm:$0xff]  }
 0x3ac   : > { %4539 = vmatprep.subr.bf16.mxu1 %v21179_v11  ;;  %4786 = vmatprep.subr.bf16.mxu0 %v21182_v31  ;;  %v2568_v24 = vpop.f32.mrb[33].mxu1  ;;  %v25069_v4 = vpack.c.bf16 %v2566_v21, %v2566_v21  ;;  %v21227_v23 = vld [vmem:[%s26970_s4 + $0x48c] ss:$20 sps:$4 sm:$0xff]   ;;  %v21230_v11 = vld [vmem:[%s26970_s4 + $0x674] ss:$20 sps:$4 sm:$0xff]  }
 0x3ad   : > { %v25067_v27 = vpack.c.bf16 %v2568_v24, %v2568_v24  ;;  %v2570_v28 = vpop.f32.mrb[34].mxu1  ;;  %v21225_v31 = vld [vmem:[%s26970_s4 + $0x488] ss:$20 sps:$4 sm:$0xff]   ;;  %v21240_v24 = vld [vmem:[%s26970_s4 + $0x6c0] ss:$20 sps:$4 sm:$0xff]  }
 0x3ae   : > { %v2571_v9 = vpop.f32.mrb[35].mxu1  ;;  %v21239_v21 = vld [vmem:[%s26970_s4 + $0x4dc] ss:$20 sps:$4 sm:$0xff]   ;;  %v21243_v28 = vld [vmem:[%s26970_s4 + $0x500] ss:$20 sps:$4 sm:$0xff]  }
 0x3af   : > { %4540 = vmatpush1.bf16.msra.mxu1 %v21177_v48  ;;  %4787 = vmatpush1.bf16.msra.mxu0 %v21180_v26  ;;  %v21233_v48 = vld [vmem:[%s26970_s4 + $0x4b4] ss:$20 sps:$4 sm:$0xff]   ;;  %v21231_v26 = vld [vmem:[%s26970_s4 + $0x4b0] ss:$20 sps:$4 sm:$0xff]  }
 0x3b0   : > { %4541 = vmatprep.subr.bf16.mxu1 %v21185_v3  ;;  %4788 = vmatprep.subr.bf16.mxu0 %v21188_v16  ;;  %v21242_v3 = vld [vmem:[%s26970_s4 + $0x6c4] ss:$20 sps:$4 sm:$0xff]   ;;  %v21246_v9 = vld [vmem:[%s26970_s4 + $0x6e8] ss:$20 sps:$4 sm:$0xff]  }
 0x3b1   : > { %4775 = vmatprep.mubr.bf16.mxu0 %v25067_v27  ;;  %v21237_v16 = vld [vmem:[%s26970_s4 + $0x4d8] ss:$20 sps:$4 sm:$0xff]  }
 0x3b2   : > { %4776 = vmatmul.mubr.bf16.gmra.mrb[24].mxu0 %v25069_v4 }
 0x3b3   : > { %4542 = vmatpush1.bf16.msra.mxu1 %v21183_v42  ;;  %4789 = vmatpush1.bf16.msra.mxu0 %v21186_v29  ;;  %v2607_v58 = vpop.f32.mrb[36].mxu1  ;;  %v21245_v42 = vld [vmem:[%s26970_s4 + $0x504] ss:$20 sps:$4 sm:$0xff]   ;;  %v21248_v29 = vld [vmem:[%s26970_s4 + $0x6ec] ss:$20 sps:$4 sm:$0xff]  }
 0x3b4   : > { %4543 = vmatprep.subr.bf16.mxu1 %v21191_v19  ;;  %4790 = vmatprep.subr.bf16.mxu0 %v21194_v33  ;;  %v2609_v2 = vpop.f32.mrb[37].mxu1  ;;  %v21251_v19 = vld [vmem:[%s26970_s4 + $0x52c] ss:$20 sps:$4 sm:$0xff]   ;;  %v21254_v33 = vld [vmem:[%s26970_s4 + $0x714] ss:$20 sps:$4 sm:$0xff]  }
 0x3b5   : > { %v2611_v5 = vpop.f32.mrb[38].mxu1 }
 0x3b6   : > { %v25103_v44 = vpack.c.bf16 %v2611_v5, %v2607_v58  ;;  %v2613_v50 = vpop.f32.mrb[39].mxu1  ;;  %v21257_v58 = vld [vmem:[%s26970_s4 + $0x554] ss:$20 sps:$4 sm:$0xff]   ;;  %v21261_v5 = vld [vmem:[%s26970_s4 + $0x578] ss:$20 sps:$4 sm:$0xff]  }
 0x3b7   : > { %4544 = vmatpush1.bf16.msra.mxu1 %v21189_v35  ;;  %4791 = vmatpush1.bf16.msra.mxu0 %v21192_v17  ;;  %v25105_v34 = vpack.c.bf16 %v2613_v50, %v2609_v2  ;;  %v21249_v35 = vld [vmem:[%s26970_s4 + $0x528] ss:$20 sps:$4 sm:$0xff]   ;;  %v21252_v17 = vld [vmem:[%s26970_s4 + $0x710] ss:$20 sps:$4 sm:$0xff]   ;;  %v21258_v2 = vld [vmem:[%s26970_s4 + $0x738] ss:$20 sps:$4 sm:$0xff]  }
 0x3b8   : > { %4545 = vmatprep.subr.bf16.mxu1 %v21197_v51  ;;  %4792 = vmatprep.subr.bf16.mxu0 %v21200_v55  ;;  %v21260_v51 = vld [vmem:[%s26970_s4 + $0x73c] ss:$20 sps:$4 sm:$0xff]   ;;  %v21272_v50 = vld [vmem:[%s26970_s4 + $0x78c] ss:$20 sps:$4 sm:$0xff]  }
 0x3b9   : > { %4816 = vmatprep.mubr.bf16.mxu0 %v25105_v34  ;;  %v21255_v55 = vld [vmem:[%s26970_s4 + $0x550] ss:$20 sps:$4 sm:$0xff]  }
 0x3bb   : > { %4546 = vmatpush1.bf16.msra.mxu1 %v21195_v43  ;;  %4793 = vmatpush1.bf16.msra.mxu0 %v21198_v36  ;;  %v25114_v57 = vpop.f32.mrb[40].mxu1  ;;  %v21263_v43 = vld [vmem:[%s26970_s4 + $0x57c] ss:$20 sps:$4 sm:$0xff]   ;;  %v21266_v36 = vld [vmem:[%s26970_s4 + $0x764] ss:$20 sps:$4 sm:$0xff]  }
 0x3bc   : > { %4547 = vmatprep.subr.bf16.mxu1 %v21203_v52  ;;  %4794 = vmatprep.subr.bf16.mxu0 %v21206_v38  ;;  %v25122_v10 = vpop.f32.mrb[41].mxu1  ;;  %v21264_v52 = vld [vmem:[%s26970_s4 + $0x760] ss:$20 sps:$4 sm:$0xff]   ;;  %v21269_v38 = vld [vmem:[%s26970_s4 + $0x5a4] ss:$20 sps:$4 sm:$0xff]  }
 0x3bd   : > { %v2621_v22 = vpop.f32.mrb[42].mxu1 }
 0x3be   : > { %v2622_v32 = vpop.f32.mrb[43].mxu1  ;;  %v21276_v22 = vld [vmem:[%s26970_s4 + $0x7b0] ss:$20 sps:$4 sm:$0xff]  }
 0x3bf   : > { %4548 = vmatpush1.bf16.msra.mxu1 %v21201_v14  ;;  %4795 = vmatpush1.bf16.msra.mxu0 %v21204_v40  ;;  %v21267_v14 = vld [vmem:[%s26970_s4 + $0x5a0] ss:$20 sps:$4 sm:$0xff]   ;;  %v21270_v40 = vld [vmem:[%s26970_s4 + $0x788] ss:$20 sps:$4 sm:$0xff]   ;;  %v21279_v32 = vld [vmem:[%s26970_s4 + $0x5f0] ss:$20 sps:$4 sm:$0xff]  }
 0x3c0   : > { %4549 = vmatprep.subr.bf16.mxu1 %v21209_v30  ;;  %4796 = vmatprep.subr.bf16.mxu0 %v21212_v6  ;;  %v21275_v30 = vld [vmem:[%s26970_s4 + $0x5cc] ss:$20 sps:$4 sm:$0xff]   ;;  %v21278_v6 = vld [vmem:[%s26970_s4 + $0x7b4] ss:$20 sps:$4 sm:$0xff]  }
 0x3c3   : > { %4550 = vmatpush1.bf16.msra.mxu1 %v21207_v39  ;;  %4797 = vmatpush1.bf16.msra.mxu0 %v21210_v54  ;;  %v21273_v39 = vld [vmem:[%s26970_s4 + $0x5c8] ss:$20 sps:$4 sm:$0xff]   ;;  %v25265_v54 = vpack.c.bf16 %v25122_v10, %v25122_v10  ;;  %v25280_v10 = vpack.c.bf16 %v25114_v57, %v25114_v57  ;;  %v21290_v57 = vld [vmem:[%s26970_s4 + $0x804] ss:$20 sps:$4 sm:$0xff]  }
 0x3c4   : > { %4551 = vmatprep.subr.bf16.mxu1 %v21215_v12  ;;  %4798 = vmatprep.subr.bf16.mxu0 %v21218_v20  ;;  %v21281_v12 = vld [vmem:[%s26970_s4 + $0x5f4] ss:$20 sps:$4 sm:$0xff]   ;;  %v21284_v20 = vld [vmem:[%s26970_s4 + $0x7dc] ss:$20 sps:$4 sm:$0xff]  }
 0x3c7   : > { %4552 = vmatpush1.bf16.msra.mxu1 %v21213_v15  ;;  %4799 = vmatpush1.bf16.msra.mxu0 %v21216_v18  ;;  %v21282_v15 = vld [vmem:[%s26970_s4 + $0x7d8] ss:$20 sps:$4 sm:$0xff]   ;;  %v21287_v18 = vld [vmem:[%s26970_s4 + $0x61c] ss:$20 sps:$4 sm:$0xff]  }
 0x3c8   : > { %4553 = vmatprep.subr.bf16.mxu1 %v21221_v0  ;;  %4800 = vmatprep.subr.bf16.mxu0 %v21224_v56  ;;  %v21285_v0 = vld [vmem:[%s26970_s4 + $0x618] ss:$20 sps:$4 sm:$0xff]   ;;  %v21288_v56 = vld [vmem:[%s26970_s4 + $0x800] ss:$20 sps:$4 sm:$0xff]  }
 0x3cb   : > { %4554 = vmatpush1.bf16.msra.mxu1 %v21219_v37  ;;  %4801 = vmatpush1.bf16.msra.mxu0 %v21222_v62  ;;  %v21293_v37 = vld [vmem:[%s26970_s4 + $0x644] ss:$20 sps:$4 sm:$0xff]   ;;  %v21296_v62 = vld [vmem:[%s26970_s4 + $0x82c] ss:$20 sps:$4 sm:$0xff]  }
 0x3cc   : > { %4555 = vmatprep.subr.bf16.mxu1 %v21227_v23  ;;  %4802 = vmatprep.subr.bf16.mxu0 %v21230_v11  ;;  %v21291_v23 = vld [vmem:[%s26970_s4 + $0x640] ss:$20 sps:$4 sm:$0xff]   ;;  %v21294_v11 = vld [vmem:[%s26970_s4 + $0x828] ss:$20 sps:$4 sm:$0xff]  }
 0x3cf   : > { %4556 = vmatpush1.bf16.msra.mxu1 %v21225_v31  ;;  %4803 = vmatpush1.bf16.msra.mxu0 %v21228_v41  ;;  %v21299_v31 = vld [vmem:[%s26970_s4 + $0x66c] ss:$20 sps:$4 sm:$0xff]   ;;  %v21302_v41 = vld [vmem:[%s26970_s4 + $0x854] ss:$20 sps:$4 sm:$0xff]  }
 0x3d0   : > { %4557 = vmatprep.subr.bf16.mxu1 %v21233_v48  ;;  %4804 = vmatprep.subr.bf16.mxu0 %v21236_v61  ;;  %v21297_v48 = vld [vmem:[%s26970_s4 + $0x668] ss:$20 sps:$4 sm:$0xff]   ;;  %v21300_v61 = vld [vmem:[%s26970_s4 + $0x850] ss:$20 sps:$4 sm:$0xff]  }
 0x3d3   : > { %4558 = vmatpush1.bf16.msra.mxu1 %v21231_v26  ;;  %4805 = vmatpush1.bf16.msra.mxu0 %v21234_v45  ;;  %v21305_v26 = vld [vmem:[%s26970_s4 + $0x694] ss:$20 sps:$4 sm:$0xff]   ;;  %v21308_v45 = vld [vmem:[%s26970_s4 + $0x87c] ss:$20 sps:$4 sm:$0xff]  }
 0x3d4   : > { %4559 = vmatprep.subr.bf16.mxu1 %v21239_v21  ;;  %4806 = vmatprep.subr.bf16.mxu0 %v21242_v3  ;;  %v21303_v21 = vld [vmem:[%s26970_s4 + $0x690] ss:$20 sps:$4 sm:$0xff]   ;;  %v21306_v3 = vld [vmem:[%s26970_s4 + $0x878] ss:$20 sps:$4 sm:$0xff]  }
 0x3d7   : > { %4560 = vmatpush1.bf16.msra.mxu1 %v21237_v16  ;;  %4807 = vmatpush1.bf16.msra.mxu0 %v21240_v24  ;;  %v21311_v16 = vld [vmem:[%s26970_s4 + $0x6bc] ss:$20 sps:$4 sm:$0xff]   ;;  %v21314_v24 = vld [vmem:[%s26970_s4 + $0x8a4] ss:$20 sps:$4 sm:$0xff]  }
 0x3d8   : > { %4580 = vmatprep.subr.bf16.mxu1 %v21245_v42  ;;  %4808 = vmatprep.subr.bf16.mxu0 %v21248_v29  ;;  %v21309_v42 = vld [vmem:[%s26970_s4 + $0x6b8] ss:$20 sps:$4 sm:$0xff]   ;;  %v21312_v29 = vld [vmem:[%s26970_s4 + $0x8a0] ss:$20 sps:$4 sm:$0xff]  }
 0x3da   : > { %4562 = vmatmul.mubr.bf16.vlgmr.msra.gmra.mrb[44].mxu1 %v25029_v25 }
 0x3db   : > { %4581 = vmatpush1.bf16.msra.mxu1 %v21243_v28  ;;  %4809 = vmatpush1.bf16.msra.mxu0 %v21246_v9  ;;  %v21317_v28 = vld [vmem:[%s26970_s4 + $0x6e4] ss:$20 sps:$4 sm:$0xff]  }
 0x3dc   : > { %4582 = vmatprep.subr.bf16.mxu1 %v21251_v19  ;;  %4810 = vmatprep.subr.bf16.mxu0 %v21254_v33  ;;  %v21318_v9 = vld [vmem:[%s26970_s4 + $0x3d0] ss:$20 sps:$4 sm:$0xff]   ;;  %v21315_v19 = vld [vmem:[%s26970_s4 + $0x6e0] ss:$20 sps:$4 sm:$0xff]  }
 0x3dd   : > { %4571 = vmatprep.mubr.bf16.mxu1 %v25067_v27  ;;  %v21319_v33 = vld [vmem:[%s26970_s4 + $0x290] ss:$20 sps:$4 sm:$0xff]  }
 0x3df   : > { %4583 = vmatpush1.bf16.msra.mxu1 %v21249_v35  ;;  %4811 = vmatpush1.bf16.msra.mxu0 %v21252_v17  ;;  %v21322_v35 = vld [vmem:[%s26970_s4 + $0x70c] ss:$20 sps:$4 sm:$0xff]  }
 0x3e0   : > { %4584 = vmatprep.subr.bf16.mxu1 %v21257_v58  ;;  %4812 = vmatprep.subr.bf16.mxu0 %v21260_v51  ;;  %v21323_v17 = vld [vmem:[%s26970_s4 + $0x3f8] ss:$20 sps:$4 sm:$0xff]   ;;  %v21320_v58 = vld [vmem:[%s26970_s4 + $0x708] ss:$20 sps:$4 sm:$0xff]  }
 0x3e1   : > { %v21324_v51 = vld [vmem:[%s26970_s4 + $0x2b8] ss:$20 sps:$4 sm:$0xff]  }
 0x3e2   : > { %4572 = vmatmul.mubr.bf16.gmra.mrb[48].mxu1 %v25069_v4 }
 0x3e3   : > { %4585 = vmatpush1.bf16.msra.mxu1 %v21255_v55  ;;  %4813 = vmatpush1.bf16.msra.mxu0 %v21258_v2  ;;  %v21327_v55 = vld [vmem:[%s26970_s4 + $0x734] ss:$20 sps:$4 sm:$0xff]  }
 0x3e4   : > { %4586 = vmatprep.subr.bf16.mxu1 %v21263_v43  ;;  %4814 = vmatprep.subr.bf16.mxu0 %v21266_v36  ;;  %v21328_v2 = vld [vmem:[%s26970_s4 + $0x420] ss:$20 sps:$4 sm:$0xff]   ;;  %v25384_v43 = vpack.c.bf16 %v25039_v7, %v25039_v7  ;;  %v21325_v36 = vld [vmem:[%s26970_s4 + $0x730] ss:$20 sps:$4 sm:$0xff]   ;;  %v21333_v7 = vld [vmem:[%s26970_s4 + $0x448] ss:$20 sps:$4 sm:$0xff]  }
 0x3e5   : > { %4612 = vmatprep.mubr.bf16.mxu1 %v25105_v34 }
 0x3e7   : > { %4587 = vmatpush1.bf16.msra.mxu1 %v21261_v5  ;;  %4815 = vmatpush1.bf16.msra.mxu0 %v21264_v52  ;;  %v21329_v5 = vld [vmem:[%s26970_s4 + $0x2e0] ss:$20 sps:$4 sm:$0xff]   ;;  %v21332_v52 = vld [vmem:[%s26970_s4 + $0x75c] ss:$20 sps:$4 sm:$0xff]  }
 0x3e8   : > { %4588 = vmatprep.subr.bf16.mxu1 %v21269_v38  ;;  %4835 = vmatprep.subr.bf16.mxu0 %v21272_v50  ;;  %v21330_v38 = vld [vmem:[%s26970_s4 + $0x758] ss:$20 sps:$4 sm:$0xff]   ;;  %v21334_v50 = vld [vmem:[%s26970_s4 + $0x308] ss:$20 sps:$4 sm:$0xff]  }
 0x3ea   : > { %4817 = vmatmul.mubr.bf16.vlgmr.msra.gmra.mrb[20].mxu0 %v25103_v44 }
 0x3eb   : > { %4589 = vmatpush1.bf16.msra.mxu1 %v21267_v14  ;;  %4836 = vmatpush1.bf16.msra.mxu0 %v21270_v40  ;;  %v21337_v14 = vld [vmem:[%s26970_s4 + $0x784] ss:$20 sps:$4 sm:$0xff]  }
 0x3ec   : > { %4590 = vmatprep.subr.bf16.mxu1 %v21275_v30  ;;  %4837 = vmatprep.subr.bf16.mxu0 %v21278_v6  ;;  %v21338_v40 = vld [vmem:[%s26970_s4 + $0x470] ss:$20 sps:$4 sm:$0xff]   ;;  %v21335_v30 = vld [vmem:[%s26970_s4 + $0x780] ss:$20 sps:$4 sm:$0xff]  }
 0x3ed   : > { %4826 = vmatprep.mubr.bf16.mxu0 %v25265_v54  ;;  %v21342_v6 = vld [vmem:[%s26970_s4 + $0x7ac] ss:$20 sps:$4 sm:$0xff]  }
 0x3ef   : > { %4591 = vmatpush1.bf16.msra.mxu1 %v21273_v39  ;;  %4838 = vmatpush1.bf16.msra.mxu0 %v21276_v22  ;;  %v21343_v39 = vld [vmem:[%s26970_s4 + $0x498] ss:$20 sps:$4 sm:$0xff]   ;;  %v21340_v22 = vld [vmem:[%s26970_s4 + $0x7a8] ss:$20 sps:$4 sm:$0xff]  }
 0x3f0   : > { %4592 = vmatprep.subr.bf16.mxu1 %v21281_v12  ;;  %4839 = vmatprep.subr.bf16.mxu0 %v21284_v20  ;;  %v21344_v12 = vld [vmem:[%s26970_s4 + $0x358] ss:$20 sps:$4 sm:$0xff]   ;;  %v21347_v20 = vld [vmem:[%s26970_s4 + $0x7d4] ss:$20 sps:$4 sm:$0xff]  }
 0x3f2   : > { %4827 = vmatmul.mubr.bf16.gmra.mrb[24].mxu0 %v25280_v10 }
 0x3f3   : > { %4593 = vmatpush1.bf16.msra.mxu1 %v21279_v32  ;;  %4840 = vmatpush1.bf16.msra.mxu0 %v21282_v15  ;;  %v21348_v32 = vld [vmem:[%s26970_s4 + $0x4c0] ss:$20 sps:$4 sm:$0xff]   ;;  %v21345_v15 = vld [vmem:[%s26970_s4 + $0x7d0] ss:$20 sps:$4 sm:$0xff]  }
 0x3f4   : > { %4594 = vmatprep.subr.bf16.mxu1 %v21287_v18  ;;  %4841 = vmatprep.subr.bf16.mxu0 %v21290_v57  ;;  %v21349_v18 = vld [vmem:[%s26970_s4 + $0x380] ss:$20 sps:$4 sm:$0xff]   ;;  %v21352_v57 = vld [vmem:[%s26970_s4 + $0x7fc] ss:$20 sps:$4 sm:$0xff]  }
 0x3f5   : > { %4867 = vmatprep.mubr.bf16.mxu0 %v27021_v13 }
 0x3f7   : > { %4595 = vmatpush1.bf16.msra.mxu1 %v21285_v0  ;;  %4842 = vmatpush1.bf16.msra.mxu0 %v21288_v56  ;;  %v21353_v0 = vld [vmem:[%s26970_s4 + $0x4e8] ss:$20 sps:$4 sm:$0xff]   ;;  %v21350_v56 = vld [vmem:[%s26970_s4 + $0x7f8] ss:$20 sps:$4 sm:$0xff]  }
 0x3f8   : > { %4596 = vmatprep.subr.bf16.mxu1 %v21293_v37  ;;  %4843 = vmatprep.subr.bf16.mxu0 %v21296_v62  ;;  %v21354_v37 = vld [vmem:[%s26970_s4 + $0x3a8] ss:$20 sps:$4 sm:$0xff]   ;;  %v21357_v62 = vld [vmem:[%s26970_s4 + $0x824] ss:$20 sps:$4 sm:$0xff]  }
 0x3fb   : > { %4597 = vmatpush1.bf16.msra.mxu1 %v21291_v23  ;;  %4844 = vmatpush1.bf16.msra.mxu0 %v21294_v11  ;;  %v21358_v23 = vld [vmem:[%s26970_s4 + $0x790] ss:$20 sps:$4 sm:$0xff]   ;;  %v21355_v11 = vld [vmem:[%s26970_s4 + $0x820] ss:$20 sps:$4 sm:$0xff]  }
 0x3fc   : > { %4598 = vmatprep.subr.bf16.mxu1 %v21299_v31  ;;  %4845 = vmatprep.subr.bf16.mxu0 %v21302_v41  ;;  %v21361_v31 = vld [vmem:[%s26970_s4 + $0x84c] ss:$20 sps:$4 sm:$0xff]  }
 0x3fd   : > { %v21362_v41 = vld [vmem:[%s26970_s4 + $0x7b8] ss:$20 sps:$4 sm:$0xff]  }
 0x3ff   : > { %4599 = vmatpush1.bf16.msra.mxu1 %v21297_v48  ;;  %4846 = vmatpush1.bf16.msra.mxu0 %v21300_v61  ;;  %v21359_v48 = vld [vmem:[%s26970_s4 + $0x848] ss:$20 sps:$4 sm:$0xff]  }
 0x400   : > { %4600 = vmatprep.subr.bf16.mxu1 %v21305_v26  ;;  %4847 = vmatprep.subr.bf16.mxu0 %v21308_v45  ;;  %v21365_v61 = vld [vmem:[%s26970_s4 + $0x874] ss:$20 sps:$4 sm:$0xff]  }
 0x401   : > { %v21366_v26 = vld [vmem:[%s26970_s4 + $0x7e0] ss:$20 sps:$4 sm:$0xff]   ;;  %v21370_v45 = vld [vmem:[%s26970_s4 + $0x808] ss:$20 sps:$4 sm:$0xff]  }
 0x403   : > { %4601 = vmatpush1.bf16.msra.mxu1 %v21303_v21  ;;  %4848 = vmatpush1.bf16.msra.mxu0 %v21306_v3  ;;  %v21367_v21 = vld [vmem:[%s26970_s4 + $0x898] ss:$20 sps:$4 sm:$0xff]  }
 0x404   : > { %4602 = vmatprep.subr.bf16.mxu1 %v21311_v16  ;;  %4849 = vmatprep.subr.bf16.mxu0 %v21314_v24  ;;  %v21373_v3 = vld [vmem:[%s26970_s4 + $0xc] ss:$20 sps:$4 sm:$0xff]   ;;  %v21374_v16 = vld [vmem:[%s26970_s4 + $0x830] ss:$20 sps:$4 sm:$0xff]   ;;  %v21377_v24 = vld [vmem:[%s26970_s4 + $0x34] ss:$20 sps:$4 sm:$0xff]  }
 0x407   : > { %4603 = vmatpush1.bf16.msra.mxu1 %v21309_v42  ;;  %4850 = vmatpush1.bf16.msra.mxu0 %v21312_v29  ;;  %v21378_v42 = vld [vmem:[%s26970_s4 + $0x858] ss:$20 sps:$4 sm:$0xff]   ;;  %v21375_v29 = vld [vmem:[%s26970_s4 + $0x30] ss:$20 sps:$4 sm:$0xff]  }
 0x408   : > { %4604 = vmatprep.subr.bf16.mxu1 %v21317_v28  ;;  %19947 = vmatprep.subr.bf16.mxu0 %v21318_v9  ;;  %v21381_v28 = vld [vmem:[%s26970_s4 + $0x5c] ss:$20 sps:$4 sm:$0xff]   ;;  %v21382_v9 = vld [vmem:[%s26970_s4 + $0x880] ss:$20 sps:$4 sm:$0xff]  }
 0x40a   : > { %4868 = vmatmul.mubr.bf16.vlgmr.msra.gmra.mrb[20].mxu0 %v25053_v59 }
 0x40b   : > { %4605 = vmatpush1.bf16.msra.mxu1 %v21315_v19  ;;  %19948 = vmatpush3.bf16.msra.mxu0 %v21319_v33  ;;  %v21385_v19 = vld [vmem:[%s26970_s4 + $0x84] ss:$20 sps:$4 sm:$0xff]   ;;  %v21386_v33 = vld [vmem:[%s26970_s4 + $0x8a8] ss:$20 sps:$4 sm:$0xff]  }
 0x40c   : > { %4606 = vmatprep.subr.bf16.mxu1 %v21322_v35  ;;  %19949 = vmatprep.subr.bf16.mxu0 %v21323_v17  ;;  %v21383_v35 = vld [vmem:[%s26970_s4 + $0x80] ss:$20 sps:$4 sm:$0xff]  }
 0x40d   : > { %4877 = vmatprep.mubr.bf16.mxu0 %v27021_v13  ;;  %v21389_v17 = vld [vmem:[%s26970_s4 + $0xac] ss:$20 sps:$4 sm:$0xff]  }
 0x40f   : > { %4607 = vmatpush1.bf16.msra.mxu1 %v21320_v58  ;;  %19950 = vmatpush3.bf16.msra.mxu0 %v21324_v51  ;;  %v21460_v58 = vld [vmem:[#allocation9 + $0x7ec] ss:$28 sps:$4 sm:$0xff]   ;;  %v21387_v51 = vld [vmem:[%s26970_s4 + $0xa8] ss:$20 sps:$4 sm:$0xff]  }
 0x410   : > { %4608 = vmatprep.subr.bf16.mxu1 %v21327_v55  ;;  %19951 = vmatprep.subr.bf16.mxu0 %v21328_v2  ;;  %v21392_v55 = vld [vmem:[%s26970_s4 + $0xd4] ss:$20 sps:$4 sm:$0xff]  }
 0x411   : > { %v21458_v2 = vld [vmem:[#allocation9 + $0x7e8] ss:$28 sps:$4 sm:$0xff]  }
 0x412   : > { %4878 = vmatmul.mubr.bf16.gmra.mrb[24].mxu0 %v25384_v43 }
 0x413   : > { %4609 = vmatpush1.bf16.msra.mxu1 %v21325_v36  ;;  %19952 = vmatpush3.bf16.msra.mxu0 %v21329_v5  ;;  %v21390_v36 = vld [vmem:[%s26970_s4 + $0xd0] ss:$20 sps:$4 sm:$0xff]  }
 0x414   : > { %4966 = vmatprep.mubr.bf16.mxu0 %v25031_v47  ;;  %4610 = vmatprep.subr.bf16.mxu1 %v21332_v52  ;;  %v21339_v47 = vld [vmem:[%s26970_s4 + $0x330] ss:$20 sps:$4 sm:$0xff]   ;;  %v21393_v52 = vld [vmem:[%s26970_s4 + $0xf8] ss:$20 sps:$4 sm:$0xff]  }
 0x415   : > { %19953 = vmatprep.subr.bf16.mxu0 %v21333_v7  ;;  %v21395_v5 = vld [vmem:[%s26970_s4 + $0xfc] ss:$20 sps:$4 sm:$0xff]   ;;  %v21396_v7 = vld [vmem:[%s26970_s4 + $0x120] ss:$20 sps:$4 sm:$0xff]  }
 0x417   : > { %4611 = vmatpush1.bf16.msra.mxu1 %v21330_v38  ;;  %19954 = vmatpush3.bf16.msra.mxu0 %v21334_v50  ;;  %v21401_v38 = vld [vmem:[%s26970_s4 + $0x14c] ss:$20 sps:$4 sm:$0xff]   ;;  %v21399_v50 = vld [vmem:[%s26970_s4 + $0x148] ss:$20 sps:$4 sm:$0xff]  }
 0x418   : > { %4631 = vmatprep.subr.bf16.mxu1 %v21337_v14  ;;  %19955 = vmatprep.subr.bf16.mxu0 %v21338_v40  ;;  %v21404_v14 = vld [vmem:[%s26970_s4 + $0x174] ss:$20 sps:$4 sm:$0xff]   ;;  %v21402_v40 = vld [vmem:[%s26970_s4 + $0x170] ss:$20 sps:$4 sm:$0xff]  }
 0x41a   : > { %4613 = vmatmul.mubr.bf16.vlgmr.msra.gmra.mrb[44].mxu1 %v25103_v44 }
 0x41b   : > { %4632 = vmatpush1.bf16.msra.mxu1 %v21335_v30  ;;  %19956 = vmatpush3.bf16.msra.mxu0 %v21339_v47  ;;  %v21407_v30 = vld [vmem:[%s26970_s4 + $0x19c] ss:$20 sps:$4 sm:$0xff]   ;;  %v21464_v47 = vld [vmem:[#allocation9 + $0x820] ss:$28 sps:$4 sm:$0xff]  }
 0x41c   : > { %4633 = vmatprep.subr.bf16.mxu1 %v21342_v6  ;;  %19957 = vmatprep.subr.bf16.mxu0 %v21343_v39  ;;  %v21405_v6 = vld [vmem:[%s26970_s4 + $0x198] ss:$20 sps:$4 sm:$0xff]   ;;  %v21466_v39 = vld [vmem:[#allocation9 + $0x824] ss:$28 sps:$4 sm:$0xff]  }
 0x41d   : > { %4622 = vmatprep.mubr.bf16.mxu1 %v25265_v54 }
 0x41f   : > { %4634 = vmatpush1.bf16.msra.mxu1 %v21340_v22  ;;  %19958 = vmatpush3.bf16.msra.mxu0 %v21344_v12  ;;  %v21410_v22 = vld [vmem:[%s26970_s4 + $0x1c4] ss:$20 sps:$4 sm:$0xff]   ;;  %v21472_v12 = vld [vmem:[#allocation9 + $0x85c] ss:$28 sps:$4 sm:$0xff]  }
 0x420   : > { %4635 = vmatprep.subr.bf16.mxu1 %v21347_v20  ;;  %19959 = vmatprep.subr.bf16.mxu0 %v21348_v32  ;;  %v21470_v20 = vld [vmem:[#allocation9 + $0x858] ss:$28 sps:$4 sm:$0xff]   ;;  %v21408_v32 = vld [vmem:[%s26970_s4 + $0x1c0] ss:$20 sps:$4 sm:$0xff]  }
 0x422   : > { %4623 = vmatmul.mubr.bf16.gmra.mrb[48].mxu1 %v25280_v10 }
 0x423   : > { %4636 = vmatpush1.bf16.msra.mxu1 %v21345_v15  ;;  %19960 = vmatpush3.bf16.msra.mxu0 %v21349_v18  ;;  %v21413_v15 = vld [vmem:[%s26970_s4 + $0x1ec] ss:$20 sps:$4 sm:$0xff]   ;;  %v21476_v18 = vld [vmem:[#allocation9 + $0x890] ss:$28 sps:$4 sm:$0xff]  }
 0x424   : > { %4637 = vmatprep.subr.bf16.mxu1 %v21352_v57  ;;  %19961 = vmatprep.subr.bf16.mxu0 %v21353_v0  ;;  %v21411_v57 = vld [vmem:[%s26970_s4 + $0x1e8] ss:$20 sps:$4 sm:$0xff]   ;;  %v21478_v0 = vld [vmem:[#allocation9 + $0x894] ss:$28 sps:$4 sm:$0xff]  }
 0x425   : > { %4663 = vmatprep.mubr.bf16.mxu1 %v27021_v13 }
 0x427   : > { %4638 = vmatpush1.bf16.msra.mxu1 %v21350_v56  ;;  %19962 = vmatpush3.bf16.msra.mxu0 %v21354_v37  ;;  %v21416_v56 = vld [vmem:[%s26970_s4 + $0x214] ss:$20 sps:$4 sm:$0xff]   ;;  %v21484_v37 = vld [vmem:[#allocation9 + $0x8cc] ss:$28 sps:$4 sm:$0xff]  }
 0x428   : > { %4639 = vmatprep.subr.bf16.mxu1 %v21357_v62  ;;  %20308 = vmatprep.subr.bf16.mxu0 %v21358_v23  ;;  %v21482_v62 = vld [vmem:[#allocation9 + $0x8c8] ss:$28 sps:$4 sm:$0xff]  }
 0x42a   : > { %4967 = vmatmul.mubr.bf16.vlgmr.msra.gmra.mrb[28].mxu0 %v25029_v25  ;;  %v21363_v25 = vld [vmem:[%s26970_s4 + $0x870] ss:$20 sps:$4 sm:$0xff]  }
 0x42b   : > { %4640 = vmatpush1.bf16.msra.mxu1 %v21355_v11  ;;  %4974 = vmatprep.mubr.bf16.mxu0 %v25067_v27  ;;  %v21369_v27 = vld [vmem:[%s26970_s4 + $0x89c] ss:$20 sps:$4 sm:$0xff]   ;;  %v21490_v11 = vld [vmem:[#allocation9 + $0x904] ss:$28 sps:$4 sm:$0xff]  }
 0x42c   : > { %20309 = vmatpush3.bf16.msra.mxu0 %v21358_v23  ;;  %4641 = vmatprep.subr.bf16.mxu1 %v21361_v31  ;;  %v21414_v23 = vld [vmem:[%s26970_s4 + $0x210] ss:$20 sps:$4 sm:$0xff]  }
 0x42d   : > { %20310 = vmatprep.subr.bf16.mxu0 %v21362_v41  ;;  %v21419_v31 = vld [vmem:[%s26970_s4 + $0x23c] ss:$20 sps:$4 sm:$0xff]  }
 0x42f   : > { %4642 = vmatpush1.bf16.msra.mxu1 %v21359_v48  ;;  %v21417_v48 = vld [vmem:[%s26970_s4 + $0x238] ss:$20 sps:$4 sm:$0xff]  }
 0x430   : > { %20311 = vmatpush3.bf16.msra.mxu0 %v21362_v41  ;;  %4643 = vmatprep.subr.bf16.mxu1 %v21365_v61  ;;  %v21488_v41 = vld [vmem:[#allocation9 + $0x900] ss:$28 sps:$4 sm:$0xff]  }
 0x431   : > { %20312 = vmatprep.subr.bf16.mxu0 %v21366_v26  ;;  %v21496_v61 = vld [vmem:[#allocation9 + $0x93c] ss:$28 sps:$4 sm:$0xff]  }
 0x432   : > { %4975 = vmatmul.mubr.bf16.gmra.mrb[32].mxu0 %v25069_v4  ;;  %v21371_v4 = vld [vmem:[%s26970_s4 + $0x8] ss:$20 sps:$4 sm:$0xff]  }
 0x433   : > { %4644 = vmatpush1.bf16.msra.mxu1 %v21363_v25  ;;  %20324 = vmatprep.mubr.bf16.mxu0 %v25053_v59  ;;  %v21494_v25 = vld [vmem:[#allocation9 + $0x938] ss:$28 sps:$4 sm:$0xff]  }
 0x434   : > { %20313 = vmatpush3.bf16.msra.mxu0 %v21366_v26  ;;  %4645 = vmatprep.subr.bf16.mxu1 %v21369_v27  ;;  %v21422_v26 = vld [vmem:[%s26970_s4 + $0x264] ss:$20 sps:$4 sm:$0xff]   ;;  %v21420_v27 = vld [vmem:[%s26970_s4 + $0x260] ss:$20 sps:$4 sm:$0xff]  }
 0x435   : > { %20314 = vmatprep.subr.bf16.mxu0 %v21370_v45 }
 0x437   : > { %4646 = vmatpush1.bf16.msra.mxu1 %v21367_v21  ;;  %v21423_v21 = vld [vmem:[%s26970_s4 + $0x150] ss:$20 sps:$4 sm:$0xff]  }
 0x438   : > { %20315 = vmatpush3.bf16.msra.mxu0 %v21370_v45  ;;  %4682 = vmatprep.subr.bf16.mxu1 %v21373_v3  ;;  %v21502_v45 = vld [vmem:[#allocation9 + $0x974] ss:$28 sps:$4 sm:$0xff]  }
 0x439   : > { %20316 = vmatprep.subr.bf16.mxu0 %v21374_v16  ;;  %v21500_v3 = vld [vmem:[#allocation9 + $0x970] ss:$28 sps:$4 sm:$0xff]  }
 0x43a   : > { %4664 = vmatmul.mubr.bf16.vlgmr.msra.gmra.mrb[44].mxu1 %v25053_v59  ;;  %v21379_v59 = vld [vmem:[%s26970_s4 + $0x58] ss:$20 sps:$4 sm:$0xff]  }
 0x43b   : > { %4683 = vmatpush1.bf16.msra.mxu1 %v21371_v4  ;;  %4673 = vmatprep.mubr.bf16.mxu1 %v27021_v13  ;;  %v21425_v4 = vld [vmem:[%s26970_s4 + $0x178] ss:$20 sps:$4 sm:$0xff]  }
 0x43c   : > { %20317 = vmatpush3.bf16.msra.mxu0 %v21374_v16  ;;  %4684 = vmatprep.subr.bf16.mxu1 %v21377_v24  ;;  %v21424_v16 = vld [vmem:[%s26970_s4 + $0x10] ss:$20 sps:$4 sm:$0xff]  }
 0x43d   : > { %20318 = vmatprep.subr.bf16.mxu0 %v21378_v42  ;;  %v21508_v24 = vld [vmem:[#allocation9 + $0x9ac] ss:$28 sps:$4 sm:$0xff]  }
 0x43f   : > { %4685 = vmatpush1.bf16.msra.mxu1 %v21375_v29  ;;  %v21426_v29 = vld [vmem:[%s26970_s4 + $0x38] ss:$20 sps:$4 sm:$0xff]  }
 0x440   : > { %20319 = vmatpush3.bf16.msra.mxu0 %v21378_v42  ;;  %4686 = vmatprep.subr.bf16.mxu1 %v21381_v28  ;;  %v21506_v42 = vld [vmem:[#allocation9 + $0x9a8] ss:$28 sps:$4 sm:$0xff]   ;;  %v21427_v28 = vld [vmem:[%s26970_s4 + $0x1a0] ss:$20 sps:$4 sm:$0xff]  }
 0x441   : > { %20320 = vmatprep.subr.bf16.mxu0 %v21382_v9 }
 0x442   : > { %4674 = vmatmul.mubr.bf16.gmra.mrb[48].mxu1 %v25384_v43 }
 0x443   : > { %4687 = vmatpush1.bf16.msra.mxu1 %v21379_v59  ;;  %4714 = vmatprep.mubr.bf16.mxu1 %v24995_v60  ;;  %v21429_v59 = vld [vmem:[%s26970_s4 + $0x1c8] ss:$20 sps:$4 sm:$0xff]  }
 0x444   : > { %20321 = vmatpush3.bf16.msra.mxu0 %v21382_v9  ;;  %4688 = vmatprep.subr.bf16.mxu1 %v21385_v19  ;;  %v21428_v9 = vld [vmem:[%s26970_s4 + $0x60] ss:$20 sps:$4 sm:$0xff]  }
 0x445   : > { %20322 = vmatprep.subr.bf16.mxu0 %v21386_v33  ;;  %v21512_v19 = vld [vmem:[#allocation9 + $0x9e0] ss:$28 sps:$4 sm:$0xff]  }
 0x447   : > { %4689 = vmatpush1.bf16.msra.mxu1 %v21383_v35  ;;  %v21520_v35 = vld [vmem:[#allocation9 + $0xa1c] ss:$28 sps:$4 sm:$0xff]  }
 0x448   : > { %20323 = vmatpush3.bf16.msra.mxu0 %v21386_v33  ;;  %4690 = vmatprep.subr.bf16.mxu1 %v21389_v17  ;;  %v21514_v33 = vld [vmem:[#allocation9 + $0x9e4] ss:$28 sps:$4 sm:$0xff]  }
 0x449   : > { %7133 = vmatprep.subr.bf16.mxu0 %v21460_v58  ;;  %v21430_v17 = vld [vmem:[%s26970_s4 + $0x88] ss:$20 sps:$4 sm:$0xff]   ;;  %v21431_v58 = vld [vmem:[%s26970_s4 + $0x1f0] ss:$20 sps:$4 sm:$0xff]  }
 0x44b   : > { %20325 = vmatmul.mubr.bf16.vlgmr.msra.gmra.mrb[36].mxu0 %v25384_v43  ;;  %4691 = vmatpush1.bf16.msra.mxu1 %v21387_v51  ;;  %v21398_v43 = vld [vmem:[%s26970_s4 + $0x124] ss:$20 sps:$4 sm:$0xff]  }
 0x44c   : > { %4692 = vmatprep.subr.bf16.mxu1 %v21392_v55  ;;  %7134 = vmatpush1.bf16.msra.mxu0 %v21458_v2  ;;  %v21518_v51 = vld [vmem:[#allocation9 + $0xa18] ss:$28 sps:$4 sm:$0xff]   ;;  %v21432_v55 = vld [vmem:[%s26970_s4 + $0xb0] ss:$20 sps:$4 sm:$0xff]  }
 0x44d   : > { %7135 = vmatprep.subr.bf16.mxu0 %v21466_v39  ;;  %v21524_v2 = vld [vmem:[#allocation9 + $0xa50] ss:$28 sps:$4 sm:$0xff]   ;;  %v21542_v39 = vld [vmem:[#allocation9 + $0xaf8] ss:$28 sps:$4 sm:$0xff]  }
 0x44f   : > { %4693 = vmatpush1.bf16.msra.mxu1 %v21390_v36  ;;  %v21526_v36 = vld [vmem:[#allocation9 + $0xa54] ss:$28 sps:$4 sm:$0xff]  }
 0x450   : > { %4694 = vmatprep.subr.bf16.mxu1 %v21395_v5  ;;  %7136 = vmatpush1.bf16.msra.mxu0 %v21464_v47  ;;  %v21532_v5 = vld [vmem:[#allocation9 + $0xa8c] ss:$28 sps:$4 sm:$0xff]   ;;  %v21438_v47 = vld [vmem:[%s26970_s4 + $0x128] ss:$20 sps:$4 sm:$0xff]  }
 0x451   : > { %7137 = vmatprep.subr.bf16.mxu0 %v21472_v12  ;;  %v21441_v12 = vld [vmem:[%s26970_s4 + $0x678] ss:$20 sps:$4 sm:$0xff]  }
 0x453   : > { %4695 = vmatpush1.bf16.msra.mxu1 %v21393_v52  ;;  %v21434_v52 = vld [vmem:[%s26970_s4 + $0xd8] ss:$20 sps:$4 sm:$0xff]  }
 0x454   : > { %4696 = vmatprep.subr.bf16.mxu1 %v21398_v43  ;;  %7138 = vmatpush1.bf16.msra.mxu0 %v21470_v20  ;;  %v21435_v43 = vld [vmem:[%s26970_s4 + $0x240] ss:$20 sps:$4 sm:$0xff]   ;;  %v21442_v20 = vld [vmem:[%s26970_s4 + $0x538] ss:$20 sps:$4 sm:$0xff]  }
 0x455   : > { %7139 = vmatprep.subr.bf16.mxu0 %v21478_v0  ;;  %v21446_v0 = vld [vmem:[%s26970_s4 + $0x588] ss:$20 sps:$4 sm:$0xff]  }
 0x457   : > { %4697 = vmatpush1.bf16.msra.mxu1 %v21396_v7  ;;  %v21530_v7 = vld [vmem:[#allocation9 + $0xa88] ss:$28 sps:$4 sm:$0xff]  }
 0x458   : > { %4698 = vmatprep.subr.bf16.mxu1 %v21401_v38  ;;  %7140 = vmatpush1.bf16.msra.mxu0 %v21476_v18  ;;  %v21436_v38 = vld [vmem:[%s26970_s4 + $0x100] ss:$20 sps:$4 sm:$0xff]  }
 0x459   : > { %7141 = vmatprep.subr.bf16.mxu0 %v21484_v37  ;;  %v21550_v18 = vld [vmem:[#allocation9 + $0xb34] ss:$28 sps:$4 sm:$0xff]   ;;  %v21448_v37 = vld [vmem:[%s26970_s4 + $0x5b0] ss:$20 sps:$4 sm:$0xff]  }
 0x45b   : > { %4699 = vmatpush1.bf16.msra.mxu1 %v21399_v50  ;;  %v21538_v50 = vld [vmem:[#allocation9 + $0xac4] ss:$28 sps:$4 sm:$0xff]  }
 0x45c   : > { %4700 = vmatprep.subr.bf16.mxu1 %v21404_v14  ;;  %7142 = vmatpush1.bf16.msra.mxu0 %v21482_v62  ;;  %v21437_v14 = vld [vmem:[%s26970_s4 + $0x268] ss:$20 sps:$4 sm:$0xff]   ;;  %v21451_v62 = vld [vmem:[%s26970_s4 + $0x740] ss:$20 sps:$4 sm:$0xff]  }
 0x45d   : > { %7143 = vmatprep.subr.bf16.mxu0 %v21490_v11  ;;  %v21453_v11 = vld [vmem:[%s26970_s4 + $0x768] ss:$20 sps:$4 sm:$0xff]  }
 0x45f   : > { %4701 = vmatpush1.bf16.msra.mxu1 %v21402_v40  ;;  %v21536_v40 = vld [vmem:[#allocation9 + $0xac0] ss:$28 sps:$4 sm:$0xff]  }
 0x460   : > { %4702 = vmatprep.subr.bf16.mxu1 %v21407_v30  ;;  %7144 = vmatpush1.bf16.msra.mxu0 %v21488_v41  ;;  %v21544_v30 = vld [vmem:[#allocation9 + $0xafc] ss:$28 sps:$4 sm:$0xff]   ;;  %v21457_v41 = vld [vmem:[#allocation9 + $0x7e4] ss:$28 sps:$4 sm:$0xff]  }
 0x461   : > { %7145 = vmatprep.subr.bf16.mxu0 %v21496_v61  ;;  %v21463_v61 = vld [vmem:[#allocation9 + $0x81c] ss:$28 sps:$4 sm:$0xff]  }
 0x463   : > { %4703 = vmatpush1.bf16.msra.mxu1 %v21405_v6  ;;  %v21439_v6 = vld [vmem:[%s26970_s4 + $0x650] ss:$20 sps:$4 sm:$0xff]  }
 0x464   : > { %4704 = vmatprep.subr.bf16.mxu1 %v21410_v22  ;;  %7146 = vmatpush1.bf16.msra.mxu0 %v21494_v25  ;;  %v21440_v22 = vld [vmem:[%s26970_s4 + $0x510] ss:$20 sps:$4 sm:$0xff]   ;;  %v21469_v25 = vld [vmem:[#allocation9 + $0x854] ss:$28 sps:$4 sm:$0xff]  }
 0x465   : > { %7147 = vmatprep.subr.bf16.mxu0 %v21502_v45  ;;  %v21475_v45 = vld [vmem:[#allocation9 + $0x88c] ss:$28 sps:$4 sm:$0xff]  }
 0x467   : > { %4705 = vmatpush1.bf16.msra.mxu1 %v21408_v32  ;;  %v21548_v32 = vld [vmem:[#allocation9 + $0xb30] ss:$28 sps:$4 sm:$0xff]  }
 0x468   : > { %4706 = vmatprep.subr.bf16.mxu1 %v21413_v15  ;;  %7148 = vmatpush1.bf16.msra.mxu0 %v21500_v3  ;;  %v21443_v15 = vld [vmem:[%s26970_s4 + $0x6a0] ss:$20 sps:$4 sm:$0xff]   ;;  %v21481_v3 = vld [vmem:[#allocation9 + $0x8c4] ss:$28 sps:$4 sm:$0xff]  }
 0x469   : > { %7149 = vmatprep.subr.bf16.mxu0 %v21508_v24  ;;  %v21491_v24 = vld [vmem:[#allocation9 + $0x930] ss:$28 sps:$4 sm:$0xff]  }
 0x46b   : > { %4707 = vmatpush1.bf16.msra.mxu1 %v21411_v57  ;;  %v21556_v57 = vld [vmem:[#allocation9 + $0xb6c] ss:$28 sps:$4 sm:$0xff]  }
 0x46c   : > { %4708 = vmatprep.subr.bf16.mxu1 %v21416_v56  ;;  %7150 = vmatpush1.bf16.msra.mxu0 %v21506_v42  ;;  %v21447_v56 = vld [vmem:[%s26970_s4 + $0x6f0] ss:$20 sps:$4 sm:$0xff]  }
 0x46d   : > { %7151 = vmatprep.subr.bf16.mxu0 %v21514_v33  ;;  %v21499_v42 = vld [vmem:[#allocation9 + $0x96c] ss:$28 sps:$4 sm:$0xff]  }
 0x46f   : > { %4709 = vmatpush1.bf16.msra.mxu1 %v21414_v23  ;;  %v21452_v23 = vld [vmem:[%s26970_s4 + $0x600] ss:$20 sps:$4 sm:$0xff]  }
 0x470   : > { %4710 = vmatprep.subr.bf16.mxu1 %v21419_v31  ;;  %7152 = vmatpush1.bf16.msra.mxu0 %v21512_v19  ;;  %v21454_v31 = vld [vmem:[%s26970_s4 + $0x628] ss:$20 sps:$4 sm:$0xff]   ;;  %v21517_v19 = vld [vmem:[#allocation9 + $0xa14] ss:$28 sps:$4 sm:$0xff]  }
 0x471   : > { %7153 = vmatprep.subr.bf16.mxu0 %v21520_v35 }
 0x473   : > { %4711 = vmatpush1.bf16.msra.mxu1 %v21417_v48  ;;  %v21455_v48 = vld [vmem:[#allocation9 + $0x7e0] ss:$28 sps:$4 sm:$0xff]  }
 0x474   : > { %4712 = vmatprep.subr.bf16.mxu1 %v21422_v26  ;;  %7154 = vmatpush1.bf16.msra.mxu0 %v21518_v51  ;;  %v21461_v26 = vld [vmem:[#allocation9 + $0x818] ss:$28 sps:$4 sm:$0xff]  }
 0x475   : > { %7155 = vmatprep.subr.bf16.mxu0 %v21526_v36 }
 0x477   : > { %4713 = vmatpush1.bf16.msra.mxu1 %v21420_v27  ;;  %v21467_v27 = vld [vmem:[#allocation9 + $0x850] ss:$28 sps:$4 sm:$0xff]  }
 0x478   : > { %19919 = vmatprep.subr.bf16.mxu1 %v21423_v21  ;;  %7156 = vmatpush1.bf16.msra.mxu0 %v21524_v2  ;;  %v21473_v21 = vld [vmem:[#allocation9 + $0x888] ss:$28 sps:$4 sm:$0xff]  }
 0x479   : > { %7157 = vmatprep.subr.bf16.mxu0 %v21532_v5  ;;  %v21529_v2 = vld [vmem:[#allocation9 + $0xa84] ss:$28 sps:$4 sm:$0xff]  }
 0x47a   : > { %4715 = vmatmul.mubr.bf16.vlgmr.msra.gmra.mrb[52].mxu1 %v24993_v63 }
 0x47b   : > { %4724 = vmatprep.mubr.bf16.mxu1 %v25008_v53  ;;  %19920 = vmatpush3.bf16.msra.mxu1 %v21424_v16  ;;  %v21479_v16 = vld [vmem:[#allocation9 + $0x8c0] ss:$28 sps:$4 sm:$0xff]  }
 0x47c   : > { %19921 = vmatprep.subr.bf16.mxu1 %v21425_v4  ;;  %7158 = vmatpush1.bf16.msra.mxu0 %v21530_v7  ;;  %v21493_v4 = vld [vmem:[#allocation9 + $0x934] ss:$28 sps:$4 sm:$0xff]  }
 0x47d   : > { %7159 = vmatprep.subr.bf16.mxu0 %v21538_v50  ;;  %v21533_v50 = vld [vmem:[#allocation9 + $0xab8] ss:$28 sps:$4 sm:$0xff]  }
 0x47f   : > { %19922 = vmatpush3.bf16.msra.mxu1 %v21426_v29  ;;  %v21497_v29 = vld [vmem:[#allocation9 + $0x968] ss:$28 sps:$4 sm:$0xff]  }
 0x480   : > { %19923 = vmatprep.subr.bf16.mxu1 %v21427_v28  ;;  %7160 = vmatpush1.bf16.msra.mxu0 %v21536_v40  ;;  %v21503_v28 = vld [vmem:[#allocation9 + $0x9a0] ss:$28 sps:$4 sm:$0xff]   ;;  %v21539_v40 = vld [vmem:[#allocation9 + $0xaf0] ss:$28 sps:$4 sm:$0xff]  }
 0x481   : > { %7161 = vmatprep.subr.bf16.mxu0 %v21544_v30  ;;  %v21547_v30 = vld [vmem:[#allocation9 + $0xb2c] ss:$28 sps:$4 sm:$0xff]  }
 0x482   : > { %4725 = vmatmul.mubr.bf16.gmra.mrb[56].mxu1 %v25010_v8 }
 0x483   : > { %19924 = vmatpush3.bf16.msra.mxu1 %v21428_v9  ;;  %4918 = vmatprep.mubr.bf16.mxu1 %v24995_v60  ;;  %v21433_v60 = vld [vmem:[%s26970_s4 + $0x218] ss:$20 sps:$4 sm:$0xff]   ;;  %v21511_v9 = vld [vmem:[#allocation9 + $0x9dc] ss:$28 sps:$4 sm:$0xff]  }
 0x484   : > { %19925 = vmatprep.subr.bf16.mxu1 %v21429_v59  ;;  %7162 = vmatpush1.bf16.msra.mxu0 %v21542_v39  ;;  %v21509_v59 = vld [vmem:[#allocation9 + $0x9d8] ss:$28 sps:$4 sm:$0xff]  }
 0x485   : > { %7163 = vmatprep.subr.bf16.mxu0 %v21550_v18 }
 0x487   : > { %19926 = vmatpush3.bf16.msra.mxu1 %v21430_v17 }
 0x488   : > { %19927 = vmatprep.subr.bf16.mxu1 %v21431_v58  ;;  %7164 = vmatpush1.bf16.msra.mxu0 %v21548_v32  ;;  %v21515_v58 = vld [vmem:[#allocation9 + $0xa10] ss:$28 sps:$4 sm:$0xff]  }
 0x489   : > { %7176 = vmatprep.subr.bf16.mxu0 %v21556_v57 }
 0x48b   : > { %19928 = vmatpush3.bf16.msra.mxu1 %v21432_v55  ;;  %v21523_v55 = vld [vmem:[#allocation9 + $0xa4c] ss:$28 sps:$4 sm:$0xff]  }
 0x48c   : > { %19929 = vmatprep.subr.bf16.mxu1 %v21433_v60  ;;  %v21521_v60 = vld [vmem:[#allocation9 + $0xa48] ss:$28 sps:$4 sm:$0xff]  }
 0x48f   : > { %19930 = vmatpush3.bf16.msra.mxu1 %v21434_v52 }
 0x490   : > { %19931 = vmatprep.subr.bf16.mxu1 %v21435_v43  ;;  %v21527_v43 = vld [vmem:[#allocation9 + $0xa80] ss:$28 sps:$4 sm:$0xff]  }
 0x493   : > { %19932 = vmatpush3.bf16.msra.mxu1 %v21436_v38  ;;  %v21535_v38 = vld [vmem:[#allocation9 + $0xabc] ss:$28 sps:$4 sm:$0xff]  }
 0x494   : > { %19933 = vmatprep.subr.bf16.mxu1 %v21437_v14  ;;  %v21541_v14 = vld [vmem:[#allocation9 + $0xaf4] ss:$28 sps:$4 sm:$0xff]  }
 0x497   : > { %19934 = vmatpush3.bf16.msra.mxu1 %v21438_v47  ;;  %v21545_v47 = vld [vmem:[#allocation9 + $0xb28] ss:$28 sps:$4 sm:$0xff]  }
 0x498   : > { %19975 = vmatprep.subr.bf16.mxu1 %v21439_v6  ;;  %v21553_v6 = vld [vmem:[#allocation9 + $0xb64] ss:$28 sps:$4 sm:$0xff]  }
 0x49a   : > { %4919 = vmatmul.mubr.bf16.vlgmr.msra.gmra.mrb[60].mxu1 %v24993_v63  ;;  %v21444_v63 = vld [vmem:[%s26970_s4 + $0x560] ss:$20 sps:$4 sm:$0xff]  }
 0x49b   : > { %4926 = vmatprep.mubr.bf16.mxu1 %v25008_v53  ;;  %19976 = vmatpush3.bf16.msra.mxu1 %v21440_v22  ;;  %v21445_v53 = vld [vmem:[%s26970_s4 + $0x6c8] ss:$20 sps:$4 sm:$0xff]  }
 0x49c   : > { %19977 = vmatprep.subr.bf16.mxu1 %v21441_v12 }
 0x49f   : > { %19978 = vmatpush3.bf16.msra.mxu1 %v21442_v20 }
 0x4a0   : > { %19979 = vmatprep.subr.bf16.mxu1 %v21443_v15 }
 0x4a2   : > { %4927 = vmatmul.mubr.bf16.gmra.mrb[64].mxu1 %v25010_v8  ;;  %v21449_v8 = vld [vmem:[%s26970_s4 + $0x718] ss:$20 sps:$4 sm:$0xff]  }
 0x4a3   : > { %19980 = vmatpush3.bf16.msra.mxu1 %v21444_v63  ;;  %5014 = vmatprep.mubr.bf16.mxu1 %v25105_v34  ;;  %v21450_v34 = vld [vmem:[%s26970_s4 + $0x5d8] ss:$20 sps:$4 sm:$0xff]  }
 0x4a4   : > { %19981 = vmatprep.subr.bf16.mxu1 %v21445_v53 }
 0x4a7   : > { %19982 = vmatpush3.bf16.msra.mxu1 %v21446_v0 }
 0x4a8   : > { %19983 = vmatprep.subr.bf16.mxu1 %v21447_v56 }
 0x4ab   : > { %19984 = vmatpush3.bf16.msra.mxu1 %v21448_v37 }
 0x4ac   : > { %19985 = vmatprep.subr.bf16.mxu1 %v21449_v8 }
 0x4af   : > { %19986 = vmatpush3.bf16.msra.mxu1 %v21450_v34 }
 0x4b0   : > { %19987 = vmatprep.subr.bf16.mxu1 %v21451_v62 }
 0x4b3   : > { %19988 = vmatpush3.bf16.msra.mxu1 %v21452_v23 }
 0x4b4   : > { %19989 = vmatprep.subr.bf16.mxu1 %v21453_v11 }
 0x4b7   : > { %19990 = vmatpush3.bf16.msra.mxu1 %v21454_v31 }
 0x4b8   : > { %7004 = vmatprep.subr.bf16.mxu1 %v21457_v41 }
 0x4ba   : > { %5015 = vmatmul.mubr.bf16.vlgmr.msra.gmra.mrb[68].mxu1 %v25103_v44  ;;  %v21487_v44 = vld [vmem:[#allocation9 + $0x8fc] ss:$28 sps:$4 sm:$0xff]  }
 0x4bb   : > { %5022 = vmatprep.mubr.bf16.mxu1 %v25265_v54  ;;  %7005 = vmatpush1.bf16.msra.mxu1 %v21455_v48  ;;  %v21485_v54 = vld [vmem:[#allocation9 + $0x8f8] ss:$28 sps:$4 sm:$0xff]  }
 0x4bc   : > { %7006 = vmatprep.subr.bf16.mxu1 %v21463_v61 }
 0x4bf   : > { %7007 = vmatpush1.bf16.msra.mxu1 %v21461_v26 }
 0x4c0   : > { %7008 = vmatprep.subr.bf16.mxu1 %v21469_v25 }
 0x4c2   : > { %5023 = vmatmul.mubr.bf16.gmra.mrb[72].mxu1 %v25280_v10  ;;  %v21505_v10 = vld [vmem:[#allocation9 + $0x9a4] ss:$28 sps:$4 sm:$0xff]  }
 0x4c3   : > { %7009 = vmatpush1.bf16.msra.mxu1 %v21467_v27 }
 0x4c4   : > { %7010 = vmatprep.subr.bf16.mxu1 %v21475_v45 }
 0x4c7   : > { %7011 = vmatpush1.bf16.msra.mxu1 %v21473_v21 }
 0x4c8   : > { %7012 = vmatprep.subr.bf16.mxu1 %v21481_v3 }
 0x4cb   : > { %7013 = vmatpush1.bf16.msra.mxu1 %v21479_v16 }
 0x4cc   : > { %7014 = vmatprep.subr.bf16.mxu1 %v21487_v44 }
 0x4cf   : > { %7015 = vmatpush1.bf16.msra.mxu1 %v21485_v54 }
 0x4d0   : > { %7016 = vmatprep.subr.bf16.mxu1 %v21493_v4 }
 0x4d3   : > { %7017 = vmatpush1.bf16.msra.mxu1 %v21491_v24 }
 0x4d4   : > { %7018 = vmatprep.subr.bf16.mxu1 %v21499_v42  ;;  %v21551_v42 = vld [vmem:[#allocation9 + $0xb60] ss:$28 sps:$4 sm:$0xff]  }
 0x4d7   : > { %7019 = vmatpush1.bf16.msra.mxu1 %v21497_v29  ;;  %v21554_v29 = vld [vmem:[#allocation9 + $0xb68] ss:$28 sps:$4 sm:$0xff]  }
 0x4d8   : > { %7020 = vmatprep.subr.bf16.mxu1 %v21505_v10 }
 0x4db   : > { %7021 = vmatpush1.bf16.msra.mxu1 %v21503_v28 }
 0x4dc   : > { %7022 = vmatprep.subr.bf16.mxu1 %v21511_v9 }
 0x4dd   : > { %v25718_v33 = vpop.f32.mrb[20].mxu0 }
 0x4de   : > { %v25720_v35 = vpop.f32.mrb[21].mxu0 }
 0x4df   : > { %v25722_v17 = vpop.f32.mrb[22].mxu0  ;;  %7023 = vmatpush1.bf16.msra.mxu1 %v21509_v59 }
 0x4e0   : > { %v25724_v51 = vpop.f32.mrb[23].mxu0  ;;  %7024 = vmatprep.subr.bf16.mxu1 %v21517_v19  ;;  %v21559_v19 = vld [vmem:[#allocation9 + $0xb9c] ss:$28 sps:$4 sm:$0xff]  }
 0x4e3   : > { %7025 = vmatpush1.bf16.msra.mxu1 %v21515_v58  ;;  %v21562_v58 = vld [vmem:[#allocation9 + $0xba4] ss:$28 sps:$4 sm:$0xff]  }
 0x4e4   : > { %7026 = vmatprep.subr.bf16.mxu1 %v21523_v55 }
 0x4e5   : > { %v25726_v36 = vpop.f32.mrb[24].mxu0 }
 0x4e6   : > { %v25728_v5 = vpop.f32.mrb[25].mxu0 }
 0x4e7   : > { %v4883_v52 = vpop.f32.mrb[26].mxu0  ;;  %7027 = vmatpush1.bf16.msra.mxu1 %v21521_v60 }
 0x4e8   : > { %v4884_v7 = vpop.f32.mrb[27].mxu0  ;;  %7028 = vmatprep.subr.bf16.mxu1 %v21529_v2 }
 0x4e9   : > { %v21560_v7 = vld [vmem:[#allocation9 + $0xba0] ss:$28 sps:$4 sm:$0xff]  }
 0x4eb   : > { %7029 = vmatpush1.bf16.msra.mxu1 %v21527_v43  ;;  %v21557_v43 = vld [vmem:[#allocation9 + $0xb98] ss:$28 sps:$4 sm:$0xff]  }
 0x4ec   : > { %7030 = vmatprep.subr.bf16.mxu1 %v21535_v38  ;;  %v21565_v38 = vld [vmem:[#allocation9 + $0xbd4] ss:$28 sps:$4 sm:$0xff]  }
 0x4ef   : > { %7031 = vmatpush1.bf16.msra.mxu1 %v21533_v50  ;;  %v21568_v50 = vld [vmem:[#allocation9 + $0xbdc] ss:$28 sps:$4 sm:$0xff]  }
 0x4f0   : > { %7032 = vmatprep.subr.bf16.mxu1 %v21541_v14 }
 0x4f3   : > { %7033 = vmatpush1.bf16.msra.mxu1 %v21539_v40 }
 0x4f4   : > { %7034 = vmatprep.subr.bf16.mxu1 %v21547_v30 }
 0x4f7   : > { %7035 = vmatpush1.bf16.msra.mxu1 %v21545_v47 }
 0x4f8   : > { %7047 = vmatprep.subr.bf16.mxu1 %v21553_v6  ;;  %v21563_v6 = vld [vmem:[#allocation9 + $0xbd0] ss:$28 sps:$4 sm:$0xff]  }
 0x4fd   : > { %v19963_v39 = vpop.f32.mrb[28].mxu0 }
 0x4fe   : > { %v19964_v22 = vpop.f32.mrb[29].mxu0 }
 0x4ff   : > { %v25730_v12 = vadd.f32 %v19964_v22, %v19963_v39  ;;  %v19966_v20 = vpop.f32.mrb[30].mxu0  ;;  %v21566_v39 = vld [vmem:[#allocation9 + $0xbd8] ss:$28 sps:$4 sm:$0xff]  }
 0x500   : > { %v19967_v32 = vpop.f32.mrb[31].mxu0 }
 0x501   : > { %v25732_v15 = vadd.f32 %v19967_v32, %v19966_v20  ;;  %v21571_v20 = vld [vmem:[#allocation9 + $0xc0c] ss:$28 sps:$4 sm:$0xff]   ;;  %v21574_v32 = vld [vmem:[#allocation9 + $0xc14] ss:$28 sps:$4 sm:$0xff]  }
 0x505   : > { %v19969_v18 = vpop.f32.mrb[32].mxu0 }
 0x506   : > { %v19970_v57 = vpop.f32.mrb[33].mxu0 }
 0x507   : > { %v25734_v63 = vadd.f32 %v19970_v57, %v19969_v18  ;;  %v19972_v53 = vpop.f32.mrb[34].mxu0  ;;  %v21569_v57 = vld [vmem:[#allocation9 + $0xc08] ss:$28 sps:$4 sm:$0xff]  }
 0x508   : > { %v19973_v0 = vpop.f32.mrb[35].mxu0  ;;  %v21572_v53 = vld [vmem:[#allocation9 + $0xc10] ss:$28 sps:$4 sm:$0xff]  }
 0x509   : > { %v21577_v0 = vld [vmem:[#allocation9 + $0xc44] ss:$28 sps:$4 sm:$0xff]  }
 0x50d   : > { %v4665_v56 = vpop.f32.mrb[44].mxu1 }
 0x50e   : > { %v4667_v37 = vpop.f32.mrb[45].mxu1 }
 0x50f   : > { %v4669_v8 = vpop.f32.mrb[46].mxu1 }
 0x510   : > { %v25736_v34 = vpack.c.bf16 %v4669_v8, %v4665_v56  ;;  %v4671_v62 = vpop.f32.mrb[47].mxu1  ;;  %v21580_v56 = vld [vmem:[#allocation9 + $0xc4c] ss:$28 sps:$4 sm:$0xff]  }
 0x511   : > { %v25738_v23 = vpack.c.bf16 %v4671_v62, %v4667_v37  ;;  %v21575_v37 = vld [vmem:[#allocation9 + $0xc40] ss:$28 sps:$4 sm:$0xff]   ;;  %v21578_v8 = vld [vmem:[#allocation9 + $0xc48] ss:$28 sps:$4 sm:$0xff]  }
 0x512   : > { %v5666_v11 = vshrl.u32 %v25736_v34, 16  ;;  %v5668_v31 = vshll.u32 %v25736_v34, 16  ;;  %v21583_v62 = vld [vmem:[#allocation9 + $0xc7c] ss:$28 sps:$4 sm:$0xff]  }
 0x513   : > { %v5673_v41 = vshrl.u32 %v25738_v23, 16  ;;  %v5675_v48 = vshll.u32 %v25738_v23, 16 }
 0x514   : > { %v5670_v61 = vrot.slane %v5668_v31, 1  ;;  %v11737_v21 = vrot.slane %v5666_v11, 1  ;;  %v11738_v44 = vrot.slane %v5668_v31, 2  ;;  %v21581_v31 = vld [vmem:[#allocation9 + $0xc78] ss:$28 sps:$4 sm:$0xff]  }
 0x515   : > { %v4675_v26 = vpop.f32.mrb[48].mxu1  ;;  %v5677_v25 = vrot.slane %v5675_v48, 1  ;;  %v11745_v27 = vrot.slane %v5673_v41, 1  ;;  %v11746_v45 = vrot.slane %v5675_v48, 2  ;;  %v21589_v48 = vld [vmem:[#allocation9 + $0xcb4] ss:$28 sps:$4 sm:$0xff]  }
 0x516   : > { %v25744_v3 = vpack.c.bf16 %v4675_v26, %v4675_v26  ;;  %v4677_v16 = vpop.f32.mrb[49].mxu1  ;;  %v25751_v59 = vor.u32 %v5670_v61, %v5666_v11  ;;  %v11739_v55 = vor.u32 %v11738_v44, %v11737_v21  ;;  %v21586_v11 = vld [vmem:[#allocation9 + $0xc84] ss:$28 sps:$4 sm:$0xff]   ;;  %v21592_v61 = vld [vmem:[#allocation9 + $0xcbc] ss:$28 sps:$4 sm:$0xff]  }
 0x517   : > { %v25746_v54 = vpack.c.bf16 %v4677_v16, %v4677_v16  ;;  %v4679_v4 = vpop.f32.mrb[50].mxu1  ;;  %v25748_v24 = vor.u32 %v5677_v25, %v5673_v41  ;;  %v11747_v10 = vor.u32 %v11746_v45, %v11745_v27  ;;  %v21584_v41 = vld [vmem:[#allocation9 + $0xc80] ss:$28 sps:$4 sm:$0xff]   ;;  %v21587_v26 = vld [vmem:[#allocation9 + $0xcb0] ss:$28 sps:$4 sm:$0xff]  }
 0x518   : > { %v11741_v28 = vshll.u32 %v25744_v3, 16  ;;  %v4680_v9 = vpop.f32.mrb[51].mxu1  ;;  %v21590_v25 = vld [vmem:[#allocation9 + $0xcb8] ss:$28 sps:$4 sm:$0xff]   ;;  %v21595_v27 = vld [vmem:[#allocation9 + $0xcec] ss:$28 sps:$4 sm:$0xff]  }
 0x519   : > { %v11749_v60 = vshll.u32 %v25746_v54, 16  ;;  %7036 = vmatprep.mubr.bf16.mxu1 %v25748_v24  ;;  %7165 = vmatprep.mubr.bf16.mxu0 %v25748_v24  ;;  %v21598_v45 = vld [vmem:[#allocation9 + $0xcf4] ss:$28 sps:$4 sm:$0xff]   ;;  %v21593_v21 = vld [vmem:[#allocation9 + $0xce8] ss:$28 sps:$4 sm:$0xff]  }
 0x51a   : > { %v11743_v2 = vrot.slane %v11741_v28, 2  ;;  %7037 = vmatmul.mubr.bf16.vlgmr.msra.gmra.mrb[76].mxu1 %v25751_v59  ;;  %7166 = vmatmul.mubr.bf16.vlgmr.msra.gmra.mrb[40].mxu0 %v25751_v59  ;;  %v21596_v16 = vld [vmem:[#allocation9 + $0xcf0] ss:$28 sps:$4 sm:$0xff]   ;;  %v21601_v44 = vld [vmem:[#allocation9 + $0xd24] ss:$28 sps:$4 sm:$0xff]  }
 0x51b   : > { %v11751_v52 = vrot.slane %v11749_v60, 2  ;;  %7048 = vmatpush1.bf16.msra.mxu1 %v21551_v42  ;;  %7177 = vmatpush1.bf16.msra.mxu0 %v21554_v29  ;;  %v21604_v4 = vld [vmem:[#allocation9 + $0xd2c] ss:$28 sps:$4 sm:$0xff]   ;;  %v21599_v42 = vld [vmem:[#allocation9 + $0xd20] ss:$28 sps:$4 sm:$0xff]  }
 0x51c   : > { %7049 = vmatprep.subr.bf16.mxu1 %v21559_v19  ;;  %7178 = vmatprep.subr.bf16.mxu0 %v21562_v58  ;;  %v25759_v14 = vsel %vm1415_vm1, %v11739_v55, %v11743_v2  ;;  %v21602_v29 = vld [vmem:[#allocation9 + $0xd28] ss:$28 sps:$4 sm:$0xff]   ;;  %v21605_v9 = vld [vmem:[#allocation9 + $0xd58] ss:$28 sps:$4 sm:$0xff]   ;;  %v21608_v19 = vld [vmem:[#allocation9 + $0xd60] ss:$28 sps:$4 sm:$0xff]  }
 0x51d   : > { %v25762_v40 = vsel %vm1415_vm1, %v11747_v10, %v11751_v52  ;;  %v21607_v10 = vld [vmem:[#allocation9 + $0xd5c] ss:$28 sps:$4 sm:$0xff]   ;;  %v21610_v28 = vld [vmem:[#allocation9 + $0xd64] ss:$28 sps:$4 sm:$0xff]   ;;  %v21613_v58 = vld [vmem:[#allocation9 + $0xd94] ss:$28 sps:$4 sm:$0xff]  }
 0x51e   : > { %v25764_v30 = vpop.f32.mrb[36].mxu0  ;;  %v21616_v55 = vld [vmem:[#allocation9 + $0xd9c] ss:$28 sps:$4 sm:$0xff]   ;;  %v21611_v60 = vld [vmem:[#allocation9 + $0xd90] ss:$28 sps:$4 sm:$0xff]  }
 0x51f   : > { %v25766_v47 = vpop.f32.mrb[37].mxu0  ;;  %7050 = vmatpush1.bf16.msra.mxu1 %v21557_v43  ;;  %7179 = vmatpush1.bf16.msra.mxu0 %v21560_v7  ;;  %v21614_v2 = vld [vmem:[#allocation9 + $0xd98] ss:$28 sps:$4 sm:$0xff]   ;;  %v21619_v52 = vld [vmem:[#allocation9 + $0xdcc] ss:$28 sps:$4 sm:$0xff]  }
 0x520   : > { %v20327_v22 = vpop.f32.mrb[38].mxu0  ;;  %7051 = vmatprep.subr.bf16.mxu1 %v21565_v38  ;;  %7180 = vmatprep.subr.bf16.mxu0 %v21568_v50  ;;  %v21622_v43 = vld [vmem:[#allocation9 + $0xdd4] ss:$28 sps:$4 sm:$0xff]   ;;  %v21617_v7 = vld [vmem:[#allocation9 + $0xdc8] ss:$28 sps:$4 sm:$0xff]  }
 0x521   : > { %v25768_v18 = vpop.f32.mrb[39].mxu0  ;;  %v21620_v38 = vld [vmem:[#allocation9 + $0xdd0] ss:$28 sps:$4 sm:$0xff]   ;;  %v21625_v50 = vld [vmem:[#allocation9 + $0xe04] ss:$28 sps:$4 sm:$0xff]  }
 0x522   : > { %v21626_v22 = vld [vmem:[#allocation9 + $0xe08] ss:$28 sps:$4 sm:$0xff]  }
 0x523   : > { %7052 = vmatpush1.bf16.msra.mxu1 %v21563_v6  ;;  %7181 = vmatpush1.bf16.msra.mxu0 %v21566_v39  ;;  %v21628_v6 = vld [vmem:[#allocation9 + $0xe0c] ss:$28 sps:$4 sm:$0xff]   ;;  %v21623_v39 = vld [vmem:[#allocation9 + $0xe00] ss:$28 sps:$4 sm:$0xff]  }
 0x524   : > { %7053 = vmatprep.subr.bf16.mxu1 %v21571_v20  ;;  %7182 = vmatprep.subr.bf16.mxu0 %v21574_v32  ;;  %v21631_v20 = vld [vmem:[#allocation9 + $0xe3c] ss:$28 sps:$4 sm:$0xff]   ;;  %v21634_v32 = vld [vmem:[#allocation9 + $0xe44] ss:$28 sps:$4 sm:$0xff]  }
 0x527   : > { %7054 = vmatpush1.bf16.msra.mxu1 %v21569_v57  ;;  %7183 = vmatpush1.bf16.msra.mxu0 %v21572_v53  ;;  %v21629_v57 = vld [vmem:[#allocation9 + $0xe38] ss:$28 sps:$4 sm:$0xff]   ;;  %v21632_v53 = vld [vmem:[#allocation9 + $0xe40] ss:$28 sps:$4 sm:$0xff]  }
 0x528   : > { %7055 = vmatprep.subr.bf16.mxu1 %v21577_v0  ;;  %7184 = vmatprep.subr.bf16.mxu0 %v21580_v56  ;;  %v21637_v0 = vld [vmem:[#allocation9 + $0xe74] ss:$28 sps:$4 sm:$0xff]   ;;  %v21640_v56 = vld [vmem:[#allocation9 + $0xe7c] ss:$28 sps:$4 sm:$0xff]  }
 0x52b   : > { %7056 = vmatpush1.bf16.msra.mxu1 %v21575_v37  ;;  %7185 = vmatpush1.bf16.msra.mxu0 %v21578_v8 }
 0x52c   : > { %7057 = vmatprep.subr.bf16.mxu1 %v21583_v62  ;;  %7186 = vmatprep.subr.bf16.mxu0 %v21586_v11 }
 0x52f   : > { %7058 = vmatpush1.bf16.msra.mxu1 %v21581_v31  ;;  %7187 = vmatpush1.bf16.msra.mxu0 %v21584_v41  ;;  %v21635_v41 = vld [vmem:[#allocation9 + $0xe70] ss:$28 sps:$4 sm:$0xff]  }
 0x530   : > { %7059 = vmatprep.subr.bf16.mxu1 %v21589_v48  ;;  %7188 = vmatprep.subr.bf16.mxu0 %v21592_v61  ;;  %v21638_v48 = vld [vmem:[#allocation9 + $0xe78] ss:$28 sps:$4 sm:$0xff]  }
 0x533   : > { %7060 = vmatpush1.bf16.msra.mxu1 %v21587_v26  ;;  %7189 = vmatpush1.bf16.msra.mxu0 %v21590_v25  ;;  %v21643_v25 = vld [vmem:[#allocation9 + $0xeac] ss:$28 sps:$4 sm:$0xff]  }
 0x534   : > { %7061 = vmatprep.subr.bf16.mxu1 %v21595_v27  ;;  %7190 = vmatprep.subr.bf16.mxu0 %v21598_v45  ;;  %v21646_v27 = vld [vmem:[#allocation9 + $0xeb4] ss:$28 sps:$4 sm:$0xff]  }
 0x537   : > { %7062 = vmatpush1.bf16.msra.mxu1 %v21593_v21  ;;  %7191 = vmatpush1.bf16.msra.mxu0 %v21596_v16  ;;  %v21644_v16 = vld [vmem:[#allocation9 + $0xeb0] ss:$28 sps:$4 sm:$0xff]  }
 0x538   : > { %7063 = vmatprep.subr.bf16.mxu1 %v21601_v44  ;;  %7192 = vmatprep.subr.bf16.mxu0 %v21604_v4  ;;  %v21649_v4 = vld [vmem:[#allocation9 + $0xee4] ss:$28 sps:$4 sm:$0xff]  }
 0x53b   : > { %7064 = vmatpush1.bf16.msra.mxu1 %v21599_v42  ;;  %7193 = vmatpush1.bf16.msra.mxu0 %v21602_v29  ;;  %v21652_v42 = vld [vmem:[#allocation9 + $0xeec] ss:$28 sps:$4 sm:$0xff]  }
 0x53c   : > { %7065 = vmatprep.subr.bf16.mxu1 %v21607_v10  ;;  %7194 = vmatprep.subr.bf16.mxu0 %v21610_v28 }
 0x53f   : > { %7066 = vmatpush1.bf16.msra.mxu1 %v21605_v9  ;;  %7195 = vmatpush1.bf16.msra.mxu0 %v21608_v19 }
 0x540   : > { %7067 = vmatprep.subr.bf16.mxu1 %v21613_v58  ;;  %7196 = vmatprep.subr.bf16.mxu0 %v21616_v55 }
 0x543   : > { %7068 = vmatpush1.bf16.msra.mxu1 %v21611_v60  ;;  %7197 = vmatpush1.bf16.msra.mxu0 %v21614_v2 }
 0x544   : > { %7069 = vmatprep.subr.bf16.mxu1 %v21619_v52  ;;  %7198 = vmatprep.subr.bf16.mxu0 %v21622_v43 }
 0x547   : > { %7070 = vmatpush1.bf16.msra.mxu1 %v21617_v7  ;;  %7199 = vmatpush1.bf16.msra.mxu0 %v21620_v38 }
 0x548   : > { %7071 = vmatprep.subr.bf16.mxu1 %v21625_v50  ;;  %7200 = vmatprep.subr.bf16.mxu0 %v21628_v6 }
 0x54b   : > { %7072 = vmatpush1.bf16.msra.mxu1 %v21623_v39  ;;  %7201 = vmatpush1.bf16.msra.mxu0 %v21626_v22  ;;  %v21647_v39 = vld [vmem:[#allocation9 + $0xee0] ss:$28 sps:$4 sm:$0xff]   ;;  %v21650_v22 = vld [vmem:[#allocation9 + $0xee8] ss:$28 sps:$4 sm:$0xff]  }
 0x54c   : > { %7073 = vmatprep.subr.bf16.mxu1 %v21631_v20  ;;  %7202 = vmatprep.subr.bf16.mxu0 %v21634_v32 }
 0x54d   : > { %v4716_v37 = vpop.f32.mrb[52].mxu1 }
 0x54e   : > { %v20402_v8 = vadd.f32 %v25718_v33, %v4716_v37  ;;  %v4718_v62 = vpop.f32.mrb[53].mxu1 }
 0x54f   : > { %v20403_v11 = vadd.f32 %v25720_v35, %v4718_v62  ;;  %v4720_v31 = vpop.f32.mrb[54].mxu1  ;;  %7074 = vmatpush1.bf16.msra.mxu1 %v21629_v57  ;;  %7203 = vmatpush1.bf16.msra.mxu0 %v21632_v53  ;;  %v21641_v35 = vld [vmem:[#allocation9 + $0xea8] ss:$28 sps:$4 sm:$0xff]   ;;  %v21655_v57 = vld [vmem:[#allocation9 + $0xf1c] ss:$28 sps:$4 sm:$0xff]  }
 0x550   : > { %v20404_v61 = vadd.f32 %v25722_v17, %v4720_v31  ;;  %v4722_v26 = vpop.f32.mrb[55].mxu1  ;;  %7075 = vmatprep.subr.bf16.mxu1 %v21637_v0  ;;  %7204 = vmatprep.subr.bf16.mxu0 %v21640_v56  ;;  %v21658_v53 = vld [vmem:[#allocation9 + $0xf24] ss:$28 sps:$4 sm:$0xff]   ;;  %v21653_v62 = vld [vmem:[#allocation9 + $0xf18] ss:$28 sps:$4 sm:$0xff]  }
 0x551   : > { %v20405_v45 = vadd.f32 %v25724_v51, %v4722_v26  ;;  %v21661_v31 = vld [vmem:[#allocation9 + $0xf54] ss:$28 sps:$4 sm:$0xff]  }
 0x552   : > { %v25774_v21 = vpack.c.bf16 %v20404_v61, %v20402_v8  ;;  %v21659_v26 = vld [vmem:[#allocation9 + $0xf50] ss:$28 sps:$4 sm:$0xff]  }
 0x553   : > { %v25776_v33 = vpack.c.bf16 %v20405_v45, %v20403_v11  ;;  %7076 = vmatpush1.bf16.msra.mxu1 %v21635_v41  ;;  %7205 = vmatpush1.bf16.msra.mxu0 %v21638_v48  ;;  %v21656_v11 = vld [vmem:[#allocation9 + $0xf20] ss:$28 sps:$4 sm:$0xff]   ;;  %v21670_v45 = vld [vmem:[#allocation9 + $0xf94] ss:$28 sps:$4 sm:$0xff]  }
 0x554   : > { %7077 = vmatprep.subr.bf16.mxu1 %v21643_v25  ;;  %7206 = vmatprep.subr.bf16.mxu0 %v21646_v27  ;;  %v5680_v44 = vshrl.u32 %v25774_v21, 16  ;;  %v5682_v17 = vshll.u32 %v25774_v21, 16  ;;  %v21664_v41 = vld [vmem:[#allocation9 + $0xf5c] ss:$28 sps:$4 sm:$0xff]   ;;  %v21667_v27 = vld [vmem:[#allocation9 + $0xf8c] ss:$28 sps:$4 sm:$0xff]  }
 0x555   : > { %v4726_v29 = vpop.f32.mrb[56].mxu1  ;;  %v5687_v10 = vshrl.u32 %v25776_v33, 16  ;;  %v5689_v51 = vshll.u32 %v25776_v33, 16  ;;  %v21662_v25 = vld [vmem:[#allocation9 + $0xf58] ss:$28 sps:$4 sm:$0xff]  }
 0x556   : > { %v20406_v28 = vadd.f32 %v25726_v36, %v4726_v29  ;;  %v4728_v9 = vpop.f32.mrb[57].mxu1  ;;  %v5684_v19 = vrot.slane %v5682_v17, 1  ;;  %v11753_v58 = vrot.slane %v5680_v44, 1  ;;  %v11754_v50 = vrot.slane %v5682_v17, 2  ;;  %v21674_v17 = vld [vmem:[#allocation9 + $0x9b8] ss:$28 sps:$4 sm:$0xff]  }
 0x557   : > { %v20407_v55 = vadd.f32 %v25728_v5, %v4728_v9  ;;  %v4730_v60 = vpop.f32.mrb[58].mxu1  ;;  %7078 = vmatpush1.bf16.msra.mxu1 %v21641_v35  ;;  %7207 = vmatpush1.bf16.msra.mxu0 %v21644_v16  ;;  %v5691_v2 = vrot.slane %v5689_v51, 1  ;;  %v11761_v52 = vrot.slane %v5687_v10, 1  ;;  %v11762_v43 = vrot.slane %v5689_v51, 2  ;;  %v21665_v35 = vld [vmem:[#allocation9 + $0xf88] ss:$28 sps:$4 sm:$0xff]  }
 0x558   : > { %v25784_v7 = vpack.c.bf16 %v20406_v28, %v20406_v28  ;;  %v4731_v38 = vpop.f32.mrb[59].mxu1  ;;  %7090 = vmatprep.subr.bf16.mxu1 %v21649_v4  ;;  %7219 = vmatprep.subr.bf16.mxu0 %v21652_v42  ;;  %v25791_v32 = vor.u32 %v5684_v19, %v5680_v44  ;;  %v11755_v0 = vor.u32 %v11754_v50, %v11753_v58  ;;  %v21668_v16 = vld [vmem:[#allocation9 + $0xf90] ss:$28 sps:$4 sm:$0xff]  }
 0x559   : > { %v25786_v6 = vpack.c.bf16 %v20407_v55, %v20407_v55  ;;  %v25788_v36 = vor.u32 %v5691_v2, %v5687_v10  ;;  %v11763_v20 = vor.u32 %v11762_v43, %v11761_v52  ;;  %v21673_v44 = vld [vmem:[#allocation9 + $0x7f4] ss:$28 sps:$4 sm:$0xff]  }
 0x55a   : > { %v11757_v5 = vshll.u32 %v25784_v7, 16 }
 0x55b   : > { %v11765_v56 = vshll.u32 %v25786_v6, 16  ;;  %7079 = vmatprep.mubr.bf16.mxu1 %v25788_v36  ;;  %7208 = vmatprep.mubr.bf16.mxu0 %v25788_v36 }
 0x55c   : > { %v11759_v37 = vrot.slane %v11757_v5, 2  ;;  %7080 = vmatmul.mubr.bf16.vlgmr.msra.gmra.mrb[76].mxu1 %v25791_v32  ;;  %7209 = vmatmul.mubr.bf16.vlgmr.msra.gmra.mrb[40].mxu0 %v25791_v32 }
 0x55d   : > { %v11767_v8 = vrot.slane %v11765_v56, 2  ;;  %7091 = vmatpush1.bf16.msra.mxu1 %v21647_v39  ;;  %7220 = vmatpush1.bf16.msra.mxu0 %v21650_v22 }
 0x55e   : > { %7092 = vmatprep.subr.bf16.mxu1 %v21655_v57  ;;  %7221 = vmatprep.subr.bf16.mxu0 %v21658_v53  ;;  %v25799_v48 = vsel %vm1415_vm1, %v11755_v0, %v11759_v37 }
 0x55f   : > { %7122 = vmatprep.mubr.bf16.mxu1 %v27021_v13  ;;  %7251 = vmatprep.mubr.bf16.mxu0 %v27021_v13  ;;  %v25804_v61 = vsel %vm1415_vm1, %v11763_v20, %v11767_v8 }
 0x561   : > { %7093 = vmatpush1.bf16.msra.mxu1 %v21653_v62  ;;  %7222 = vmatpush1.bf16.msra.mxu0 %v21656_v11 }
 0x562   : > { %7094 = vmatprep.subr.bf16.mxu1 %v21661_v31  ;;  %7223 = vmatprep.subr.bf16.mxu0 %v21664_v41 }
 0x565   : > { %7095 = vmatpush1.bf16.msra.mxu1 %v21659_v26  ;;  %7224 = vmatpush1.bf16.msra.mxu0 %v21662_v25 }
 0x566   : > { %7096 = vmatprep.subr.bf16.mxu1 %v21667_v27  ;;  %7225 = vmatprep.subr.bf16.mxu0 %v21670_v45  ;;  %v21671_v45 = vld [vmem:[#allocation9 + $0x7f0] ss:$28 sps:$4 sm:$0xff]  }
 0x569   : > { %7097 = vmatpush1.bf16.msra.mxu1 %v21665_v35  ;;  %7226 = vmatpush1.bf16.msra.mxu0 %v21668_v16 }
 0x56a   : > { %7262 = vmatprep.subr.bf16.mxu1 %v21673_v44  ;;  %20013 = vmatprep.subr.bf16.mxu0 %v21674_v17  ;;  %v21678_v17 = vld [vmem:[#allocation9 + $0x82c] ss:$28 sps:$4 sm:$0xff]  }
 0x56d   : > { %v19935_v4 = vpop.f32.mrb[60].mxu1 }
 0x56e   : > { %v19936_v42 = vpop.f32.mrb[61].mxu1 }
 0x56f   : > { %v19937_v29 = vadd.f32 %v19936_v42, %v19935_v4  ;;  %v19938_v10 = vpop.f32.mrb[62].mxu1  ;;  %v21679_v4 = vld [vmem:[#allocation9 + $0x9f0] ss:$28 sps:$4 sm:$0xff]  }
 0x570   : > { %v19939_v51 = vpop.f32.mrb[63].mxu1 }
 0x571   : > { %v4969_v28 = vadd.f32 %v25730_v12, %v19937_v29  ;;  %v19940_v9 = vadd.f32 %v19939_v51, %v19938_v10  ;;  %v21680_v29 = vld [vmem:[#allocation9 + $0x830] ss:$28 sps:$4 sm:$0xff]   ;;  %v21683_v51 = vld [vmem:[#allocation9 + $0x864] ss:$28 sps:$4 sm:$0xff]  }
 0x573   : > { %v4972_v19 = vadd.f32 %v25732_v15, %v19940_v9 }
 0x575   : > { %v19941_v58 = vpop.f32.mrb[64].mxu1 }
 0x576   : > { %v19942_v55 = vpop.f32.mrb[65].mxu1 }
 0x577   : > { %v19943_v60 = vadd.f32 %v19942_v55, %v19941_v58  ;;  %v19944_v2 = vpop.f32.mrb[66].mxu1  ;;  %v21685_v58 = vld [vmem:[#allocation9 + $0x868] ss:$28 sps:$4 sm:$0xff]   ;;  %v21688_v55 = vld [vmem:[#allocation9 + $0x89c] ss:$28 sps:$4 sm:$0xff]  }
 0x578   : > { %v19945_v52 = vpop.f32.mrb[67].mxu1  ;;  %v21686_v2 = vld [vmem:[#allocation9 + $0x898] ss:$28 sps:$4 sm:$0xff]  }
 0x579   : > { %v4977_v43 = vadd.f32 %v25734_v63, %v19943_v60  ;;  %v21689_v60 = vld [vmem:[#allocation9 + $0xa60] ss:$28 sps:$4 sm:$0xff]  }
 0x57a   : > { %v21690_v52 = vld [vmem:[#allocation9 + $0x8a0] ss:$28 sps:$4 sm:$0xff]  }
 0x58d   : > { %v19991_v38 = vpop.f32.mrb[68].mxu1 }
 0x58e   : > { %v19992_v50 = vpop.f32.mrb[69].mxu1 }
 0x58f   : > { %v19993_v39 = vadd.f32 %v19992_v50, %v19991_v38  ;;  %v19994_v22 = vpop.f32.mrb[70].mxu1  ;;  %v21691_v38 = vld [vmem:[#allocation9 + $0x8d0] ss:$28 sps:$4 sm:$0xff]   ;;  %v21695_v50 = vld [vmem:[#allocation9 + $0x8d8] ss:$28 sps:$4 sm:$0xff]  }
 0x590   : > { %v19995_v20 = vpop.f32.mrb[71].mxu1 }
 0x591   : > { %v5017_v5 = vadd.f32 %v19993_v39, %v4969_v28  ;;  %v19996_v57 = vadd.f32 %v19995_v20, %v19994_v22  ;;  %v21684_v28 = vld [vmem:[#allocation9 + $0xa28] ss:$28 sps:$4 sm:$0xff]   ;;  %v21699_v22 = vld [vmem:[#allocation9 + $0xad0] ss:$28 sps:$4 sm:$0xff]  }
 0x592   : > { %v21698_v39 = vld [vmem:[#allocation9 + $0x90c] ss:$28 sps:$4 sm:$0xff]  }
 0x593   : > { %v5065_v53 = vadd.f32 %v25766_v47, %v5017_v5  ;;  %v5020_v12 = vadd.f32 %v19996_v57, %v4972_v19  ;;  %v21681_v19 = vld [vmem:[#allocation9 + $0x860] ss:$28 sps:$4 sm:$0xff]   ;;  %v21696_v20 = vld [vmem:[#allocation9 + $0x908] ss:$28 sps:$4 sm:$0xff]   ;;  %v21700_v5 = vld [vmem:[#allocation9 + $0x910] ss:$28 sps:$4 sm:$0xff]  }
 0x594   : > { %v21703_v57 = vld [vmem:[#allocation9 + $0x944] ss:$28 sps:$4 sm:$0xff]  }
 0x595   : > { %v5068_v0 = vadd.f32 %v25768_v18, %v5020_v12  ;;  %v19997_v15 = vpop.f32.mrb[72].mxu1  ;;  %v21675_v18 = vld [vmem:[#allocation9 + $0x7f8] ss:$28 sps:$4 sm:$0xff]   ;;  %v21701_v12 = vld [vmem:[#allocation9 + $0x940] ss:$28 sps:$4 sm:$0xff]  }
 0x596   : > { %v19998_v56 = vpop.f32.mrb[73].mxu1 }
 0x597   : > { %v25811_v37 = vpack.c.bf16 %v5068_v0, %v5065_v53  ;;  %v19999_v8 = vadd.f32 %v19998_v56, %v19997_v15  ;;  %v20000_v62 = vpop.f32.mrb[74].mxu1  ;;  %v21704_v53 = vld [vmem:[#allocation9 + $0xb08] ss:$28 sps:$4 sm:$0xff]   ;;  %v21708_v15 = vld [vmem:[#allocation9 + $0x97c] ss:$28 sps:$4 sm:$0xff]  }
 0x598   : > { %v20001_v11 = vpop.f32.mrb[75].mxu1  ;;  %v21705_v0 = vld [vmem:[#allocation9 + $0x948] ss:$28 sps:$4 sm:$0xff]   ;;  %v21709_v56 = vld [vmem:[#allocation9 + $0xb40] ss:$28 sps:$4 sm:$0xff]  }
 0x599   : > { %v5025_v63 = vadd.f32 %v19999_v8, %v4977_v43  ;;  %v5694_v31 = vshrl.u32 %v25811_v37, 16  ;;  %v5696_v41 = vshll.u32 %v25811_v37, 16  ;;  %v21694_v43 = vld [vmem:[#allocation9 + $0xa98] ss:$28 sps:$4 sm:$0xff]   ;;  %v21710_v62 = vld [vmem:[#allocation9 + $0x980] ss:$28 sps:$4 sm:$0xff]  }
 0x59a   : > { %v21706_v8 = vld [vmem:[#allocation9 + $0x978] ss:$28 sps:$4 sm:$0xff]  }
 0x59b   : > { %v5073_v26 = vadd.f32 %v25764_v30, %v5025_v63  ;;  %v5698_v25 = vrot.slane %v5696_v41, 1  ;;  %v11769_v27 = vrot.slane %v5694_v31, 1  ;;  %v11770_v47 = vrot.slane %v5696_v41, 2  ;;  %v21676_v30 = vld [vmem:[#allocation9 + $0x828] ss:$28 sps:$4 sm:$0xff]  }
 0x59c   : > { %v21713_v11 = vld [vmem:[#allocation9 + $0x9b4] ss:$28 sps:$4 sm:$0xff]  }
 0x59d   : > { %v25816_v35 = vpack.c.bf16 %v5073_v26, %v5073_v26  ;;  %v25818_v16 = vor.u32 %v5698_v25, %v5694_v31  ;;  %v11771_v44 = vor.u32 %v11770_v47, %v11769_v27  ;;  %v21714_v63 = vld [vmem:[#allocation9 + $0xd38] ss:$28 sps:$4 sm:$0xff]   ;;  %v21711_v31 = vld [vmem:[#allocation9 + $0x9b0] ss:$28 sps:$4 sm:$0xff]   ;;  %v21716_v27 = vld [vmem:[#allocation9 + $0x9e8] ss:$28 sps:$4 sm:$0xff]  }
 0x59e   : > { %v21715_v41 = vld [vmem:[#allocation9 + $0xb78] ss:$28 sps:$4 sm:$0xff]   ;;  %v21718_v26 = vld [vmem:[#allocation9 + $0x9ec] ss:$28 sps:$4 sm:$0xff]  }
 0x59f   : > { %v11773_v42 = vshll.u32 %v25816_v35, 16  ;;  %18631 = vmatmul.mubr.msk.bf16.vlgmr.msra.gmra.mrb[76].mxu1 %vm7000_vm8, %v25818_v16  ;;  %18632 = vmatmul.mubr.msk.bf16.vlgmr.msra.gmra.mrb[40].mxu0 %vm7000_vm8, %v25818_v16  ;;  %v21719_v25 = vld [vmem:[#allocation9 + $0xd70] ss:$28 sps:$4 sm:$0xff]  }
 0x5a0   : > { %7263 = vmatpush1.bf16.msra.mxu1 %v21671_v45  ;;  %20014 = vmatpush3.bf16.msra.mxu0 %v21675_v18  ;;  %v21720_v47 = vld [vmem:[#allocation9 + $0xbb0] ss:$28 sps:$4 sm:$0xff]   ;;  %v21723_v45 = vld [vmem:[#allocation9 + $0xa24] ss:$28 sps:$4 sm:$0xff]  }
 0x5a1   : > { %v11775_v10 = vrot.slane %v11773_v42, 2  ;;  %7294 = vmatprep.mubr.bf16.mxu1 %v25748_v24  ;;  %7423 = vmatprep.mubr.bf16.mxu0 %v25748_v24  ;;  %v21693_v24 = vld [vmem:[#allocation9 + $0x8d4] ss:$28 sps:$4 sm:$0xff]   ;;  %v21724_v18 = vld [vmem:[#allocation9 + $0xda8] ss:$28 sps:$4 sm:$0xff]  }
 0x5a2   : > { %7264 = vmatprep.subr.bf16.mxu1 %v21678_v17  ;;  %20015 = vmatprep.subr.bf16.mxu0 %v21679_v4  ;;  %v21725_v17 = vld [vmem:[#allocation9 + $0xbe8] ss:$28 sps:$4 sm:$0xff]   ;;  %v21728_v4 = vld [vmem:[#allocation9 + $0xa5c] ss:$28 sps:$4 sm:$0xff]  }
 0x5a3   : > { %v25828_v9 = vsel %vm1415_vm1, %v11771_v44, %v11775_v10  ;;  %v21721_v44 = vld [vmem:[#allocation9 + $0xa20] ss:$28 sps:$4 sm:$0xff]   ;;  %v21733_v10 = vld [vmem:[#allocation9 + $0xa94] ss:$28 sps:$4 sm:$0xff]   ;;  %vm26922_vm1 = vmand %vm17818_vm13, %vm17819_vm14 }
 0x5a4   : > { %7265 = vmatpush1.bf16.msra.mxu1 %v21676_v30  ;;  %20016 = vmatpush3.bf16.msra.mxu0 %v21680_v29  ;;  %v21729_v42 = vld [vmem:[#allocation9 + $0xde0] ss:$28 sps:$4 sm:$0xff]   ;;  %v21726_v30 = vld [vmem:[#allocation9 + $0xa58] ss:$28 sps:$4 sm:$0xff]   ;;  %vm17823_vm2 = vmor %vm26913_vm15, %vm26922_vm1 }
 0x5a5   : > { %7266 = vmatprep.subr.bf16.mxu1 %v21683_v51  ;;  %20017 = vmatprep.subr.bf16.mxu0 %v21684_v28  ;;  %v21730_v29 = vld [vmem:[#allocation9 + $0xc20] ss:$28 sps:$4 sm:$0xff]   ;;  %v21734_v51 = vld [vmem:[#allocation9 + $0xe18] ss:$28 sps:$4 sm:$0xff]   ;;  %v21731_v28 = vld [vmem:[#allocation9 + $0xa90] ss:$28 sps:$4 sm:$0xff]  }
 0x5a8   : > { %7267 = vmatpush1.bf16.msra.mxu1 %v21681_v19  ;;  %20018 = vmatpush3.bf16.msra.mxu0 %v21685_v58  ;;  %v21735_v19 = vld [vmem:[#allocation9 + $0xc58] ss:$28 sps:$4 sm:$0xff]   ;;  %v21738_v58 = vld [vmem:[#allocation9 + $0xacc] ss:$28 sps:$4 sm:$0xff]  }
 0x5a9   : > { %7268 = vmatprep.subr.bf16.mxu1 %v21688_v55  ;;  %20019 = vmatprep.subr.bf16.mxu0 %v21689_v60  ;;  %v21739_v55 = vld [vmem:[#allocation9 + $0xe50] ss:$28 sps:$4 sm:$0xff]   ;;  %v21736_v60 = vld [vmem:[#allocation9 + $0xac8] ss:$28 sps:$4 sm:$0xff]  }
 0x5ac   : > { %7269 = vmatpush1.bf16.msra.mxu1 %v21686_v2  ;;  %20020 = vmatpush3.bf16.msra.mxu0 %v21690_v52  ;;  %v21740_v2 = vld [vmem:[#allocation9 + $0xc90] ss:$28 sps:$4 sm:$0xff]   ;;  %v21743_v52 = vld [vmem:[#allocation9 + $0xb04] ss:$28 sps:$4 sm:$0xff]  }
 0x5ad   : > { %7270 = vmatprep.subr.bf16.mxu1 %v21693_v24  ;;  %20021 = vmatprep.subr.bf16.mxu0 %v21694_v43  ;;  %v21744_v24 = vld [vmem:[#allocation9 + $0xe88] ss:$28 sps:$4 sm:$0xff]   ;;  %v21741_v43 = vld [vmem:[#allocation9 + $0xb00] ss:$28 sps:$4 sm:$0xff]  }
 0x5b0   : > { %7271 = vmatpush1.bf16.msra.mxu1 %v21691_v38  ;;  %20022 = vmatpush3.bf16.msra.mxu0 %v21695_v50  ;;  %v21745_v38 = vld [vmem:[#allocation9 + $0xcc8] ss:$28 sps:$4 sm:$0xff]   ;;  %v21748_v50 = vld [vmem:[#allocation9 + $0xb3c] ss:$28 sps:$4 sm:$0xff]  }
 0x5b1   : > { %7272 = vmatprep.subr.bf16.mxu1 %v21698_v39  ;;  %20023 = vmatprep.subr.bf16.mxu0 %v21699_v22  ;;  %v21749_v39 = vld [vmem:[#allocation9 + $0xec0] ss:$28 sps:$4 sm:$0xff]   ;;  %v21746_v22 = vld [vmem:[#allocation9 + $0xb38] ss:$28 sps:$4 sm:$0xff]  }
 0x5b4   : > { %7273 = vmatpush1.bf16.msra.mxu1 %v21696_v20  ;;  %20024 = vmatpush3.bf16.msra.mxu0 %v21700_v5  ;;  %v21750_v20 = vld [vmem:[#allocation9 + $0xd00] ss:$28 sps:$4 sm:$0xff]   ;;  %v21753_v5 = vld [vmem:[#allocation9 + $0xb74] ss:$28 sps:$4 sm:$0xff]  }
 0x5b5   : > { %7274 = vmatprep.subr.bf16.mxu1 %v21703_v57  ;;  %20025 = vmatprep.subr.bf16.mxu0 %v21704_v53  ;;  %v21751_v57 = vld [vmem:[#allocation9 + $0xb70] ss:$28 sps:$4 sm:$0xff]   ;;  %v23854_v53 = vmov 0.0  }
 0x5b8   : > { %7275 = vmatpush1.bf16.msra.mxu1 %v21701_v12  ;;  %20026 = vmatpush3.bf16.msra.mxu0 %v21705_v0  ;;  %v21754_v12 = vld [vmem:[#allocation9 + $0xef8] ss:$28 sps:$4 sm:$0xff]   ;;  %v21757_v0 = vld [vmem:[#allocation9 + $0xbac] ss:$28 sps:$4 sm:$0xff]  }
 0x5b9   : > { %7276 = vmatprep.subr.bf16.mxu1 %v21708_v15  ;;  %20027 = vmatprep.subr.bf16.mxu0 %v21709_v56  ;;  %v21755_v15 = vld [vmem:[#allocation9 + $0xba8] ss:$28 sps:$4 sm:$0xff]   ;;  %v21758_v56 = vld [vmem:[#allocation9 + $0xf30] ss:$28 sps:$4 sm:$0xff]  }
 0x5bc   : > { %7277 = vmatpush1.bf16.msra.mxu1 %v21706_v8  ;;  %20028 = vmatpush3.bf16.msra.mxu0 %v21710_v62  ;;  %v21761_v8 = vld [vmem:[#allocation9 + $0xbe4] ss:$28 sps:$4 sm:$0xff]  }
 0x5bd   : > { %7278 = vmatprep.subr.bf16.mxu1 %v21713_v11  ;;  %20035 = vmatprep.subr.bf16.mxu0 %v21714_v63  ;;  %v21759_v62 = vld [vmem:[#allocation9 + $0xbe0] ss:$28 sps:$4 sm:$0xff]  }
 0x5be   : > { %v21765_v11 = vld [vmem:[#allocation9 + $0xc1c] ss:$28 sps:$4 sm:$0xff]  }
 0x5bf   : > { %7424 = vmatmul.mubr.bf16.vlgmr.msra.gmra.mrb[44].mxu0 %v25751_v59  ;;  %v21766_v63 = vld [vmem:[#allocation9 + $0xfa0] ss:$28 sps:$4 sm:$0xff]  }
 0x5c0   : > { %7279 = vmatpush1.bf16.msra.mxu1 %v21711_v31  ;;  %20036 = vmatpush3.bf16.msra.mxu0 %v21715_v41  ;;  %v21769_v31 = vld [vmem:[#allocation9 + $0xc54] ss:$28 sps:$4 sm:$0xff]   ;;  %v21772_v41 = vld [vmem:[#allocation9 + $0xc] ss:$28 sps:$4 sm:$0xff]  }
 0x5c1   : > { %7464 = vmatprep.mubr.bf16.mxu0 %v25788_v36  ;;  %7280 = vmatprep.subr.bf16.mxu1 %v21718_v26  ;;  %v21767_v26 = vld [vmem:[#allocation9 + $0xc50] ss:$28 sps:$4 sm:$0xff]  }
 0x5c2   : > { %20037 = vmatprep.subr.bf16.mxu0 %v21719_v25  ;;  %v21770_v25 = vld [vmem:[#allocation9 + $0x8] ss:$28 sps:$4 sm:$0xff]  }
 0x5c4   : > { %7281 = vmatpush1.bf16.msra.mxu1 %v21716_v27  ;;  %20038 = vmatpush3.bf16.msra.mxu0 %v21720_v47  ;;  %v21775_v27 = vld [vmem:[#allocation9 + $0xc8c] ss:$28 sps:$4 sm:$0xff]   ;;  %v21778_v47 = vld [vmem:[#allocation9 + $0x44] ss:$28 sps:$4 sm:$0xff]  }
 0x5c5   : > { %7282 = vmatprep.subr.bf16.mxu1 %v21723_v45  ;;  %20039 = vmatprep.subr.bf16.mxu0 %v21724_v18  ;;  %v21773_v45 = vld [vmem:[#allocation9 + $0xc88] ss:$28 sps:$4 sm:$0xff]   ;;  %v21776_v18 = vld [vmem:[#allocation9 + $0x40] ss:$28 sps:$4 sm:$0xff]  }
 0x5c8   : > { %7283 = vmatpush1.bf16.msra.mxu1 %v21721_v44  ;;  %20040 = vmatpush3.bf16.msra.mxu0 %v21725_v17  ;;  %v21781_v44 = vld [vmem:[#allocation9 + $0xcc4] ss:$28 sps:$4 sm:$0xff]   ;;  %v21784_v17 = vld [vmem:[#allocation9 + $0x7c] ss:$28 sps:$4 sm:$0xff]  }
 0x5c9   : > { %7284 = vmatprep.subr.bf16.mxu1 %v21728_v4  ;;  %20041 = vmatprep.subr.bf16.mxu0 %v21729_v42  ;;  %v21779_v4 = vld [vmem:[#allocation9 + $0xcc0] ss:$28 sps:$4 sm:$0xff]   ;;  %v21782_v42 = vld [vmem:[#allocation9 + $0x78] ss:$28 sps:$4 sm:$0xff]  }
 0x5cc   : > { %7285 = vmatpush1.bf16.msra.mxu1 %v21726_v30  ;;  %20042 = vmatpush3.bf16.msra.mxu0 %v21730_v29  ;;  %v21787_v30 = vld [vmem:[#allocation9 + $0xcfc] ss:$28 sps:$4 sm:$0xff]   ;;  %v21790_v29 = vld [vmem:[#allocation9 + $0xb4] ss:$28 sps:$4 sm:$0xff]  }
 0x5cd   : > { %7286 = vmatprep.subr.bf16.mxu1 %v21733_v10  ;;  %20043 = vmatprep.subr.bf16.mxu0 %v21734_v51  ;;  %v21785_v10 = vld [vmem:[#allocation9 + $0xcf8] ss:$28 sps:$4 sm:$0xff]   ;;  %v21788_v51 = vld [vmem:[#allocation9 + $0xb0] ss:$28 sps:$4 sm:$0xff]  }
 0x5d0   : > { %7287 = vmatpush1.bf16.msra.mxu1 %v21731_v28  ;;  %20044 = vmatpush3.bf16.msra.mxu0 %v21735_v19  ;;  %v21793_v28 = vld [vmem:[#allocation9 + $0xd34] ss:$28 sps:$4 sm:$0xff]   ;;  %v21796_v19 = vld [vmem:[#allocation9 + $0xec] ss:$28 sps:$4 sm:$0xff]  }
 0x5d1   : > { %7288 = vmatprep.subr.bf16.mxu1 %v21738_v58  ;;  %20045 = vmatprep.subr.bf16.mxu0 %v21739_v55  ;;  %v21791_v58 = vld [vmem:[#allocation9 + $0xd30] ss:$28 sps:$4 sm:$0xff]   ;;  %v21794_v55 = vld [vmem:[#allocation9 + $0xe8] ss:$28 sps:$4 sm:$0xff]  }
 0x5d4   : > { %7289 = vmatpush1.bf16.msra.mxu1 %v21736_v60  ;;  %20046 = vmatpush3.bf16.msra.mxu0 %v21740_v2  ;;  %v21799_v60 = vld [vmem:[#allocation9 + $0xd6c] ss:$28 sps:$4 sm:$0xff]   ;;  %v21802_v2 = vld [vmem:[#allocation9 + $0x124] ss:$28 sps:$4 sm:$0xff]  }
 0x5d5   : > { %7290 = vmatprep.subr.bf16.mxu1 %v21743_v52  ;;  %20047 = vmatprep.subr.bf16.mxu0 %v21744_v24  ;;  %v21797_v52 = vld [vmem:[#allocation9 + $0xd68] ss:$28 sps:$4 sm:$0xff]   ;;  %v21800_v24 = vld [vmem:[#allocation9 + $0x120] ss:$28 sps:$4 sm:$0xff]  }
 0x5d8   : > { %7291 = vmatpush1.bf16.msra.mxu1 %v21741_v43  ;;  %20048 = vmatpush3.bf16.msra.mxu0 %v21745_v38  ;;  %v21805_v43 = vld [vmem:[#allocation9 + $0xda4] ss:$28 sps:$4 sm:$0xff]   ;;  %v21808_v38 = vld [vmem:[#allocation9 + $0x15c] ss:$28 sps:$4 sm:$0xff]  }
 0x5d9   : > { %7292 = vmatprep.subr.bf16.mxu1 %v21748_v50  ;;  %20049 = vmatprep.subr.bf16.mxu0 %v21749_v39  ;;  %v21803_v50 = vld [vmem:[#allocation9 + $0xda0] ss:$28 sps:$4 sm:$0xff]   ;;  %v21806_v39 = vld [vmem:[#allocation9 + $0x158] ss:$28 sps:$4 sm:$0xff]  }
 0x5dc   : > { %7293 = vmatpush1.bf16.msra.mxu1 %v21746_v22  ;;  %20050 = vmatpush3.bf16.msra.mxu0 %v21750_v20  ;;  %v21811_v22 = vld [vmem:[#allocation9 + $0xddc] ss:$28 sps:$4 sm:$0xff]   ;;  %v21814_v20 = vld [vmem:[#allocation9 + $0x194] ss:$28 sps:$4 sm:$0xff]  }
 0x5dd   : > { %7305 = vmatprep.subr.bf16.mxu1 %v21753_v5  ;;  %20328 = vmatprep.subr.bf16.mxu0 %v23854_v53  ;;  %v21809_v5 = vld [vmem:[#allocation9 + $0xdd8] ss:$28 sps:$4 sm:$0xff]  }
 0x5df   : > { %7295 = vmatmul.mubr.bf16.vlgmr.msra.gmra.mrb[80].mxu1 %v25751_v59  ;;  %7465 = vmatmul.mubr.bf16.vlgmr.msra.gmra.mrb[48].mxu0 %v25791_v32  ;;  %v21762_v59 = vld [vmem:[#allocation9 + $0xf68] ss:$28 sps:$4 sm:$0xff]  }
 0x5e0   : > { %7306 = vmatpush1.bf16.msra.mxu1 %v21751_v57  ;;  %7337 = vmatprep.mubr.bf16.mxu1 %v25788_v36  ;;  %v21763_v36 = vld [vmem:[#allocation9 + $0xc18] ss:$28 sps:$4 sm:$0xff]   ;;  %v21812_v57 = vld [vmem:[#allocation9 + $0x190] ss:$28 sps:$4 sm:$0xff]  }
 0x5e1   : > { %20329 = vmatpush3.bf16.msra.mxu0 %v21754_v12  ;;  %7307 = vmatprep.subr.bf16.mxu1 %v21757_v0  ;;  %v21817_v12 = vld [vmem:[#allocation9 + $0xe14] ss:$28 sps:$4 sm:$0xff]   ;;  %v21820_v0 = vld [vmem:[#allocation9 + $0x1cc] ss:$28 sps:$4 sm:$0xff]  }
 0x5e2   : > { %20330 = vmatprep.subr.bf16.mxu0 %v23854_v53  ;;  %20336 = vmatprep.mubr.msk.bf16.mxu0 %vm23855_vm9, %v23854_v53 }
 0x5e4   : > { %7308 = vmatpush1.bf16.msra.mxu1 %v21755_v15  ;;  %v21815_v15 = vld [vmem:[#allocation9 + $0xe10] ss:$28 sps:$4 sm:$0xff]  }
 0x5e5   : > { %20331 = vmatpush3.bf16.msra.mxu0 %v21758_v56  ;;  %7309 = vmatprep.subr.bf16.mxu1 %v21761_v8  ;;  %v21818_v56 = vld [vmem:[#allocation9 + $0x1c8] ss:$28 sps:$4 sm:$0xff]  }
 0x5e6   : > { %20332 = vmatprep.subr.bf16.mxu0 %v23854_v53  ;;  %v21823_v8 = vld [vmem:[#allocation9 + $0xe4c] ss:$28 sps:$4 sm:$0xff]  }
 0x5e8   : > { %7310 = vmatpush1.bf16.msra.mxu1 %v21759_v62  ;;  %v21826_v62 = vld [vmem:[#allocation9 + $0x204] ss:$28 sps:$4 sm:$0xff]  }
 0x5e9   : > { %20333 = vmatpush3.bf16.msra.mxu0 %v21762_v59  ;;  %7311 = vmatprep.subr.bf16.mxu1 %v21765_v11  ;;  %v21821_v59 = vld [vmem:[#allocation9 + $0xe48] ss:$28 sps:$4 sm:$0xff]   ;;  %v21824_v11 = vld [vmem:[#allocation9 + $0x200] ss:$28 sps:$4 sm:$0xff]  }
 0x5ea   : > { %20334 = vmatprep.subr.bf16.mxu0 %v23854_v53 }
 0x5ec   : > { %7312 = vmatpush1.bf16.msra.mxu1 %v21763_v36  ;;  %v21829_v36 = vld [vmem:[#allocation9 + $0xe84] ss:$28 sps:$4 sm:$0xff]  }
 0x5ed   : > { %20335 = vmatpush3.bf16.msra.mxu0 %v21766_v63  ;;  %7313 = vmatprep.subr.bf16.mxu1 %v21769_v31  ;;  %v21832_v63 = vld [vmem:[#allocation9 + $0x23c] ss:$28 sps:$4 sm:$0xff]  }
 0x5ee   : > { %8941 = vmatprep.subr.bf16.mxu0 %v21772_v41  ;;  %v21827_v31 = vld [vmem:[#allocation9 + $0xe80] ss:$28 sps:$4 sm:$0xff]   ;;  %v21830_v41 = vld [vmem:[#allocation9 + $0x238] ss:$28 sps:$4 sm:$0xff]  }
 0x5f0   : > { %20337 = vmatmul.mubr.msk.bf16.vlgmr.msra.gmra.mrb[52].mxu0 %vm7000_vm8, %v25818_v16  ;;  %7314 = vmatpush1.bf16.msra.mxu1 %v21767_v26  ;;  %v21835_v26 = vld [vmem:[#allocation9 + $0xebc] ss:$28 sps:$4 sm:$0xff]  }
 0x5f1   : > { %8942 = vmatpush1.bf16.msra.mxu0 %v21770_v25  ;;  %8973 = vmatprep.mubr.bf16.mxu0 %v25738_v23  ;;  %v21838_v25 = vld [vmem:[#allocation9 + $0x274] ss:$28 sps:$4 sm:$0xff]  }
 0x5f2   : > { %7315 = vmatprep.subr.bf16.mxu1 %v21775_v27  ;;  %8943 = vmatprep.subr.bf16.mxu0 %v21778_v47  ;;  %v21833_v27 = vld [vmem:[#allocation9 + $0xeb8] ss:$28 sps:$4 sm:$0xff]   ;;  %v21836_v47 = vld [vmem:[#allocation9 + $0x270] ss:$28 sps:$4 sm:$0xff]  }
 0x5f4   : > { %7316 = vmatpush1.bf16.msra.mxu1 %v21773_v45  ;;  %v21841_v45 = vld [vmem:[#allocation9 + $0xef4] ss:$28 sps:$4 sm:$0xff]  }
 0x5f5   : > { %8944 = vmatpush1.bf16.msra.mxu0 %v21776_v18  ;;  %7317 = vmatprep.subr.bf16.mxu1 %v21781_v44  ;;  %v21844_v18 = vld [vmem:[#allocation9 + $0x2ac] ss:$28 sps:$4 sm:$0xff]  }
 0x5f6   : > { %8945 = vmatprep.subr.bf16.mxu0 %v21784_v17  ;;  %v21839_v44 = vld [vmem:[#allocation9 + $0xef0] ss:$28 sps:$4 sm:$0xff]   ;;  %v21842_v17 = vld [vmem:[#allocation9 + $0x2a8] ss:$28 sps:$4 sm:$0xff]  }
 0x5f8   : > { %7318 = vmatpush1.bf16.msra.mxu1 %v21779_v4  ;;  %v21847_v4 = vld [vmem:[#allocation9 + $0xf2c] ss:$28 sps:$4 sm:$0xff]  }
 0x5f9   : > { %8946 = vmatpush1.bf16.msra.mxu0 %v21782_v42  ;;  %7319 = vmatprep.subr.bf16.mxu1 %v21787_v30  ;;  %v21850_v42 = vld [vmem:[#allocation9 + $0x2e4] ss:$28 sps:$4 sm:$0xff]  }
 0x5fa   : > { %8947 = vmatprep.subr.bf16.mxu0 %v21790_v29  ;;  %v21845_v30 = vld [vmem:[#allocation9 + $0xf28] ss:$28 sps:$4 sm:$0xff]   ;;  %v21848_v29 = vld [vmem:[#allocation9 + $0x2e0] ss:$28 sps:$4 sm:$0xff]  }
 0x5fc   : > { %7320 = vmatpush1.bf16.msra.mxu1 %v21785_v10  ;;  %v21853_v10 = vld [vmem:[#allocation9 + $0xf64] ss:$28 sps:$4 sm:$0xff]  }
 0x5fd   : > { %8948 = vmatpush1.bf16.msra.mxu0 %v21788_v51  ;;  %7321 = vmatprep.subr.bf16.mxu1 %v21793_v28  ;;  %v21856_v51 = vld [vmem:[#allocation9 + $0x31c] ss:$28 sps:$4 sm:$0xff]  }
 0x5fe   : > { %8949 = vmatprep.subr.bf16.mxu0 %v21796_v19  ;;  %v21851_v28 = vld [vmem:[#allocation9 + $0xf60] ss:$28 sps:$4 sm:$0xff]   ;;  %v21854_v19 = vld [vmem:[#allocation9 + $0x318] ss:$28 sps:$4 sm:$0xff]  }
 0x600   : > { %7322 = vmatpush1.bf16.msra.mxu1 %v21791_v58  ;;  %v21859_v58 = vld [vmem:[#allocation9 + $0xf9c] ss:$28 sps:$4 sm:$0xff]  }
 0x601   : > { %8950 = vmatpush1.bf16.msra.mxu0 %v21794_v55  ;;  %7323 = vmatprep.subr.bf16.mxu1 %v21799_v60  ;;  %v21862_v55 = vld [vmem:[#allocation9 + $0x354] ss:$28 sps:$4 sm:$0xff]  }
 0x602   : > { %8951 = vmatprep.subr.bf16.mxu0 %v21802_v2  ;;  %v21860_v60 = vld [vmem:[#allocation9 + $0x350] ss:$28 sps:$4 sm:$0xff]   ;;  %v21865_v2 = vld [vmem:[#allocation9 + $0x4] ss:$28 sps:$4 sm:$0xff]  }
 0x604   : > { %7324 = vmatpush1.bf16.msra.mxu1 %v21797_v52  ;;  %v21868_v52 = vld [vmem:[#allocation9 + $0x38c] ss:$28 sps:$4 sm:$0xff]  }
 0x605   : > { %8952 = vmatpush1.bf16.msra.mxu0 %v21800_v24  ;;  %7325 = vmatprep.subr.bf16.mxu1 %v21805_v43  ;;  %v21863_v24 = vld [vmem:[#allocation9] ss:$28 sps:$4 sm:$0xff]   ;;  %v21866_v43 = vld [vmem:[#allocation9 + $0x388] ss:$28 sps:$4 sm:$0xff]  }
 0x606   : > { %8953 = vmatprep.subr.bf16.mxu0 %v21808_v38  ;;  %v21871_v38 = vld [vmem:[#allocation9 + $0x3c] ss:$28 sps:$4 sm:$0xff]  }
 0x608   : > { %7326 = vmatpush1.bf16.msra.mxu1 %v21803_v50  ;;  %v21874_v50 = vld [vmem:[#allocation9 + $0x3c4] ss:$28 sps:$4 sm:$0xff]  }
 0x609   : > { %8954 = vmatpush1.bf16.msra.mxu0 %v21806_v39  ;;  %7327 = vmatprep.subr.bf16.mxu1 %v21811_v22  ;;  %v21869_v39 = vld [vmem:[#allocation9 + $0x38] ss:$28 sps:$4 sm:$0xff]   ;;  %v21872_v22 = vld [vmem:[#allocation9 + $0x3c0] ss:$28 sps:$4 sm:$0xff]  }
 0x60a   : > { %8955 = vmatprep.subr.bf16.mxu0 %v21814_v20  ;;  %v21877_v20 = vld [vmem:[#allocation9 + $0x74] ss:$28 sps:$4 sm:$0xff]  }
 0x60c   : > { %7328 = vmatpush1.bf16.msra.mxu1 %v21809_v5  ;;  %v21880_v5 = vld [vmem:[#allocation9 + $0x3fc] ss:$28 sps:$4 sm:$0xff]  }
 0x60d   : > { %8956 = vmatpush1.bf16.msra.mxu0 %v21812_v57  ;;  %7329 = vmatprep.subr.bf16.mxu1 %v21817_v12  ;;  %v21875_v57 = vld [vmem:[#allocation9 + $0x70] ss:$28 sps:$4 sm:$0xff]  }
 0x60e   : > { %8957 = vmatprep.subr.bf16.mxu0 %v21820_v0  ;;  %v21883_v12 = vld [vmem:[#allocation9 + $0xac] ss:$28 sps:$4 sm:$0xff]   ;;  %v21886_v0 = vld [vmem:[#allocation9 + $0x434] ss:$28 sps:$4 sm:$0xff]  }
 0x610   : > { %7330 = vmatpush1.bf16.msra.mxu1 %v21815_v15  ;;  %v21881_v15 = vld [vmem:[#allocation9 + $0xa8] ss:$28 sps:$4 sm:$0xff]  }
 0x611   : > { %8958 = vmatpush1.bf16.msra.mxu0 %v21818_v56  ;;  %7331 = vmatprep.subr.bf16.mxu1 %v21823_v8  ;;  %v21884_v56 = vld [vmem:[#allocation9 + $0x430] ss:$28 sps:$4 sm:$0xff]   ;;  %v21889_v8 = vld [vmem:[#allocation9 + $0xe4] ss:$28 sps:$4 sm:$0xff]  }
 0x612   : > { %8959 = vmatprep.subr.bf16.mxu0 %v21826_v62  ;;  %v21892_v62 = vld [vmem:[#allocation9 + $0x46c] ss:$28 sps:$4 sm:$0xff]  }
 0x614   : > { %7332 = vmatpush1.bf16.msra.mxu1 %v21821_v59  ;;  %v21887_v59 = vld [vmem:[#allocation9 + $0xe0] ss:$28 sps:$4 sm:$0xff]  }
 0x615   : > { %8960 = vmatpush1.bf16.msra.mxu0 %v21824_v11  ;;  %7333 = vmatprep.subr.bf16.mxu1 %v21829_v36  ;;  %v21890_v11 = vld [vmem:[#allocation9 + $0x468] ss:$28 sps:$4 sm:$0xff]   ;;  %v21895_v36 = vld [vmem:[#allocation9 + $0x11c] ss:$28 sps:$4 sm:$0xff]  }
 0x616   : > { %8961 = vmatprep.subr.bf16.mxu0 %v21832_v63  ;;  %v21898_v63 = vld [vmem:[#allocation9 + $0x4a4] ss:$28 sps:$4 sm:$0xff]  }
 0x618   : > { %7334 = vmatpush1.bf16.msra.mxu1 %v21827_v31  ;;  %v21893_v31 = vld [vmem:[#allocation9 + $0x118] ss:$28 sps:$4 sm:$0xff]  }
 0x619   : > { %8962 = vmatpush1.bf16.msra.mxu0 %v21830_v41  ;;  %7335 = vmatprep.subr.bf16.mxu1 %v21835_v26  ;;  %v21896_v41 = vld [vmem:[#allocation9 + $0x4a0] ss:$28 sps:$4 sm:$0xff]   ;;  %v21901_v26 = vld [vmem:[#allocation9 + $0x154] ss:$28 sps:$4 sm:$0xff]  }
 0x61a   : > { %8963 = vmatprep.subr.bf16.mxu0 %v21838_v25  ;;  %v21904_v25 = vld [vmem:[#allocation9 + $0x4dc] ss:$28 sps:$4 sm:$0xff]  }
 0x61c   : > { %7336 = vmatpush1.bf16.msra.mxu1 %v21833_v27  ;;  %v21899_v27 = vld [vmem:[#allocation9 + $0x150] ss:$28 sps:$4 sm:$0xff]  }
 0x61d   : > { %8964 = vmatpush1.bf16.msra.mxu0 %v21836_v47  ;;  %7348 = vmatprep.subr.bf16.mxu1 %v21841_v45  ;;  %v21902_v47 = vld [vmem:[#allocation9 + $0x4d8] ss:$28 sps:$4 sm:$0xff]   ;;  %v21907_v45 = vld [vmem:[#allocation9 + $0x18c] ss:$28 sps:$4 sm:$0xff]  }
 0x61e   : > { %8965 = vmatprep.subr.bf16.mxu0 %v21844_v18  ;;  %v21910_v18 = vld [vmem:[#allocation9 + $0x514] ss:$28 sps:$4 sm:$0xff]  }
 0x61f   : > { %7338 = vmatmul.mubr.bf16.vlgmr.msra.gmra.mrb[80].mxu1 %v25791_v32  ;;  %v21857_v32 = vld [vmem:[#allocation9 + $0xf98] ss:$28 sps:$4 sm:$0xff]  }
 0x620   : > { %7349 = vmatpush1.bf16.msra.mxu1 %v21839_v44  ;;  %7380 = vmatprep.mubr.bf16.mxu1 %v27021_v13  ;;  %v21905_v44 = vld [vmem:[#allocation9 + $0x188] ss:$28 sps:$4 sm:$0xff]  }
 0x621   : > { %8966 = vmatpush1.bf16.msra.mxu0 %v21842_v17  ;;  %7350 = vmatprep.subr.bf16.mxu1 %v21847_v4  ;;  %v21908_v17 = vld [vmem:[#allocation9 + $0x510] ss:$28 sps:$4 sm:$0xff]   ;;  %v21913_v4 = vld [vmem:[#allocation9 + $0x1c4] ss:$28 sps:$4 sm:$0xff]  }
 0x622   : > { %8967 = vmatprep.subr.bf16.mxu0 %v21850_v42  ;;  %v21916_v42 = vld [vmem:[#allocation9 + $0x54c] ss:$28 sps:$4 sm:$0xff]  }
 0x624   : > { %7351 = vmatpush1.bf16.msra.mxu1 %v21845_v30  ;;  %v21911_v30 = vld [vmem:[#allocation9 + $0x1c0] ss:$28 sps:$4 sm:$0xff]  }
 0x625   : > { %8968 = vmatpush1.bf16.msra.mxu0 %v21848_v29  ;;  %7352 = vmatprep.subr.bf16.mxu1 %v21853_v10  ;;  %v21914_v29 = vld [vmem:[#allocation9 + $0x548] ss:$28 sps:$4 sm:$0xff]   ;;  %v21919_v10 = vld [vmem:[#allocation9 + $0x1fc] ss:$28 sps:$4 sm:$0xff]  }
 0x626   : > { %8969 = vmatprep.subr.bf16.mxu0 %v21856_v51  ;;  %v21922_v51 = vld [vmem:[#allocation9 + $0x584] ss:$28 sps:$4 sm:$0xff]  }
 0x628   : > { %7353 = vmatpush1.bf16.msra.mxu1 %v21851_v28  ;;  %v21917_v28 = vld [vmem:[#allocation9 + $0x1f8] ss:$28 sps:$4 sm:$0xff]  }
 0x629   : > { %8970 = vmatpush1.bf16.msra.mxu0 %v21854_v19  ;;  %7354 = vmatprep.subr.bf16.mxu1 %v21859_v58  ;;  %v21920_v19 = vld [vmem:[#allocation9 + $0x580] ss:$28 sps:$4 sm:$0xff]   ;;  %v21925_v58 = vld [vmem:[#allocation9 + $0x234] ss:$28 sps:$4 sm:$0xff]  }
 0x62a   : > { %8971 = vmatprep.subr.bf16.mxu0 %v21862_v55  ;;  %v21928_v55 = vld [vmem:[#allocation9 + $0x5bc] ss:$28 sps:$4 sm:$0xff]  }
 0x62c   : > { %7355 = vmatpush1.bf16.msra.mxu1 %v21857_v32  ;;  %v21923_v32 = vld [vmem:[#allocation9 + $0x230] ss:$28 sps:$4 sm:$0xff]  }
 0x62d   : > { %8972 = vmatpush1.bf16.msra.mxu0 %v21860_v60  ;;  %8812 = vmatprep.subr.bf16.mxu1 %v21865_v2  ;;  %v21926_v60 = vld [vmem:[#allocation9 + $0x5b8] ss:$28 sps:$4 sm:$0xff]   ;;  %v21931_v2 = vld [vmem:[#allocation9 + $0x26c] ss:$28 sps:$4 sm:$0xff]  }
 0x62e   : > { %8984 = vmatprep.subr.bf16.mxu0 %v21868_v52  ;;  %v21934_v52 = vld [vmem:[#allocation9 + $0x5f4] ss:$28 sps:$4 sm:$0xff]  }
 0x62f   : > { %18633 = vmatmul.mubr.msk.bf16.vlgmr.msra.gmra.mrb[80].mxu1 %vm7000_vm8, %v25818_v16  ;;  %v21878_v16 = vld [vmem:[#allocation9 + $0x3f8] ss:$28 sps:$4 sm:$0xff]  }
 0x630   : > { %8974 = vmatmul.mubr.bf16.vlgmr.msra.gmra.mrb[40].mxu0 %v25736_v34  ;;  %8813 = vmatpush1.bf16.msra.mxu1 %v21863_v24  ;;  %v21929_v24 = vld [vmem:[#allocation9 + $0x268] ss:$28 sps:$4 sm:$0xff]  }
 0x631   : > { %8844 = vmatprep.mubr.bf16.mxu1 %v25738_v23  ;;  %8985 = vmatpush1.bf16.msra.mxu0 %v21866_v43  ;;  %v21932_v43 = vld [vmem:[#allocation9 + $0x5f0] ss:$28 sps:$4 sm:$0xff]  }
 0x632   : > { %9016 = vmatprep.mubr.bf16.mxu0 %v25776_v33  ;;  %8814 = vmatprep.subr.bf16.mxu1 %v21871_v38  ;;  %v21937_v38 = vld [vmem:[#allocation9 + $0x2a4] ss:$28 sps:$4 sm:$0xff]  }
 0x633   : > { %8986 = vmatprep.subr.bf16.mxu0 %v21874_v50  ;;  %v21940_v50 = vld [vmem:[#allocation9 + $0x62c] ss:$28 sps:$4 sm:$0xff]  }
 0x634   : > { %8815 = vmatpush1.bf16.msra.mxu1 %v21869_v39  ;;  %v21935_v39 = vld [vmem:[#allocation9 + $0x2a0] ss:$28 sps:$4 sm:$0xff]  }
 0x635   : > { %8987 = vmatpush1.bf16.msra.mxu0 %v21872_v22  ;;  %8816 = vmatprep.subr.bf16.mxu1 %v21877_v20  ;;  %v21938_v22 = vld [vmem:[#allocation9 + $0x628] ss:$28 sps:$4 sm:$0xff]   ;;  %v21943_v20 = vld [vmem:[#allocation9 + $0x2dc] ss:$28 sps:$4 sm:$0xff]  }
 0x636   : > { %8988 = vmatprep.subr.bf16.mxu0 %v21880_v5  ;;  %v21946_v5 = vld [vmem:[#allocation9 + $0x664] ss:$28 sps:$4 sm:$0xff]  }
 0x638   : > { %8817 = vmatpush1.bf16.msra.mxu1 %v21875_v57  ;;  %v21941_v57 = vld [vmem:[#allocation9 + $0x2d8] ss:$28 sps:$4 sm:$0xff]  }
 0x639   : > { %8989 = vmatpush1.bf16.msra.mxu0 %v21878_v16  ;;  %8818 = vmatprep.subr.bf16.mxu1 %v21883_v12  ;;  %v21944_v16 = vld [vmem:[#allocation9 + $0x660] ss:$28 sps:$4 sm:$0xff]   ;;  %v21949_v12 = vld [vmem:[#allocation9 + $0x314] ss:$28 sps:$4 sm:$0xff]  }
 0x63a   : > { %8990 = vmatprep.subr.bf16.mxu0 %v21886_v0  ;;  %v21952_v0 = vld [vmem:[#allocation9 + $0x69c] ss:$28 sps:$4 sm:$0xff]  }
 0x63c   : > { %8819 = vmatpush1.bf16.msra.mxu1 %v21881_v15  ;;  %v21947_v15 = vld [vmem:[#allocation9 + $0x310] ss:$28 sps:$4 sm:$0xff]  }
 0x63d   : > { %8991 = vmatpush1.bf16.msra.mxu0 %v21884_v56  ;;  %8820 = vmatprep.subr.bf16.mxu1 %v21889_v8  ;;  %v21950_v56 = vld [vmem:[#allocation9 + $0x698] ss:$28 sps:$4 sm:$0xff]   ;;  %v21955_v8 = vld [vmem:[#allocation9 + $0x34c] ss:$28 sps:$4 sm:$0xff]  }
 0x63e   : > { %8992 = vmatprep.subr.bf16.mxu0 %v21892_v62  ;;  %v21958_v62 = vld [vmem:[#allocation9 + $0x6d4] ss:$28 sps:$4 sm:$0xff]  }
 0x640   : > { %8821 = vmatpush1.bf16.msra.mxu1 %v21887_v59  ;;  %v21953_v59 = vld [vmem:[#allocation9 + $0x348] ss:$28 sps:$4 sm:$0xff]  }
 0x641   : > { %8993 = vmatpush1.bf16.msra.mxu0 %v21890_v11  ;;  %8822 = vmatprep.subr.bf16.mxu1 %v21895_v36  ;;  %v21956_v11 = vld [vmem:[#allocation9 + $0x6d0] ss:$28 sps:$4 sm:$0xff]   ;;  %v21961_v36 = vld [vmem:[#allocation9 + $0x384] ss:$28 sps:$4 sm:$0xff]  }
 0x642   : > { %8994 = vmatprep.subr.bf16.mxu0 %v21898_v63  ;;  %v21964_v63 = vld [vmem:[#allocation9 + $0x70c] ss:$28 sps:$4 sm:$0xff]  }
 0x644   : > { %8823 = vmatpush1.bf16.msra.mxu1 %v21893_v31  ;;  %v21959_v31 = vld [vmem:[#allocation9 + $0x380] ss:$28 sps:$4 sm:$0xff]  }
 0x645   : > { %8995 = vmatpush1.bf16.msra.mxu0 %v21896_v41  ;;  %8824 = vmatprep.subr.bf16.mxu1 %v21901_v26  ;;  %v21962_v41 = vld [vmem:[#allocation9 + $0x708] ss:$28 sps:$4 sm:$0xff]   ;;  %v21967_v26 = vld [vmem:[#allocation9 + $0x3bc] ss:$28 sps:$4 sm:$0xff]  }
 0x646   : > { %8996 = vmatprep.subr.bf16.mxu0 %v21904_v25  ;;  %v21970_v25 = vld [vmem:[#allocation9 + $0x744] ss:$28 sps:$4 sm:$0xff]  }
 0x648   : > { %8825 = vmatpush1.bf16.msra.mxu1 %v21899_v27  ;;  %v21965_v27 = vld [vmem:[#allocation9 + $0x3b8] ss:$28 sps:$4 sm:$0xff]  }
 0x649   : > { %8997 = vmatpush1.bf16.msra.mxu0 %v21902_v47  ;;  %8826 = vmatprep.subr.bf16.mxu1 %v21907_v45  ;;  %v21968_v47 = vld [vmem:[#allocation9 + $0x740] ss:$28 sps:$4 sm:$0xff]   ;;  %v21973_v45 = vld [vmem:[#allocation9 + $0x3f4] ss:$28 sps:$4 sm:$0xff]  }
 0x64a   : > { %8998 = vmatprep.subr.bf16.mxu0 %v21910_v18  ;;  %v21976_v18 = vld [vmem:[#allocation9 + $0x77c] ss:$28 sps:$4 sm:$0xff]  }
 0x64c   : > { %8827 = vmatpush1.bf16.msra.mxu1 %v21905_v44  ;;  %v21971_v44 = vld [vmem:[#allocation9 + $0x3f0] ss:$28 sps:$4 sm:$0xff]  }
 0x64d   : > { %8999 = vmatpush1.bf16.msra.mxu0 %v21908_v17  ;;  %8828 = vmatprep.subr.bf16.mxu1 %v21913_v4  ;;  %v21974_v17 = vld [vmem:[#allocation9 + $0x778] ss:$28 sps:$4 sm:$0xff]   ;;  %v21979_v4 = vld [vmem:[#allocation9 + $0x42c] ss:$28 sps:$4 sm:$0xff]  }
 0x64e   : > { %9000 = vmatprep.subr.bf16.mxu0 %v21916_v42  ;;  %v21982_v42 = vld [vmem:[#allocation9 + $0x7b4] ss:$28 sps:$4 sm:$0xff]  }
 0x650   : > { %8829 = vmatpush1.bf16.msra.mxu1 %v21911_v30  ;;  %v21977_v30 = vld [vmem:[#allocation9 + $0x428] ss:$28 sps:$4 sm:$0xff]  }
 0x651   : > { %9001 = vmatpush1.bf16.msra.mxu0 %v21914_v29  ;;  %8830 = vmatprep.subr.bf16.mxu1 %v21919_v10  ;;  %v21980_v29 = vld [vmem:[#allocation9 + $0x7b0] ss:$28 sps:$4 sm:$0xff]   ;;  %v21985_v10 = vld [vmem:[#allocation9 + $0x464] ss:$28 sps:$4 sm:$0xff]  }
 0x652   : > { %9002 = vmatprep.subr.bf16.mxu0 %v21922_v51  ;;  %v21986_v51 = vld [vmem:[#allocation9 + $0x1d8] ss:$28 sps:$4 sm:$0xff]  }
 0x654   : > { %8831 = vmatpush1.bf16.msra.mxu1 %v21917_v28  ;;  %v21983_v28 = vld [vmem:[#allocation9 + $0x460] ss:$28 sps:$4 sm:$0xff]  }
 0x655   : > { %9003 = vmatpush1.bf16.msra.mxu0 %v21920_v19  ;;  %8832 = vmatprep.subr.bf16.mxu1 %v21925_v58  ;;  %v21987_v19 = vld [vmem:[#allocation9 + $0x18] ss:$28 sps:$4 sm:$0xff]  }
 0x656   : > { %9004 = vmatprep.subr.bf16.mxu0 %v21928_v55  ;;  %v21990_v58 = vld [vmem:[#allocation9 + $0x49c] ss:$28 sps:$4 sm:$0xff]   ;;  %v21991_v55 = vld [vmem:[#allocation9 + $0x210] ss:$28 sps:$4 sm:$0xff]  }
 0x658   : > { %8833 = vmatpush1.bf16.msra.mxu1 %v21923_v32  ;;  %v21988_v32 = vld [vmem:[#allocation9 + $0x498] ss:$28 sps:$4 sm:$0xff]  }
 0x659   : > { %9005 = vmatpush1.bf16.msra.mxu0 %v21926_v60  ;;  %8834 = vmatprep.subr.bf16.mxu1 %v21931_v2  ;;  %v21992_v60 = vld [vmem:[#allocation9 + $0x50] ss:$28 sps:$4 sm:$0xff]  }
 0x65a   : > { %9006 = vmatprep.subr.bf16.mxu0 %v21934_v52  ;;  %v21995_v2 = vld [vmem:[#allocation9 + $0x4d4] ss:$28 sps:$4 sm:$0xff]   ;;  %v21996_v52 = vld [vmem:[#allocation9 + $0x248] ss:$28 sps:$4 sm:$0xff]  }
 0x65c   : > { %8835 = vmatpush1.bf16.msra.mxu1 %v21929_v24  ;;  %v21993_v24 = vld [vmem:[#allocation9 + $0x4d0] ss:$28 sps:$4 sm:$0xff]  }
 0x65d   : > { %9007 = vmatpush1.bf16.msra.mxu0 %v21932_v43  ;;  %8836 = vmatprep.subr.bf16.mxu1 %v21937_v38  ;;  %v21997_v43 = vld [vmem:[#allocation9 + $0x88] ss:$28 sps:$4 sm:$0xff]  }
 0x65e   : > { %9008 = vmatprep.subr.bf16.mxu0 %v21940_v50  ;;  %v22000_v38 = vld [vmem:[#allocation9 + $0x50c] ss:$28 sps:$4 sm:$0xff]   ;;  %v22001_v50 = vld [vmem:[#allocation9 + $0x280] ss:$28 sps:$4 sm:$0xff]  }
 0x660   : > { %8837 = vmatpush1.bf16.msra.mxu1 %v21935_v39  ;;  %v21998_v39 = vld [vmem:[#allocation9 + $0x508] ss:$28 sps:$4 sm:$0xff]  }
 0x661   : > { %9009 = vmatpush1.bf16.msra.mxu0 %v21938_v22  ;;  %8838 = vmatprep.subr.bf16.mxu1 %v21943_v20  ;;  %v22002_v22 = vld [vmem:[#allocation9 + $0xc0] ss:$28 sps:$4 sm:$0xff]  }
 0x662   : > { %9010 = vmatprep.subr.bf16.mxu0 %v21946_v5  ;;  %v22005_v20 = vld [vmem:[#allocation9 + $0x544] ss:$28 sps:$4 sm:$0xff]   ;;  %v22006_v5 = vld [vmem:[#allocation9 + $0x2b8] ss:$28 sps:$4 sm:$0xff]  }
 0x664   : > { %8839 = vmatpush1.bf16.msra.mxu1 %v21941_v57  ;;  %v22003_v57 = vld [vmem:[#allocation9 + $0x540] ss:$28 sps:$4 sm:$0xff]  }
 0x665   : > { %9011 = vmatpush1.bf16.msra.mxu0 %v21944_v16  ;;  %8840 = vmatprep.subr.bf16.mxu1 %v21949_v12  ;;  %v22007_v16 = vld [vmem:[#allocation9 + $0xf8] ss:$28 sps:$4 sm:$0xff]  }
 0x666   : > { %9012 = vmatprep.subr.bf16.mxu0 %v21952_v0  ;;  %v22010_v12 = vld [vmem:[#allocation9 + $0x57c] ss:$28 sps:$4 sm:$0xff]   ;;  %v22011_v0 = vld [vmem:[#allocation9 + $0x2f0] ss:$28 sps:$4 sm:$0xff]  }
 0x668   : > { %8841 = vmatpush1.bf16.msra.mxu1 %v21947_v15  ;;  %v22008_v15 = vld [vmem:[#allocation9 + $0x578] ss:$28 sps:$4 sm:$0xff]  }
 0x669   : > { %9013 = vmatpush1.bf16.msra.mxu0 %v21950_v56  ;;  %8842 = vmatprep.subr.bf16.mxu1 %v21955_v8  ;;  %v22012_v56 = vld [vmem:[#allocation9 + $0x130] ss:$28 sps:$4 sm:$0xff]  }
 0x66a   : > { %9014 = vmatprep.subr.bf16.mxu0 %v21958_v62  ;;  %v22015_v8 = vld [vmem:[#allocation9 + $0x5b4] ss:$28 sps:$4 sm:$0xff]  }
 0x66c   : > { %8843 = vmatpush1.bf16.msra.mxu1 %v21953_v59  ;;  %v22016_v59 = vld [vmem:[#allocation9 + $0x328] ss:$28 sps:$4 sm:$0xff]  }
 0x66d   : > { %9015 = vmatpush1.bf16.msra.mxu0 %v21956_v11  ;;  %8855 = vmatprep.subr.bf16.mxu1 %v21961_v36 }
 0x66e   : > { %9027 = vmatprep.subr.bf16.mxu0 %v21964_v63 }
 0x66f   : > { %8845 = vmatmul.mubr.bf16.vlgmr.msra.gmra.mrb[76].mxu1 %v25736_v34 }
 0x670   : > { %9017 = vmatmul.mubr.bf16.vlgmr.msra.gmra.mrb[40].mxu0 %v25774_v21  ;;  %8856 = vmatpush1.bf16.msra.mxu1 %v21959_v31  ;;  %v22013_v31 = vld [vmem:[#allocation9 + $0x5b0] ss:$28 sps:$4 sm:$0xff]  }
 0x671   : > { %8887 = vmatprep.mubr.bf16.mxu1 %v25776_v33  ;;  %9028 = vmatpush1.bf16.msra.mxu0 %v21962_v41 }
 0x672   : > { %8857 = vmatprep.subr.bf16.mxu1 %v21967_v26  ;;  %9029 = vmatprep.subr.bf16.mxu0 %v21970_v25  ;;  %v22017_v26 = vld [vmem:[#allocation9 + $0x168] ss:$28 sps:$4 sm:$0xff]  }
 0x673   : > { %9059 = vmatprep.mubr.bf16.mxu0 %v27021_v13  ;;  %v22020_v25 = vld [vmem:[#allocation9 + $0x5ec] ss:$28 sps:$4 sm:$0xff]  }
 0x674   : > { %8858 = vmatpush1.bf16.msra.mxu1 %v21965_v27 }
 0x675   : > { %9030 = vmatpush1.bf16.msra.mxu0 %v21968_v47  ;;  %8859 = vmatprep.subr.bf16.mxu1 %v21973_v45  ;;  %v22021_v47 = vld [vmem:[#allocation9 + $0x360] ss:$28 sps:$4 sm:$0xff]   ;;  %v22018_v45 = vld [vmem:[#allocation9 + $0x5e8] ss:$28 sps:$4 sm:$0xff]  }
 0x676   : > { %9031 = vmatprep.subr.bf16.mxu0 %v21976_v18  ;;  %v22022_v18 = vld [vmem:[#allocation9 + $0x1a0] ss:$28 sps:$4 sm:$0xff]  }
 0x678   : > { %8860 = vmatpush1.bf16.msra.mxu1 %v21971_v44  ;;  %v22025_v44 = vld [vmem:[#allocation9 + $0x624] ss:$28 sps:$4 sm:$0xff]  }
 0x679   : > { %9032 = vmatpush1.bf16.msra.mxu0 %v21974_v17  ;;  %8861 = vmatprep.subr.bf16.mxu1 %v21979_v4  ;;  %v22026_v17 = vld [vmem:[#allocation9 + $0x558] ss:$28 sps:$4 sm:$0xff]   ;;  %v22023_v4 = vld [vmem:[#allocation9 + $0x620] ss:$28 sps:$4 sm:$0xff]  }
 0x67a   : > { %9033 = vmatprep.subr.bf16.mxu0 %v21982_v42  ;;  %v22027_v42 = vld [vmem:[#allocation9 + $0x398] ss:$28 sps:$4 sm:$0xff]  }
 0x67c   : > { %8862 = vmatpush1.bf16.msra.mxu1 %v21977_v30  ;;  %v22030_v30 = vld [vmem:[#allocation9 + $0x65c] ss:$28 sps:$4 sm:$0xff]  }
 0x67d   : > { %9034 = vmatpush1.bf16.msra.mxu0 %v21980_v29  ;;  %8863 = vmatprep.subr.bf16.mxu1 %v21985_v10  ;;  %v22031_v29 = vld [vmem:[#allocation9 + $0x590] ss:$28 sps:$4 sm:$0xff]   ;;  %v22028_v10 = vld [vmem:[#allocation9 + $0x658] ss:$28 sps:$4 sm:$0xff]  }
 0x67e   : > { %20062 = vmatprep.subr.bf16.mxu0 %v21986_v51  ;;  %v22032_v51 = vld [vmem:[#allocation9 + $0x3d0] ss:$28 sps:$4 sm:$0xff]  }
 0x680   : > { %18888 = vmatmul.mubr.msk.bf16.vlgmr.msra.gmra.mrb[40].mxu0 %vm7000_vm8, %v25811_v37  ;;  %8864 = vmatpush1.bf16.msra.mxu1 %v21983_v28  ;;  %v22035_v28 = vld [vmem:[#allocation9 + $0x694] ss:$28 sps:$4 sm:$0xff]  }
 0x681   : > { %20063 = vmatpush3.bf16.msra.mxu0 %v21987_v19  ;;  %9231 = vmatprep.mubr.bf16.mxu0 %v25738_v23  ;;  %v22036_v19 = vld [vmem:[#allocation9 + $0x5c8] ss:$28 sps:$4 sm:$0xff]  }
 0x682   : > { %8865 = vmatprep.subr.bf16.mxu1 %v21990_v58  ;;  %20064 = vmatprep.subr.bf16.mxu0 %v21991_v55  ;;  %v22033_v58 = vld [vmem:[#allocation9 + $0x690] ss:$28 sps:$4 sm:$0xff]   ;;  %v22037_v55 = vld [vmem:[#allocation9 + $0x408] ss:$28 sps:$4 sm:$0xff]  }
 0x684   : > { %8866 = vmatpush1.bf16.msra.mxu1 %v21988_v32  ;;  %v22040_v32 = vld [vmem:[#allocation9 + $0x6cc] ss:$28 sps:$4 sm:$0xff]  }
 0x685   : > { %20065 = vmatpush3.bf16.msra.mxu0 %v21992_v60  ;;  %8867 = vmatprep.subr.bf16.mxu1 %v21995_v2  ;;  %v22041_v60 = vld [vmem:[#allocation9 + $0x600] ss:$28 sps:$4 sm:$0xff]   ;;  %v22038_v2 = vld [vmem:[#allocation9 + $0x6c8] ss:$28 sps:$4 sm:$0xff]  }
 0x686   : > { %20066 = vmatprep.subr.bf16.mxu0 %v21996_v52  ;;  %v22042_v52 = vld [vmem:[#allocation9 + $0x440] ss:$28 sps:$4 sm:$0xff]  }
 0x688   : > { %8868 = vmatpush1.bf16.msra.mxu1 %v21993_v24  ;;  %v22045_v24 = vld [vmem:[#allocation9 + $0x704] ss:$28 sps:$4 sm:$0xff]  }
 0x689   : > { %20067 = vmatpush3.bf16.msra.mxu0 %v21997_v43  ;;  %8869 = vmatprep.subr.bf16.mxu1 %v22000_v38  ;;  %v22046_v43 = vld [vmem:[#allocation9 + $0x638] ss:$28 sps:$4 sm:$0xff]   ;;  %v22043_v38 = vld [vmem:[#allocation9 + $0x700] ss:$28 sps:$4 sm:$0xff]  }
 0x68a   : > { %20068 = vmatprep.subr.bf16.mxu0 %v22001_v50  ;;  %v22047_v50 = vld [vmem:[#allocation9 + $0x478] ss:$28 sps:$4 sm:$0xff]  }
 0x68c   : > { %8870 = vmatpush1.bf16.msra.mxu1 %v21998_v39  ;;  %v22050_v39 = vld [vmem:[#allocation9 + $0x73c] ss:$28 sps:$4 sm:$0xff]  }
 0x68d   : > { %20069 = vmatpush3.bf16.msra.mxu0 %v22002_v22  ;;  %8871 = vmatprep.subr.bf16.mxu1 %v22005_v20  ;;  %v22051_v22 = vld [vmem:[#allocation9 + $0x670] ss:$28 sps:$4 sm:$0xff]   ;;  %v22048_v20 = vld [vmem:[#allocation9 + $0x738] ss:$28 sps:$4 sm:$0xff]  }
 0x68e   : > { %20070 = vmatprep.subr.bf16.mxu0 %v22006_v5  ;;  %v22052_v5 = vld [vmem:[#allocation9 + $0x4b0] ss:$28 sps:$4 sm:$0xff]  }
 0x690   : > { %8872 = vmatpush1.bf16.msra.mxu1 %v22003_v57  ;;  %v22055_v57 = vld [vmem:[#allocation9 + $0x774] ss:$28 sps:$4 sm:$0xff]  }
 0x691   : > { %20071 = vmatpush3.bf16.msra.mxu0 %v22007_v16  ;;  %8873 = vmatprep.subr.bf16.mxu1 %v22010_v12  ;;  %v22056_v12 = vld [vmem:[#allocation9 + $0x6a8] ss:$28 sps:$4 sm:$0xff]  }
 0x692   : > { %v20029_v62 = vpop.f32.mrb[44].mxu0  ;;  %20072 = vmatprep.subr.bf16.mxu0 %v22011_v0 }
 0x693   : > { %v20030_v11 = vpop.f32.mrb[45].mxu0 }
 0x694   : > { %v25858_v36 = vadd.f32 %v20030_v11, %v20029_v62  ;;  %v20032_v63 = vpop.f32.mrb[46].mxu0  ;;  %8874 = vmatpush1.bf16.msra.mxu1 %v22008_v15  ;;  %v22060_v11 = vld [vmem:[#allocation9 + $0x7ac] ss:$28 sps:$4 sm:$0xff]  }
 0x695   : > { %20073 = vmatpush3.bf16.msra.mxu0 %v22012_v56  ;;  %v20033_v41 = vpop.f32.mrb[47].mxu0  ;;  %8875 = vmatprep.subr.bf16.mxu1 %v22015_v8  ;;  %v22053_v8 = vld [vmem:[#allocation9 + $0x770] ss:$28 sps:$4 sm:$0xff]  }
 0x696   : > { %v25860_v27 = vadd.f32 %v20033_v41, %v20032_v63  ;;  %20074 = vmatprep.subr.bf16.mxu0 %v22016_v59  ;;  %v22057_v59 = vld [vmem:[#allocation9 + $0x4e8] ss:$28 sps:$4 sm:$0xff]  }
 0x698   : > { %8876 = vmatpush1.bf16.msra.mxu1 %v22013_v31  ;;  %v22061_v31 = vld [vmem:[#allocation9 + $0x6e0] ss:$28 sps:$4 sm:$0xff]  }
 0x699   : > { %20075 = vmatpush3.bf16.msra.mxu0 %v22017_v26  ;;  %8877 = vmatprep.subr.bf16.mxu1 %v22020_v25  ;;  %v22058_v26 = vld [vmem:[#allocation9 + $0x7a8] ss:$28 sps:$4 sm:$0xff]  }
 0x69a   : > { %20076 = vmatprep.subr.bf16.mxu0 %v22021_v47  ;;  %v22062_v47 = vld [vmem:[#allocation9 + $0x520] ss:$28 sps:$4 sm:$0xff]  }
 0x69c   : > { %8878 = vmatpush1.bf16.msra.mxu1 %v22018_v45  ;;  %v22065_v45 = vld [vmem:[#allocation9 + $0x14] ss:$28 sps:$4 sm:$0xff]  }
 0x69d   : > { %20077 = vmatpush3.bf16.msra.mxu0 %v22022_v18  ;;  %8879 = vmatprep.subr.bf16.mxu1 %v22025_v44  ;;  %v22063_v18 = vld [vmem:[#allocation9 + $0x10] ss:$28 sps:$4 sm:$0xff]   ;;  %v22066_v44 = vld [vmem:[#allocation9 + $0x718] ss:$28 sps:$4 sm:$0xff]  }
 0x69e   : > { %20084 = vmatprep.subr.bf16.mxu0 %v22026_v17  ;;  %v22069_v17 = vld [vmem:[#allocation9 + $0x4c] ss:$28 sps:$4 sm:$0xff]  }
 0x6a0   : > { %9232 = vmatmul.mubr.bf16.vlgmr.msra.gmra.mrb[56].mxu0 %v25736_v34  ;;  %8880 = vmatpush1.bf16.msra.mxu1 %v22023_v4  ;;  %v22073_v4 = vld [vmem:[#allocation9 + $0x84] ss:$28 sps:$4 sm:$0xff]  }
 0x6a1   : > { %20085 = vmatpush3.bf16.msra.mxu0 %v22027_v42  ;;  %9272 = vmatprep.mubr.bf16.mxu0 %v25776_v33 }
 0x6a2   : > { %8881 = vmatprep.subr.bf16.mxu1 %v22030_v30  ;;  %20086 = vmatprep.subr.bf16.mxu0 %v22031_v29 }
 0x6a4   : > { %8882 = vmatpush1.bf16.msra.mxu1 %v22028_v10  ;;  %v22071_v10 = vld [vmem:[#allocation9 + $0x80] ss:$28 sps:$4 sm:$0xff]  }
 0x6a5   : > { %20087 = vmatpush3.bf16.msra.mxu0 %v22032_v51  ;;  %8883 = vmatprep.subr.bf16.mxu1 %v22035_v28  ;;  %v22074_v28 = vld [vmem:[#allocation9 + $0x788] ss:$28 sps:$4 sm:$0xff]  }
 0x6a6   : > { %20088 = vmatprep.subr.bf16.mxu0 %v22036_v19  ;;  %v22077_v19 = vld [vmem:[#allocation9 + $0xbc] ss:$28 sps:$4 sm:$0xff]  }
 0x6a8   : > { %8884 = vmatpush1.bf16.msra.mxu1 %v22033_v58 }
 0x6a9   : > { %20089 = vmatpush3.bf16.msra.mxu0 %v22037_v55  ;;  %8885 = vmatprep.subr.bf16.mxu1 %v22040_v32  ;;  %v22075_v32 = vld [vmem:[#allocation9 + $0xb8] ss:$28 sps:$4 sm:$0xff]  }
 0x6aa   : > { %20090 = vmatprep.subr.bf16.mxu0 %v22041_v60  ;;  %v22078_v60 = vld [vmem:[#allocation9 + $0x7c0] ss:$28 sps:$4 sm:$0xff]  }
 0x6ac   : > { %8886 = vmatpush1.bf16.msra.mxu1 %v22038_v2  ;;  %v22081_v2 = vld [vmem:[#allocation9 + $0xf4] ss:$28 sps:$4 sm:$0xff]  }
 0x6ad   : > { %20091 = vmatpush3.bf16.msra.mxu0 %v22042_v52  ;;  %8898 = vmatprep.subr.bf16.mxu1 %v22045_v24  ;;  %v22084_v52 = vld [vmem:[#allocation9 + $0xfcc] ss:$28 sps:$4 sm:$0xff]  }
 0x6ae   : > { %20092 = vmatprep.subr.bf16.mxu0 %v22046_v43  ;;  %v22079_v24 = vld [vmem:[#allocation9 + $0xf0] ss:$28 sps:$4 sm:$0xff]   ;;  %v22082_v43 = vld [vmem:[#allocation9 + $0xfc8] ss:$28 sps:$4 sm:$0xff]  }
 0x6af   : > { %8888 = vmatmul.mubr.bf16.vlgmr.msra.gmra.mrb[76].mxu1 %v25774_v21 }
 0x6b0   : > { %8899 = vmatpush1.bf16.msra.mxu1 %v22043_v38  ;;  %8930 = vmatprep.mubr.bf16.mxu1 %v27021_v13  ;;  %v22087_v38 = vld [vmem:[#allocation9 + $0x12c] ss:$28 sps:$4 sm:$0xff]  }
 0x6b1   : > { %20093 = vmatpush3.bf16.msra.mxu0 %v22047_v50  ;;  %8900 = vmatprep.subr.bf16.mxu1 %v22050_v39  ;;  %v22090_v50 = vld [vmem:[#allocation9 + $0x1004] ss:$28 sps:$4 sm:$0xff]   ;;  %v25883_v39 = vrot.slane %v25738_v23, 1 }
 0x6b2   : > { %v20051_v16 = vpop.f32.mrb[48].mxu0  ;;  %20094 = vmatprep.subr.bf16.mxu0 %v22051_v22  ;;  %v22085_v22 = vld [vmem:[#allocation9 + $0x128] ss:$28 sps:$4 sm:$0xff]  }
 0x6b3   : > { %v20052_v0 = vpop.f32.mrb[49].mxu0 }
 0x6b4   : > { %v20053_v15 = vadd.f32 %v20052_v0, %v20051_v16  ;;  %v20054_v56 = vpop.f32.mrb[50].mxu0  ;;  %8901 = vmatpush1.bf16.msra.mxu1 %v22048_v20  ;;  %v22088_v20 = vld [vmem:[#allocation9 + $0x1000] ss:$28 sps:$4 sm:$0xff]  }
 0x6b5   : > { %20095 = vmatpush3.bf16.msra.mxu0 %v22052_v5  ;;  %v20055_v62 = vpop.f32.mrb[51].mxu0  ;;  %8902 = vmatprep.subr.bf16.mxu1 %v22055_v57  ;;  %v22093_v5 = vld [vmem:[#allocation9 + $0x164] ss:$28 sps:$4 sm:$0xff]   ;;  %v22096_v57 = vld [vmem:[#allocation9 + $0x103c] ss:$28 sps:$4 sm:$0xff]  }
 0x6b6   : > { %v20056_v63 = vadd.f32 %v20055_v62, %v20054_v56  ;;  %20096 = vmatprep.subr.bf16.mxu0 %v22056_v12  ;;  %v7467_v41 = vadd.f32 %v20053_v15, %v25858_v36  ;;  %v22067_v36 = vld [vmem:[#allocation9 + $0x48] ss:$28 sps:$4 sm:$0xff]   ;;  %v22091_v16 = vld [vmem:[#allocation9 + $0x160] ss:$28 sps:$4 sm:$0xff]   ;;  %v22094_v12 = vld [vmem:[#allocation9 + $0x1038] ss:$28 sps:$4 sm:$0xff]  }
 0x6b7   : > { %v22099_v0 = vld [vmem:[#allocation9 + $0x19c] ss:$28 sps:$4 sm:$0xff]   ;;  %v22102_v15 = vld [vmem:[#allocation9 + $0x1074] ss:$28 sps:$4 sm:$0xff]  }
 0x6b8   : > { %8903 = vmatpush1.bf16.msra.mxu1 %v22053_v8  ;;  %v7470_v25 = vadd.f32 %v20056_v63, %v25860_v27  ;;  %v22070_v27 = vld [vmem:[#allocation9 + $0x750] ss:$28 sps:$4 sm:$0xff]   ;;  %v22097_v56 = vld [vmem:[#allocation9 + $0x198] ss:$28 sps:$4 sm:$0xff]   ;;  %v22106_v63 = vld [vmem:[#allocation9 + $0x10a8] ss:$28 sps:$4 sm:$0xff]  }
 0x6b9   : > { %20097 = vmatpush3.bf16.msra.mxu0 %v22057_v59  ;;  %8904 = vmatprep.subr.bf16.mxu1 %v22060_v11  ;;  %v22100_v8 = vld [vmem:[#allocation9 + $0x1070] ss:$28 sps:$4 sm:$0xff]  }
 0x6ba   : > { %20098 = vmatprep.subr.bf16.mxu0 %v22061_v31  ;;  %v22105_v62 = vld [vmem:[#allocation9 + $0x1d4] ss:$28 sps:$4 sm:$0xff]   ;;  %v22108_v59 = vld [vmem:[#allocation9 + $0x10ac] ss:$28 sps:$4 sm:$0xff]  }
 0x6bb   : > { %v22103_v11 = vld [vmem:[#allocation9 + $0x1d0] ss:$28 sps:$4 sm:$0xff]  }
 0x6bc   : > { %8905 = vmatpush1.bf16.msra.mxu1 %v22058_v26  ;;  %v22111_v31 = vld [vmem:[#allocation9 + $0x20c] ss:$28 sps:$4 sm:$0xff]  }
 0x6bd   : > { %20099 = vmatpush3.bf16.msra.mxu0 %v22062_v47  ;;  %9070 = vmatprep.subr.bf16.mxu1 %v22065_v45  ;;  %v22109_v26 = vld [vmem:[#allocation9 + $0x208] ss:$28 sps:$4 sm:$0xff]   ;;  %v22120_v45 = vld [vmem:[#allocation9 + $0x111c] ss:$28 sps:$4 sm:$0xff]  }
 0x6be   : > { %20340 = vmatprep.subr.bf16.mxu0 %v23854_v53  ;;  %v22117_v47 = vld [vmem:[#allocation9 + $0x244] ss:$28 sps:$4 sm:$0xff]  }
 0x6bf   : > { %18887 = vmatmul.mubr.msk.bf16.vlgmr.msra.gmra.mrb[76].mxu1 %vm7000_vm8, %v25811_v37 }
 0x6c0   : > { %9273 = vmatmul.mubr.bf16.vlgmr.msra.gmra.mrb[60].mxu0 %v25774_v21  ;;  %9071 = vmatpush1.bf16.msra.mxu1 %v22063_v18  ;;  %v22115_v18 = vld [vmem:[#allocation9 + $0x240] ss:$28 sps:$4 sm:$0xff]  }
 0x6c1   : > { %9102 = vmatprep.mubr.bf16.mxu1 %v25738_v23  ;;  %20341 = vmatpush3.bf16.msra.mxu0 %v22066_v44  ;;  %v22118_v44 = vld [vmem:[#allocation9 + $0x1118] ss:$28 sps:$4 sm:$0xff]  }
 0x6c2   : > { %9072 = vmatprep.subr.bf16.mxu1 %v22069_v17  ;;  %20342 = vmatprep.subr.bf16.mxu0 %v23854_v53  ;;  %v22123_v17 = vld [vmem:[#allocation9 + $0x27c] ss:$28 sps:$4 sm:$0xff]  }
 0x6c3   : > { %v7507_v42 = vpop.f32.mrb[52].mxu0  ;;  %20348 = vmatprep.mubr.msk.bf16.mxu0 %vm23855_vm9, %v23854_v53 }
 0x6c4   : > { %v25876_v30 = vadd.f32 %v7507_v42, %v7467_v41  ;;  %v20338_v29 = vpop.f32.mrb[53].mxu0  ;;  %9073 = vmatpush1.bf16.msra.mxu1 %v22067_v36  ;;  %v22114_v41 = vld [vmem:[#allocation9 + $0x10e4] ss:$28 sps:$4 sm:$0xff]   ;;  %v22126_v36 = vld [vmem:[#allocation9 + $0x1154] ss:$28 sps:$4 sm:$0xff]  }
 0x6c5   : > { %v7510_v51 = vpop.f32.mrb[54].mxu0  ;;  %20343 = vmatpush3.bf16.msra.mxu0 %v22070_v27  ;;  %9074 = vmatprep.subr.bf16.mxu1 %v22073_v4  ;;  %v22121_v27 = vld [vmem:[#allocation9 + $0x278] ss:$28 sps:$4 sm:$0xff]   ;;  %v22124_v4 = vld [vmem:[#allocation9 + $0x1150] ss:$28 sps:$4 sm:$0xff]  }
 0x6c6   : > { %v25878_v58 = vadd.f32 %v7510_v51, %v7470_v25  ;;  %v20339_v55 = vpop.f32.mrb[55].mxu0  ;;  %20344 = vmatprep.subr.bf16.mxu0 %v23854_v53  ;;  %v22112_v25 = vld [vmem:[#allocation9 + $0x10e0] ss:$28 sps:$4 sm:$0xff]   ;;  %v22129_v42 = vld [vmem:[#allocation9 + $0x2b4] ss:$28 sps:$4 sm:$0xff]  }
 0x6c7   : > { %v22132_v29 = vld [vmem:[#allocation9 + $0x118c] ss:$28 sps:$4 sm:$0xff]  }
 0x6c8   : > { %9075 = vmatpush1.bf16.msra.mxu1 %v22071_v10  ;;  %v22127_v10 = vld [vmem:[#allocation9 + $0x2b0] ss:$28 sps:$4 sm:$0xff]   ;;  %v22130_v51 = vld [vmem:[#allocation9 + $0x1188] ss:$28 sps:$4 sm:$0xff]  }
 0x6c9   : > { %20345 = vmatpush3.bf16.msra.mxu0 %v22074_v28  ;;  %9076 = vmatprep.subr.bf16.mxu1 %v22077_v19  ;;  %v22135_v28 = vld [vmem:[#allocation9 + $0x2ec] ss:$28 sps:$4 sm:$0xff]   ;;  %v22138_v19 = vld [vmem:[#allocation9 + $0x11c4] ss:$28 sps:$4 sm:$0xff]  }
 0x6ca   : > { %20346 = vmatprep.subr.bf16.mxu0 %v23854_v53  ;;  %v22133_v55 = vld [vmem:[#allocation9 + $0x2e8] ss:$28 sps:$4 sm:$0xff]  }
 0x6cc   : > { %9077 = vmatpush1.bf16.msra.mxu1 %v22075_v32  ;;  %v22136_v32 = vld [vmem:[#allocation9 + $0x11c0] ss:$28 sps:$4 sm:$0xff]  }
 0x6cd   : > { %20347 = vmatpush3.bf16.msra.mxu0 %v22078_v60  ;;  %9078 = vmatprep.subr.bf16.mxu1 %v22081_v2  ;;  %v22141_v60 = vld [vmem:[#allocation9 + $0x324] ss:$28 sps:$4 sm:$0xff]   ;;  %v22144_v2 = vld [vmem:[#allocation9 + $0x11fc] ss:$28 sps:$4 sm:$0xff]  }
 0x6ce   : > { %11053 = vmatprep.subr.bf16.mxu0 %v22084_v52  ;;  %v22139_v52 = vld [vmem:[#allocation9 + $0x320] ss:$28 sps:$4 sm:$0xff]  }
 0x6d0   : > { %20349 = vmatmul.mubr.msk.bf16.vlgmr.msra.gmra.mrb[64].mxu0 %vm7000_vm8, %v25811_v37  ;;  %9079 = vmatpush1.bf16.msra.mxu1 %v22079_v24  ;;  %v22142_v24 = vld [vmem:[#allocation9 + $0x11f8] ss:$28 sps:$4 sm:$0xff]  }
 0x6d1   : > { %11054 = vmatpush1.bf16.msra.mxu0 %v22082_v43  ;;  %11085 = vmatprep.mubr.bf16.mxu0 %v25883_v39  ;;  %v22147_v43 = vld [vmem:[#allocation9 + $0x35c] ss:$28 sps:$4 sm:$0xff]  }
 0x6d2   : > { %9080 = vmatprep.subr.bf16.mxu1 %v22087_v38  ;;  %11055 = vmatprep.subr.bf16.mxu0 %v22090_v50  ;;  %v22150_v38 = vld [vmem:[#allocation9 + $0x1234] ss:$28 sps:$4 sm:$0xff]  }
 0x6d3   : > { %v22145_v50 = vld [vmem:[#allocation9 + $0x358] ss:$28 sps:$4 sm:$0xff]  }
 0x6d4   : > { %9081 = vmatpush1.bf16.msra.mxu1 %v22085_v22  ;;  %v22148_v22 = vld [vmem:[#allocation9 + $0x1230] ss:$28 sps:$4 sm:$0xff]  }
 0x6d5   : > { %11056 = vmatpush1.bf16.msra.mxu0 %v22088_v20  ;;  %9082 = vmatprep.subr.bf16.mxu1 %v22093_v5  ;;  %v22153_v20 = vld [vmem:[#allocation9 + $0x394] ss:$28 sps:$4 sm:$0xff]   ;;  %v22156_v5 = vld [vmem:[#allocation9 + $0x126c] ss:$28 sps:$4 sm:$0xff]  }
 0x6d6   : > { %11057 = vmatprep.subr.bf16.mxu0 %v22096_v57  ;;  %v22151_v57 = vld [vmem:[#allocation9 + $0x390] ss:$28 sps:$4 sm:$0xff]  }
 0x6d8   : > { %9083 = vmatpush1.bf16.msra.mxu1 %v22091_v16  ;;  %v22154_v16 = vld [vmem:[#allocation9 + $0x1268] ss:$28 sps:$4 sm:$0xff]  }
 0x6d9   : > { %11058 = vmatpush1.bf16.msra.mxu0 %v22094_v12  ;;  %9084 = vmatprep.subr.bf16.mxu1 %v22099_v0  ;;  %v22159_v12 = vld [vmem:[#allocation9 + $0x3cc] ss:$28 sps:$4 sm:$0xff]   ;;  %v22162_v0 = vld [vmem:[#allocation9 + $0x12a4] ss:$28 sps:$4 sm:$0xff]  }
 0x6da   : > { %11059 = vmatprep.subr.bf16.mxu0 %v22102_v15  ;;  %v22157_v15 = vld [vmem:[#allocation9 + $0x3c8] ss:$28 sps:$4 sm:$0xff]  }
 0x6dc   : > { %9085 = vmatpush1.bf16.msra.mxu1 %v22097_v56  ;;  %v22160_v56 = vld [vmem:[#allocation9 + $0x12a0] ss:$28 sps:$4 sm:$0xff]  }
 0x6dd   : > { %11060 = vmatpush1.bf16.msra.mxu0 %v22100_v8  ;;  %9086 = vmatprep.subr.bf16.mxu1 %v22105_v62  ;;  %v22165_v8 = vld [vmem:[#allocation9 + $0x404] ss:$28 sps:$4 sm:$0xff]   ;;  %v22168_v62 = vld [vmem:[#allocation9 + $0x12dc] ss:$28 sps:$4 sm:$0xff]  }
 0x6de   : > { %11061 = vmatprep.subr.bf16.mxu0 %v22108_v59  ;;  %v22163_v59 = vld [vmem:[#allocation9 + $0x400] ss:$28 sps:$4 sm:$0xff]  }
 0x6e0   : > { %9087 = vmatpush1.bf16.msra.mxu1 %v22103_v11  ;;  %v22166_v11 = vld [vmem:[#allocation9 + $0x12d8] ss:$28 sps:$4 sm:$0xff]  }
 0x6e1   : > { %11062 = vmatpush1.bf16.msra.mxu0 %v22106_v63  ;;  %9088 = vmatprep.subr.bf16.mxu1 %v22111_v31  ;;  %v22171_v63 = vld [vmem:[#allocation9 + $0x43c] ss:$28 sps:$4 sm:$0xff]   ;;  %v22174_v31 = vld [vmem:[#allocation9 + $0x1314] ss:$28 sps:$4 sm:$0xff]  }
 0x6e2   : > { %11063 = vmatprep.subr.bf16.mxu0 %v22114_v41  ;;  %v22169_v41 = vld [vmem:[#allocation9 + $0x438] ss:$28 sps:$4 sm:$0xff]  }
 0x6e4   : > { %9089 = vmatpush1.bf16.msra.mxu1 %v22109_v26  ;;  %v22172_v26 = vld [vmem:[#allocation9 + $0x1310] ss:$28 sps:$4 sm:$0xff]  }
 0x6e5   : > { %11064 = vmatpush1.bf16.msra.mxu0 %v22112_v25  ;;  %9090 = vmatprep.subr.bf16.mxu1 %v22117_v47  ;;  %v22177_v25 = vld [vmem:[#allocation9 + $0x474] ss:$28 sps:$4 sm:$0xff]   ;;  %v22180_v47 = vld [vmem:[#allocation9 + $0x134c] ss:$28 sps:$4 sm:$0xff]  }
 0x6e6   : > { %11065 = vmatprep.subr.bf16.mxu0 %v22120_v45  ;;  %v22175_v45 = vld [vmem:[#allocation9 + $0x470] ss:$28 sps:$4 sm:$0xff]  }
 0x6e8   : > { %9091 = vmatpush1.bf16.msra.mxu1 %v22115_v18  ;;  %v22178_v18 = vld [vmem:[#allocation9 + $0x1348] ss:$28 sps:$4 sm:$0xff]  }
 0x6e9   : > { %11066 = vmatpush1.bf16.msra.mxu0 %v22118_v44  ;;  %9092 = vmatprep.subr.bf16.mxu1 %v22123_v17  ;;  %v25891_v44 = vrot.slane %v25736_v34, 1  ;;  %v22183_v17 = vld [vmem:[#allocation9 + $0x4ac] ss:$28 sps:$4 sm:$0xff]  }
 0x6ea   : > { %11067 = vmatprep.subr.bf16.mxu0 %v22126_v36  ;;  %v22186_v36 = vld [vmem:[#allocation9 + $0x1384] ss:$28 sps:$4 sm:$0xff]  }
 0x6ec   : > { %9093 = vmatpush1.bf16.msra.mxu1 %v22121_v27  ;;  %v25894_v27 = vrot.slane %v25776_v33, 1 }
 0x6ed   : > { %11068 = vmatpush1.bf16.msra.mxu0 %v22124_v4  ;;  %9094 = vmatprep.subr.bf16.mxu1 %v22129_v42  ;;  %v22181_v4 = vld [vmem:[#allocation9 + $0x4a8] ss:$28 sps:$4 sm:$0xff]   ;;  %v22184_v42 = vld [vmem:[#allocation9 + $0x1380] ss:$28 sps:$4 sm:$0xff]  }
 0x6ee   : > { %11069 = vmatprep.subr.bf16.mxu0 %v22132_v29  ;;  %v22189_v29 = vld [vmem:[#allocation9 + $0x4e4] ss:$28 sps:$4 sm:$0xff]  }
 0x6f0   : > { %9095 = vmatpush1.bf16.msra.mxu1 %v22127_v10  ;;  %v22192_v10 = vld [vmem:[#allocation9 + $0x13bc] ss:$28 sps:$4 sm:$0xff]  }
 0x6f1   : > { %11070 = vmatpush1.bf16.msra.mxu0 %v22130_v51  ;;  %9096 = vmatprep.subr.bf16.mxu1 %v22135_v28  ;;  %v22187_v51 = vld [vmem:[#allocation9 + $0x4e0] ss:$28 sps:$4 sm:$0xff]   ;;  %v22190_v28 = vld [vmem:[#allocation9 + $0x13b8] ss:$28 sps:$4 sm:$0xff]  }
 0x6f2   : > { %11071 = vmatprep.subr.bf16.mxu0 %v22138_v19  ;;  %v22195_v19 = vld [vmem:[#allocation9 + $0x51c] ss:$28 sps:$4 sm:$0xff]  }
 0x6f4   : > { %9097 = vmatpush1.bf16.msra.mxu1 %v22133_v55  ;;  %v22198_v55 = vld [vmem:[#allocation9 + $0x13f4] ss:$28 sps:$4 sm:$0xff]  }
 0x6f5   : > { %11072 = vmatpush1.bf16.msra.mxu0 %v22136_v32  ;;  %9098 = vmatprep.subr.bf16.mxu1 %v22141_v60  ;;  %v22193_v32 = vld [vmem:[#allocation9 + $0x518] ss:$28 sps:$4 sm:$0xff]   ;;  %v22196_v60 = vld [vmem:[#allocation9 + $0x13f0] ss:$28 sps:$4 sm:$0xff]  }
 0x6f6   : > { %11073 = vmatprep.subr.bf16.mxu0 %v22144_v2  ;;  %v22201_v2 = vld [vmem:[#allocation9 + $0x554] ss:$28 sps:$4 sm:$0xff]  }
 0x6f8   : > { %9099 = vmatpush1.bf16.msra.mxu1 %v22139_v52  ;;  %v22204_v52 = vld [vmem:[#allocation9 + $0x142c] ss:$28 sps:$4 sm:$0xff]  }
 0x6f9   : > { %11074 = vmatpush1.bf16.msra.mxu0 %v22142_v24  ;;  %9100 = vmatprep.subr.bf16.mxu1 %v22147_v43  ;;  %v22199_v24 = vld [vmem:[#allocation9 + $0x550] ss:$28 sps:$4 sm:$0xff]   ;;  %v22202_v43 = vld [vmem:[#allocation9 + $0x1428] ss:$28 sps:$4 sm:$0xff]  }
 0x6fa   : > { %11075 = vmatprep.subr.bf16.mxu0 %v22150_v38  ;;  %v22207_v38 = vld [vmem:[#allocation9 + $0x58c] ss:$28 sps:$4 sm:$0xff]  }
 0x6fc   : > { %9101 = vmatpush1.bf16.msra.mxu1 %v22145_v50  ;;  %v22210_v50 = vld [vmem:[#allocation9 + $0x1464] ss:$28 sps:$4 sm:$0xff]  }
 0x6fd   : > { %11076 = vmatpush1.bf16.msra.mxu0 %v22148_v22  ;;  %9113 = vmatprep.subr.bf16.mxu1 %v22153_v20  ;;  %v22205_v22 = vld [vmem:[#allocation9 + $0x588] ss:$28 sps:$4 sm:$0xff]   ;;  %v22208_v20 = vld [vmem:[#allocation9 + $0x1460] ss:$28 sps:$4 sm:$0xff]  }
 0x6fe   : > { %11077 = vmatprep.subr.bf16.mxu0 %v22156_v5  ;;  %v22213_v5 = vld [vmem:[#allocation9 + $0x5c4] ss:$28 sps:$4 sm:$0xff]  }
 0x6ff   : > { %9103 = vmatmul.mubr.bf16.vlgmr.msra.gmra.mrb[80].mxu1 %v25736_v34 }
 0x700   : > { %9114 = vmatpush1.bf16.msra.mxu1 %v22151_v57  ;;  %9145 = vmatprep.mubr.bf16.mxu1 %v25776_v33  ;;  %v22216_v57 = vld [vmem:[#allocation9 + $0x149c] ss:$28 sps:$4 sm:$0xff]  }
 0x701   : > { %11078 = vmatpush1.bf16.msra.mxu0 %v22154_v16  ;;  %9115 = vmatprep.subr.bf16.mxu1 %v22159_v12  ;;  %v22211_v16 = vld [vmem:[#allocation9 + $0x5c0] ss:$28 sps:$4 sm:$0xff]   ;;  %v22214_v12 = vld [vmem:[#allocation9 + $0x1498] ss:$28 sps:$4 sm:$0xff]  }
 0x702   : > { %11079 = vmatprep.subr.bf16.mxu0 %v22162_v0  ;;  %v22219_v0 = vld [vmem:[#allocation9 + $0x5fc] ss:$28 sps:$4 sm:$0xff]  }
 0x704   : > { %9116 = vmatpush1.bf16.msra.mxu1 %v22157_v15  ;;  %v22222_v15 = vld [vmem:[#allocation9 + $0x14d4] ss:$28 sps:$4 sm:$0xff]  }
 0x705   : > { %11080 = vmatpush1.bf16.msra.mxu0 %v22160_v56  ;;  %9117 = vmatprep.subr.bf16.mxu1 %v22165_v8  ;;  %v22217_v56 = vld [vmem:[#allocation9 + $0x5f8] ss:$28 sps:$4 sm:$0xff]   ;;  %v22220_v8 = vld [vmem:[#allocation9 + $0x14d0] ss:$28 sps:$4 sm:$0xff]  }
 0x706   : > { %11081 = vmatprep.subr.bf16.mxu0 %v22168_v62  ;;  %v22225_v62 = vld [vmem:[#allocation9 + $0x634] ss:$28 sps:$4 sm:$0xff]  }
 0x708   : > { %9118 = vmatpush1.bf16.msra.mxu1 %v22163_v59  ;;  %v22228_v59 = vld [vmem:[#allocation9 + $0x150c] ss:$28 sps:$4 sm:$0xff]  }
 0x709   : > { %11082 = vmatpush1.bf16.msra.mxu0 %v22166_v11  ;;  %9119 = vmatprep.subr.bf16.mxu1 %v22171_v63  ;;  %v22223_v11 = vld [vmem:[#allocation9 + $0x630] ss:$28 sps:$4 sm:$0xff]   ;;  %v22226_v63 = vld [vmem:[#allocation9 + $0x1508] ss:$28 sps:$4 sm:$0xff]  }
 0x70a   : > { %11083 = vmatprep.subr.bf16.mxu0 %v22174_v31  ;;  %v22231_v31 = vld [vmem:[#allocation9 + $0x66c] ss:$28 sps:$4 sm:$0xff]  }
 0x70c   : > { %9120 = vmatpush1.bf16.msra.mxu1 %v22169_v41  ;;  %v22234_v41 = vld [vmem:[#allocation9 + $0x1544] ss:$28 sps:$4 sm:$0xff]  }
 0x70d   : > { %11084 = vmatpush1.bf16.msra.mxu0 %v22172_v26  ;;  %9121 = vmatprep.subr.bf16.mxu1 %v22177_v25  ;;  %v22229_v26 = vld [vmem:[#allocation9 + $0x668] ss:$28 sps:$4 sm:$0xff]   ;;  %v22232_v25 = vld [vmem:[#allocation9 + $0x1540] ss:$28 sps:$4 sm:$0xff]  }
 0x70e   : > { %11096 = vmatprep.subr.bf16.mxu0 %v22180_v47  ;;  %v22237_v47 = vld [vmem:[#allocation9 + $0x6a4] ss:$28 sps:$4 sm:$0xff]  }
 0x710   : > { %11086 = vmatmul.mubr.bf16.vlgmr.msra.gmra.mrb[40].mxu0 %v25891_v44  ;;  %9122 = vmatpush1.bf16.msra.mxu1 %v22175_v45  ;;  %v22240_v45 = vld [vmem:[#allocation9 + $0x157c] ss:$28 sps:$4 sm:$0xff]  }
 0x711   : > { %11097 = vmatpush1.bf16.msra.mxu0 %v22178_v18  ;;  %11128 = vmatprep.mubr.bf16.mxu0 %v25894_v27  ;;  %v22235_v18 = vld [vmem:[#allocation9 + $0x6a0] ss:$28 sps:$4 sm:$0xff]  }
 0x712   : > { %9123 = vmatprep.subr.bf16.mxu1 %v22183_v17  ;;  %11098 = vmatprep.subr.bf16.mxu0 %v22186_v36  ;;  %v22238_v17 = vld [vmem:[#allocation9 + $0x1578] ss:$28 sps:$4 sm:$0xff]  }
 0x713   : > { %v22243_v36 = vld [vmem:[#allocation9 + $0x6dc] ss:$28 sps:$4 sm:$0xff]  }
 0x714   : > { %9124 = vmatpush1.bf16.msra.mxu1 %v22181_v4  ;;  %v22246_v4 = vld [vmem:[#allocation9 + $0x15b4] ss:$28 sps:$4 sm:$0xff]  }
 0x715   : > { %11099 = vmatpush1.bf16.msra.mxu0 %v22184_v42  ;;  %9125 = vmatprep.subr.bf16.mxu1 %v22189_v29  ;;  %v22241_v42 = vld [vmem:[#allocation9 + $0x6d8] ss:$28 sps:$4 sm:$0xff]   ;;  %v22244_v29 = vld [vmem:[#allocation9 + $0x15b0] ss:$28 sps:$4 sm:$0xff]  }
 0x716   : > { %11100 = vmatprep.subr.bf16.mxu0 %v22192_v10  ;;  %v22249_v10 = vld [vmem:[#allocation9 + $0x714] ss:$28 sps:$4 sm:$0xff]  }
 0x718   : > { %9126 = vmatpush1.bf16.msra.mxu1 %v22187_v51  ;;  %v22252_v51 = vld [vmem:[#allocation9 + $0x15ec] ss:$28 sps:$4 sm:$0xff]  }
 0x719   : > { %11101 = vmatpush1.bf16.msra.mxu0 %v22190_v28  ;;  %9127 = vmatprep.subr.bf16.mxu1 %v22195_v19  ;;  %v22247_v28 = vld [vmem:[#allocation9 + $0x710] ss:$28 sps:$4 sm:$0xff]   ;;  %v22250_v19 = vld [vmem:[#allocation9 + $0x15e8] ss:$28 sps:$4 sm:$0xff]  }
 0x71a   : > { %11102 = vmatprep.subr.bf16.mxu0 %v22198_v55  ;;  %v22255_v55 = vld [vmem:[#allocation9 + $0x74c] ss:$28 sps:$4 sm:$0xff]  }
 0x71c   : > { %9128 = vmatpush1.bf16.msra.mxu1 %v22193_v32  ;;  %v22258_v32 = vld [vmem:[#allocation9 + $0x1624] ss:$28 sps:$4 sm:$0xff]  }
 0x71d   : > { %11103 = vmatpush1.bf16.msra.mxu0 %v22196_v60  ;;  %9129 = vmatprep.subr.bf16.mxu1 %v22201_v2  ;;  %v22253_v60 = vld [vmem:[#allocation9 + $0x748] ss:$28 sps:$4 sm:$0xff]   ;;  %v22256_v2 = vld [vmem:[#allocation9 + $0x1620] ss:$28 sps:$4 sm:$0xff]  }
 0x71e   : > { %11104 = vmatprep.subr.bf16.mxu0 %v22204_v52  ;;  %v22261_v52 = vld [vmem:[#allocation9 + $0x784] ss:$28 sps:$4 sm:$0xff]  }
 0x720   : > { %9130 = vmatpush1.bf16.msra.mxu1 %v22199_v24  ;;  %v22264_v24 = vld [vmem:[#allocation9 + $0x165c] ss:$28 sps:$4 sm:$0xff]  }
 0x721   : > { %11105 = vmatpush1.bf16.msra.mxu0 %v22202_v43  ;;  %9131 = vmatprep.subr.bf16.mxu1 %v22207_v38  ;;  %v22259_v43 = vld [vmem:[#allocation9 + $0x780] ss:$28 sps:$4 sm:$0xff]   ;;  %v22262_v38 = vld [vmem:[#allocation9 + $0x1658] ss:$28 sps:$4 sm:$0xff]  }
 0x722   : > { %11106 = vmatprep.subr.bf16.mxu0 %v22210_v50  ;;  %v22267_v50 = vld [vmem:[#allocation9 + $0x7bc] ss:$28 sps:$4 sm:$0xff]  }
 0x724   : > { %9132 = vmatpush1.bf16.msra.mxu1 %v22205_v22  ;;  %v22270_v22 = vld [vmem:[#allocation9 + $0x1694] ss:$28 sps:$4 sm:$0xff]  }
 0x725   : > { %11107 = vmatpush1.bf16.msra.mxu0 %v22208_v20  ;;  %9133 = vmatprep.subr.bf16.mxu1 %v22213_v5  ;;  %v22265_v20 = vld [vmem:[#allocation9 + $0x7b8] ss:$28 sps:$4 sm:$0xff]   ;;  %v22268_v5 = vld [vmem:[#allocation9 + $0x1690] ss:$28 sps:$4 sm:$0xff]  }
 0x726   : > { %11108 = vmatprep.subr.bf16.mxu0 %v22216_v57  ;;  %v22273_v57 = vld [vmem:[#allocation9 + $0xfc4] ss:$28 sps:$4 sm:$0xff]  }
 0x728   : > { %9134 = vmatpush1.bf16.msra.mxu1 %v22211_v16  ;;  %v22276_v16 = vld [vmem:[#allocation9 + $0x16cc] ss:$28 sps:$4 sm:$0xff]  }
 0x729   : > { %11109 = vmatpush1.bf16.msra.mxu0 %v22214_v12  ;;  %9135 = vmatprep.subr.bf16.mxu1 %v22219_v0  ;;  %v22271_v12 = vld [vmem:[#allocation9 + $0xfc0] ss:$28 sps:$4 sm:$0xff]   ;;  %v22274_v0 = vld [vmem:[#allocation9 + $0x16c8] ss:$28 sps:$4 sm:$0xff]  }
 0x72a   : > { %11110 = vmatprep.subr.bf16.mxu0 %v22222_v15  ;;  %v25901_v15 = vrot.slane %v25774_v21, 1 }
 0x72c   : > { %9136 = vmatpush1.bf16.msra.mxu1 %v22217_v56  ;;  %v22279_v56 = vld [vmem:[#allocation9 + $0xffc] ss:$28 sps:$4 sm:$0xff]  }
 0x72d   : > { %11111 = vmatpush1.bf16.msra.mxu0 %v22220_v8  ;;  %9137 = vmatprep.subr.bf16.mxu1 %v22225_v62  ;;  %v22282_v8 = vld [vmem:[#allocation9 + $0x1704] ss:$28 sps:$4 sm:$0xff]   ;;  %v22277_v62 = vld [vmem:[#allocation9 + $0xff8] ss:$28 sps:$4 sm:$0xff]  }
 0x72e   : > { %11112 = vmatprep.subr.bf16.mxu0 %v22228_v59  ;;  %v22280_v59 = vld [vmem:[#allocation9 + $0x1700] ss:$28 sps:$4 sm:$0xff]  }
 0x730   : > { %9138 = vmatpush1.bf16.msra.mxu1 %v22223_v11  ;;  %v22285_v11 = vld [vmem:[#allocation9 + $0x1034] ss:$28 sps:$4 sm:$0xff]  }
 0x731   : > { %11113 = vmatpush1.bf16.msra.mxu0 %v22226_v63  ;;  %9139 = vmatprep.subr.bf16.mxu1 %v22231_v31  ;;  %v22288_v63 = vld [vmem:[#allocation9 + $0x173c] ss:$28 sps:$4 sm:$0xff]   ;;  %v22283_v31 = vld [vmem:[#allocation9 + $0x1030] ss:$28 sps:$4 sm:$0xff]  }
 0x732   : > { %11114 = vmatprep.subr.bf16.mxu0 %v22234_v41  ;;  %v22286_v41 = vld [vmem:[#allocation9 + $0x1738] ss:$28 sps:$4 sm:$0xff]  }
 0x734   : > { %9140 = vmatpush1.bf16.msra.mxu1 %v22229_v26  ;;  %v22291_v26 = vld [vmem:[#allocation9 + $0x106c] ss:$28 sps:$4 sm:$0xff]  }
 0x735   : > { %11115 = vmatpush1.bf16.msra.mxu0 %v22232_v25  ;;  %9141 = vmatprep.subr.bf16.mxu1 %v22237_v47  ;;  %v22294_v25 = vld [vmem:[#allocation9 + $0x1774] ss:$28 sps:$4 sm:$0xff]   ;;  %v22289_v47 = vld [vmem:[#allocation9 + $0x1068] ss:$28 sps:$4 sm:$0xff]  }
 0x736   : > { %11116 = vmatprep.subr.bf16.mxu0 %v22240_v45  ;;  %v22292_v45 = vld [vmem:[#allocation9 + $0x1770] ss:$28 sps:$4 sm:$0xff]  }
 0x738   : > { %9142 = vmatpush1.bf16.msra.mxu1 %v22235_v18  ;;  %v22297_v18 = vld [vmem:[#allocation9 + $0x10a4] ss:$28 sps:$4 sm:$0xff]  }
 0x739   : > { %11117 = vmatpush1.bf16.msra.mxu0 %v22238_v17  ;;  %9143 = vmatprep.subr.bf16.mxu1 %v22243_v36  ;;  %v22298_v17 = vld [vmem:[#allocation9 + $0x1198] ss:$28 sps:$4 sm:$0xff]   ;;  %v22295_v36 = vld [vmem:[#allocation9 + $0x10a0] ss:$28 sps:$4 sm:$0xff]  }
 0x73a   : > { %11118 = vmatprep.subr.bf16.mxu0 %v22246_v4  ;;  %v22299_v4 = vld [vmem:[#allocation9 + $0xfd8] ss:$28 sps:$4 sm:$0xff]  }
 0x73c   : > { %9144 = vmatpush1.bf16.msra.mxu1 %v22241_v42  ;;  %v25909_v42 = vrot.slane %v25811_v37, 1 }
 0x73d   : > { %11119 = vmatpush1.bf16.msra.mxu0 %v22244_v29  ;;  %9156 = vmatprep.subr.bf16.mxu1 %v22249_v10  ;;  %v22302_v29 = vld [vmem:[#allocation9 + $0x10dc] ss:$28 sps:$4 sm:$0xff]   ;;  %v22303_v10 = vld [vmem:[#allocation9 + $0x11d0] ss:$28 sps:$4 sm:$0xff]  }
 0x73e   : > { %11120 = vmatprep.subr.bf16.mxu0 %v22252_v51  ;;  %v22300_v51 = vld [vmem:[#allocation9 + $0x10d8] ss:$28 sps:$4 sm:$0xff]  }
 0x73f   : > { %9146 = vmatmul.mubr.bf16.vlgmr.msra.gmra.mrb[80].mxu1 %v25774_v21 }
 0x740   : > { %9157 = vmatpush1.bf16.msra.mxu1 %v22247_v28  ;;  %9188 = vmatprep.mubr.bf16.mxu1 %v27021_v13  ;;  %v22304_v28 = vld [vmem:[#allocation9 + $0x1010] ss:$28 sps:$4 sm:$0xff]  }
 0x741   : > { %11121 = vmatpush1.bf16.msra.mxu0 %v22250_v19  ;;  %9158 = vmatprep.subr.bf16.mxu1 %v22255_v55  ;;  %v22307_v19 = vld [vmem:[#allocation9 + $0x1114] ss:$28 sps:$4 sm:$0xff]   ;;  %v22308_v55 = vld [vmem:[#allocation9 + $0x1208] ss:$28 sps:$4 sm:$0xff]  }
 0x742   : > { %11122 = vmatprep.subr.bf16.mxu0 %v22258_v32  ;;  %v22305_v32 = vld [vmem:[#allocation9 + $0x1110] ss:$28 sps:$4 sm:$0xff]  }
 0x744   : > { %9159 = vmatpush1.bf16.msra.mxu1 %v22253_v60  ;;  %v22309_v60 = vld [vmem:[#allocation9 + $0x1048] ss:$28 sps:$4 sm:$0xff]  }
 0x745   : > { %11123 = vmatpush1.bf16.msra.mxu0 %v22256_v2  ;;  %9160 = vmatprep.subr.bf16.mxu1 %v22261_v52  ;;  %v22312_v2 = vld [vmem:[#allocation9 + $0x114c] ss:$28 sps:$4 sm:$0xff]   ;;  %v22313_v52 = vld [vmem:[#allocation9 + $0x1240] ss:$28 sps:$4 sm:$0xff]  }
 0x746   : > { %11124 = vmatprep.subr.bf16.mxu0 %v22264_v24  ;;  %v22310_v24 = vld [vmem:[#allocation9 + $0x1148] ss:$28 sps:$4 sm:$0xff]  }
 0x748   : > { %9161 = vmatpush1.bf16.msra.mxu1 %v22259_v43  ;;  %v22314_v43 = vld [vmem:[#allocation9 + $0x1080] ss:$28 sps:$4 sm:$0xff]  }
 0x749   : > { %11125 = vmatpush1.bf16.msra.mxu0 %v22262_v38  ;;  %9162 = vmatprep.subr.bf16.mxu1 %v22267_v50  ;;  %v22317_v38 = vld [vmem:[#allocation9 + $0x1184] ss:$28 sps:$4 sm:$0xff]   ;;  %v22318_v50 = vld [vmem:[#allocation9 + $0x1278] ss:$28 sps:$4 sm:$0xff]  }
 0x74a   : > { %11126 = vmatprep.subr.bf16.mxu0 %v22270_v22  ;;  %v22315_v22 = vld [vmem:[#allocation9 + $0x1180] ss:$28 sps:$4 sm:$0xff]  }
 0x74c   : > { %9163 = vmatpush1.bf16.msra.mxu1 %v22265_v20  ;;  %v22319_v20 = vld [vmem:[#allocation9 + $0x10b8] ss:$28 sps:$4 sm:$0xff]  }
 0x74d   : > { %11127 = vmatpush1.bf16.msra.mxu0 %v22268_v5  ;;  %10924 = vmatprep.subr.bf16.mxu1 %v22273_v57  ;;  %v22322_v5 = vld [vmem:[#allocation9 + $0x11bc] ss:$28 sps:$4 sm:$0xff]   ;;  %v22323_v57 = vld [vmem:[#allocation9 + $0x12b0] ss:$28 sps:$4 sm:$0xff]  }
 0x74e   : > { %11139 = vmatprep.subr.bf16.mxu0 %v22276_v16  ;;  %v22320_v16 = vld [vmem:[#allocation9 + $0x11b8] ss:$28 sps:$4 sm:$0xff]  }
 0x74f   : > { %18889 = vmatmul.mubr.msk.bf16.vlgmr.msra.gmra.mrb[80].mxu1 %vm7000_vm8, %v25811_v37 }
 0x750   : > { %11129 = vmatmul.mubr.bf16.vlgmr.msra.gmra.mrb[40].mxu0 %v25901_v15  ;;  %10925 = vmatpush1.bf16.msra.mxu1 %v22271_v12  ;;  %v22324_v12 = vld [vmem:[#allocation9 + $0x10f0] ss:$28 sps:$4 sm:$0xff]  }
 0x751   : > { %10956 = vmatprep.mubr.bf16.mxu1 %v25883_v39  ;;  %11140 = vmatpush1.bf16.msra.mxu0 %v22274_v0  ;;  %v22327_v0 = vld [vmem:[#allocation9 + $0x11f4] ss:$28 sps:$4 sm:$0xff]  }
 0x752   : > { %10926 = vmatprep.subr.bf16.mxu1 %v22279_v56  ;;  %11141 = vmatprep.subr.bf16.mxu0 %v22282_v8  ;;  %v22328_v56 = vld [vmem:[#allocation9 + $0x12e8] ss:$28 sps:$4 sm:$0xff]  }
 0x753   : > { %11171 = vmatprep.mubr.bf16.mxu0 %v27021_v13 }
 0x754   : > { %10927 = vmatpush1.bf16.msra.mxu1 %v22277_v62 }
 0x755   : > { %11142 = vmatpush1.bf16.msra.mxu0 %v22280_v59  ;;  %10928 = vmatprep.subr.bf16.mxu1 %v22285_v11  ;;  %v22325_v59 = vld [vmem:[#allocation9 + $0x11f0] ss:$28 sps:$4 sm:$0xff]  }
 0x756   : > { %11143 = vmatprep.subr.bf16.mxu0 %v22288_v63 }
 0x758   : > { %10929 = vmatpush1.bf16.msra.mxu1 %v22283_v31  ;;  %v22329_v31 = vld [vmem:[#allocation9 + $0x1128] ss:$28 sps:$4 sm:$0xff]  }
 0x759   : > { %11144 = vmatpush1.bf16.msra.mxu0 %v22286_v41  ;;  %10930 = vmatprep.subr.bf16.mxu1 %v22291_v26  ;;  %v22332_v41 = vld [vmem:[#allocation9 + $0x122c] ss:$28 sps:$4 sm:$0xff]  }
 0x75a   : > { %11145 = vmatprep.subr.bf16.mxu0 %v22294_v25  ;;  %v22333_v25 = vld [vmem:[#allocation9 + $0x1320] ss:$28 sps:$4 sm:$0xff]  }
 0x75c   : > { %10931 = vmatpush1.bf16.msra.mxu1 %v22289_v47 }
 0x75d   : > { %11146 = vmatpush1.bf16.msra.mxu0 %v22292_v45  ;;  %10932 = vmatprep.subr.bf16.mxu1 %v22297_v18  ;;  %v22330_v18 = vld [vmem:[#allocation9 + $0x1228] ss:$28 sps:$4 sm:$0xff]  }
 0x75e   : > { %20111 = vmatprep.subr.bf16.mxu0 %v22298_v17 }
 0x760   : > { %19144 = vmatmul.mubr.msk.bf16.vlgmr.msra.gmra.mrb[40].mxu0 %vm7000_vm8, %v25909_v42  ;;  %10933 = vmatpush1.bf16.msra.mxu1 %v22295_v36  ;;  %v22334_v36 = vld [vmem:[#allocation9 + $0x1160] ss:$28 sps:$4 sm:$0xff]  }
 0x761   : > { %20112 = vmatpush3.bf16.msra.mxu0 %v22299_v4  ;;  %11343 = vmatprep.mubr.bf16.mxu0 %v25883_v39  ;;  %v22337_v4 = vld [vmem:[#allocation9 + $0x1264] ss:$28 sps:$4 sm:$0xff]  }
 0x762   : > { %10934 = vmatprep.subr.bf16.mxu1 %v22302_v29  ;;  %20113 = vmatprep.subr.bf16.mxu0 %v22303_v10  ;;  %v22338_v29 = vld [vmem:[#allocation9 + $0x1518] ss:$28 sps:$4 sm:$0xff]   ;;  %v22335_v10 = vld [vmem:[#allocation9 + $0x1260] ss:$28 sps:$4 sm:$0xff]  }
 0x764   : > { %10935 = vmatpush1.bf16.msra.mxu1 %v22300_v51  ;;  %v22339_v51 = vld [vmem:[#allocation9 + $0x1358] ss:$28 sps:$4 sm:$0xff]  }
 0x765   : > { %20114 = vmatpush3.bf16.msra.mxu0 %v22304_v28  ;;  %10936 = vmatprep.subr.bf16.mxu1 %v22307_v19  ;;  %v22343_v28 = vld [vmem:[#allocation9 + $0x1550] ss:$28 sps:$4 sm:$0xff]   ;;  %v22340_v19 = vld [vmem:[#allocation9 + $0x1298] ss:$28 sps:$4 sm:$0xff]  }
 0x766   : > { %20115 = vmatprep.subr.bf16.mxu0 %v22308_v55  ;;  %v22347_v55 = vld [vmem:[#allocation9 + $0x12d4] ss:$28 sps:$4 sm:$0xff]  }
 0x768   : > { %10937 = vmatpush1.bf16.msra.mxu1 %v22305_v32  ;;  %v22348_v32 = vld [vmem:[#allocation9 + $0x1588] ss:$28 sps:$4 sm:$0xff]  }
 0x769   : > { %20116 = vmatpush3.bf16.msra.mxu0 %v22309_v60  ;;  %10938 = vmatprep.subr.bf16.mxu1 %v22312_v2  ;;  %v22345_v60 = vld [vmem:[#allocation9 + $0x12d0] ss:$28 sps:$4 sm:$0xff]   ;;  %v22349_v2 = vld [vmem:[#allocation9 + $0x13c8] ss:$28 sps:$4 sm:$0xff]  }
 0x76a   : > { %20117 = vmatprep.subr.bf16.mxu0 %v22313_v52  ;;  %v22352_v52 = vld [vmem:[#allocation9 + $0x130c] ss:$28 sps:$4 sm:$0xff]  }
 0x76c   : > { %10939 = vmatpush1.bf16.msra.mxu1 %v22310_v24  ;;  %v22353_v24 = vld [vmem:[#allocation9 + $0x15c0] ss:$28 sps:$4 sm:$0xff]  }
 0x76d   : > { %20118 = vmatpush3.bf16.msra.mxu0 %v22314_v43  ;;  %10940 = vmatprep.subr.bf16.mxu1 %v22317_v38  ;;  %v22350_v43 = vld [vmem:[#allocation9 + $0x1308] ss:$28 sps:$4 sm:$0xff]   ;;  %v22354_v38 = vld [vmem:[#allocation9 + $0x1400] ss:$28 sps:$4 sm:$0xff]  }
 0x76e   : > { %20119 = vmatprep.subr.bf16.mxu0 %v22318_v50  ;;  %v22357_v50 = vld [vmem:[#allocation9 + $0x1344] ss:$28 sps:$4 sm:$0xff]  }
 0x770   : > { %10941 = vmatpush1.bf16.msra.mxu1 %v22315_v22  ;;  %v22358_v22 = vld [vmem:[#allocation9 + $0x15f8] ss:$28 sps:$4 sm:$0xff]  }
 0x771   : > { %20120 = vmatpush3.bf16.msra.mxu0 %v22319_v20  ;;  %10942 = vmatprep.subr.bf16.mxu1 %v22322_v5  ;;  %v22355_v20 = vld [vmem:[#allocation9 + $0x1340] ss:$28 sps:$4 sm:$0xff]   ;;  %v22359_v5 = vld [vmem:[#allocation9 + $0x1438] ss:$28 sps:$4 sm:$0xff]  }
 0x772   : > { %20121 = vmatprep.subr.bf16.mxu0 %v22323_v57  ;;  %v22362_v57 = vld [vmem:[#allocation9 + $0x137c] ss:$28 sps:$4 sm:$0xff]  }
 0x773   : > { %v20078_v8 = vpop.f32.mrb[56].mxu0 }
 0x774   : > { %v20079_v62 = vpop.f32.mrb[57].mxu0  ;;  %10943 = vmatpush1.bf16.msra.mxu1 %v22320_v16  ;;  %v22363_v16 = vld [vmem:[#allocation9 + $0x1630] ss:$28 sps:$4 sm:$0xff]  }
 0x775   : > { %v20080_v11 = vadd.f32 %v20079_v62, %v20078_v8  ;;  %v20081_v63 = vpop.f32.mrb[58].mxu0  ;;  %20122 = vmatpush3.bf16.msra.mxu0 %v22324_v12  ;;  %10944 = vmatprep.subr.bf16.mxu1 %v22327_v0  ;;  %v22360_v12 = vld [vmem:[#allocation9 + $0x1378] ss:$28 sps:$4 sm:$0xff]   ;;  %v22364_v0 = vld [vmem:[#allocation9 + $0x1470] ss:$28 sps:$4 sm:$0xff]  }
 0x776   : > { %v20082_v26 = vpop.f32.mrb[59].mxu0  ;;  %20123 = vmatprep.subr.bf16.mxu0 %v22328_v56  ;;  %v22367_v56 = vld [vmem:[#allocation9 + $0x13b4] ss:$28 sps:$4 sm:$0xff]   ;;  %v22368_v8 = vld [vmem:[#allocation9 + $0x1668] ss:$28 sps:$4 sm:$0xff]  }
 0x777   : > { %v25915_v47 = vadd.f32 %v20080_v11, %v25876_v30  ;;  %v20083_v45 = vadd.f32 %v20082_v26, %v20081_v63  ;;  %v22342_v30 = vld [vmem:[#allocation9 + $0x129c] ss:$28 sps:$4 sm:$0xff]   ;;  %v22365_v11 = vld [vmem:[#allocation9 + $0x13b0] ss:$28 sps:$4 sm:$0xff]  }
 0x778   : > { %10945 = vmatpush1.bf16.msra.mxu1 %v22325_v59  ;;  %v22372_v26 = vld [vmem:[#allocation9 + $0x13ec] ss:$28 sps:$4 sm:$0xff]  }
 0x779   : > { %v25918_v17 = vadd.f32 %v20083_v45, %v25878_v58  ;;  %20124 = vmatpush3.bf16.msra.mxu0 %v22329_v31  ;;  %10946 = vmatprep.subr.bf16.mxu1 %v22332_v41  ;;  %v22344_v58 = vld [vmem:[#allocation9 + $0x1390] ss:$28 sps:$4 sm:$0xff]   ;;  %v22369_v41 = vld [vmem:[#allocation9 + $0x14a8] ss:$28 sps:$4 sm:$0xff]   ;;  %v22373_v45 = vld [vmem:[#allocation9 + $0x16a0] ss:$28 sps:$4 sm:$0xff]  }
 0x77a   : > { %20125 = vmatprep.subr.bf16.mxu0 %v22333_v25 }
 0x77c   : > { %10947 = vmatpush1.bf16.msra.mxu1 %v22330_v18 }
 0x77d   : > { %20126 = vmatpush3.bf16.msra.mxu0 %v22334_v36  ;;  %10948 = vmatprep.subr.bf16.mxu1 %v22337_v4  ;;  %v22370_v4 = vld [vmem:[#allocation9 + $0x13e8] ss:$28 sps:$4 sm:$0xff]  }
 0x77e   : > { %20133 = vmatprep.subr.bf16.mxu0 %v22338_v29  ;;  %v22374_v29 = vld [vmem:[#allocation9 + $0x14e0] ss:$28 sps:$4 sm:$0xff]  }
 0x780   : > { %11344 = vmatmul.mubr.bf16.vlgmr.msra.gmra.mrb[68].mxu0 %v25891_v44  ;;  %10949 = vmatpush1.bf16.msra.mxu1 %v22335_v10  ;;  %v22377_v10 = vld [vmem:[#allocation9 + $0x1424] ss:$28 sps:$4 sm:$0xff]  }
 0x781   : > { %20134 = vmatpush3.bf16.msra.mxu0 %v22339_v51  ;;  %11384 = vmatprep.mubr.bf16.mxu0 %v25894_v27 }
 0x782   : > { %10950 = vmatprep.subr.bf16.mxu1 %v22342_v30  ;;  %20135 = vmatprep.subr.bf16.mxu0 %v22343_v28  ;;  %v22375_v30 = vld [vmem:[#allocation9 + $0x1420] ss:$28 sps:$4 sm:$0xff]   ;;  %v22378_v28 = vld [vmem:[#allocation9 + $0x16d8] ss:$28 sps:$4 sm:$0xff]  }
 0x784   : > { %10951 = vmatpush1.bf16.msra.mxu1 %v22340_v19  ;;  %v22381_v19 = vld [vmem:[#allocation9 + $0x145c] ss:$28 sps:$4 sm:$0xff]  }
 0x785   : > { %20136 = vmatpush3.bf16.msra.mxu0 %v22344_v58  ;;  %10952 = vmatprep.subr.bf16.mxu1 %v22347_v55  ;;  %v22382_v58 = vld [vmem:[#allocation9 + $0x1710] ss:$28 sps:$4 sm:$0xff]  }
 0x786   : > { %20137 = vmatprep.subr.bf16.mxu0 %v22348_v32  ;;  %v22385_v55 = vld [vmem:[#allocation9 + $0x1494] ss:$28 sps:$4 sm:$0xff]  }
 0x788   : > { %10953 = vmatpush1.bf16.msra.mxu1 %v22345_v60 }
 0x789   : > { %20138 = vmatpush3.bf16.msra.mxu0 %v22349_v2  ;;  %10954 = vmatprep.subr.bf16.mxu1 %v22352_v52  ;;  %v22383_v2 = vld [vmem:[#allocation9 + $0x1490] ss:$28 sps:$4 sm:$0xff]  }
 0x78a   : > { %20139 = vmatprep.subr.bf16.mxu0 %v22353_v24  ;;  %v22386_v24 = vld [vmem:[#allocation9 + $0x1748] ss:$28 sps:$4 sm:$0xff]  }
 0x78c   : > { %10955 = vmatpush1.bf16.msra.mxu1 %v22350_v43  ;;  %v22389_v43 = vld [vmem:[#allocation9 + $0x14cc] ss:$28 sps:$4 sm:$0xff]  }
 0x78d   : > { %20140 = vmatpush3.bf16.msra.mxu0 %v22354_v38  ;;  %10967 = vmatprep.subr.bf16.mxu1 %v22357_v50 }
 0x78e   : > { %20141 = vmatprep.subr.bf16.mxu0 %v22358_v22  ;;  %v22387_v22 = vld [vmem:[#allocation9 + $0x14c8] ss:$28 sps:$4 sm:$0xff]  }
 0x78f   : > { %10957 = vmatmul.mubr.bf16.vlgmr.msra.gmra.mrb[76].mxu1 %v25891_v44 }
 0x790   : > { %10968 = vmatpush1.bf16.msra.mxu1 %v22355_v20  ;;  %10999 = vmatprep.mubr.bf16.mxu1 %v25894_v27  ;;  %v22390_v20 = vld [vmem:[#allocation9 + $0x1780] ss:$28 sps:$4 sm:$0xff]  }
 0x791   : > { %20142 = vmatpush3.bf16.msra.mxu0 %v22359_v5  ;;  %10969 = vmatprep.subr.bf16.mxu1 %v22362_v57  ;;  %v22393_v5 = vld [vmem:[#allocation9 + $0x1504] ss:$28 sps:$4 sm:$0xff]   ;;  %v22396_v57 = vld [vmem:[#allocation9 + $0x17ac] ss:$28 sps:$4 sm:$0xff]  }
 0x792   : > { %20143 = vmatprep.subr.bf16.mxu0 %v22363_v16  ;;  %v22391_v16 = vld [vmem:[#allocation9 + $0x1500] ss:$28 sps:$4 sm:$0xff]  }
 0x793   : > { %v20100_v62 = vpop.f32.mrb[60].mxu0 }
 0x794   : > { %v20101_v59 = vpop.f32.mrb[61].mxu0  ;;  %10970 = vmatpush1.bf16.msra.mxu1 %v22360_v12  ;;  %v22394_v12 = vld [vmem:[#allocation9 + $0x17a8] ss:$28 sps:$4 sm:$0xff]  }
 0x795   : > { %v20102_v63 = vadd.f32 %v20101_v59, %v20100_v62  ;;  %v20103_v31 = vpop.f32.mrb[62].mxu0  ;;  %20144 = vmatpush3.bf16.msra.mxu0 %v22364_v0  ;;  %10971 = vmatprep.subr.bf16.mxu1 %v22367_v56  ;;  %v22399_v0 = vld [vmem:[#allocation9 + $0x153c] ss:$28 sps:$4 sm:$0xff]   ;;  %v22402_v56 = vld [vmem:[#allocation9 + $0x17e4] ss:$28 sps:$4 sm:$0xff]  }
 0x796   : > { %v20104_v25 = vpop.f32.mrb[63].mxu0  ;;  %20145 = vmatprep.subr.bf16.mxu0 %v22368_v8  ;;  %v22397_v8 = vld [vmem:[#allocation9 + $0x1538] ss:$28 sps:$4 sm:$0xff]   ;;  %v22400_v62 = vld [vmem:[#allocation9 + $0x17e0] ss:$28 sps:$4 sm:$0xff]  }
 0x797   : > { %v20105_v18 = vadd.f32 %v20104_v25, %v20103_v31  ;;  %v9275_v36 = vadd.f32 %v20102_v63, %v25915_v47  ;;  %v22379_v47 = vld [vmem:[#allocation9 + $0x1458] ss:$28 sps:$4 sm:$0xff]   ;;  %v22403_v63 = vld [vmem:[#allocation9 + $0x1570] ss:$28 sps:$4 sm:$0xff]   ;;  %v22409_v25 = vld [vmem:[#allocation9 + $0x15a8] ss:$28 sps:$4 sm:$0xff]  }
 0x798   : > { %10972 = vmatpush1.bf16.msra.mxu1 %v22365_v11  ;;  %v22405_v59 = vld [vmem:[#allocation9 + $0x1574] ss:$28 sps:$4 sm:$0xff]   ;;  %v22408_v11 = vld [vmem:[#allocation9 + $0x181c] ss:$28 sps:$4 sm:$0xff]  }
 0x799   : > { %20146 = vmatpush3.bf16.msra.mxu0 %v22369_v41  ;;  %10973 = vmatprep.subr.bf16.mxu1 %v22372_v26  ;;  %v9278_v51 = vadd.f32 %v20105_v18, %v25918_v17  ;;  %v22406_v31 = vld [vmem:[#allocation9 + $0x1818] ss:$28 sps:$4 sm:$0xff]   ;;  %v22411_v41 = vld [vmem:[#allocation9 + $0x15ac] ss:$28 sps:$4 sm:$0xff]   ;;  %v22417_v18 = vld [vmem:[#allocation9 + $0x15e4] ss:$28 sps:$4 sm:$0xff]  }
 0x79a   : > { %20147 = vmatprep.subr.bf16.mxu0 %v22373_v45  ;;  %v22414_v26 = vld [vmem:[#allocation9 + $0x1854] ss:$28 sps:$4 sm:$0xff]  }
 0x79b   : > { %v22412_v45 = vld [vmem:[#allocation9 + $0x1850] ss:$28 sps:$4 sm:$0xff]  }
 0x79c   : > { %10974 = vmatpush1.bf16.msra.mxu1 %v22370_v4  ;;  %v22415_v4 = vld [vmem:[#allocation9 + $0x15e0] ss:$28 sps:$4 sm:$0xff]  }
 0x79d   : > { %20148 = vmatpush3.bf16.msra.mxu0 %v22374_v29  ;;  %10975 = vmatprep.subr.bf16.mxu1 %v22377_v10  ;;  %v22418_v29 = vld [vmem:[#allocation9 + $0x1888] ss:$28 sps:$4 sm:$0xff]   ;;  %v22423_v10 = vld [vmem:[#allocation9 + $0x161c] ss:$28 sps:$4 sm:$0xff]  }
 0x79e   : > { %20352 = vmatprep.subr.bf16.mxu0 %v23854_v53 }
 0x7a0   : > { %11385 = vmatmul.mubr.bf16.vlgmr.msra.gmra.mrb[72].mxu0 %v25901_v15  ;;  %10976 = vmatpush1.bf16.msra.mxu1 %v22375_v30  ;;  %v22421_v30 = vld [vmem:[#allocation9 + $0x1618] ss:$28 sps:$4 sm:$0xff]  }
 0x7a1   : > { %20353 = vmatpush3.bf16.msra.mxu0 %v22378_v28  ;;  %10977 = vmatprep.subr.bf16.mxu1 %v22381_v19  ;;  %v22424_v28 = vld [vmem:[#allocation9 + $0x18c0] ss:$28 sps:$4 sm:$0xff]   ;;  %v22429_v19 = vld [vmem:[#allocation9 + $0x1654] ss:$28 sps:$4 sm:$0xff]  }
 0x7a2   : > { %20354 = vmatprep.subr.bf16.mxu0 %v23854_v53  ;;  %20360 = vmatprep.mubr.msk.bf16.mxu0 %vm23855_vm9, %v23854_v53 }
 0x7a3   : > { %v9315_v17 = vpop.f32.mrb[64].mxu0 }
 0x7a4   : > { %v25931_v32 = vadd.f32 %v9315_v17, %v9275_v36  ;;  %v20350_v60 = vpop.f32.mrb[65].mxu0  ;;  %10978 = vmatpush1.bf16.msra.mxu1 %v22379_v47  ;;  %v22420_v36 = vld [vmem:[#allocation9 + $0x188c] ss:$28 sps:$4 sm:$0xff]   ;;  %v22432_v47 = vld [vmem:[#allocation9 + $0x18fc] ss:$28 sps:$4 sm:$0xff]  }
 0x7a5   : > { %v9318_v52 = vpop.f32.mrb[66].mxu0  ;;  %20355 = vmatpush3.bf16.msra.mxu0 %v22382_v58  ;;  %10979 = vmatprep.subr.bf16.mxu1 %v22385_v55  ;;  %v22427_v58 = vld [vmem:[#allocation9 + $0x1650] ss:$28 sps:$4 sm:$0xff]   ;;  %v22430_v55 = vld [vmem:[#allocation9 + $0x18f8] ss:$28 sps:$4 sm:$0xff]  }
 0x7a6   : > { %v25933_v38 = vadd.f32 %v9318_v52, %v9278_v51  ;;  %v20351_v50 = vpop.f32.mrb[67].mxu0  ;;  %20356 = vmatprep.subr.bf16.mxu0 %v23854_v53  ;;  %v22426_v51 = vld [vmem:[#allocation9 + $0x18c4] ss:$28 sps:$4 sm:$0xff]   ;;  %v22435_v17 = vld [vmem:[#allocation9 + $0x168c] ss:$28 sps:$4 sm:$0xff]  }
 0x7a7   : > { %v22438_v60 = vld [vmem:[#allocation9 + $0x1934] ss:$28 sps:$4 sm:$0xff]   ;;  %v22439_v50 = vld [vmem:[#allocation9 + $0x16c0] ss:$28 sps:$4 sm:$0xff]  }
 0x7a8   : > { %10980 = vmatpush1.bf16.msra.mxu1 %v22383_v2  ;;  %v22433_v2 = vld [vmem:[#allocation9 + $0x1688] ss:$28 sps:$4 sm:$0xff]   ;;  %v22436_v52 = vld [vmem:[#allocation9 + $0x1930] ss:$28 sps:$4 sm:$0xff]  }
 0x7a9   : > { %20357 = vmatpush3.bf16.msra.mxu0 %v22386_v24  ;;  %10981 = vmatprep.subr.bf16.mxu1 %v22389_v43  ;;  %v22441_v24 = vld [vmem:[#allocation9 + $0x16c4] ss:$28 sps:$4 sm:$0xff]   ;;  %v22444_v43 = vld [vmem:[#allocation9 + $0x196c] ss:$28 sps:$4 sm:$0xff]  }
 0x7aa   : > { %20358 = vmatprep.subr.bf16.mxu0 %v23854_v53 }
 0x7ac   : > { %10982 = vmatpush1.bf16.msra.mxu1 %v22387_v22  ;;  %v22442_v22 = vld [vmem:[#allocation9 + $0x1968] ss:$28 sps:$4 sm:$0xff]  }
 0x7ad   : > { %20359 = vmatpush3.bf16.msra.mxu0 %v22390_v20  ;;  %10983 = vmatprep.subr.bf16.mxu1 %v22393_v5  ;;  %v22447_v20 = vld [vmem:[#allocation9 + $0x16fc] ss:$28 sps:$4 sm:$0xff]   ;;  %v22450_v5 = vld [vmem:[#allocation9 + $0x19a4] ss:$28 sps:$4 sm:$0xff]  }
 0x7ae   : > { %13209 = vmatprep.subr.bf16.mxu0 %v22396_v57  ;;  %v22445_v57 = vld [vmem:[#allocation9 + $0x16f8] ss:$28 sps:$4 sm:$0xff]  }
 0x7b0   : > { %20361 = vmatmul.mubr.msk.bf16.vlgmr.msra.gmra.mrb[76].mxu0 %vm7000_vm8, %v25909_v42  ;;  %10984 = vmatpush1.bf16.msra.mxu1 %v22391_v16  ;;  %v22448_v16 = vld [vmem:[#allocation9 + $0x19a0] ss:$28 sps:$4 sm:$0xff]  }
 0x7b1   : > { %13210 = vmatpush1.bf16.msra.mxu0 %v22394_v12  ;;  %13241 = vmatprep.mubr.bf16.mxu0 %v25762_v40  ;;  %v22453_v12 = vld [vmem:[#allocation9 + $0x1734] ss:$28 sps:$4 sm:$0xff]  }
 0x7b2   : > { %10985 = vmatprep.subr.bf16.mxu1 %v22399_v0  ;;  %13211 = vmatprep.subr.bf16.mxu0 %v22402_v56  ;;  %v22456_v0 = vld [vmem:[#allocation9 + $0x19dc] ss:$28 sps:$4 sm:$0xff]   ;;  %v22451_v56 = vld [vmem:[#allocation9 + $0x1730] ss:$28 sps:$4 sm:$0xff]  }
 0x7b4   : > { %10986 = vmatpush1.bf16.msra.mxu1 %v22397_v8  ;;  %v22454_v8 = vld [vmem:[#allocation9 + $0x19d8] ss:$28 sps:$4 sm:$0xff]  }
 0x7b5   : > { %13212 = vmatpush1.bf16.msra.mxu0 %v22400_v62  ;;  %10987 = vmatprep.subr.bf16.mxu1 %v22405_v59  ;;  %v22459_v62 = vld [vmem:[#allocation9 + $0x176c] ss:$28 sps:$4 sm:$0xff]   ;;  %v22462_v59 = vld [vmem:[#allocation9 + $0x1a14] ss:$28 sps:$4 sm:$0xff]  }
 0x7b6   : > { %13213 = vmatprep.subr.bf16.mxu0 %v22408_v11  ;;  %v22457_v11 = vld [vmem:[#allocation9 + $0x1768] ss:$28 sps:$4 sm:$0xff]  }
 0x7b8   : > { %10988 = vmatpush1.bf16.msra.mxu1 %v22403_v63  ;;  %v22460_v63 = vld [vmem:[#allocation9 + $0x1a10] ss:$28 sps:$4 sm:$0xff]  }
 0x7b9   : > { %13214 = vmatpush1.bf16.msra.mxu0 %v22406_v31  ;;  %10989 = vmatprep.subr.bf16.mxu1 %v22411_v41  ;;  %v22465_v31 = vld [vmem:[#allocation9 + $0xfd4] ss:$28 sps:$4 sm:$0xff]   ;;  %v22468_v41 = vld [vmem:[#allocation9 + $0x1a4c] ss:$28 sps:$4 sm:$0xff]  }
 0x7ba   : > { %13215 = vmatprep.subr.bf16.mxu0 %v22414_v26  ;;  %v22463_v26 = vld [vmem:[#allocation9 + $0xfd0] ss:$28 sps:$4 sm:$0xff]  }
 0x7bc   : > { %10990 = vmatpush1.bf16.msra.mxu1 %v22409_v25  ;;  %v22466_v25 = vld [vmem:[#allocation9 + $0x1a48] ss:$28 sps:$4 sm:$0xff]  }
 0x7bd   : > { %13216 = vmatpush1.bf16.msra.mxu0 %v22412_v45  ;;  %10991 = vmatprep.subr.bf16.mxu1 %v22417_v18  ;;  %v22471_v45 = vld [vmem:[#allocation9 + $0x100c] ss:$28 sps:$4 sm:$0xff]   ;;  %v22474_v18 = vld [vmem:[#allocation9 + $0x1a84] ss:$28 sps:$4 sm:$0xff]  }
 0x7be   : > { %13217 = vmatprep.subr.bf16.mxu0 %v22420_v36  ;;  %v22469_v36 = vld [vmem:[#allocation9 + $0x1008] ss:$28 sps:$4 sm:$0xff]  }
 0x7c0   : > { %10992 = vmatpush1.bf16.msra.mxu1 %v22415_v4  ;;  %v22472_v4 = vld [vmem:[#allocation9 + $0x1a80] ss:$28 sps:$4 sm:$0xff]  }
 0x7c1   : > { %13218 = vmatpush1.bf16.msra.mxu0 %v22418_v29  ;;  %10993 = vmatprep.subr.bf16.mxu1 %v22423_v10  ;;  %v22477_v29 = vld [vmem:[#allocation9 + $0x1044] ss:$28 sps:$4 sm:$0xff]   ;;  %v22480_v10 = vld [vmem:[#allocation9 + $0x1abc] ss:$28 sps:$4 sm:$0xff]  }
 0x7c2   : > { %13219 = vmatprep.subr.bf16.mxu0 %v22426_v51  ;;  %v22475_v51 = vld [vmem:[#allocation9 + $0x1040] ss:$28 sps:$4 sm:$0xff]  }
 0x7c4   : > { %10994 = vmatpush1.bf16.msra.mxu1 %v22421_v30  ;;  %v22478_v30 = vld [vmem:[#allocation9 + $0x1ab8] ss:$28 sps:$4 sm:$0xff]  }
 0x7c5   : > { %13220 = vmatpush1.bf16.msra.mxu0 %v22424_v28  ;;  %10995 = vmatprep.subr.bf16.mxu1 %v22429_v19  ;;  %v22483_v28 = vld [vmem:[#allocation9 + $0x107c] ss:$28 sps:$4 sm:$0xff]   ;;  %v22486_v19 = vld [vmem:[#allocation9 + $0x1af4] ss:$28 sps:$4 sm:$0xff]  }
 0x7c6   : > { %13221 = vmatprep.subr.bf16.mxu0 %v22432_v47  ;;  %v22481_v47 = vld [vmem:[#allocation9 + $0x1078] ss:$28 sps:$4 sm:$0xff]  }
 0x7c8   : > { %10996 = vmatpush1.bf16.msra.mxu1 %v22427_v58  ;;  %v22489_v58 = vld [vmem:[#allocation9 + $0x10b4] ss:$28 sps:$4 sm:$0xff]  }
 0x7c9   : > { %13222 = vmatpush1.bf16.msra.mxu0 %v22430_v55  ;;  %10997 = vmatprep.subr.bf16.mxu1 %v22435_v17  ;;  %v22492_v55 = vld [vmem:[#allocation9 + $0x1b2c] ss:$28 sps:$4 sm:$0xff]  }
 0x7ca   : > { %13223 = vmatprep.subr.bf16.mxu0 %v22438_v60  ;;  %v22487_v17 = vld [vmem:[#allocation9 + $0x10b0] ss:$28 sps:$4 sm:$0xff]   ;;  %v22490_v60 = vld [vmem:[#allocation9 + $0x1b28] ss:$28 sps:$4 sm:$0xff]  }
 0x7cc   : > { %10998 = vmatpush1.bf16.msra.mxu1 %v22433_v2  ;;  %v22495_v2 = vld [vmem:[#allocation9 + $0x10ec] ss:$28 sps:$4 sm:$0xff]  }
 0x7cd   : > { %13224 = vmatpush1.bf16.msra.mxu0 %v22436_v52  ;;  %11010 = vmatprep.subr.bf16.mxu1 %v22441_v24  ;;  %v22498_v52 = vld [vmem:[#allocation9 + $0x1b64] ss:$28 sps:$4 sm:$0xff]  }
 0x7ce   : > { %13225 = vmatprep.subr.bf16.mxu0 %v22444_v43  ;;  %v22493_v24 = vld [vmem:[#allocation9 + $0x10e8] ss:$28 sps:$4 sm:$0xff]   ;;  %v22496_v43 = vld [vmem:[#allocation9 + $0x1b60] ss:$28 sps:$4 sm:$0xff]  }
 0x7cf   : > { %11000 = vmatmul.mubr.bf16.vlgmr.msra.gmra.mrb[76].mxu1 %v25901_v15 }
 0x7d0   : > { %11011 = vmatpush1.bf16.msra.mxu1 %v22439_v50  ;;  %11042 = vmatprep.mubr.bf16.mxu1 %v27021_v13  ;;  %v22501_v50 = vld [vmem:[#allocation9 + $0x1124] ss:$28 sps:$4 sm:$0xff]  }
 0x7d1   : > { %13226 = vmatpush1.bf16.msra.mxu0 %v22442_v22  ;;  %11012 = vmatprep.subr.bf16.mxu1 %v22447_v20  ;;  %v22504_v22 = vld [vmem:[#allocation9 + $0x1b9c] ss:$28 sps:$4 sm:$0xff]  }
 0x7d2   : > { %13227 = vmatprep.subr.bf16.mxu0 %v22450_v5  ;;  %v22499_v20 = vld [vmem:[#allocation9 + $0x1120] ss:$28 sps:$4 sm:$0xff]   ;;  %v22502_v5 = vld [vmem:[#allocation9 + $0x1b98] ss:$28 sps:$4 sm:$0xff]  }
 0x7d4   : > { %11013 = vmatpush1.bf16.msra.mxu1 %v22445_v57  ;;  %v22507_v57 = vld [vmem:[#allocation9 + $0x115c] ss:$28 sps:$4 sm:$0xff]  }
 0x7d5   : > { %13228 = vmatpush1.bf16.msra.mxu0 %v22448_v16  ;;  %11014 = vmatprep.subr.bf16.mxu1 %v22453_v12  ;;  %v22510_v16 = vld [vmem:[#allocation9 + $0x1bd4] ss:$28 sps:$4 sm:$0xff]  }
 0x7d6   : > { %13229 = vmatprep.subr.bf16.mxu0 %v22456_v0  ;;  %v22505_v12 = vld [vmem:[#allocation9 + $0x1158] ss:$28 sps:$4 sm:$0xff]   ;;  %v22508_v0 = vld [vmem:[#allocation9 + $0x1bd0] ss:$28 sps:$4 sm:$0xff]  }
 0x7d8   : > { %11015 = vmatpush1.bf16.msra.mxu1 %v22451_v56  ;;  %v22513_v56 = vld [vmem:[#allocation9 + $0x1194] ss:$28 sps:$4 sm:$0xff]  }
 0x7d9   : > { %13230 = vmatpush1.bf16.msra.mxu0 %v22454_v8  ;;  %11016 = vmatprep.subr.bf16.mxu1 %v22459_v62  ;;  %v22516_v8 = vld [vmem:[#allocation9 + $0x1c0c] ss:$28 sps:$4 sm:$0xff]  }
 0x7da   : > { %13231 = vmatprep.subr.bf16.mxu0 %v22462_v59  ;;  %v22511_v62 = vld [vmem:[#allocation9 + $0x1190] ss:$28 sps:$4 sm:$0xff]   ;;  %v22514_v59 = vld [vmem:[#allocation9 + $0x1c08] ss:$28 sps:$4 sm:$0xff]  }
 0x7dc   : > { %11017 = vmatpush1.bf16.msra.mxu1 %v22457_v11  ;;  %v22519_v11 = vld [vmem:[#allocation9 + $0x11cc] ss:$28 sps:$4 sm:$0xff]  }
 0x7dd   : > { %13232 = vmatpush1.bf16.msra.mxu0 %v22460_v63  ;;  %11182 = vmatprep.subr.bf16.mxu1 %v22465_v31  ;;  %v22522_v63 = vld [vmem:[#allocation9 + $0x1c44] ss:$28 sps:$4 sm:$0xff]  }
 0x7de   : > { %13233 = vmatprep.subr.bf16.mxu0 %v22468_v41  ;;  %v22517_v31 = vld [vmem:[#allocation9 + $0x11c8] ss:$28 sps:$4 sm:$0xff]   ;;  %v22520_v41 = vld [vmem:[#allocation9 + $0x1c40] ss:$28 sps:$4 sm:$0xff]  }
 0x7df   : > { %19143 = vmatmul.mubr.msk.bf16.vlgmr.msra.gmra.mrb[76].mxu1 %vm7000_vm8, %v25909_v42 }
 0x7e0   : > { %11183 = vmatpush1.bf16.msra.mxu1 %v22463_v26  ;;  %11214 = vmatprep.mubr.bf16.mxu1 %v25883_v39  ;;  %v22484_v39 = vld [vmem:[#allocation9 + $0x1af0] ss:$28 sps:$4 sm:$0xff]   ;;  %v22525_v26 = vld [vmem:[#allocation9 + $0x1204] ss:$28 sps:$4 sm:$0xff]  }
 0x7e1   : > { %13234 = vmatpush1.bf16.msra.mxu0 %v22466_v25  ;;  %11184 = vmatprep.subr.bf16.mxu1 %v22471_v45  ;;  %v22528_v25 = vld [vmem:[#allocation9 + $0x1c7c] ss:$28 sps:$4 sm:$0xff]  }
 0x7e2   : > { %13235 = vmatprep.subr.bf16.mxu0 %v22474_v18  ;;  %v22523_v45 = vld [vmem:[#allocation9 + $0x1200] ss:$28 sps:$4 sm:$0xff]   ;;  %v22526_v18 = vld [vmem:[#allocation9 + $0x1c78] ss:$28 sps:$4 sm:$0xff]  }
 0x7e4   : > { %11185 = vmatpush1.bf16.msra.mxu1 %v22469_v36  ;;  %v22531_v36 = vld [vmem:[#allocation9 + $0x123c] ss:$28 sps:$4 sm:$0xff]  }
 0x7e5   : > { %13236 = vmatpush1.bf16.msra.mxu0 %v22472_v4  ;;  %11186 = vmatprep.subr.bf16.mxu1 %v22477_v29  ;;  %v22534_v4 = vld [vmem:[#allocation9 + $0x1cb4] ss:$28 sps:$4 sm:$0xff]  }
 0x7e6   : > { %13237 = vmatprep.subr.bf16.mxu0 %v22480_v10  ;;  %v22529_v29 = vld [vmem:[#allocation9 + $0x1238] ss:$28 sps:$4 sm:$0xff]   ;;  %v22532_v10 = vld [vmem:[#allocation9 + $0x1cb0] ss:$28 sps:$4 sm:$0xff]  }
 0x7e8   : > { %11187 = vmatpush1.bf16.msra.mxu1 %v22475_v51  ;;  %v22537_v51 = vld [vmem:[#allocation9 + $0x1274] ss:$28 sps:$4 sm:$0xff]  }
 0x7e9   : > { %13238 = vmatpush1.bf16.msra.mxu0 %v22478_v30  ;;  %11188 = vmatprep.subr.bf16.mxu1 %v22483_v28  ;;  %v22540_v30 = vld [vmem:[#allocation9 + $0x1cec] ss:$28 sps:$4 sm:$0xff]  }
 0x7ea   : > { %13239 = vmatprep.subr.bf16.mxu0 %v22486_v19  ;;  %v22535_v28 = vld [vmem:[#allocation9 + $0x1270] ss:$28 sps:$4 sm:$0xff]   ;;  %v22538_v19 = vld [vmem:[#allocation9 + $0x1ce8] ss:$28 sps:$4 sm:$0xff]  }
 0x7ec   : > { %11189 = vmatpush1.bf16.msra.mxu1 %v22481_v47  ;;  %v22543_v47 = vld [vmem:[#allocation9 + $0x12ac] ss:$28 sps:$4 sm:$0xff]  }
 0x7ed   : > { %13240 = vmatpush1.bf16.msra.mxu0 %v22484_v39  ;;  %11190 = vmatprep.subr.bf16.mxu1 %v22489_v58  ;;  %v22546_v39 = vld [vmem:[#allocation9 + $0x1d24] ss:$28 sps:$4 sm:$0xff]  }
 0x7ee   : > { %13252 = vmatprep.subr.bf16.mxu0 %v22492_v55  ;;  %v22541_v58 = vld [vmem:[#allocation9 + $0x12a8] ss:$28 sps:$4 sm:$0xff]   ;;  %v22544_v55 = vld [vmem:[#allocation9 + $0x1d20] ss:$28 sps:$4 sm:$0xff]  }
 0x7f0   : > { %13242 = vmatmul.mubr.bf16.vlgmr.msra.gmra.mrb[40].mxu0 %v25759_v14  ;;  %11191 = vmatpush1.bf16.msra.mxu1 %v22487_v17  ;;  %v22549_v17 = vld [vmem:[#allocation9 + $0x12e4] ss:$28 sps:$4 sm:$0xff]  }
 0x7f1   : > { %13253 = vmatpush1.bf16.msra.mxu0 %v22490_v60  ;;  %13284 = vmatprep.mubr.bf16.mxu0 %v25804_v61  ;;  %v22552_v60 = vld [vmem:[#allocation9 + $0x1d5c] ss:$28 sps:$4 sm:$0xff]  }
 0x7f2   : > { %11192 = vmatprep.subr.bf16.mxu1 %v22495_v2  ;;  %13254 = vmatprep.subr.bf16.mxu0 %v22498_v52  ;;  %v22547_v2 = vld [vmem:[#allocation9 + $0x12e0] ss:$28 sps:$4 sm:$0xff]   ;;  %v22550_v52 = vld [vmem:[#allocation9 + $0x1d58] ss:$28 sps:$4 sm:$0xff]  }
 0x7f4   : > { %11193 = vmatpush1.bf16.msra.mxu1 %v22493_v24  ;;  %v22555_v24 = vld [vmem:[#allocation9 + $0x131c] ss:$28 sps:$4 sm:$0xff]  }
 0x7f5   : > { %13255 = vmatpush1.bf16.msra.mxu0 %v22496_v43  ;;  %11194 = vmatprep.subr.bf16.mxu1 %v22501_v50  ;;  %v22558_v43 = vld [vmem:[#allocation9 + $0x1d94] ss:$28 sps:$4 sm:$0xff]  }
 0x7f6   : > { %13256 = vmatprep.subr.bf16.mxu0 %v22504_v22  ;;  %v22553_v50 = vld [vmem:[#allocation9 + $0x1318] ss:$28 sps:$4 sm:$0xff]   ;;  %v22556_v22 = vld [vmem:[#allocation9 + $0x1d90] ss:$28 sps:$4 sm:$0xff]  }
 0x7f8   : > { %11195 = vmatpush1.bf16.msra.mxu1 %v22499_v20  ;;  %v22561_v20 = vld [vmem:[#allocation9 + $0x1354] ss:$28 sps:$4 sm:$0xff]  }
 0x7f9   : > { %13257 = vmatpush1.bf16.msra.mxu0 %v22502_v5  ;;  %11196 = vmatprep.subr.bf16.mxu1 %v22507_v57  ;;  %v22564_v5 = vld [vmem:[#allocation9 + $0x1dcc] ss:$28 sps:$4 sm:$0xff]  }
 0x7fa   : > { %13258 = vmatprep.subr.bf16.mxu0 %v22510_v16  ;;  %v22559_v57 = vld [vmem:[#allocation9 + $0x1350] ss:$28 sps:$4 sm:$0xff]   ;;  %v22562_v16 = vld [vmem:[#allocation9 + $0x1dc8] ss:$28 sps:$4 sm:$0xff]  }
 0x7fc   : > { %11197 = vmatpush1.bf16.msra.mxu1 %v22505_v12  ;;  %v22567_v12 = vld [vmem:[#allocation9 + $0x138c] ss:$28 sps:$4 sm:$0xff]  }
 0x7fd   : > { %13259 = vmatpush1.bf16.msra.mxu0 %v22508_v0  ;;  %11198 = vmatprep.subr.bf16.mxu1 %v22513_v56  ;;  %v22570_v0 = vld [vmem:[#allocation9 + $0x1e04] ss:$28 sps:$4 sm:$0xff]  }
 0x7fe   : > { %13260 = vmatprep.subr.bf16.mxu0 %v22516_v8  ;;  %v22565_v56 = vld [vmem:[#allocation9 + $0x1388] ss:$28 sps:$4 sm:$0xff]   ;;  %v22568_v8 = vld [vmem:[#allocation9 + $0x1e00] ss:$28 sps:$4 sm:$0xff]  }
 0x800   : > { %11199 = vmatpush1.bf16.msra.mxu1 %v22511_v62  ;;  %v22573_v62 = vld [vmem:[#allocation9 + $0x13c4] ss:$28 sps:$4 sm:$0xff]  }
 0x801   : > { %13261 = vmatpush1.bf16.msra.mxu0 %v22514_v59  ;;  %11200 = vmatprep.subr.bf16.mxu1 %v22519_v11  ;;  %v22576_v59 = vld [vmem:[#allocation9 + $0x1e3c] ss:$28 sps:$4 sm:$0xff]  }
 0x802   : > { %13262 = vmatprep.subr.bf16.mxu0 %v22522_v63  ;;  %v22571_v11 = vld [vmem:[#allocation9 + $0x13c0] ss:$28 sps:$4 sm:$0xff]   ;;  %v22574_v63 = vld [vmem:[#allocation9 + $0x1e38] ss:$28 sps:$4 sm:$0xff]  }
 0x804   : > { %11201 = vmatpush1.bf16.msra.mxu1 %v22517_v31  ;;  %v22579_v31 = vld [vmem:[#allocation9 + $0x13fc] ss:$28 sps:$4 sm:$0xff]  }
 0x805   : > { %13263 = vmatpush1.bf16.msra.mxu0 %v22520_v41  ;;  %11202 = vmatprep.subr.bf16.mxu1 %v22525_v26  ;;  %v22582_v41 = vld [vmem:[#allocation9 + $0x1e74] ss:$28 sps:$4 sm:$0xff]  }
 0x806   : > { %13264 = vmatprep.subr.bf16.mxu0 %v22528_v25  ;;  %v22585_v26 = vld [vmem:[#allocation9 + $0x1434] ss:$28 sps:$4 sm:$0xff]   ;;  %v22588_v25 = vld [vmem:[#allocation9 + $0x1eac] ss:$28 sps:$4 sm:$0xff]  }
 0x808   : > { %11203 = vmatpush1.bf16.msra.mxu1 %v22523_v45  ;;  %v22583_v45 = vld [vmem:[#allocation9 + $0x1430] ss:$28 sps:$4 sm:$0xff]  }
 0x809   : > { %13265 = vmatpush1.bf16.msra.mxu0 %v22526_v18  ;;  %11204 = vmatprep.subr.bf16.mxu1 %v22531_v36  ;;  %v22586_v18 = vld [vmem:[#allocation9 + $0x1ea8] ss:$28 sps:$4 sm:$0xff]  }
 0x80a   : > { %13266 = vmatprep.subr.bf16.mxu0 %v22534_v4  ;;  %v22591_v36 = vld [vmem:[#allocation9 + $0x146c] ss:$28 sps:$4 sm:$0xff]   ;;  %v22594_v4 = vld [vmem:[#allocation9 + $0x1ee4] ss:$28 sps:$4 sm:$0xff]  }
 0x80c   : > { %11205 = vmatpush1.bf16.msra.mxu1 %v22529_v29  ;;  %v22589_v29 = vld [vmem:[#allocation9 + $0x1468] ss:$28 sps:$4 sm:$0xff]  }
 0x80d   : > { %13267 = vmatpush1.bf16.msra.mxu0 %v22532_v10  ;;  %11206 = vmatprep.subr.bf16.mxu1 %v22537_v51  ;;  %v22592_v10 = vld [vmem:[#allocation9 + $0x1ee0] ss:$28 sps:$4 sm:$0xff]  }
 0x80e   : > { %13268 = vmatprep.subr.bf16.mxu0 %v22540_v30  ;;  %v22597_v51 = vld [vmem:[#allocation9 + $0x14a4] ss:$28 sps:$4 sm:$0xff]   ;;  %v22600_v30 = vld [vmem:[#allocation9 + $0x1f1c] ss:$28 sps:$4 sm:$0xff]  }
 0x810   : > { %11207 = vmatpush1.bf16.msra.mxu1 %v22535_v28  ;;  %v22595_v28 = vld [vmem:[#allocation9 + $0x14a0] ss:$28 sps:$4 sm:$0xff]  }
 0x811   : > { %13269 = vmatpush1.bf16.msra.mxu0 %v22538_v19  ;;  %11208 = vmatprep.subr.bf16.mxu1 %v22543_v47  ;;  %v22598_v19 = vld [vmem:[#allocation9 + $0x1f18] ss:$28 sps:$4 sm:$0xff]  }
 0x812   : > { %13270 = vmatprep.subr.bf16.mxu0 %v22546_v39  ;;  %v22603_v47 = vld [vmem:[#allocation9 + $0x14dc] ss:$28 sps:$4 sm:$0xff]   ;;  %v22606_v39 = vld [vmem:[#allocation9 + $0x1f54] ss:$28 sps:$4 sm:$0xff]  }
 0x814   : > { %11209 = vmatpush1.bf16.msra.mxu1 %v22541_v58  ;;  %v22601_v58 = vld [vmem:[#allocation9 + $0x14d8] ss:$28 sps:$4 sm:$0xff]  }
 0x815   : > { %13271 = vmatpush1.bf16.msra.mxu0 %v22544_v55  ;;  %11210 = vmatprep.subr.bf16.mxu1 %v22549_v17  ;;  %v22604_v55 = vld [vmem:[#allocation9 + $0x1f50] ss:$28 sps:$4 sm:$0xff]  }
 0x816   : > { %13272 = vmatprep.subr.bf16.mxu0 %v22552_v60  ;;  %v22609_v17 = vld [vmem:[#allocation9 + $0x1514] ss:$28 sps:$4 sm:$0xff]  }
 0x817   : > { %v22610_v60 = vld [vmem:[#allocation9 + $0x1978] ss:$28 sps:$4 sm:$0xff]  }
 0x818   : > { %11211 = vmatpush1.bf16.msra.mxu1 %v22547_v2  ;;  %v22607_v2 = vld [vmem:[#allocation9 + $0x1510] ss:$28 sps:$4 sm:$0xff]  }
 0x819   : > { %13273 = vmatpush1.bf16.msra.mxu0 %v22550_v52  ;;  %11212 = vmatprep.subr.bf16.mxu1 %v22555_v24  ;;  %v22611_v52 = vld [vmem:[#allocation9 + $0x17b8] ss:$28 sps:$4 sm:$0xff]   ;;  %v22614_v24 = vld [vmem:[#allocation9 + $0x154c] ss:$28 sps:$4 sm:$0xff]  }
 0x81a   : > { %13274 = vmatprep.subr.bf16.mxu0 %v22558_v43  ;;  %v22615_v43 = vld [vmem:[#allocation9 + $0x19b0] ss:$28 sps:$4 sm:$0xff]  }
 0x81c   : > { %11213 = vmatpush1.bf16.msra.mxu1 %v22553_v50  ;;  %v22612_v50 = vld [vmem:[#allocation9 + $0x1548] ss:$28 sps:$4 sm:$0xff]  }
 0x81d   : > { %13275 = vmatpush1.bf16.msra.mxu0 %v22556_v22  ;;  %11225 = vmatprep.subr.bf16.mxu1 %v22561_v20  ;;  %v22616_v22 = vld [vmem:[#allocation9 + $0x17f0] ss:$28 sps:$4 sm:$0xff]   ;;  %v22619_v20 = vld [vmem:[#allocation9 + $0x1584] ss:$28 sps:$4 sm:$0xff]  }
 0x81e   : > { %13276 = vmatprep.subr.bf16.mxu0 %v22564_v5  ;;  %v22620_v5 = vld [vmem:[#allocation9 + $0x19e8] ss:$28 sps:$4 sm:$0xff]  }
 0x81f   : > { %11215 = vmatmul.mubr.bf16.vlgmr.msra.gmra.mrb[80].mxu1 %v25891_v44  ;;  %v22577_v44 = vld [vmem:[#allocation9 + $0x13f8] ss:$28 sps:$4 sm:$0xff]  }
 0x820   : > { %11226 = vmatpush1.bf16.msra.mxu1 %v22559_v57  ;;  %11257 = vmatprep.mubr.bf16.mxu1 %v25894_v27  ;;  %v22580_v27 = vld [vmem:[#allocation9 + $0x1e70] ss:$28 sps:$4 sm:$0xff]   ;;  %v22617_v57 = vld [vmem:[#allocation9 + $0x1580] ss:$28 sps:$4 sm:$0xff]  }
 0x821   : > { %13277 = vmatpush1.bf16.msra.mxu0 %v22562_v16  ;;  %11227 = vmatprep.subr.bf16.mxu1 %v22567_v12  ;;  %v22621_v16 = vld [vmem:[#allocation9 + $0x1828] ss:$28 sps:$4 sm:$0xff]   ;;  %v22624_v12 = vld [vmem:[#allocation9 + $0x15bc] ss:$28 sps:$4 sm:$0xff]  }
 0x822   : > { %13278 = vmatprep.subr.bf16.mxu0 %v22570_v0  ;;  %v22625_v0 = vld [vmem:[#allocation9 + $0x1a20] ss:$28 sps:$4 sm:$0xff]  }
 0x824   : > { %11228 = vmatpush1.bf16.msra.mxu1 %v22565_v56  ;;  %v22622_v56 = vld [vmem:[#allocation9 + $0x15b8] ss:$28 sps:$4 sm:$0xff]  }
 0x825   : > { %13279 = vmatpush1.bf16.msra.mxu0 %v22568_v8  ;;  %11229 = vmatprep.subr.bf16.mxu1 %v22573_v62  ;;  %v22626_v8 = vld [vmem:[#allocation9 + $0x1860] ss:$28 sps:$4 sm:$0xff]   ;;  %v22629_v62 = vld [vmem:[#allocation9 + $0x15f4] ss:$28 sps:$4 sm:$0xff]  }
 0x826   : > { %13280 = vmatprep.subr.bf16.mxu0 %v22576_v59  ;;  %v22630_v59 = vld [vmem:[#allocation9 + $0x1a58] ss:$28 sps:$4 sm:$0xff]  }
 0x828   : > { %11230 = vmatpush1.bf16.msra.mxu1 %v22571_v11  ;;  %v22627_v11 = vld [vmem:[#allocation9 + $0x15f0] ss:$28 sps:$4 sm:$0xff]  }
 0x829   : > { %13281 = vmatpush1.bf16.msra.mxu0 %v22574_v63  ;;  %11231 = vmatprep.subr.bf16.mxu1 %v22579_v31  ;;  %v22631_v63 = vld [vmem:[#allocation9 + $0x1898] ss:$28 sps:$4 sm:$0xff]   ;;  %v22634_v31 = vld [vmem:[#allocation9 + $0x162c] ss:$28 sps:$4 sm:$0xff]  }
 0x82a   : > { %13282 = vmatprep.subr.bf16.mxu0 %v22582_v41  ;;  %v22635_v41 = vld [vmem:[#allocation9 + $0x1a90] ss:$28 sps:$4 sm:$0xff]  }
 0x82c   : > { %11232 = vmatpush1.bf16.msra.mxu1 %v22577_v44  ;;  %v22632_v44 = vld [vmem:[#allocation9 + $0x1628] ss:$28 sps:$4 sm:$0xff]  }
 0x82d   : > { %13283 = vmatpush1.bf16.msra.mxu0 %v22580_v27  ;;  %11233 = vmatprep.subr.bf16.mxu1 %v22585_v26  ;;  %v22636_v27 = vld [vmem:[#allocation9 + $0x18d0] ss:$28 sps:$4 sm:$0xff]   ;;  %v22639_v26 = vld [vmem:[#allocation9 + $0x1664] ss:$28 sps:$4 sm:$0xff]  }
 0x82e   : > { %13295 = vmatprep.subr.bf16.mxu0 %v22588_v25  ;;  %v22640_v25 = vld [vmem:[#allocation9 + $0x1ac8] ss:$28 sps:$4 sm:$0xff]  }
 0x830   : > { %13285 = vmatmul.mubr.bf16.vlgmr.msra.gmra.mrb[40].mxu0 %v25799_v48  ;;  %11234 = vmatpush1.bf16.msra.mxu1 %v22583_v45 }
 0x831   : > { %13296 = vmatpush1.bf16.msra.mxu0 %v22586_v18  ;;  %11235 = vmatprep.subr.bf16.mxu1 %v22591_v36  ;;  %v22637_v36 = vld [vmem:[#allocation9 + $0x1660] ss:$28 sps:$4 sm:$0xff]  }
 0x832   : > { %13297 = vmatprep.subr.bf16.mxu0 %v22594_v4  ;;  %13327 = vmatprep.mubr.bf16.mxu0 %v27021_v13 }
 0x834   : > { %11236 = vmatpush1.bf16.msra.mxu1 %v22589_v29 }
 0x835   : > { %13298 = vmatpush1.bf16.msra.mxu0 %v22592_v10  ;;  %11237 = vmatprep.subr.bf16.mxu1 %v22597_v51  ;;  %v22641_v10 = vld [vmem:[#allocation9 + $0x1908] ss:$28 sps:$4 sm:$0xff]   ;;  %v22644_v51 = vld [vmem:[#allocation9 + $0x169c] ss:$28 sps:$4 sm:$0xff]  }
 0x836   : > { %13299 = vmatprep.subr.bf16.mxu0 %v22600_v30 }
 0x838   : > { %11238 = vmatpush1.bf16.msra.mxu1 %v22595_v28  ;;  %v22645_v28 = vld [vmem:[#allocation9 + $0x1b00] ss:$28 sps:$4 sm:$0xff]  }
 0x839   : > { %13300 = vmatpush1.bf16.msra.mxu0 %v22598_v19  ;;  %11239 = vmatprep.subr.bf16.mxu1 %v22603_v47  ;;  %v22642_v47 = vld [vmem:[#allocation9 + $0x1698] ss:$28 sps:$4 sm:$0xff]  }
 0x83a   : > { %13301 = vmatprep.subr.bf16.mxu0 %v22606_v39  ;;  %v22646_v39 = vld [vmem:[#allocation9 + $0x1940] ss:$28 sps:$4 sm:$0xff]  }
 0x83c   : > { %11240 = vmatpush1.bf16.msra.mxu1 %v22601_v58  ;;  %v22649_v58 = vld [vmem:[#allocation9 + $0x16d4] ss:$28 sps:$4 sm:$0xff]  }
 0x83d   : > { %13302 = vmatpush1.bf16.msra.mxu0 %v22604_v55  ;;  %11241 = vmatprep.subr.bf16.mxu1 %v22609_v17  ;;  %v22650_v55 = vld [vmem:[#allocation9 + $0x1cf8] ss:$28 sps:$4 sm:$0xff]   ;;  %v22647_v17 = vld [vmem:[#allocation9 + $0x16d0] ss:$28 sps:$4 sm:$0xff]  }
 0x83e   : > { %20160 = vmatprep.subr.bf16.mxu0 %v22610_v60  ;;  %v22651_v60 = vld [vmem:[#allocation9 + $0x1b38] ss:$28 sps:$4 sm:$0xff]  }
 0x840   : > { %19400 = vmatmul.mubr.msk.bf16.vlgmr.msra.gmra.mrb[40].mxu0 %vm7000_vm8, %v25828_v9  ;;  %11242 = vmatpush1.bf16.msra.mxu1 %v22607_v2  ;;  %v22654_v2 = vld [vmem:[#allocation9 + $0x170c] ss:$28 sps:$4 sm:$0xff]  }
 0x841   : > { %20161 = vmatpush3.bf16.msra.mxu0 %v22611_v52  ;;  %13499 = vmatprep.mubr.bf16.mxu0 %v25762_v40  ;;  %v22655_v52 = vld [vmem:[#allocation9 + $0x1d30] ss:$28 sps:$4 sm:$0xff]  }
 0x842   : > { %11243 = vmatprep.subr.bf16.mxu1 %v22614_v24  ;;  %20162 = vmatprep.subr.bf16.mxu0 %v22615_v43  ;;  %v22652_v24 = vld [vmem:[#allocation9 + $0x1708] ss:$28 sps:$4 sm:$0xff]   ;;  %v22656_v43 = vld [vmem:[#allocation9 + $0x1b70] ss:$28 sps:$4 sm:$0xff]  }
 0x844   : > { %11244 = vmatpush1.bf16.msra.mxu1 %v22612_v50  ;;  %v22659_v50 = vld [vmem:[#allocation9 + $0x1744] ss:$28 sps:$4 sm:$0xff]  }
 0x845   : > { %20163 = vmatpush3.bf16.msra.mxu0 %v22616_v22  ;;  %11245 = vmatprep.subr.bf16.mxu1 %v22619_v20  ;;  %v22660_v22 = vld [vmem:[#allocation9 + $0x1d68] ss:$28 sps:$4 sm:$0xff]   ;;  %v22657_v20 = vld [vmem:[#allocation9 + $0x1740] ss:$28 sps:$4 sm:$0xff]  }
 0x846   : > { %20164 = vmatprep.subr.bf16.mxu0 %v22620_v5  ;;  %v22661_v5 = vld [vmem:[#allocation9 + $0x1ba8] ss:$28 sps:$4 sm:$0xff]  }
 0x848   : > { %11246 = vmatpush1.bf16.msra.mxu1 %v22617_v57  ;;  %v22665_v57 = vld [vmem:[#allocation9 + $0x1da0] ss:$28 sps:$4 sm:$0xff]  }
 0x849   : > { %20165 = vmatpush3.bf16.msra.mxu0 %v22621_v16  ;;  %11247 = vmatprep.subr.bf16.mxu1 %v22624_v12  ;;  %v22662_v16 = vld [vmem:[#allocation9 + $0x1778] ss:$28 sps:$4 sm:$0xff]   ;;  %v22666_v12 = vld [vmem:[#allocation9 + $0x1be0] ss:$28 sps:$4 sm:$0xff]  }
 0x84a   : > { %20166 = vmatprep.subr.bf16.mxu0 %v22625_v0  ;;  %v22669_v0 = vld [vmem:[#allocation9 + $0x17a4] ss:$28 sps:$4 sm:$0xff]  }
 0x84c   : > { %11248 = vmatpush1.bf16.msra.mxu1 %v22622_v56  ;;  %v22670_v56 = vld [vmem:[#allocation9 + $0x1dd8] ss:$28 sps:$4 sm:$0xff]  }
 0x84d   : > { %20167 = vmatpush3.bf16.msra.mxu0 %v22626_v8  ;;  %11249 = vmatprep.subr.bf16.mxu1 %v22629_v62  ;;  %v22667_v8 = vld [vmem:[#allocation9 + $0x17a0] ss:$28 sps:$4 sm:$0xff]   ;;  %v22671_v62 = vld [vmem:[#allocation9 + $0x1c18] ss:$28 sps:$4 sm:$0xff]  }
 0x84e   : > { %20168 = vmatprep.subr.bf16.mxu0 %v22630_v59  ;;  %v22674_v59 = vld [vmem:[#allocation9 + $0x17dc] ss:$28 sps:$4 sm:$0xff]  }
 0x850   : > { %11250 = vmatpush1.bf16.msra.mxu1 %v22627_v11  ;;  %v22675_v11 = vld [vmem:[#allocation9 + $0x1e10] ss:$28 sps:$4 sm:$0xff]  }
 0x851   : > { %20169 = vmatpush3.bf16.msra.mxu0 %v22631_v63  ;;  %11251 = vmatprep.subr.bf16.mxu1 %v22634_v31  ;;  %v22672_v63 = vld [vmem:[#allocation9 + $0x17d8] ss:$28 sps:$4 sm:$0xff]   ;;  %v22676_v31 = vld [vmem:[#allocation9 + $0x1c50] ss:$28 sps:$4 sm:$0xff]  }
 0x852   : > { %20170 = vmatprep.subr.bf16.mxu0 %v22635_v41  ;;  %v22679_v41 = vld [vmem:[#allocation9 + $0x1814] ss:$28 sps:$4 sm:$0xff]  }
 0x853   : > { %v20127_v45 = vpop.f32.mrb[68].mxu0 }
 0x854   : > { %v20128_v18 = vpop.f32.mrb[69].mxu0  ;;  %11252 = vmatpush1.bf16.msra.mxu1 %v22632_v44  ;;  %v22680_v44 = vld [vmem:[#allocation9 + $0x1e48] ss:$28 sps:$4 sm:$0xff]  }
 0x855   : > { %v25954_v4 = vadd.f32 %v20128_v18, %v20127_v45  ;;  %v20130_v29 = vpop.f32.mrb[70].mxu0  ;;  %20171 = vmatpush3.bf16.msra.mxu0 %v22636_v27  ;;  %11253 = vmatprep.subr.bf16.mxu1 %v22639_v26 }
 0x856   : > { %v20131_v30 = vpop.f32.mrb[71].mxu0  ;;  %20172 = vmatprep.subr.bf16.mxu0 %v22640_v25  ;;  %v22677_v25 = vld [vmem:[#allocation9 + $0x1810] ss:$28 sps:$4 sm:$0xff]  }
 0x857   : > { %v25956_v19 = vadd.f32 %v20131_v30, %v20130_v29 }
 0x858   : > { %11254 = vmatpush1.bf16.msra.mxu1 %v22637_v36  ;;  %v22681_v36 = vld [vmem:[#allocation9 + $0x1c88] ss:$28 sps:$4 sm:$0xff]  }
 0x859   : > { %20173 = vmatpush3.bf16.msra.mxu0 %v22641_v10  ;;  %11255 = vmatprep.subr.bf16.mxu1 %v22644_v51  ;;  %v22685_v10 = vld [vmem:[#allocation9 + $0x1e80] ss:$28 sps:$4 sm:$0xff]  }
 0x85a   : > { %20174 = vmatprep.subr.bf16.mxu0 %v22645_v28  ;;  %v22682_v28 = vld [vmem:[#allocation9 + $0x1848] ss:$28 sps:$4 sm:$0xff]  }
 0x85c   : > { %11256 = vmatpush1.bf16.msra.mxu1 %v22642_v47  ;;  %v22686_v47 = vld [vmem:[#allocation9 + $0x1cc0] ss:$28 sps:$4 sm:$0xff]  }
 0x85d   : > { %20175 = vmatpush3.bf16.msra.mxu0 %v22646_v39  ;;  %11268 = vmatprep.subr.bf16.mxu1 %v22649_v58  ;;  %v22689_v39 = vld [vmem:[#allocation9 + $0x1884] ss:$28 sps:$4 sm:$0xff]  }
 0x85e   : > { %20182 = vmatprep.subr.bf16.mxu0 %v22650_v55  ;;  %v22687_v55 = vld [vmem:[#allocation9 + $0x1880] ss:$28 sps:$4 sm:$0xff]  }
 0x85f   : > { %11258 = vmatmul.mubr.bf16.vlgmr.msra.gmra.mrb[80].mxu1 %v25901_v15  ;;  %v22664_v15 = vld [vmem:[#allocation9 + $0x177c] ss:$28 sps:$4 sm:$0xff]  }
 0x860   : > { %13500 = vmatmul.mubr.bf16.vlgmr.msra.gmra.mrb[80].mxu0 %v25759_v14  ;;  %11269 = vmatpush1.bf16.msra.mxu1 %v22647_v17  ;;  %v22690_v17 = vld [vmem:[#allocation9 + $0x1eb8] ss:$28 sps:$4 sm:$0xff]  }
 0x861   : > { %20183 = vmatpush3.bf16.msra.mxu0 %v22651_v60  ;;  %13540 = vmatprep.mubr.bf16.mxu0 %v25804_v61  ;;  %v22693_v60 = vld [vmem:[#allocation9 + $0x18bc] ss:$28 sps:$4 sm:$0xff]  }
 0x862   : > { %11270 = vmatprep.subr.bf16.mxu1 %v22654_v2  ;;  %20184 = vmatprep.subr.bf16.mxu0 %v22655_v52  ;;  %v22694_v2 = vld [vmem:[#allocation9 + $0x1ef0] ss:$28 sps:$4 sm:$0xff]  }
 0x863   : > { %11300 = vmatprep.mubr.bf16.mxu1 %v27021_v13  ;;  %v22697_v52 = vld [vmem:[#allocation9 + $0x18f4] ss:$28 sps:$4 sm:$0xff]  }
 0x864   : > { %11271 = vmatpush1.bf16.msra.mxu1 %v22652_v24 }
 0x865   : > { %20185 = vmatpush3.bf16.msra.mxu0 %v22656_v43  ;;  %11272 = vmatprep.subr.bf16.mxu1 %v22659_v50  ;;  %v22695_v50 = vld [vmem:[#allocation9 + $0x18f0] ss:$28 sps:$4 sm:$0xff]  }
 0x866   : > { %20186 = vmatprep.subr.bf16.mxu0 %v22660_v22 }
 0x868   : > { %11273 = vmatpush1.bf16.msra.mxu1 %v22657_v20  ;;  %v22698_v20 = vld [vmem:[#allocation9 + $0x1f28] ss:$28 sps:$4 sm:$0xff]  }
 0x869   : > { %20187 = vmatpush3.bf16.msra.mxu0 %v22661_v5  ;;  %11274 = vmatprep.subr.bf16.mxu1 %v22664_v15  ;;  %v22701_v5 = vld [vmem:[#allocation9 + $0x192c] ss:$28 sps:$4 sm:$0xff]  }
 0x86a   : > { %20188 = vmatprep.subr.bf16.mxu0 %v22665_v57 }
 0x86c   : > { %11275 = vmatpush1.bf16.msra.mxu1 %v22662_v16 }
 0x86d   : > { %20189 = vmatpush3.bf16.msra.mxu0 %v22666_v12  ;;  %13080 = vmatprep.subr.bf16.mxu1 %v22669_v0  ;;  %v22699_v0 = vld [vmem:[#allocation9 + $0x1928] ss:$28 sps:$4 sm:$0xff]  }
 0x86e   : > { %20190 = vmatprep.subr.bf16.mxu0 %v22670_v56  ;;  %v22702_v56 = vld [vmem:[#allocation9 + $0x1f60] ss:$28 sps:$4 sm:$0xff]  }
 0x86f   : > { %19145 = vmatmul.mubr.msk.bf16.vlgmr.msra.gmra.mrb[80].mxu1 %vm7000_vm8, %v25909_v42  ;;  %v22684_v42 = vld [vmem:[#allocation9 + $0x184c] ss:$28 sps:$4 sm:$0xff]  }
 0x870   : > { %13081 = vmatpush1.bf16.msra.mxu1 %v22667_v8  ;;  %13112 = vmatprep.mubr.bf16.mxu1 %v25762_v40  ;;  %v22705_v8 = vld [vmem:[#allocation9 + $0x1964] ss:$28 sps:$4 sm:$0xff]  }
 0x871   : > { %20191 = vmatpush3.bf16.msra.mxu0 %v22671_v62  ;;  %13082 = vmatprep.subr.bf16.mxu1 %v22674_v59  ;;  %v22708_v62 = vld [vmem:[#allocation9 + $0x1f8c] ss:$28 sps:$4 sm:$0xff]   ;;  %v13902_v59 = vrot.slane %v25746_v54, 2  ;;  %v22712_v54 = vld [vmem:[#allocation9 + $0x1fc0] ss:$28 sps:$4 sm:$0xff]  }
 0x872   : > { %20192 = vmatprep.subr.bf16.mxu0 %v22675_v11  ;;  %v22706_v11 = vld [vmem:[#allocation9 + $0x1f88] ss:$28 sps:$4 sm:$0xff]  }
 0x873   : > { %v20149_v27 = vpop.f32.mrb[72].mxu0 }
 0x874   : > { %v20150_v26 = vpop.f32.mrb[73].mxu0  ;;  %13083 = vmatpush1.bf16.msra.mxu1 %v22672_v63  ;;  %v22711_v63 = vld [vmem:[#allocation9 + $0x199c] ss:$28 sps:$4 sm:$0xff]  }
 0x875   : > { %v20151_v45 = vadd.f32 %v20150_v26, %v20149_v27  ;;  %v20152_v18 = vpop.f32.mrb[74].mxu0  ;;  %20193 = vmatpush3.bf16.msra.mxu0 %v22676_v31  ;;  %13084 = vmatprep.subr.bf16.mxu1 %v22679_v41  ;;  %v22714_v31 = vld [vmem:[#allocation9 + $0x1fc4] ss:$28 sps:$4 sm:$0xff]   ;;  %v22717_v27 = vld [vmem:[#allocation9 + $0x19d4] ss:$28 sps:$4 sm:$0xff]  }
 0x876   : > { %v20153_v29 = vpop.f32.mrb[75].mxu0  ;;  %20194 = vmatprep.subr.bf16.mxu0 %v22680_v44  ;;  %v22709_v44 = vld [vmem:[#allocation9 + $0x1998] ss:$28 sps:$4 sm:$0xff]  }
 0x877   : > { %v20154_v51 = vadd.f32 %v20153_v29, %v20152_v18  ;;  %v11387_v30 = vadd.f32 %v20151_v45, %v25954_v4  ;;  %v22691_v4 = vld [vmem:[#allocation9 + $0x18b8] ss:$28 sps:$4 sm:$0xff]   ;;  %v22723_v45 = vld [vmem:[#allocation9 + $0x1a0c] ss:$28 sps:$4 sm:$0xff]   ;;  %v22729_v29 = vld [vmem:[#allocation9 + $0x1a44] ss:$28 sps:$4 sm:$0xff]  }
 0x878   : > { %13085 = vmatpush1.bf16.msra.mxu1 %v22677_v25  ;;  %v22720_v26 = vld [vmem:[#allocation9 + $0x1ffc] ss:$28 sps:$4 sm:$0xff]   ;;  %v22726_v18 = vld [vmem:[#allocation9 + $0x2034] ss:$28 sps:$4 sm:$0xff]  }
 0x879   : > { %20195 = vmatpush3.bf16.msra.mxu0 %v22681_v36  ;;  %13086 = vmatprep.subr.bf16.mxu1 %v22684_v42  ;;  %v11390_v58 = vadd.f32 %v20154_v51, %v25956_v19  ;;  %v22718_v25 = vld [vmem:[#allocation9 + $0x1ff8] ss:$28 sps:$4 sm:$0xff]   ;;  %v22721_v36 = vld [vmem:[#allocation9 + $0x1a08] ss:$28 sps:$4 sm:$0xff]   ;;  %v22724_v42 = vld [vmem:[#allocation9 + $0x2030] ss:$28 sps:$4 sm:$0xff]  }
 0x87a   : > { %20196 = vmatprep.subr.bf16.mxu0 %v22685_v10  ;;  %v22732_v10 = vld [vmem:[#allocation9 + $0x206c] ss:$28 sps:$4 sm:$0xff]   ;;  %v22727_v51 = vld [vmem:[#allocation9 + $0x1a40] ss:$28 sps:$4 sm:$0xff]  }
 0x87c   : > { %13087 = vmatpush1.bf16.msra.mxu1 %v22682_v28  ;;  %v22735_v28 = vld [vmem:[#allocation9 + $0x1a7c] ss:$28 sps:$4 sm:$0xff]  }
 0x87d   : > { %20197 = vmatpush3.bf16.msra.mxu0 %v22686_v47  ;;  %13088 = vmatprep.subr.bf16.mxu1 %v22689_v39  ;;  %v22738_v47 = vld [vmem:[#allocation9 + $0x20a4] ss:$28 sps:$4 sm:$0xff]   ;;  %v22733_v39 = vld [vmem:[#allocation9 + $0x1a78] ss:$28 sps:$4 sm:$0xff]  }
 0x87e   : > { %20364 = vmatprep.subr.bf16.mxu0 %v23854_v53 }
 0x880   : > { %13541 = vmatmul.mubr.bf16.vlgmr.msra.gmra.mrb[84].mxu0 %v25799_v48  ;;  %13089 = vmatpush1.bf16.msra.mxu1 %v22687_v55  ;;  %v22741_v55 = vld [vmem:[#allocation9 + $0x1ab4] ss:$28 sps:$4 sm:$0xff]  }
 0x881   : > { %20365 = vmatpush3.bf16.msra.mxu0 %v22690_v17  ;;  %13090 = vmatprep.subr.bf16.mxu1 %v22693_v60  ;;  %v22744_v17 = vld [vmem:[#allocation9 + $0x20dc] ss:$28 sps:$4 sm:$0xff]   ;;  %v22739_v60 = vld [vmem:[#allocation9 + $0x1ab0] ss:$28 sps:$4 sm:$0xff]  }
 0x882   : > { %20366 = vmatprep.subr.bf16.mxu0 %v23854_v53  ;;  %20372 = vmatprep.mubr.msk.bf16.mxu0 %vm23855_vm9, %v23854_v53 }
 0x883   : > { %v11427_v19 = vpop.f32.mrb[76].mxu0 }
 0x884   : > { %v11428_v24 = vadd.f32 %v11427_v19, %v11387_v30  ;;  %v20362_v43 = vpop.f32.mrb[77].mxu0  ;;  %13091 = vmatpush1.bf16.msra.mxu1 %v22691_v4  ;;  %v22730_v30 = vld [vmem:[#allocation9 + $0x2068] ss:$28 sps:$4 sm:$0xff]   ;;  %v22742_v4 = vld [vmem:[#allocation9 + $0x20d8] ss:$28 sps:$4 sm:$0xff]  }
 0x885   : > { %v11430_v22 = vpop.f32.mrb[78].mxu0  ;;  %20367 = vmatpush3.bf16.msra.mxu0 %v22694_v2  ;;  %13092 = vmatprep.subr.bf16.mxu1 %v22697_v52  ;;  %v22747_v2 = vld [vmem:[#allocation9 + $0x1aec] ss:$28 sps:$4 sm:$0xff]   ;;  %v22750_v52 = vld [vmem:[#allocation9 + $0x2114] ss:$28 sps:$4 sm:$0xff]  }
 0x886   : > { %v25973_v15 = vadd.f32 %v11428_v24, %v25931_v32  ;;  %v11431_v57 = vadd.f32 %v11430_v22, %v11390_v58  ;;  %v20363_v16 = vpop.f32.mrb[79].mxu0  ;;  %20368 = vmatprep.subr.bf16.mxu0 %v23854_v53  ;;  %v22703_v32 = vld [vmem:[#allocation9 + $0x1960] ss:$28 sps:$4 sm:$0xff]   ;;  %v22745_v19 = vld [vmem:[#allocation9 + $0x1ae8] ss:$28 sps:$4 sm:$0xff]  }
 0x887   : > { %v22736_v58 = vld [vmem:[#allocation9 + $0x20a0] ss:$28 sps:$4 sm:$0xff]   ;;  %v22748_v24 = vld [vmem:[#allocation9 + $0x2110] ss:$28 sps:$4 sm:$0xff]   ;;  %v22757_v16 = vld [vmem:[#allocation9 + $0x1b58] ss:$28 sps:$4 sm:$0xff]  }
 0x888   : > { %v25977_v12 = vadd.f32 %v11431_v57, %v25933_v38  ;;  %13093 = vmatpush1.bf16.msra.mxu1 %v22695_v50  ;;  %v13901_v38 = vrot.slane %v25738_v23, 2  ;;  %v22715_v23 = vld [vmem:[#allocation9 + $0x19d0] ss:$28 sps:$4 sm:$0xff]   ;;  %v22753_v43 = vld [vmem:[#allocation9 + $0x1b24] ss:$28 sps:$4 sm:$0xff]  }
 0x889   : > { %20369 = vmatpush3.bf16.msra.mxu0 %v22698_v20  ;;  %13094 = vmatprep.subr.bf16.mxu1 %v22701_v5  ;;  %v22756_v50 = vld [vmem:[#allocation9 + $0x214c] ss:$28 sps:$4 sm:$0xff]   ;;  %v22751_v22 = vld [vmem:[#allocation9 + $0x1b20] ss:$28 sps:$4 sm:$0xff]  }
 0x88a   : > { %20370 = vmatprep.subr.bf16.mxu0 %v23854_v53  ;;  %v25985_v41 = vsel %vm1754_vm3, %v13901_v38, %v13902_v59  ;;  %v22754_v20 = vld [vmem:[#allocation9 + $0x2148] ss:$28 sps:$4 sm:$0xff]   ;;  %v22759_v5 = vld [vmem:[#allocation9 + $0x1b5c] ss:$28 sps:$4 sm:$0xff]  }
 0x88b   : > { %v22762_v57 = vld [vmem:[#allocation9 + $0x2184] ss:$28 sps:$4 sm:$0xff]   ;;  %v22766_v59 = vld [vmem:[#allocation9 + $0x21b8] ss:$28 sps:$4 sm:$0xff]  }
 0x88c   : > { %13095 = vmatpush1.bf16.msra.mxu1 %v22699_v0  ;;  %v22760_v0 = vld [vmem:[#allocation9 + $0x2180] ss:$28 sps:$4 sm:$0xff]   ;;  %v22769_v38 = vld [vmem:[#allocation9 + $0x1bc8] ss:$28 sps:$4 sm:$0xff]  }
 0x88d   : > { %20371 = vmatpush3.bf16.msra.mxu0 %v22702_v56  ;;  %13096 = vmatprep.subr.bf16.mxu1 %v22705_v8  ;;  %v22765_v56 = vld [vmem:[#allocation9 + $0x1b94] ss:$28 sps:$4 sm:$0xff]   ;;  %v22768_v8 = vld [vmem:[#allocation9 + $0x21bc] ss:$28 sps:$4 sm:$0xff]  }
 0x88e   : > { %15345 = vmatprep.subr.bf16.mxu0 %v22708_v62  ;;  %v22763_v62 = vld [vmem:[#allocation9 + $0x1b90] ss:$28 sps:$4 sm:$0xff]  }
 0x890   : > { %20373 = vmatmul.mubr.msk.bf16.vlgmr.msra.gmra.mrb[88].mxu0 %vm7000_vm8, %v25828_v9  ;;  %13097 = vmatpush1.bf16.msra.mxu1 %v22703_v32  ;;  %v22771_v32 = vld [vmem:[#allocation9 + $0x1bcc] ss:$28 sps:$4 sm:$0xff]  }
 0x891   : > { %15346 = vmatpush1.bf16.msra.mxu0 %v22706_v11  ;;  %15377 = vmatprep.mubr.bf16.mxu0 %v25985_v41  ;;  %v22774_v11 = vld [vmem:[#allocation9 + $0x21f4] ss:$28 sps:$4 sm:$0xff]  }
 0x892   : > { %13098 = vmatprep.subr.bf16.mxu1 %v22711_v63  ;;  %15347 = vmatprep.subr.bf16.mxu0 %v22714_v31  ;;  %v22772_v63 = vld [vmem:[#allocation9 + $0x21f0] ss:$28 sps:$4 sm:$0xff]   ;;  %v22777_v31 = vld [vmem:[#allocation9 + $0x1c04] ss:$28 sps:$4 sm:$0xff]  }
 0x894   : > { %13099 = vmatpush1.bf16.msra.mxu1 %v22709_v44  ;;  %v22780_v44 = vld [vmem:[#allocation9 + $0x222c] ss:$28 sps:$4 sm:$0xff]  }
 0x895   : > { %15348 = vmatpush1.bf16.msra.mxu0 %v22712_v54  ;;  %13100 = vmatprep.subr.bf16.mxu1 %v22717_v27  ;;  %v22775_v54 = vld [vmem:[#allocation9 + $0x1c00] ss:$28 sps:$4 sm:$0xff]   ;;  %v22778_v27 = vld [vmem:[#allocation9 + $0x2228] ss:$28 sps:$4 sm:$0xff]  }
 0x896   : > { %15349 = vmatprep.subr.bf16.mxu0 %v22720_v26  ;;  %v22783_v26 = vld [vmem:[#allocation9 + $0x1c3c] ss:$28 sps:$4 sm:$0xff]  }
 0x898   : > { %13101 = vmatpush1.bf16.msra.mxu1 %v22715_v23  ;;  %v22786_v23 = vld [vmem:[#allocation9 + $0x2264] ss:$28 sps:$4 sm:$0xff]  }
 0x899   : > { %15350 = vmatpush1.bf16.msra.mxu0 %v22718_v25  ;;  %13102 = vmatprep.subr.bf16.mxu1 %v22723_v45  ;;  %v22781_v25 = vld [vmem:[#allocation9 + $0x1c38] ss:$28 sps:$4 sm:$0xff]   ;;  %v22784_v45 = vld [vmem:[#allocation9 + $0x2260] ss:$28 sps:$4 sm:$0xff]  }
 0x89a   : > { %15351 = vmatprep.subr.bf16.mxu0 %v22726_v18  ;;  %v22789_v18 = vld [vmem:[#allocation9 + $0x1c74] ss:$28 sps:$4 sm:$0xff]  }
 0x89c   : > { %13103 = vmatpush1.bf16.msra.mxu1 %v22721_v36  ;;  %v22792_v36 = vld [vmem:[#allocation9 + $0x229c] ss:$28 sps:$4 sm:$0xff]  }
 0x89d   : > { %15352 = vmatpush1.bf16.msra.mxu0 %v22724_v42  ;;  %13104 = vmatprep.subr.bf16.mxu1 %v22729_v29  ;;  %v22787_v42 = vld [vmem:[#allocation9 + $0x1c70] ss:$28 sps:$4 sm:$0xff]   ;;  %v22790_v29 = vld [vmem:[#allocation9 + $0x2298] ss:$28 sps:$4 sm:$0xff]  }
 0x89e   : > { %15353 = vmatprep.subr.bf16.mxu0 %v22732_v10  ;;  %v22795_v10 = vld [vmem:[#allocation9 + $0x1cac] ss:$28 sps:$4 sm:$0xff]  }
 0x8a0   : > { %13105 = vmatpush1.bf16.msra.mxu1 %v22727_v51  ;;  %v22798_v51 = vld [vmem:[#allocation9 + $0x22d4] ss:$28 sps:$4 sm:$0xff]  }
 0x8a1   : > { %15354 = vmatpush1.bf16.msra.mxu0 %v22730_v30  ;;  %13106 = vmatprep.subr.bf16.mxu1 %v22735_v28  ;;  %v22793_v30 = vld [vmem:[#allocation9 + $0x1ca8] ss:$28 sps:$4 sm:$0xff]   ;;  %v22796_v28 = vld [vmem:[#allocation9 + $0x22d0] ss:$28 sps:$4 sm:$0xff]  }
 0x8a2   : > { %15355 = vmatprep.subr.bf16.mxu0 %v22738_v47  ;;  %v22801_v47 = vld [vmem:[#allocation9 + $0x1ce4] ss:$28 sps:$4 sm:$0xff]  }
 0x8a4   : > { %13107 = vmatpush1.bf16.msra.mxu1 %v22733_v39  ;;  %v22804_v39 = vld [vmem:[#allocation9 + $0x230c] ss:$28 sps:$4 sm:$0xff]  }
 0x8a5   : > { %15356 = vmatpush1.bf16.msra.mxu0 %v22736_v58  ;;  %13108 = vmatprep.subr.bf16.mxu1 %v22741_v55  ;;  %v13899_v58 = vrot.slane %v25744_v3, 2  ;;  %v13908_v55 = vrot.slane %v25786_v6, 2  ;;  %v22805_v6 = vld [vmem:[#allocation9 + $0x1d18] ss:$28 sps:$4 sm:$0xff]  }
 0x8a6   : > { %15357 = vmatprep.subr.bf16.mxu0 %v22744_v17  ;;  %v22799_v17 = vld [vmem:[#allocation9 + $0x1ce0] ss:$28 sps:$4 sm:$0xff]  }
 0x8a8   : > { %13109 = vmatpush1.bf16.msra.mxu1 %v22739_v60  ;;  %v13898_v60 = vrot.slane %v25736_v34, 2  ;;  %v22808_v34 = vld [vmem:[#allocation9 + $0x2340] ss:$28 sps:$4 sm:$0xff]  }
 0x8a9   : > { %15358 = vmatpush1.bf16.msra.mxu0 %v22742_v4  ;;  %13110 = vmatprep.subr.bf16.mxu1 %v22747_v2  ;;  %v22802_v4 = vld [vmem:[#allocation9 + $0x2308] ss:$28 sps:$4 sm:$0xff]   ;;  %v13907_v2 = vrot.slane %v25776_v33, 2  ;;  %v22816_v33 = vld [vmem:[#allocation9 + $0x237c] ss:$28 sps:$4 sm:$0xff]  }
 0x8aa   : > { %15359 = vmatprep.subr.bf16.mxu0 %v22750_v52  ;;  %v22807_v52 = vld [vmem:[#allocation9 + $0x1d1c] ss:$28 sps:$4 sm:$0xff]  }
 0x8ab   : > { %v25999_v3 = vsel %vm1754_vm3, %v13907_v2, %v13908_v55  ;;  %v22867_v55 = vld [vmem:[#allocation9 + $0x1f4c] ss:$28 sps:$4 sm:$0xff]   ;;  %v22873_v2 = vld [vmem:[#allocation9 + $0x17b4] ss:$28 sps:$4 sm:$0xff]  }
 0x8ac   : > { %13111 = vmatpush1.bf16.msra.mxu1 %v22745_v19  ;;  %v22810_v19 = vld [vmem:[#allocation9 + $0x2344] ss:$28 sps:$4 sm:$0xff]  }
 0x8ad   : > { %15360 = vmatpush1.bf16.msra.mxu0 %v22748_v24  ;;  %13123 = vmatprep.subr.bf16.mxu1 %v22753_v43  ;;  %v25995_v24 = vsel %vm1754_vm3, %v13898_v60, %v13899_v58  ;;  %v22813_v43 = vld [vmem:[#allocation9 + $0x1d54] ss:$28 sps:$4 sm:$0xff]   ;;  %v22865_v60 = vld [vmem:[#allocation9 + $0x1f48] ss:$28 sps:$4 sm:$0xff]  }
 0x8ae   : > { %15361 = vmatprep.subr.bf16.mxu0 %v22756_v50  ;;  %v22811_v50 = vld [vmem:[#allocation9 + $0x1d50] ss:$28 sps:$4 sm:$0xff]   ;;  %v22862_v58 = vld [vmem:[#allocation9 + $0x2538] ss:$28 sps:$4 sm:$0xff]  }
 0x8af   : > { %13113 = vmatmul.mubr.bf16.vlgmr.msra.gmra.mrb[76].mxu1 %v25759_v14 }
 0x8b0   : > { %13124 = vmatpush1.bf16.msra.mxu1 %v22751_v22  ;;  %13155 = vmatprep.mubr.bf16.mxu1 %v25804_v61  ;;  %v22814_v22 = vld [vmem:[#allocation9 + $0x2378] ss:$28 sps:$4 sm:$0xff]  }
 0x8b1   : > { %15362 = vmatpush1.bf16.msra.mxu0 %v22754_v20  ;;  %13125 = vmatprep.subr.bf16.mxu1 %v22759_v5  ;;  %v22819_v20 = vld [vmem:[#allocation9 + $0x1d8c] ss:$28 sps:$4 sm:$0xff]   ;;  %v22822_v5 = vld [vmem:[#allocation9 + $0x23b4] ss:$28 sps:$4 sm:$0xff]  }
 0x8b2   : > { %15363 = vmatprep.subr.bf16.mxu0 %v22762_v57  ;;  %v22817_v57 = vld [vmem:[#allocation9 + $0x1d88] ss:$28 sps:$4 sm:$0xff]  }
 0x8b4   : > { %13126 = vmatpush1.bf16.msra.mxu1 %v22757_v16  ;;  %v22820_v16 = vld [vmem:[#allocation9 + $0x23b0] ss:$28 sps:$4 sm:$0xff]  }
 0x8b5   : > { %15364 = vmatpush1.bf16.msra.mxu0 %v22760_v0  ;;  %13127 = vmatprep.subr.bf16.mxu1 %v22765_v56  ;;  %v22825_v0 = vld [vmem:[#allocation9 + $0x1dc4] ss:$28 sps:$4 sm:$0xff]   ;;  %v22828_v56 = vld [vmem:[#allocation9 + $0x23ec] ss:$28 sps:$4 sm:$0xff]  }
 0x8b6   : > { %15365 = vmatprep.subr.bf16.mxu0 %v22768_v8  ;;  %v22823_v8 = vld [vmem:[#allocation9 + $0x1dc0] ss:$28 sps:$4 sm:$0xff]  }
 0x8b8   : > { %13128 = vmatpush1.bf16.msra.mxu1 %v22763_v62  ;;  %v22826_v62 = vld [vmem:[#allocation9 + $0x23e8] ss:$28 sps:$4 sm:$0xff]  }
 0x8b9   : > { %15366 = vmatpush1.bf16.msra.mxu0 %v22766_v59  ;;  %13129 = vmatprep.subr.bf16.mxu1 %v22771_v32  ;;  %v22831_v59 = vld [vmem:[#allocation9 + $0x1dfc] ss:$28 sps:$4 sm:$0xff]   ;;  %v22834_v32 = vld [vmem:[#allocation9 + $0x2424] ss:$28 sps:$4 sm:$0xff]  }
 0x8ba   : > { %15367 = vmatprep.subr.bf16.mxu0 %v22774_v11  ;;  %v22829_v11 = vld [vmem:[#allocation9 + $0x1df8] ss:$28 sps:$4 sm:$0xff]  }
 0x8bc   : > { %13130 = vmatpush1.bf16.msra.mxu1 %v22769_v38  ;;  %v22832_v38 = vld [vmem:[#allocation9 + $0x2420] ss:$28 sps:$4 sm:$0xff]  }
 0x8bd   : > { %15368 = vmatpush1.bf16.msra.mxu0 %v22772_v63  ;;  %13131 = vmatprep.subr.bf16.mxu1 %v22777_v31  ;;  %v22837_v63 = vld [vmem:[#allocation9 + $0x1e34] ss:$28 sps:$4 sm:$0xff]   ;;  %v22840_v31 = vld [vmem:[#allocation9 + $0x245c] ss:$28 sps:$4 sm:$0xff]  }
 0x8be   : > { %15369 = vmatprep.subr.bf16.mxu0 %v22780_v44  ;;  %v22835_v44 = vld [vmem:[#allocation9 + $0x1e30] ss:$28 sps:$4 sm:$0xff]  }
 0x8c0   : > { %13132 = vmatpush1.bf16.msra.mxu1 %v22775_v54  ;;  %v22838_v54 = vld [vmem:[#allocation9 + $0x2458] ss:$28 sps:$4 sm:$0xff]  }
 0x8c1   : > { %15370 = vmatpush1.bf16.msra.mxu0 %v22778_v27  ;;  %13133 = vmatprep.subr.bf16.mxu1 %v22783_v26  ;;  %v22843_v27 = vld [vmem:[#allocation9 + $0x1e6c] ss:$28 sps:$4 sm:$0xff]   ;;  %v22846_v26 = vld [vmem:[#allocation9 + $0x2494] ss:$28 sps:$4 sm:$0xff]  }
 0x8c2   : > { %15371 = vmatprep.subr.bf16.mxu0 %v22786_v23  ;;  %v22841_v23 = vld [vmem:[#allocation9 + $0x1e68] ss:$28 sps:$4 sm:$0xff]  }
 0x8c4   : > { %13134 = vmatpush1.bf16.msra.mxu1 %v22781_v25  ;;  %v22844_v25 = vld [vmem:[#allocation9 + $0x2490] ss:$28 sps:$4 sm:$0xff]  }
 0x8c5   : > { %15372 = vmatpush1.bf16.msra.mxu0 %v22784_v45  ;;  %13135 = vmatprep.subr.bf16.mxu1 %v22789_v18  ;;  %v22849_v45 = vld [vmem:[#allocation9 + $0x1ea4] ss:$28 sps:$4 sm:$0xff]   ;;  %v22852_v18 = vld [vmem:[#allocation9 + $0x24cc] ss:$28 sps:$4 sm:$0xff]  }
 0x8c6   : > { %15373 = vmatprep.subr.bf16.mxu0 %v22792_v36  ;;  %v22847_v36 = vld [vmem:[#allocation9 + $0x1ea0] ss:$28 sps:$4 sm:$0xff]  }
 0x8c8   : > { %13136 = vmatpush1.bf16.msra.mxu1 %v22787_v42  ;;  %v22850_v42 = vld [vmem:[#allocation9 + $0x24c8] ss:$28 sps:$4 sm:$0xff]  }
 0x8c9   : > { %15374 = vmatpush1.bf16.msra.mxu0 %v22790_v29  ;;  %13137 = vmatprep.subr.bf16.mxu1 %v22795_v10  ;;  %v22855_v29 = vld [vmem:[#allocation9 + $0x1edc] ss:$28 sps:$4 sm:$0xff]   ;;  %v22858_v10 = vld [vmem:[#allocation9 + $0x2504] ss:$28 sps:$4 sm:$0xff]  }
 0x8ca   : > { %15375 = vmatprep.subr.bf16.mxu0 %v22798_v51  ;;  %v22853_v51 = vld [vmem:[#allocation9 + $0x1ed8] ss:$28 sps:$4 sm:$0xff]  }
 0x8cc   : > { %13138 = vmatpush1.bf16.msra.mxu1 %v22793_v30  ;;  %v22856_v30 = vld [vmem:[#allocation9 + $0x2500] ss:$28 sps:$4 sm:$0xff]  }
 0x8cd   : > { %15376 = vmatpush1.bf16.msra.mxu0 %v22796_v28  ;;  %13139 = vmatprep.subr.bf16.mxu1 %v22801_v47  ;;  %v22861_v28 = vld [vmem:[#allocation9 + $0x1f14] ss:$28 sps:$4 sm:$0xff]   ;;  %v22864_v47 = vld [vmem:[#allocation9 + $0x253c] ss:$28 sps:$4 sm:$0xff]  }
 0x8ce   : > { %15388 = vmatprep.subr.bf16.mxu0 %v22804_v39  ;;  %v22859_v39 = vld [vmem:[#allocation9 + $0x1f10] ss:$28 sps:$4 sm:$0xff]  }
 0x8d0   : > { %15378 = vmatmul.mubr.bf16.vlgmr.msra.gmra.mrb[40].mxu0 %v25995_v24  ;;  %13140 = vmatpush1.bf16.msra.mxu1 %v22799_v17  ;;  %v22870_v17 = vld [vmem:[#allocation9 + $0x2574] ss:$28 sps:$4 sm:$0xff]  }
 0x8d1   : > { %15389 = vmatpush1.bf16.msra.mxu0 %v22802_v4  ;;  %15420 = vmatprep.mubr.bf16.mxu0 %v25999_v3  ;;  %v22868_v4 = vld [vmem:[#allocation9 + $0x2570] ss:$28 sps:$4 sm:$0xff]  }
 0x8d2   : > { %13141 = vmatprep.subr.bf16.mxu1 %v22807_v52  ;;  %15390 = vmatprep.subr.bf16.mxu0 %v22810_v19  ;;  %v22876_v52 = vld [vmem:[#allocation9 + $0x25ac] ss:$28 sps:$4 sm:$0xff]  }
 0x8d3   : > { %v22871_v19 = vld [vmem:[#allocation9 + $0x17b0] ss:$28 sps:$4 sm:$0xff]  }
 0x8d4   : > { %13142 = vmatpush1.bf16.msra.mxu1 %v22805_v6  ;;  %v22874_v6 = vld [vmem:[#allocation9 + $0x25a8] ss:$28 sps:$4 sm:$0xff]  }
 0x8d5   : > { %15391 = vmatpush1.bf16.msra.mxu0 %v22808_v34  ;;  %13143 = vmatprep.subr.bf16.mxu1 %v22813_v43  ;;  %v22879_v34 = vld [vmem:[#allocation9 + $0x17ec] ss:$28 sps:$4 sm:$0xff]   ;;  %v22882_v43 = vld [vmem:[#allocation9 + $0x25e4] ss:$28 sps:$4 sm:$0xff]  }
 0x8d6   : > { %15392 = vmatprep.subr.bf16.mxu0 %v22816_v33  ;;  %v22877_v33 = vld [vmem:[#allocation9 + $0x17e8] ss:$28 sps:$4 sm:$0xff]  }
 0x8d8   : > { %13144 = vmatpush1.bf16.msra.mxu1 %v22811_v50  ;;  %v22880_v50 = vld [vmem:[#allocation9 + $0x25e0] ss:$28 sps:$4 sm:$0xff]  }
 0x8d9   : > { %15393 = vmatpush1.bf16.msra.mxu0 %v22814_v22  ;;  %13145 = vmatprep.subr.bf16.mxu1 %v22819_v20  ;;  %v22885_v22 = vld [vmem:[#allocation9 + $0x1824] ss:$28 sps:$4 sm:$0xff]   ;;  %v22888_v20 = vld [vmem:[#allocation9 + $0x261c] ss:$28 sps:$4 sm:$0xff]  }
 0x8da   : > { %15394 = vmatprep.subr.bf16.mxu0 %v22822_v5  ;;  %v22883_v5 = vld [vmem:[#allocation9 + $0x1820] ss:$28 sps:$4 sm:$0xff]  }
 0x8dc   : > { %13146 = vmatpush1.bf16.msra.mxu1 %v22817_v57  ;;  %v22886_v57 = vld [vmem:[#allocation9 + $0x2618] ss:$28 sps:$4 sm:$0xff]  }
 0x8dd   : > { %15395 = vmatpush1.bf16.msra.mxu0 %v22820_v16  ;;  %13147 = vmatprep.subr.bf16.mxu1 %v22825_v0  ;;  %v22891_v16 = vld [vmem:[#allocation9 + $0x185c] ss:$28 sps:$4 sm:$0xff]   ;;  %v22894_v0 = vld [vmem:[#allocation9 + $0x2654] ss:$28 sps:$4 sm:$0xff]  }
 0x8de   : > { %15396 = vmatprep.subr.bf16.mxu0 %v22828_v56  ;;  %v22889_v56 = vld [vmem:[#allocation9 + $0x1858] ss:$28 sps:$4 sm:$0xff]  }
 0x8e0   : > { %13148 = vmatpush1.bf16.msra.mxu1 %v22823_v8  ;;  %v22897_v8 = vld [vmem:[#allocation9 + $0x1894] ss:$28 sps:$4 sm:$0xff]  }
 0x8e1   : > { %15397 = vmatpush1.bf16.msra.mxu0 %v22826_v62  ;;  %13149 = vmatprep.subr.bf16.mxu1 %v22831_v59  ;;  %v22900_v62 = vld [vmem:[#allocation9 + $0x268c] ss:$28 sps:$4 sm:$0xff]   ;;  %v13905_v59 = vrot.slane %v25784_v7, 2  ;;  %v22904_v7 = vld [vmem:[#allocation9 + $0x26c0] ss:$28 sps:$4 sm:$0xff]  }
 0x8e2   : > { %15398 = vmatprep.subr.bf16.mxu0 %v22834_v32  ;;  %v22895_v32 = vld [vmem:[#allocation9 + $0x1890] ss:$28 sps:$4 sm:$0xff]  }
 0x8e4   : > { %13150 = vmatpush1.bf16.msra.mxu1 %v22829_v11  ;;  %v13904_v11 = vrot.slane %v25774_v21, 2  ;;  %v22907_v21 = vld [vmem:[#allocation9 + $0x1900] ss:$28 sps:$4 sm:$0xff]  }
 0x8e5   : > { %15399 = vmatpush1.bf16.msra.mxu0 %v22832_v38  ;;  %13151 = vmatprep.subr.bf16.mxu1 %v22837_v63  ;;  %v22898_v38 = vld [vmem:[#allocation9 + $0x2688] ss:$28 sps:$4 sm:$0xff]  }
 0x8e6   : > { %15400 = vmatprep.subr.bf16.mxu0 %v22840_v31  ;;  %v22903_v63 = vld [vmem:[#allocation9 + $0x18cc] ss:$28 sps:$4 sm:$0xff]   ;;  %v22906_v31 = vld [vmem:[#allocation9 + $0x26c4] ss:$28 sps:$4 sm:$0xff]  }
 0x8e8   : > { %13152 = vmatpush1.bf16.msra.mxu1 %v22835_v44  ;;  %v26010_v44 = vsel %vm1754_vm3, %v13904_v11, %v13905_v59  ;;  %v22956_v11 = vld [vmem:[#allocation9 + $0x1afc] ss:$28 sps:$4 sm:$0xff]  }
 0x8e9   : > { %15401 = vmatpush1.bf16.msra.mxu0 %v22838_v54  ;;  %13153 = vmatprep.subr.bf16.mxu1 %v22843_v27  ;;  %v22901_v54 = vld [vmem:[#allocation9 + $0x18c8] ss:$28 sps:$4 sm:$0xff]  }
 0x8ea   : > { %15402 = vmatprep.subr.bf16.mxu0 %v22846_v26  ;;  %v22909_v27 = vld [vmem:[#allocation9 + $0x1904] ss:$28 sps:$4 sm:$0xff]   ;;  %v22912_v26 = vld [vmem:[#allocation9 + $0x26fc] ss:$28 sps:$4 sm:$0xff]  }
 0x8ec   : > { %13154 = vmatpush1.bf16.msra.mxu1 %v22841_v23  ;;  %v22910_v23 = vld [vmem:[#allocation9 + $0x26f8] ss:$28 sps:$4 sm:$0xff]  }
 0x8ed   : > { %15403 = vmatpush1.bf16.msra.mxu0 %v22844_v25  ;;  %13166 = vmatprep.subr.bf16.mxu1 %v22849_v45  ;;  %v22915_v25 = vld [vmem:[#allocation9 + $0x193c] ss:$28 sps:$4 sm:$0xff]   ;;  %v22918_v45 = vld [vmem:[#allocation9 + $0x2734] ss:$28 sps:$4 sm:$0xff]  }
 0x8ee   : > { %15404 = vmatprep.subr.bf16.mxu0 %v22852_v18  ;;  %v22913_v18 = vld [vmem:[#allocation9 + $0x1938] ss:$28 sps:$4 sm:$0xff]  }
 0x8ef   : > { %13156 = vmatmul.mubr.bf16.vlgmr.msra.gmra.mrb[76].mxu1 %v25799_v48 }
 0x8f0   : > { %13167 = vmatpush1.bf16.msra.mxu1 %v22847_v36  ;;  %13198 = vmatprep.mubr.bf16.mxu1 %v27021_v13  ;;  %v22916_v36 = vld [vmem:[#allocation9 + $0x2730] ss:$28 sps:$4 sm:$0xff]  }
 0x8f1   : > { %15405 = vmatpush1.bf16.msra.mxu0 %v22850_v42  ;;  %13168 = vmatprep.subr.bf16.mxu1 %v22855_v29  ;;  %v22921_v42 = vld [vmem:[#allocation9 + $0x1974] ss:$28 sps:$4 sm:$0xff]  }
 0x8f2   : > { %15406 = vmatprep.subr.bf16.mxu0 %v22858_v10  ;;  %v22922_v29 = vld [vmem:[#allocation9 + $0x2158] ss:$28 sps:$4 sm:$0xff]   ;;  %v13911_v10 = vrot.slane %v25816_v35, 2  ;;  %v22928_v35 = vld [vmem:[#allocation9 + $0x1fd0] ss:$28 sps:$4 sm:$0xff]  }
 0x8f4   : > { %13169 = vmatpush1.bf16.msra.mxu1 %v22853_v51  ;;  %v22919_v51 = vld [vmem:[#allocation9 + $0x1970] ss:$28 sps:$4 sm:$0xff]  }
 0x8f5   : > { %15407 = vmatpush1.bf16.msra.mxu0 %v22856_v30  ;;  %13170 = vmatprep.subr.bf16.mxu1 %v22861_v28  ;;  %v13910_v30 = vrot.slane %v25811_v37, 2  ;;  %v22923_v28 = vld [vmem:[#allocation9 + $0x1f98] ss:$28 sps:$4 sm:$0xff]   ;;  %v22932_v37 = vld [vmem:[#allocation9 + $0x21c8] ss:$28 sps:$4 sm:$0xff]  }
 0x8f6   : > { %15408 = vmatprep.subr.bf16.mxu0 %v22864_v47  ;;  %v22926_v47 = vld [vmem:[#allocation9 + $0x19ac] ss:$28 sps:$4 sm:$0xff]  }
 0x8f8   : > { %13171 = vmatpush1.bf16.msra.mxu1 %v22859_v39  ;;  %v22927_v39 = vld [vmem:[#allocation9 + $0x2190] ss:$28 sps:$4 sm:$0xff]  }
 0x8f9   : > { %15409 = vmatpush1.bf16.msra.mxu0 %v22862_v58  ;;  %13172 = vmatprep.subr.bf16.mxu1 %v22867_v55  ;;  %v26017_v58 = vsel %vm1754_vm3, %v13910_v30, %v13911_v10  ;;  %v22924_v55 = vld [vmem:[#allocation9 + $0x19a8] ss:$28 sps:$4 sm:$0xff]   ;;  %v22969_v10 = vld [vmem:[#allocation9 + $0x1ba0] ss:$28 sps:$4 sm:$0xff]  }
 0x8fa   : > { %15410 = vmatprep.subr.bf16.mxu0 %v22870_v17  ;;  %v22931_v17 = vld [vmem:[#allocation9 + $0x19e4] ss:$28 sps:$4 sm:$0xff]  }
 0x8fb   : > { %v22977_v30 = vld [vmem:[#allocation9 + $0x2580] ss:$28 sps:$4 sm:$0xff]  }
 0x8fc   : > { %13173 = vmatpush1.bf16.msra.mxu1 %v22865_v60  ;;  %v22929_v60 = vld [vmem:[#allocation9 + $0x19e0] ss:$28 sps:$4 sm:$0xff]  }
 0x8fd   : > { %15411 = vmatpush1.bf16.msra.mxu0 %v22868_v4  ;;  %13338 = vmatprep.subr.bf16.mxu1 %v22873_v2  ;;  %v22933_v4 = vld [vmem:[#allocation9 + $0x2008] ss:$28 sps:$4 sm:$0xff]   ;;  %v22936_v2 = vld [vmem:[#allocation9 + $0x1a1c] ss:$28 sps:$4 sm:$0xff]  }
 0x8fe   : > { %15412 = vmatprep.subr.bf16.mxu0 %v22876_v52  ;;  %v22937_v52 = vld [vmem:[#allocation9 + $0x2200] ss:$28 sps:$4 sm:$0xff]  }
 0x8ff   : > { %19399 = vmatmul.mubr.msk.bf16.vlgmr.msra.gmra.mrb[76].mxu1 %vm7000_vm8, %v25828_v9 }
 0x900   : > { %13339 = vmatpush1.bf16.msra.mxu1 %v22871_v19  ;;  %13370 = vmatprep.mubr.bf16.mxu1 %v25762_v40  ;;  %v22892_v40 = vld [vmem:[#allocation9 + $0x2650] ss:$28 sps:$4 sm:$0xff]   ;;  %v22934_v19 = vld [vmem:[#allocation9 + $0x1a18] ss:$28 sps:$4 sm:$0xff]  }
 0x901   : > { %15413 = vmatpush1.bf16.msra.mxu0 %v22874_v6  ;;  %13340 = vmatprep.subr.bf16.mxu1 %v22879_v34  ;;  %v22938_v6 = vld [vmem:[#allocation9 + $0x2040] ss:$28 sps:$4 sm:$0xff]   ;;  %v22941_v34 = vld [vmem:[#allocation9 + $0x1a54] ss:$28 sps:$4 sm:$0xff]  }
 0x902   : > { %15414 = vmatprep.subr.bf16.mxu0 %v22882_v43  ;;  %v22942_v43 = vld [vmem:[#allocation9 + $0x2238] ss:$28 sps:$4 sm:$0xff]  }
 0x904   : > { %13341 = vmatpush1.bf16.msra.mxu1 %v22877_v33  ;;  %v22939_v33 = vld [vmem:[#allocation9 + $0x1a50] ss:$28 sps:$4 sm:$0xff]  }
 0x905   : > { %15415 = vmatpush1.bf16.msra.mxu0 %v22880_v50  ;;  %13342 = vmatprep.subr.bf16.mxu1 %v22885_v22  ;;  %v22943_v50 = vld [vmem:[#allocation9 + $0x2078] ss:$28 sps:$4 sm:$0xff]   ;;  %v22946_v22 = vld [vmem:[#allocation9 + $0x1a8c] ss:$28 sps:$4 sm:$0xff]  }
 0x906   : > { %15416 = vmatprep.subr.bf16.mxu0 %v22888_v20  ;;  %v22947_v20 = vld [vmem:[#allocation9 + $0x2270] ss:$28 sps:$4 sm:$0xff]  }
 0x908   : > { %13343 = vmatpush1.bf16.msra.mxu1 %v22883_v5  ;;  %v22944_v5 = vld [vmem:[#allocation9 + $0x1a88] ss:$28 sps:$4 sm:$0xff]  }
 0x909   : > { %15417 = vmatpush1.bf16.msra.mxu0 %v22886_v57  ;;  %13344 = vmatprep.subr.bf16.mxu1 %v22891_v16  ;;  %v22948_v57 = vld [vmem:[#allocation9 + $0x20b0] ss:$28 sps:$4 sm:$0xff]   ;;  %v22951_v16 = vld [vmem:[#allocation9 + $0x1ac4] ss:$28 sps:$4 sm:$0xff]  }
 0x90a   : > { %15418 = vmatprep.subr.bf16.mxu0 %v22894_v0  ;;  %v22952_v0 = vld [vmem:[#allocation9 + $0x22a8] ss:$28 sps:$4 sm:$0xff]  }
 0x90c   : > { %13345 = vmatpush1.bf16.msra.mxu1 %v22889_v56 }
 0x90d   : > { %15419 = vmatpush1.bf16.msra.mxu0 %v22892_v40  ;;  %13346 = vmatprep.subr.bf16.mxu1 %v22897_v8  ;;  %v22949_v8 = vld [vmem:[#allocation9 + $0x1ac0] ss:$28 sps:$4 sm:$0xff]  }
 0x90e   : > { %15431 = vmatprep.subr.bf16.mxu0 %v22900_v62 }
 0x910   : > { %15421 = vmatmul.mubr.bf16.vlgmr.msra.gmra.mrb[40].mxu0 %v26010_v44  ;;  %13347 = vmatpush1.bf16.msra.mxu1 %v22895_v32  ;;  %v22953_v32 = vld [vmem:[#allocation9 + $0x20e8] ss:$28 sps:$4 sm:$0xff]  }
 0x911   : > { %15432 = vmatpush1.bf16.msra.mxu0 %v22898_v38  ;;  %13348 = vmatprep.subr.bf16.mxu1 %v22903_v63  ;;  %v22957_v63 = vld [vmem:[#allocation9 + $0x22e0] ss:$28 sps:$4 sm:$0xff]  }
 0x912   : > { %15433 = vmatprep.subr.bf16.mxu0 %v22906_v31  ;;  %15463 = vmatprep.mubr.bf16.mxu0 %v27021_v13 }
 0x914   : > { %13349 = vmatpush1.bf16.msra.mxu1 %v22901_v54  ;;  %v22954_v54 = vld [vmem:[#allocation9 + $0x1af8] ss:$28 sps:$4 sm:$0xff]  }
 0x915   : > { %15434 = vmatpush1.bf16.msra.mxu0 %v22904_v7  ;;  %13350 = vmatprep.subr.bf16.mxu1 %v22909_v27  ;;  %v22958_v7 = vld [vmem:[#allocation9 + $0x2120] ss:$28 sps:$4 sm:$0xff]   ;;  %v22961_v27 = vld [vmem:[#allocation9 + $0x1b34] ss:$28 sps:$4 sm:$0xff]  }
 0x916   : > { %15435 = vmatprep.subr.bf16.mxu0 %v22912_v26  ;;  %v22962_v26 = vld [vmem:[#allocation9 + $0x24d8] ss:$28 sps:$4 sm:$0xff]  }
 0x918   : > { %13351 = vmatpush1.bf16.msra.mxu1 %v22907_v21  ;;  %v22959_v21 = vld [vmem:[#allocation9 + $0x1b30] ss:$28 sps:$4 sm:$0xff]  }
 0x919   : > { %15436 = vmatpush1.bf16.msra.mxu0 %v22910_v23  ;;  %13352 = vmatprep.subr.bf16.mxu1 %v22915_v25  ;;  %v22963_v23 = vld [vmem:[#allocation9 + $0x2318] ss:$28 sps:$4 sm:$0xff]   ;;  %v22966_v25 = vld [vmem:[#allocation9 + $0x1b6c] ss:$28 sps:$4 sm:$0xff]  }
 0x91a   : > { %15437 = vmatprep.subr.bf16.mxu0 %v22918_v45  ;;  %v22967_v45 = vld [vmem:[#allocation9 + $0x2510] ss:$28 sps:$4 sm:$0xff]  }
 0x91c   : > { %13353 = vmatpush1.bf16.msra.mxu1 %v22913_v18  ;;  %v22964_v18 = vld [vmem:[#allocation9 + $0x1b68] ss:$28 sps:$4 sm:$0xff]  }
 0x91d   : > { %15438 = vmatpush1.bf16.msra.mxu0 %v22916_v36  ;;  %13354 = vmatprep.subr.bf16.mxu1 %v22921_v42  ;;  %v22968_v36 = vld [vmem:[#allocation9 + $0x2350] ss:$28 sps:$4 sm:$0xff]   ;;  %v22971_v42 = vld [vmem:[#allocation9 + $0x1ba4] ss:$28 sps:$4 sm:$0xff]  }
 0x91e   : > { %20209 = vmatprep.subr.bf16.mxu0 %v22922_v29  ;;  %v22972_v29 = vld [vmem:[#allocation9 + $0x2548] ss:$28 sps:$4 sm:$0xff]  }
 0x920   : > { %19656 = vmatmul.mubr.msk.bf16.vlgmr.msra.gmra.mrb[40].mxu0 %vm7000_vm8, %v26017_v58  ;;  %13355 = vmatpush1.bf16.msra.mxu1 %v22919_v51  ;;  %v22976_v51 = vld [vmem:[#allocation9 + $0x1bdc] ss:$28 sps:$4 sm:$0xff]  }
 0x921   : > { %20210 = vmatpush3.bf16.msra.mxu0 %v22923_v28  ;;  %15635 = vmatprep.mubr.bf16.mxu0 %v25985_v41  ;;  %v22974_v28 = vld [vmem:[#allocation9 + $0x1bd8] ss:$28 sps:$4 sm:$0xff]  }
 0x922   : > { %13356 = vmatprep.subr.bf16.mxu1 %v22926_v47  ;;  %20211 = vmatprep.subr.bf16.mxu0 %v22927_v39  ;;  %v22981_v47 = vld [vmem:[#allocation9 + $0x1c14] ss:$28 sps:$4 sm:$0xff]  }
 0x923   : > { %v22982_v39 = vld [vmem:[#allocation9 + $0x25b8] ss:$28 sps:$4 sm:$0xff]  }
 0x924   : > { %13357 = vmatpush1.bf16.msra.mxu1 %v22924_v55  ;;  %v22979_v55 = vld [vmem:[#allocation9 + $0x1c10] ss:$28 sps:$4 sm:$0xff]  }
 0x925   : > { %20212 = vmatpush3.bf16.msra.mxu0 %v22928_v35  ;;  %13358 = vmatprep.subr.bf16.mxu1 %v22931_v17  ;;  %v22983_v35 = vld [vmem:[#allocation9 + $0x23f8] ss:$28 sps:$4 sm:$0xff]   ;;  %v22986_v17 = vld [vmem:[#allocation9 + $0x1c4c] ss:$28 sps:$4 sm:$0xff]  }
 0x926   : > { %20213 = vmatprep.subr.bf16.mxu0 %v22932_v37  ;;  %v22987_v37 = vld [vmem:[#allocation9 + $0x25f0] ss:$28 sps:$4 sm:$0xff]  }
 0x928   : > { %13359 = vmatpush1.bf16.msra.mxu1 %v22929_v60  ;;  %v22984_v60 = vld [vmem:[#allocation9 + $0x1c48] ss:$28 sps:$4 sm:$0xff]  }
 0x929   : > { %20214 = vmatpush3.bf16.msra.mxu0 %v22933_v4  ;;  %13360 = vmatprep.subr.bf16.mxu1 %v22936_v2  ;;  %v22988_v4 = vld [vmem:[#allocation9 + $0x2430] ss:$28 sps:$4 sm:$0xff]   ;;  %v22991_v2 = vld [vmem:[#allocation9 + $0x1c84] ss:$28 sps:$4 sm:$0xff]  }
 0x92a   : > { %20215 = vmatprep.subr.bf16.mxu0 %v22937_v52  ;;  %v22992_v52 = vld [vmem:[#allocation9 + $0x2628] ss:$28 sps:$4 sm:$0xff]  }
 0x92c   : > { %13361 = vmatpush1.bf16.msra.mxu1 %v22934_v19 }
 0x92d   : > { %20216 = vmatpush3.bf16.msra.mxu0 %v22938_v6  ;;  %13362 = vmatprep.subr.bf16.mxu1 %v22941_v34  ;;  %v22989_v34 = vld [vmem:[#allocation9 + $0x1c80] ss:$28 sps:$4 sm:$0xff]  }
 0x92e   : > { %20217 = vmatprep.subr.bf16.mxu0 %v22942_v43 }
 0x930   : > { %13363 = vmatpush1.bf16.msra.mxu1 %v22939_v33 }
 0x931   : > { %20218 = vmatpush3.bf16.msra.mxu0 %v22943_v50  ;;  %13364 = vmatprep.subr.bf16.mxu1 %v22946_v22  ;;  %v22993_v50 = vld [vmem:[#allocation9 + $0x2468] ss:$28 sps:$4 sm:$0xff]   ;;  %v22996_v22 = vld [vmem:[#allocation9 + $0x1cbc] ss:$28 sps:$4 sm:$0xff]  }
 0x932   : > { %20219 = vmatprep.subr.bf16.mxu0 %v22947_v20 }
 0x933   : > { %v20176_v56 = vpop.f32.mrb[80].mxu0 }
 0x934   : > { %v20177_v40 = vpop.f32.mrb[81].mxu0  ;;  %13365 = vmatpush1.bf16.msra.mxu1 %v22944_v5  ;;  %v22997_v5 = vld [vmem:[#allocation9 + $0x2660] ss:$28 sps:$4 sm:$0xff]  }
 0x935   : > { %v26022_v62 = vadd.f32 %v20177_v40, %v20176_v56  ;;  %v20179_v59 = vpop.f32.mrb[82].mxu0  ;;  %20220 = vmatpush3.bf16.msra.mxu0 %v22948_v57  ;;  %13366 = vmatprep.subr.bf16.mxu1 %v22951_v16  ;;  %v22998_v56 = vld [vmem:[#allocation9 + $0x24a0] ss:$28 sps:$4 sm:$0xff]   ;;  %v23001_v40 = vld [vmem:[#allocation9 + $0x1cf4] ss:$28 sps:$4 sm:$0xff]  }
 0x936   : > { %v20180_v38 = vpop.f32.mrb[83].mxu0  ;;  %20221 = vmatprep.subr.bf16.mxu0 %v22952_v0  ;;  %v22994_v0 = vld [vmem:[#allocation9 + $0x1cb8] ss:$28 sps:$4 sm:$0xff]  }
 0x937   : > { %v26024_v31 = vadd.f32 %v20180_v38, %v20179_v59  ;;  %v22999_v59 = vld [vmem:[#allocation9 + $0x1cf0] ss:$28 sps:$4 sm:$0xff]  }
 0x938   : > { %13367 = vmatpush1.bf16.msra.mxu1 %v22949_v8  ;;  %v23006_v38 = vld [vmem:[#allocation9 + $0x26d0] ss:$28 sps:$4 sm:$0xff]  }
 0x939   : > { %20222 = vmatpush3.bf16.msra.mxu0 %v22953_v32  ;;  %13368 = vmatprep.subr.bf16.mxu1 %v22956_v11  ;;  %v23002_v32 = vld [vmem:[#allocation9 + $0x2698] ss:$28 sps:$4 sm:$0xff]   ;;  %v23005_v11 = vld [vmem:[#allocation9 + $0x1d2c] ss:$28 sps:$4 sm:$0xff]  }
 0x93a   : > { %20223 = vmatprep.subr.bf16.mxu0 %v22957_v63  ;;  %v23009_v63 = vld [vmem:[#allocation9 + $0x1d64] ss:$28 sps:$4 sm:$0xff]  }
 0x93c   : > { %13369 = vmatpush1.bf16.msra.mxu1 %v22954_v54 }
 0x93d   : > { %20224 = vmatpush3.bf16.msra.mxu0 %v22958_v7  ;;  %13381 = vmatprep.subr.bf16.mxu1 %v22961_v27  ;;  %v23007_v27 = vld [vmem:[#allocation9 + $0x1d60] ss:$28 sps:$4 sm:$0xff]  }
 0x93e   : > { %20231 = vmatprep.subr.bf16.mxu0 %v22962_v26 }
 0x93f   : > { %13371 = vmatmul.mubr.bf16.vlgmr.msra.gmra.mrb[80].mxu1 %v25759_v14  ;;  %v22973_v14 = vld [vmem:[#allocation9 + $0x2388] ss:$28 sps:$4 sm:$0xff]  }
 0x940   : > { %15636 = vmatmul.mubr.bf16.vlgmr.msra.gmra.mrb[92].mxu0 %v25995_v24  ;;  %13382 = vmatpush1.bf16.msra.mxu1 %v22959_v21  ;;  %v23010_v21 = vld [vmem:[#allocation9 + $0x2708] ss:$28 sps:$4 sm:$0xff]  }
 0x941   : > { %13413 = vmatprep.mubr.bf16.mxu1 %v25804_v61  ;;  %20232 = vmatpush3.bf16.msra.mxu0 %v22963_v23  ;;  %v22978_v61 = vld [vmem:[#allocation9 + $0x23c0] ss:$28 sps:$4 sm:$0xff]  }
 0x942   : > { %15676 = vmatprep.mubr.bf16.mxu0 %v25999_v3  ;;  %13383 = vmatprep.subr.bf16.mxu1 %v22966_v25  ;;  %v23013_v23 = vld [vmem:[#allocation9 + $0x1d9c] ss:$28 sps:$4 sm:$0xff]  }
 0x943   : > { %20233 = vmatprep.subr.bf16.mxu0 %v22967_v45 }
 0x944   : > { %13384 = vmatpush1.bf16.msra.mxu1 %v22964_v18 }
 0x945   : > { %20234 = vmatpush3.bf16.msra.mxu0 %v22968_v36  ;;  %13385 = vmatprep.subr.bf16.mxu1 %v22971_v42  ;;  %v23011_v42 = vld [vmem:[#allocation9 + $0x1d98] ss:$28 sps:$4 sm:$0xff]  }
 0x946   : > { %20235 = vmatprep.subr.bf16.mxu0 %v22972_v29  ;;  %v23014_v29 = vld [vmem:[#allocation9 + $0x2740] ss:$28 sps:$4 sm:$0xff]  }
 0x948   : > { %13386 = vmatpush1.bf16.msra.mxu1 %v22969_v10  ;;  %v23017_v10 = vld [vmem:[#allocation9 + $0x1dd4] ss:$28 sps:$4 sm:$0xff]  }
 0x949   : > { %20236 = vmatpush3.bf16.msra.mxu0 %v22973_v14  ;;  %13387 = vmatprep.subr.bf16.mxu1 %v22976_v51  ;;  %v23015_v14 = vld [vmem:[#allocation9 + $0x1dd0] ss:$28 sps:$4 sm:$0xff]   ;;  %v23018_v51 = vld [vmem:[#allocation9 + $0x1e08] ss:$28 sps:$4 sm:$0xff]  }
 0x94a   : > { %20237 = vmatprep.subr.bf16.mxu0 %v22977_v30  ;;  %v23021_v30 = vld [vmem:[#allocation9 + $0x1e40] ss:$28 sps:$4 sm:$0xff]  }
 0x94c   : > { %13388 = vmatpush1.bf16.msra.mxu1 %v22974_v28  ;;  %v23026_v28 = vld [vmem:[#allocation9 + $0x1e7c] ss:$28 sps:$4 sm:$0xff]  }
 0x94d   : > { %20238 = vmatpush3.bf16.msra.mxu0 %v22978_v61  ;;  %13389 = vmatprep.subr.bf16.mxu1 %v22981_v47  ;;  %v23024_v61 = vld [vmem:[#allocation9 + $0x1e78] ss:$28 sps:$4 sm:$0xff]  }
 0x94e   : > { %20239 = vmatprep.subr.bf16.mxu0 %v22982_v39  ;;  %v23029_v47 = vld [vmem:[#allocation9 + $0x1eb4] ss:$28 sps:$4 sm:$0xff]  }
 0x94f   : > { %v23027_v39 = vld [vmem:[#allocation9 + $0x1eb0] ss:$28 sps:$4 sm:$0xff]  }
 0x950   : > { %13390 = vmatpush1.bf16.msra.mxu1 %v22979_v55  ;;  %v23032_v55 = vld [vmem:[#allocation9 + $0x1eec] ss:$28 sps:$4 sm:$0xff]  }
 0x951   : > { %20240 = vmatpush3.bf16.msra.mxu0 %v22983_v35  ;;  %13391 = vmatprep.subr.bf16.mxu1 %v22986_v17  ;;  %v23030_v35 = vld [vmem:[#allocation9 + $0x1ee8] ss:$28 sps:$4 sm:$0xff]  }
 0x952   : > { %20241 = vmatprep.subr.bf16.mxu0 %v22987_v37  ;;  %v23035_v17 = vld [vmem:[#allocation9 + $0x1f24] ss:$28 sps:$4 sm:$0xff]  }
 0x953   : > { %v20198_v19 = vpop.f32.mrb[84].mxu0  ;;  %v23033_v37 = vld [vmem:[#allocation9 + $0x1f20] ss:$28 sps:$4 sm:$0xff]  }
 0x954   : > { %v20199_v6 = vpop.f32.mrb[85].mxu0  ;;  %13392 = vmatpush1.bf16.msra.mxu1 %v22984_v60  ;;  %v23038_v60 = vld [vmem:[#allocation9 + $0x1f5c] ss:$28 sps:$4 sm:$0xff]  }
 0x955   : > { %v20200_v43 = vadd.f32 %v20199_v6, %v20198_v19  ;;  %v20201_v33 = vpop.f32.mrb[86].mxu0  ;;  %20242 = vmatpush3.bf16.msra.mxu0 %v22988_v4  ;;  %13393 = vmatprep.subr.bf16.mxu1 %v22991_v2  ;;  %v23036_v4 = vld [vmem:[#allocation9 + $0x1f58] ss:$28 sps:$4 sm:$0xff]   ;;  %v23041_v2 = vld [vmem:[#allocation9 + $0x1f84] ss:$28 sps:$4 sm:$0xff]  }
 0x956   : > { %v20202_v20 = vpop.f32.mrb[87].mxu0  ;;  %20243 = vmatprep.subr.bf16.mxu0 %v22992_v52  ;;  %v23039_v52 = vld [vmem:[#allocation9 + $0x1f80] ss:$28 sps:$4 sm:$0xff]   ;;  %v23047_v6 = vld [vmem:[#allocation9 + $0x1ff4] ss:$28 sps:$4 sm:$0xff]  }
 0x957   : > { %v20203_v57 = vadd.f32 %v20202_v20, %v20201_v33  ;;  %v13543_v16 = vadd.f32 %v20200_v43, %v26022_v62  ;;  %v23003_v62 = vld [vmem:[#allocation9 + $0x1d28] ss:$28 sps:$4 sm:$0xff]   ;;  %v23044_v19 = vld [vmem:[#allocation9 + $0x1fbc] ss:$28 sps:$4 sm:$0xff]  }
 0x958   : > { %13394 = vmatpush1.bf16.msra.mxu1 %v22989_v34  ;;  %v23045_v34 = vld [vmem:[#allocation9 + $0x1ff0] ss:$28 sps:$4 sm:$0xff]   ;;  %v23048_v33 = vld [vmem:[#allocation9 + $0x2028] ss:$28 sps:$4 sm:$0xff]   ;;  %v23056_v20 = vld [vmem:[#allocation9 + $0x209c] ss:$28 sps:$4 sm:$0xff]  }
 0x959   : > { %20244 = vmatpush3.bf16.msra.mxu0 %v22993_v50  ;;  %13395 = vmatprep.subr.bf16.mxu1 %v22996_v22  ;;  %v13546_v8 = vadd.f32 %v20203_v57, %v26024_v31  ;;  %v23050_v43 = vld [vmem:[#allocation9 + $0x202c] ss:$28 sps:$4 sm:$0xff]   ;;  %v23053_v50 = vld [vmem:[#allocation9 + $0x2064] ss:$28 sps:$4 sm:$0xff]  }
 0x95a   : > { %20245 = vmatprep.subr.bf16.mxu0 %v22997_v5  ;;  %v23051_v22 = vld [vmem:[#allocation9 + $0x2060] ss:$28 sps:$4 sm:$0xff]   ;;  %v23059_v5 = vld [vmem:[#allocation9 + $0x20d4] ss:$28 sps:$4 sm:$0xff]  }
 0x95b   : > { %v23057_v57 = vld [vmem:[#allocation9 + $0x20d0] ss:$28 sps:$4 sm:$0xff]  }
 0x95c   : > { %13396 = vmatpush1.bf16.msra.mxu1 %v22994_v0  ;;  %v23060_v0 = vld [vmem:[#allocation9 + $0x2108] ss:$28 sps:$4 sm:$0xff]  }
 0x95d   : > { %20246 = vmatpush3.bf16.msra.mxu0 %v22998_v56  ;;  %13397 = vmatprep.subr.bf16.mxu1 %v23001_v40  ;;  %v23065_v56 = vld [vmem:[#allocation9 + $0x2144] ss:$28 sps:$4 sm:$0xff]  }
 0x95e   : > { %20376 = vmatprep.subr.bf16.mxu0 %v23854_v53  ;;  %v23063_v40 = vld [vmem:[#allocation9 + $0x2140] ss:$28 sps:$4 sm:$0xff]  }
 0x960   : > { %15677 = vmatmul.mubr.bf16.vlgmr.msra.gmra.mrb[96].mxu0 %v26010_v44  ;;  %13398 = vmatpush1.bf16.msra.mxu1 %v22999_v59  ;;  %v23066_v59 = vld [vmem:[#allocation9 + $0x2178] ss:$28 sps:$4 sm:$0xff]  }
 0x961   : > { %20377 = vmatpush3.bf16.msra.mxu0 %v23002_v32  ;;  %13399 = vmatprep.subr.bf16.mxu1 %v23005_v11  ;;  %v23071_v32 = vld [vmem:[#allocation9 + $0x21b4] ss:$28 sps:$4 sm:$0xff]  }
 0x962   : > { %20378 = vmatprep.subr.bf16.mxu0 %v23854_v53  ;;  %20384 = vmatprep.mubr.msk.bf16.mxu0 %vm23855_vm9, %v23854_v53  ;;  %v23069_v11 = vld [vmem:[#allocation9 + $0x21b0] ss:$28 sps:$4 sm:$0xff]  }
 0x963   : > { %v13583_v31 = vpop.f32.mrb[88].mxu0 }
 0x964   : > { %v13584_v54 = vadd.f32 %v13583_v31, %v13543_v16  ;;  %v20374_v7 = vpop.f32.mrb[89].mxu0  ;;  %13400 = vmatpush1.bf16.msra.mxu1 %v23003_v62  ;;  %v23062_v16 = vld [vmem:[#allocation9 + $0x210c] ss:$28 sps:$4 sm:$0xff]   ;;  %v23075_v31 = vld [vmem:[#allocation9 + $0x2220] ss:$28 sps:$4 sm:$0xff]  }
 0x965   : > { %v13586_v26 = vpop.f32.mrb[90].mxu0  ;;  %20379 = vmatpush3.bf16.msra.mxu0 %v23006_v38  ;;  %13401 = vmatprep.subr.bf16.mxu1 %v23009_v63  ;;  %v23074_v62 = vld [vmem:[#allocation9 + $0x21ec] ss:$28 sps:$4 sm:$0xff]   ;;  %v23077_v63 = vld [vmem:[#allocation9 + $0x2224] ss:$28 sps:$4 sm:$0xff]  }
 0x966   : > { %v26038_v25 = vadd.f32 %v13584_v54, %v25973_v15  ;;  %v13587_v45 = vadd.f32 %v13586_v26, %v13546_v8  ;;  %v20375_v18 = vpop.f32.mrb[91].mxu0  ;;  %20380 = vmatprep.subr.bf16.mxu0 %v23854_v53  ;;  %v23020_v15 = vld [vmem:[#allocation9 + $0x1e0c] ss:$28 sps:$4 sm:$0xff]   ;;  %v23068_v8 = vld [vmem:[#allocation9 + $0x217c] ss:$28 sps:$4 sm:$0xff]  }
 0x967   : > { %v23072_v38 = vld [vmem:[#allocation9 + $0x21e8] ss:$28 sps:$4 sm:$0xff]   ;;  %v23080_v54 = vld [vmem:[#allocation9 + $0x225c] ss:$28 sps:$4 sm:$0xff]   ;;  %v23081_v26 = vld [vmem:[#allocation9 + $0x2290] ss:$28 sps:$4 sm:$0xff]  }
 0x968   : > { %v26042_v36 = vadd.f32 %v13587_v45, %v25977_v12  ;;  %13402 = vmatpush1.bf16.msra.mxu1 %v23007_v27  ;;  %v23023_v12 = vld [vmem:[#allocation9 + $0x1e44] ss:$28 sps:$4 sm:$0xff]   ;;  %v23078_v7 = vld [vmem:[#allocation9 + $0x2258] ss:$28 sps:$4 sm:$0xff]  }
 0x969   : > { %20381 = vmatpush3.bf16.msra.mxu0 %v23010_v21  ;;  %13403 = vmatprep.subr.bf16.mxu1 %v23013_v23  ;;  %v23083_v27 = vld [vmem:[#allocation9 + $0x2294] ss:$28 sps:$4 sm:$0xff]   ;;  %v23086_v21 = vld [vmem:[#allocation9 + $0x22cc] ss:$28 sps:$4 sm:$0xff]   ;;  %v23089_v45 = vld [vmem:[#allocation9 + $0x2304] ss:$28 sps:$4 sm:$0xff]  }
 0x96a   : > { %20382 = vmatprep.subr.bf16.mxu0 %v23854_v53  ;;  %v23084_v23 = vld [vmem:[#allocation9 + $0x22c8] ss:$28 sps:$4 sm:$0xff]   ;;  %v23087_v18 = vld [vmem:[#allocation9 + $0x2300] ss:$28 sps:$4 sm:$0xff]  }
 0x96c   : > { %13404 = vmatpush1.bf16.msra.mxu1 %v23011_v42  ;;  %v23092_v42 = vld [vmem:[#allocation9 + $0x233c] ss:$28 sps:$4 sm:$0xff]  }
 0x96d   : > { %20383 = vmatpush3.bf16.msra.mxu0 %v23014_v29  ;;  %13405 = vmatprep.subr.bf16.mxu1 %v23017_v10  ;;  %v23090_v29 = vld [vmem:[#allocation9 + $0x2338] ss:$28 sps:$4 sm:$0xff]  }
 0x96e   : > { %v23095_v10 = vld [vmem:[#allocation9 + $0x2374] ss:$28 sps:$4 sm:$0xff]  }
 0x970   : > { %20385 = vmatmul.mubr.msk.bf16.vlgmr.msra.gmra.mrb[100].mxu0 %vm7000_vm8, %v26017_v58  ;;  %13406 = vmatpush1.bf16.msra.mxu1 %v23015_v14  ;;  %v23093_v14 = vld [vmem:[#allocation9 + $0x2370] ss:$28 sps:$4 sm:$0xff]  }
 0x971   : > { %13407 = vmatprep.subr.bf16.mxu1 %v23020_v15  ;;  %15992 = vmatprep.mubr.bf16.mxu0 %v27021_v13  ;;  %v23098_v15 = vld [vmem:[#allocation9 + $0x23ac] ss:$28 sps:$4 sm:$0xff]  }
 0x974   : > { %13408 = vmatpush1.bf16.msra.mxu1 %v23018_v51  ;;  %v23096_v51 = vld [vmem:[#allocation9 + $0x23a8] ss:$28 sps:$4 sm:$0xff]  }
 0x975   : > { %13409 = vmatprep.subr.bf16.mxu1 %v23023_v12  ;;  %v23101_v12 = vld [vmem:[#allocation9 + $0x23e4] ss:$28 sps:$4 sm:$0xff]  }
 0x978   : > { %13410 = vmatpush1.bf16.msra.mxu1 %v23021_v30  ;;  %v23099_v30 = vld [vmem:[#allocation9 + $0x23e0] ss:$28 sps:$4 sm:$0xff]  }
 0x979   : > { %13411 = vmatprep.subr.bf16.mxu1 %v23026_v28  ;;  %v23104_v28 = vld [vmem:[#allocation9 + $0x241c] ss:$28 sps:$4 sm:$0xff]  }
 0x97c   : > { %13412 = vmatpush1.bf16.msra.mxu1 %v23024_v61  ;;  %v23102_v61 = vld [vmem:[#allocation9 + $0x2418] ss:$28 sps:$4 sm:$0xff]  }
 0x97d   : > { %13424 = vmatprep.subr.bf16.mxu1 %v23029_v47  ;;  %v23107_v47 = vld [vmem:[#allocation9 + $0x2454] ss:$28 sps:$4 sm:$0xff]  }
 0x97f   : > { %13414 = vmatmul.mubr.bf16.vlgmr.msra.gmra.mrb[80].mxu1 %v25799_v48  ;;  %v23042_v48 = vld [vmem:[#allocation9 + $0x1fb8] ss:$28 sps:$4 sm:$0xff]  }
 0x980   : > { %13425 = vmatpush1.bf16.msra.mxu1 %v23027_v39  ;;  %13456 = vmatprep.mubr.bf16.mxu1 %v27021_v13  ;;  %v23105_v39 = vld [vmem:[#allocation9 + $0x2450] ss:$28 sps:$4 sm:$0xff]  }
 0x981   : > { %13426 = vmatprep.subr.bf16.mxu1 %v23032_v55  ;;  %v23110_v55 = vld [vmem:[#allocation9 + $0x248c] ss:$28 sps:$4 sm:$0xff]  }
 0x984   : > { %13427 = vmatpush1.bf16.msra.mxu1 %v23030_v35  ;;  %v23108_v35 = vld [vmem:[#allocation9 + $0x2488] ss:$28 sps:$4 sm:$0xff]  }
 0x985   : > { %13428 = vmatprep.subr.bf16.mxu1 %v23035_v17  ;;  %v23113_v17 = vld [vmem:[#allocation9 + $0x24c4] ss:$28 sps:$4 sm:$0xff]  }
 0x988   : > { %13429 = vmatpush1.bf16.msra.mxu1 %v23033_v37  ;;  %v23111_v37 = vld [vmem:[#allocation9 + $0x24c0] ss:$28 sps:$4 sm:$0xff]  }
 0x989   : > { %13430 = vmatprep.subr.bf16.mxu1 %v23038_v60  ;;  %v26055_v60 = vld [vmem:[#allocation10] sm:$0xff] }
 0x98c   : > { %13431 = vmatpush1.bf16.msra.mxu1 %v23036_v4  ;;  %v23116_v4 = vld [vmem:[#allocation9 + $0x24fc] ss:$28 sps:$4 sm:$0xff]  }
 0x98d   : > { %15216 = vmatprep.subr.bf16.mxu1 %v23041_v2  ;;  %v27022_v2 = vsub.s32 2, %v24291_v46 }
 0x98f   : > { %19401 = vmatmul.mubr.msk.bf16.vlgmr.msra.gmra.mrb[80].mxu1 %vm7000_vm8, %v25828_v9  ;;  %v23054_v9 = vld [vmem:[#allocation9 + $0x2098] ss:$28 sps:$4 sm:$0xff]  }
 0x990   : > { %15217 = vmatpush1.bf16.msra.mxu1 %v23039_v52  ;;  %15248 = vmatprep.mubr.bf16.mxu1 %v25985_v41  ;;  %v15753_v52 = vrot.slane %v26055_v60, %v27022_v2  ;;  %v23146_v2 = vld [vmem:[#allocation9 + $0x272c] ss:$28 sps:$4 sm:$0xff]  }
 0x991   : > { %15218 = vmatprep.subr.bf16.mxu1 %v23044_v19  ;;  %v23114_v19 = vld [vmem:[#allocation9 + $0x24f8] ss:$28 sps:$4 sm:$0xff]  }
 0x994   : > { %15219 = vmatpush1.bf16.msra.mxu1 %v23042_v48  ;;  %v27023_v48 = vsub.s32 3, %v24291_v46 }
 0x995   : > { %15220 = vmatprep.subr.bf16.mxu1 %v23047_v6 }
 0x996   : > { %v15757_v6 = vrot.slane %v26055_v60, %v27023_v48  ;;  %v23144_v48 = vld [vmem:[#allocation9 + $0x2728] ss:$28 sps:$4 sm:$0xff]  }
 0x998   : > { %15221 = vmatpush1.bf16.msra.mxu1 %v23045_v34  ;;  %v23119_v34 = vld [vmem:[#allocation9 + $0x2534] ss:$28 sps:$4 sm:$0xff]  }
 0x999   : > { %15222 = vmatprep.subr.bf16.mxu1 %v23050_v43 }
 0x99c   : > { %15223 = vmatpush1.bf16.msra.mxu1 %v23048_v33 }
 0x99d   : > { %15224 = vmatprep.subr.bf16.mxu1 %v23053_v50 }
 0x9a0   : > { %15225 = vmatpush1.bf16.msra.mxu1 %v23051_v22  ;;  %v23117_v22 = vld [vmem:[#allocation9 + $0x2530] ss:$28 sps:$4 sm:$0xff]  }
 0x9a1   : > { %15226 = vmatprep.subr.bf16.mxu1 %v23056_v20 }
 0x9a4   : > { %15227 = vmatpush1.bf16.msra.mxu1 %v23054_v9 }
 0x9a5   : > { %15228 = vmatprep.subr.bf16.mxu1 %v23059_v5  ;;  %v23122_v5 = vld [vmem:[#allocation9 + $0x256c] ss:$28 sps:$4 sm:$0xff]  }
 0x9a8   : > { %15229 = vmatpush1.bf16.msra.mxu1 %v23057_v57 }
 0x9a9   : > { %15230 = vmatprep.subr.bf16.mxu1 %v23062_v16 }
 0x9ac   : > { %15231 = vmatpush1.bf16.msra.mxu1 %v23060_v0 }
 0x9ad   : > { %15232 = vmatprep.subr.bf16.mxu1 %v23065_v56 }
 0x9b0   : > { %15233 = vmatpush1.bf16.msra.mxu1 %v23063_v40 }
 0x9b1   : > { %15234 = vmatprep.subr.bf16.mxu1 %v23068_v8 }
 0x9b4   : > { %15235 = vmatpush1.bf16.msra.mxu1 %v23066_v59  ;;  %v23120_v59 = vld [vmem:[#allocation9 + $0x2568] ss:$28 sps:$4 sm:$0xff]  }
 0x9b5   : > { %15236 = vmatprep.subr.bf16.mxu1 %v23071_v32 }
 0x9b8   : > { %15237 = vmatpush1.bf16.msra.mxu1 %v23069_v11  ;;  %v23125_v11 = vld [vmem:[#allocation9 + $0x25a4] ss:$28 sps:$4 sm:$0xff]  }
 0x9b9   : > { %15238 = vmatprep.subr.bf16.mxu1 %v23074_v62 }
 0x9bc   : > { %15239 = vmatpush1.bf16.msra.mxu1 %v23072_v38 }
 0x9bd   : > { %15240 = vmatprep.subr.bf16.mxu1 %v23077_v63 }
 0x9c0   : > { %15241 = vmatpush1.bf16.msra.mxu1 %v23075_v31 }
 0x9c1   : > { %15242 = vmatprep.subr.bf16.mxu1 %v23080_v54 }
 0x9c4   : > { %15243 = vmatpush1.bf16.msra.mxu1 %v23078_v7  ;;  %v23123_v7 = vld [vmem:[#allocation9 + $0x25a0] ss:$28 sps:$4 sm:$0xff]  }
 0x9c5   : > { %15244 = vmatprep.subr.bf16.mxu1 %v23083_v27 }
 0x9c8   : > { %15245 = vmatpush1.bf16.msra.mxu1 %v23081_v26 }
 0x9c9   : > { %15246 = vmatprep.subr.bf16.mxu1 %v23086_v21  ;;  %v23128_v21 = vld [vmem:[#allocation9 + $0x25dc] ss:$28 sps:$4 sm:$0xff]  }
 0x9cc   : > { %15247 = vmatpush1.bf16.msra.mxu1 %v23084_v23 }
 0x9cd   : > { %15259 = vmatprep.subr.bf16.mxu1 %v23089_v45 }
 0x9cf   : > { %15249 = vmatmul.mubr.bf16.vlgmr.msra.gmra.mrb[76].mxu1 %v25995_v24 }
 0x9d0   : > { %15260 = vmatpush1.bf16.msra.mxu1 %v23087_v18  ;;  %15291 = vmatprep.mubr.bf16.mxu1 %v25999_v3 }
 0x9d1   : > { %15261 = vmatprep.subr.bf16.mxu1 %v23092_v42 }
 0x9d4   : > { %15262 = vmatpush1.bf16.msra.mxu1 %v23090_v29  ;;  %v23126_v29 = vld [vmem:[#allocation9 + $0x25d8] ss:$28 sps:$4 sm:$0xff]  }
 0x9d5   : > { %15263 = vmatprep.subr.bf16.mxu1 %v23095_v10  ;;  %v23131_v10 = vld [vmem:[#allocation9 + $0x2614] ss:$28 sps:$4 sm:$0xff]  }
 0x9d8   : > { %15264 = vmatpush1.bf16.msra.mxu1 %v23093_v14 }
 0x9d9   : > { %15265 = vmatprep.subr.bf16.mxu1 %v23098_v15  ;;  %v23129_v15 = vld [vmem:[#allocation9 + $0x2610] ss:$28 sps:$4 sm:$0xff]  }
 0x9dc   : > { %15266 = vmatpush1.bf16.msra.mxu1 %v23096_v51  ;;  %v23134_v51 = vld [vmem:[#allocation9 + $0x264c] ss:$28 sps:$4 sm:$0xff]  }
 0x9dd   : > { %15267 = vmatprep.subr.bf16.mxu1 %v23101_v12  ;;  %v23132_v12 = vld [vmem:[#allocation9 + $0x2648] ss:$28 sps:$4 sm:$0xff]  }
 0x9e0   : > { %15268 = vmatpush1.bf16.msra.mxu1 %v23099_v30  ;;  %v23137_v30 = vld [vmem:[#allocation9 + $0x2684] ss:$28 sps:$4 sm:$0xff]  }
 0x9e1   : > { %15269 = vmatprep.subr.bf16.mxu1 %v23104_v28  ;;  %v23135_v28 = vld [vmem:[#allocation9 + $0x2680] ss:$28 sps:$4 sm:$0xff]  }
 0x9e4   : > { %15270 = vmatpush1.bf16.msra.mxu1 %v23102_v61  ;;  %v23140_v61 = vld [vmem:[#allocation9 + $0x26bc] ss:$28 sps:$4 sm:$0xff]  }
 0x9e5   : > { %15271 = vmatprep.subr.bf16.mxu1 %v23107_v47  ;;  %v23138_v47 = vld [vmem:[#allocation9 + $0x26b8] ss:$28 sps:$4 sm:$0xff]  }
 0x9e8   : > { %15272 = vmatpush1.bf16.msra.mxu1 %v23105_v39  ;;  %v23143_v39 = vld [vmem:[#allocation9 + $0x26f4] ss:$28 sps:$4 sm:$0xff]  }
 0x9e9   : > { %15273 = vmatprep.subr.bf16.mxu1 %v23110_v55 }
 0x9ec   : > { %15274 = vmatpush1.bf16.msra.mxu1 %v23108_v35 }
 0x9ed   : > { %15275 = vmatprep.subr.bf16.mxu1 %v23113_v17  ;;  %v23141_v17 = vld [vmem:[#allocation9 + $0x26f0] ss:$28 sps:$4 sm:$0xff]  }
 0x9f0   : > { %15276 = vmatpush1.bf16.msra.mxu1 %v23111_v37 }
 0x9f1   : > { %15277 = vmatprep.subr.bf16.mxu1 %v23116_v4 }
 0x9f3   : > { %v15465_v43 = vpop.f32.mrb[40].mxu0 }
 0x9f4   : > { %v15779_v33 = vadd.f32 %v15753_v52, %v15465_v43  ;;  %v15467_v50 = vpop.f32.mrb[41].mxu0  ;;  %15278 = vmatpush1.bf16.msra.mxu1 %v23114_v19  ;;  %v23152_v43 = vld [vmem:[#allocation9 + $0x1fcc] ss:$28 sps:$4 sm:$0xff]  }
 0x9f5   : > { %v15780_v20 = vadd.f32 %v15757_v6, %v15467_v50  ;;  %v15469_v9 = vpop.f32.mrb[42].mxu0  ;;  %15279 = vmatprep.subr.bf16.mxu1 %v23119_v34  ;;  %v23147_v34 = vld [vmem:[#allocation9 + $0x1f90] ss:$28 sps:$4 sm:$0xff]   ;;  %v23155_v50 = vld [vmem:[#allocation9 + $0x2004] ss:$28 sps:$4 sm:$0xff]  }
 0x9f6   : > { %v15793_v57 = vmax.f32 %v15779_v33, 0.0  ;;  %v15786_v16 = vadd.f32 %v15753_v52, %v15469_v9  ;;  %v15471_v0 = vpop.f32.mrb[43].mxu0  ;;  %v23150_v33 = vld [vmem:[#allocation9 + $0x1fc8] ss:$28 sps:$4 sm:$0xff]   ;;  %v23156_v9 = vld [vmem:[#allocation9 + $0x2038] ss:$28 sps:$4 sm:$0xff]  }
 0x9f7   : > { %v15794_v56 = vmax.f32 %v15780_v20, 0.0  ;;  %v15787_v40 = vadd.f32 %v15757_v6, %v15471_v0  ;;  %v23149_v6 = vld [vmem:[#allocation9 + $0x1f94] ss:$28 sps:$4 sm:$0xff]   ;;  %v23158_v20 = vld [vmem:[#allocation9 + $0x203c] ss:$28 sps:$4 sm:$0xff]  }
 0x9f8   : > { %v15800_v8 = vmax.f32 %v15786_v16, 0.0  ;;  %15280 = vmatpush1.bf16.msra.mxu1 %v23117_v22  ;;  %v15825_v62 = vrot.slane %v15793_v57, 1  ;;  %v23153_v22 = vld [vmem:[#allocation9 + $0x2000] ss:$28 sps:$4 sm:$0xff]   ;;  %v23164_v16 = vld [vmem:[#allocation9 + $0x20ac] ss:$28 sps:$4 sm:$0xff]  }
 0x9f9   : > { %v15801_v32 = vmax.f32 %v15787_v40, 0.0  ;;  %15281 = vmatprep.subr.bf16.mxu1 %v23122_v5  ;;  %v15828_v63 = vrot.slane %v15794_v56, 1  ;;  %v23161_v5 = vld [vmem:[#allocation9 + $0x2074] ss:$28 sps:$4 sm:$0xff]   ;;  %v23162_v0 = vld [vmem:[#allocation9 + $0x20a8] ss:$28 sps:$4 sm:$0xff]  }
 0x9fa   : > { %v15826_v38 = vrot.slane %v15800_v8, 1 }
 0x9fb   : > { %v15829_v31 = vrot.slane %v15801_v32, 1 }
 0x9fc   : > { %v26063_v54 = vmax.f32 %v15800_v8, %v15826_v38  ;;  %15282 = vmatpush1.bf16.msra.mxu1 %v23120_v59  ;;  %v15827_v27 = vsel %vm1080_vm4, %v15825_v62, %v15826_v38  ;;  %v23165_v8 = vld [vmem:[#allocation9 + $0x20e0] ss:$28 sps:$4 sm:$0xff]  }
 0x9fd   : > { %15283 = vmatprep.subr.bf16.mxu1 %v23125_v11  ;;  %v26066_v26 = vmax.f32 %v15793_v57, %v15827_v27  ;;  %v15830_v23 = vsel %vm1080_vm4, %v15828_v63, %v15829_v31  ;;  %v26071_v18 = vmax.f32 %v15801_v32, %v15829_v31  ;;  %v23159_v57 = vld [vmem:[#allocation9 + $0x2070] ss:$28 sps:$4 sm:$0xff]   ;;  %v23170_v11 = vld [vmem:[#allocation9 + $0x211c] ss:$28 sps:$4 sm:$0xff]  }
 0x9fe   : > { %v26069_v45 = vmax.f32 %v15794_v56, %v15830_v23  ;;  %v23167_v56 = vld [vmem:[#allocation9 + $0x20e4] ss:$28 sps:$4 sm:$0xff]   ;;  %v23168_v31 = vld [vmem:[#allocation9 + $0x2118] ss:$28 sps:$4 sm:$0xff]   ;;  %v23176_v23 = vld [vmem:[#allocation9 + $0x218c] ss:$28 sps:$4 sm:$0xff]  }
 0x9ff   : > { %v20926_v42 = vpack.i.bf16 %v26063_v54, %v26066_v26 }
 0xa00   : > { %15284 = vmatpush1.bf16.msra.mxu1 %v23123_v7  ;;  %v20941_v14 = vpack.i.bf16 %v26071_v18, %v26069_v45  ;;  %v23173_v7 = vld [vmem:[#allocation9 + $0x2154] ss:$28 sps:$4 sm:$0xff]  }
 0xa01   : > { %20927 = vrot.lane.b32.xlu1 %v20926_v42, %s23856_s16  ;;  %15285 = vmatprep.subr.bf16.mxu1 %v23128_v21  ;;  %v23171_v21 = vld [vmem:[#allocation9 + $0x2150] ss:$28 sps:$4 sm:$0xff]   ;;  %v23174_v42 = vld [vmem:[#allocation9 + $0x2188] ss:$28 sps:$4 sm:$0xff]  }
 0xa04   : > { %15286 = vmatpush1.bf16.msra.mxu1 %v23126_v29  ;;  %v23179_v29 = vld [vmem:[#allocation9 + $0x21c4] ss:$28 sps:$4 sm:$0xff]  }
 0xa05   : > { %20942 = vrot.lane.b32.xlu1 %v20941_v14, %s23856_s16  ;;  %15287 = vmatprep.subr.bf16.mxu1 %v23131_v10 }
 0xa08   : > { %15288 = vmatpush1.bf16.msra.mxu1 %v23129_v15  ;;  %v27024_v15 = vsub.s32 6, %v24291_v46 }
 0xa09   : > { %15289 = vmatprep.subr.bf16.mxu1 %v23134_v51 }
 0xa0a   : > { %v15769_v51 = vrot.slane %v26055_v60, %v27024_v15  ;;  %v23231_v15 = vld [vmem:[#allocation9 + $0x25b0] ss:$28 sps:$4 sm:$0xff]  }
 0xa0c   : > { %15290 = vmatpush1.bf16.msra.mxu1 %v23132_v12 }
 0xa0d   : > { %15302 = vmatprep.subr.bf16.mxu1 %v23137_v30  ;;  %v23177_v30 = vld [vmem:[#allocation9 + $0x21c0] ss:$28 sps:$4 sm:$0xff]  }
 0xa0f   : > { %15292 = vmatmul.mubr.bf16.vlgmr.msra.gmra.mrb[76].mxu1 %v26010_v44 }
 0xa10   : > { %15303 = vmatpush1.bf16.msra.mxu1 %v23135_v28  ;;  %15334 = vmatprep.mubr.bf16.mxu1 %v27021_v13 }
 0xa11   : > { %15304 = vmatprep.subr.bf16.mxu1 %v23140_v61  ;;  %v23182_v61 = vld [vmem:[#allocation9 + $0x21fc] ss:$28 sps:$4 sm:$0xff]  }
 0xa13   : > { %v20225_v55 = vpop.f32.mrb[92].mxu0 }
 0xa14   : > { %v20226_v35 = vpop.f32.mrb[93].mxu0  ;;  %15305 = vmatpush1.bf16.msra.mxu1 %v23138_v47 }
 0xa15   : > { %v20227_v37 = vadd.f32 %v20226_v35, %v20225_v55  ;;  %v20228_v4 = vpop.f32.mrb[94].mxu0  ;;  %15306 = vmatprep.subr.bf16.mxu1 %v23143_v39 }
 0xa16   : > { %v20229_v52 = vpop.f32.mrb[95].mxu0 }
 0xa17   : > { %v20230_v19 = vadd.f32 %v20229_v52, %v20228_v4  ;;  %v23185_v4 = vld [vmem:[#allocation9 + $0x2234] ss:$28 sps:$4 sm:$0xff]  }
 0xa18   : > { %15307 = vmatpush1.bf16.msra.mxu1 %v23141_v17 }
 0xa19   : > { %15308 = vmatprep.subr.bf16.mxu1 %v23146_v2 }
 0xa1c   : > { %15309 = vmatpush1.bf16.msra.mxu1 %v23144_v48  ;;  %v23183_v48 = vld [vmem:[#allocation9 + $0x2230] ss:$28 sps:$4 sm:$0xff]  }
 0xa1d   : > { %15474 = vmatprep.subr.bf16.mxu1 %v23149_v6  ;;  %v23188_v6 = vld [vmem:[#allocation9 + $0x226c] ss:$28 sps:$4 sm:$0xff]  }
 0xa1f   : > { %19655 = vmatmul.mubr.msk.bf16.vlgmr.msra.gmra.mrb[76].mxu1 %vm7000_vm8, %v26017_v58 }
 0xa20   : > { %15475 = vmatpush1.bf16.msra.mxu1 %v23147_v34  ;;  %15506 = vmatprep.mubr.bf16.mxu1 %v25985_v41 }
 0xa21   : > { %15476 = vmatprep.subr.bf16.mxu1 %v23152_v43 }
 0xa24   : > { %15477 = vmatpush1.bf16.msra.mxu1 %v23150_v33  ;;  %v23191_v33 = vld [vmem:[#allocation9 + $0x22a4] ss:$28 sps:$4 sm:$0xff]  }
 0xa25   : > { %15478 = vmatprep.subr.bf16.mxu1 %v23155_v50 }
 0xa28   : > { %15479 = vmatpush1.bf16.msra.mxu1 %v23153_v22  ;;  %v23189_v22 = vld [vmem:[#allocation9 + $0x22a0] ss:$28 sps:$4 sm:$0xff]  }
 0xa29   : > { %15480 = vmatprep.subr.bf16.mxu1 %v23158_v20  ;;  %v23194_v20 = vld [vmem:[#allocation9 + $0x22dc] ss:$28 sps:$4 sm:$0xff]  }
 0xa2c   : > { %15481 = vmatpush1.bf16.msra.mxu1 %v23156_v9  ;;  %v23192_v9 = vld [vmem:[#allocation9 + $0x22d8] ss:$28 sps:$4 sm:$0xff]  }
 0xa2d   : > { %15482 = vmatprep.subr.bf16.mxu1 %v23161_v5  ;;  %v23197_v5 = vld [vmem:[#allocation9 + $0x2314] ss:$28 sps:$4 sm:$0xff]  }
 0xa30   : > { %15483 = vmatpush1.bf16.msra.mxu1 %v23159_v57  ;;  %v23195_v57 = vld [vmem:[#allocation9 + $0x2310] ss:$28 sps:$4 sm:$0xff]  }
 0xa31   : > { %15484 = vmatprep.subr.bf16.mxu1 %v23164_v16  ;;  %v23200_v16 = vld [vmem:[#allocation9 + $0x234c] ss:$28 sps:$4 sm:$0xff]  }
 0xa33   : > { %v20247_v41 = vpop.f32.mrb[96].mxu0 }
 0xa34   : > { %v20248_v40 = vpop.f32.mrb[97].mxu0  ;;  %15485 = vmatpush1.bf16.msra.mxu1 %v23162_v0  ;;  %v23198_v0 = vld [vmem:[#allocation9 + $0x2348] ss:$28 sps:$4 sm:$0xff]  }
 0xa35   : > { %v20249_v59 = vadd.f32 %v20248_v40, %v20247_v41  ;;  %v20250_v32 = vpop.f32.mrb[98].mxu0  ;;  %15486 = vmatprep.subr.bf16.mxu1 %v23167_v56  ;;  %v23203_v56 = vld [vmem:[#allocation9 + $0x2384] ss:$28 sps:$4 sm:$0xff]   ;;  %v23206_v40 = vld [vmem:[#allocation9 + $0x23bc] ss:$28 sps:$4 sm:$0xff]  }
 0xa36   : > { %v20251_v62 = vpop.f32.mrb[99].mxu0  ;;  %v23201_v41 = vld [vmem:[#allocation9 + $0x2380] ss:$28 sps:$4 sm:$0xff]  }
 0xa37   : > { %v20252_v38 = vadd.f32 %v20251_v62, %v20250_v32  ;;  %v15679_v63 = vadd.f32 %v20249_v59, %v20227_v37  ;;  %v23180_v37 = vld [vmem:[#allocation9 + $0x21f8] ss:$28 sps:$4 sm:$0xff]   ;;  %v23207_v32 = vld [vmem:[#allocation9 + $0x23f0] ss:$28 sps:$4 sm:$0xff]   ;;  %v23215_v62 = vld [vmem:[#allocation9 + $0x2464] ss:$28 sps:$4 sm:$0xff]  }
 0xa38   : > { %15487 = vmatpush1.bf16.msra.mxu1 %v23165_v8  ;;  %v23204_v8 = vld [vmem:[#allocation9 + $0x23b8] ss:$28 sps:$4 sm:$0xff]  }
 0xa39   : > { %15488 = vmatprep.subr.bf16.mxu1 %v23170_v11  ;;  %v15682_v27 = vadd.f32 %v20252_v38, %v20230_v19  ;;  %v23209_v59 = vld [vmem:[#allocation9 + $0x23f4] ss:$28 sps:$4 sm:$0xff]   ;;  %v23212_v11 = vld [vmem:[#allocation9 + $0x242c] ss:$28 sps:$4 sm:$0xff]   ;;  %v23218_v38 = vld [vmem:[#allocation9 + $0x249c] ss:$28 sps:$4 sm:$0xff]  }
 0xa3c   : > { %15489 = vmatpush1.bf16.msra.mxu1 %v23168_v31  ;;  %v23221_v31 = vld [vmem:[#allocation9 + $0x24d4] ss:$28 sps:$4 sm:$0xff]  }
 0xa3d   : > { %15490 = vmatprep.subr.bf16.mxu1 %v23173_v7  ;;  %v23219_v7 = vld [vmem:[#allocation9 + $0x24d0] ss:$28 sps:$4 sm:$0xff]  }
 0xa40   : > { %15491 = vmatpush1.bf16.msra.mxu1 %v23171_v21  ;;  %v23222_v21 = vld [vmem:[#allocation9 + $0x2508] ss:$28 sps:$4 sm:$0xff]  }
 0xa41   : > { %15492 = vmatprep.subr.bf16.mxu1 %v23176_v23  ;;  %v23227_v23 = vld [vmem:[#allocation9 + $0x2544] ss:$28 sps:$4 sm:$0xff]  }
 0xa43   : > { %v15719_v10 = vpop.f32.mrb[100].mxu0 }
 0xa44   : > { %v15720_v14 = vadd.f32 %v15719_v10, %v15679_v63  ;;  %v20386_v12 = vpop.f32.mrb[101].mxu0  ;;  %15493 = vmatpush1.bf16.msra.mxu1 %v23174_v42  ;;  %v23216_v63 = vld [vmem:[#allocation9 + $0x2498] ss:$28 sps:$4 sm:$0xff]   ;;  %v23225_v42 = vld [vmem:[#allocation9 + $0x2540] ss:$28 sps:$4 sm:$0xff]  }
 0xa45   : > { %v15722_v28 = vpop.f32.mrb[102].mxu0  ;;  %15494 = vmatprep.subr.bf16.mxu1 %v23179_v29  ;;  %v23230_v29 = vld [vmem:[#allocation9 + $0x257c] ss:$28 sps:$4 sm:$0xff]   ;;  %v23234_v12 = vld [vmem:[#allocation9 + $0x25e8] ss:$28 sps:$4 sm:$0xff]  }
 0xa46   : > { %v15732_v47 = vadd.f32 %v15720_v14, %v26038_v25  ;;  %v15723_v39 = vadd.f32 %v15722_v28, %v15682_v27  ;;  %v20387_v55 = vpop.f32.mrb[103].mxu0  ;;  %v23224_v27 = vld [vmem:[#allocation9 + $0x250c] ss:$28 sps:$4 sm:$0xff]   ;;  %v23228_v10 = vld [vmem:[#allocation9 + $0x2578] ss:$28 sps:$4 sm:$0xff]  }
 0xa47   : > { %v23233_v14 = vld [vmem:[#allocation9 + $0x25b4] ss:$28 sps:$4 sm:$0xff]   ;;  %v23237_v28 = vld [vmem:[#allocation9 + $0x2620] ss:$28 sps:$4 sm:$0xff]  }
 0xa48   : > { %v15783_v35 = vadd.f32 %v15769_v51, %v15732_v47  ;;  %v15739_v17 = vadd.f32 %v15723_v39, %v26042_v36  ;;  %15495 = vmatpush1.bf16.msra.mxu1 %v23177_v30  ;;  %v23186_v36 = vld [vmem:[#allocation9 + $0x2268] ss:$28 sps:$4 sm:$0xff]   ;;  %v23240_v47 = vld [vmem:[#allocation9 + $0x2658] ss:$28 sps:$4 sm:$0xff]   ;;  %v23243_v55 = vld [vmem:[#allocation9 + $0x2690] ss:$28 sps:$4 sm:$0xff]  }
 0xa49   : > { %15496 = vmatprep.subr.bf16.mxu1 %v23182_v61  ;;  %v23239_v30 = vld [vmem:[#allocation9 + $0x2624] ss:$28 sps:$4 sm:$0xff]   ;;  %v23242_v61 = vld [vmem:[#allocation9 + $0x265c] ss:$28 sps:$4 sm:$0xff]   ;;  %v23245_v39 = vld [vmem:[#allocation9 + $0x2694] ss:$28 sps:$4 sm:$0xff]  }
 0xa4a   : > { %v15797_v2 = vmax.f32 %v15783_v35, 0.0  ;;  %v26089_v52 = vadd.f32 %v15769_v51, %v15739_v17  ;;  %v23236_v51 = vld [vmem:[#allocation9 + $0x25ec] ss:$28 sps:$4 sm:$0xff]  }
 0xa4b   : > { %v23248_v35 = vld [vmem:[#allocation9 + $0x26cc] ss:$28 sps:$4 sm:$0xff]  }
 0xa4c   : > { %v15804_v19 = vmax.f32 %v26089_v52, 0.0  ;;  %15497 = vmatpush1.bf16.msra.mxu1 %v23180_v37  ;;  %v15837_v34 = vrot.slane %v15797_v2, 1  ;;  %v23246_v17 = vld [vmem:[#allocation9 + $0x26c8] ss:$28 sps:$4 sm:$0xff]  }
 0xa4d   : > { %15498 = vmatprep.subr.bf16.mxu1 %v23185_v4  ;;  %v23251_v37 = vld [vmem:[#allocation9 + $0x2704] ss:$28 sps:$4 sm:$0xff]  }
 0xa4e   : > { %v26094_v25 = vrot.slane %v15804_v19, 1  ;;  %v23249_v4 = vld [vmem:[#allocation9 + $0x2700] ss:$28 sps:$4 sm:$0xff]  }
 0xa50   : > { %15499 = vmatpush1.bf16.msra.mxu1 %v23183_v48  ;;  %v15839_v43 = vsel %vm1080_vm4, %v15837_v34, %v26094_v25  ;;  %v23252_v48 = vld [vmem:[#allocation9 + $0x2738] ss:$28 sps:$4 sm:$0xff]   ;;  %v27026_v34 = vsub.s32 1, %v24291_v46 }
 0xa51   : > { %15500 = vmatprep.subr.bf16.mxu1 %v23188_v6  ;;  %v26098_v50 = vmax.f32 %v15797_v2, %v15839_v43  ;;  %v23254_v2 = vld [vmem:[#allocation9 + $0x273c] ss:$28 sps:$4 sm:$0xff]   ;;  %v27025_v6 = vsub.s32 0, %v24291_v46 }
 0xa54   : > { %15501 = vmatpush1.bf16.msra.mxu1 %v23186_v36  ;;  %v15749_v36 = vrot.slane %v26055_v60, %v27026_v34  ;;  %v27028_v34 = vsub.s32 5, %v24291_v46 }
 0xa55   : > { %15502 = vmatprep.subr.bf16.mxu1 %v23191_v33 }
 0xa58   : > { %15503 = vmatpush1.bf16.msra.mxu1 %v23189_v22 }
 0xa59   : > { %15504 = vmatprep.subr.bf16.mxu1 %v23194_v20 }
 0xa5c   : > { %15505 = vmatpush1.bf16.msra.mxu1 %v23192_v9 }
 0xa5d   : > { %15517 = vmatprep.subr.bf16.mxu1 %v23197_v5 }
 0xa5f   : > { %15507 = vmatmul.mubr.bf16.vlgmr.msra.gmra.mrb[80].mxu1 %v25995_v24  ;;  %v23210_v24 = vld [vmem:[#allocation9 + $0x2428] ss:$28 sps:$4 sm:$0xff]  }
 0xa60   : > { %15518 = vmatpush1.bf16.msra.mxu1 %v23195_v57  ;;  %15549 = vmatprep.mubr.bf16.mxu1 %v25999_v3  ;;  %v23213_v3 = vld [vmem:[#allocation9 + $0x2460] ss:$28 sps:$4 sm:$0xff]  }
 0xa61   : > { %15519 = vmatprep.subr.bf16.mxu1 %v23200_v16 }
 0xa64   : > { %15520 = vmatpush1.bf16.msra.mxu1 %v23198_v0 }
 0xa65   : > { %15521 = vmatprep.subr.bf16.mxu1 %v23203_v56 }
 0xa68   : > { %15522 = vmatpush1.bf16.msra.mxu1 %v23201_v41 }
 0xa69   : > { %15523 = vmatprep.subr.bf16.mxu1 %v23206_v40 }
 0xa6c   : > { %15524 = vmatpush1.bf16.msra.mxu1 %v23204_v8 }
 0xa6d   : > { %15525 = vmatprep.subr.bf16.mxu1 %v23209_v59 }
 0xa70   : > { %15526 = vmatpush1.bf16.msra.mxu1 %v23207_v32 }
 0xa71   : > { %15527 = vmatprep.subr.bf16.mxu1 %v23212_v11 }
 0xa74   : > { %15528 = vmatpush1.bf16.msra.mxu1 %v23210_v24 }
 0xa75   : > { %15529 = vmatprep.subr.bf16.mxu1 %v23215_v62 }
 0xa78   : > { %15530 = vmatpush1.bf16.msra.mxu1 %v23213_v3 }
 0xa79   : > { %15531 = vmatprep.subr.bf16.mxu1 %v23218_v38 }
 0xa7c   : > { %15532 = vmatpush1.bf16.msra.mxu1 %v23216_v63 }
 0xa7d   : > { %15533 = vmatprep.subr.bf16.mxu1 %v23221_v31 }
 0xa80   : > { %15534 = vmatpush1.bf16.msra.mxu1 %v23219_v7 }
 0xa81   : > { %15535 = vmatprep.subr.bf16.mxu1 %v23224_v27  ;;  %v26116_v27 = vpop.permute.xlu1 %20927 }
 0xa84   : > { %15536 = vmatpush1.bf16.msra.mxu1 %v23222_v21 }
 0xa85   : > { %15537 = vmatprep.subr.bf16.mxu1 %v23227_v23  ;;  %v20930_v23 = vunpack.i.h.bf16 %v26116_v27 }
 0xa88   : > { %15538 = vmatpush1.bf16.msra.mxu1 %v23225_v42  ;;  %v20929_v42 = vunpack.i.l.bf16 %v26116_v27 }
 0xa89   : > { %15539 = vmatprep.subr.bf16.mxu1 %v23230_v29 }
 0xa8c   : > { %15540 = vmatpush1.bf16.msra.mxu1 %v23228_v10 }
 0xa8d   : > { %15541 = vmatprep.subr.bf16.mxu1 %v23233_v14 }
 0xa90   : > { %15542 = vmatpush1.bf16.msra.mxu1 %v23231_v15 }
 0xa91   : > { %15543 = vmatprep.subr.bf16.mxu1 %v23236_v51 }
 0xa94   : > { %15544 = vmatpush1.bf16.msra.mxu1 %v23234_v12 }
 0xa95   : > { %15545 = vmatprep.subr.bf16.mxu1 %v23239_v30 }
 0xa98   : > { %15546 = vmatpush1.bf16.msra.mxu1 %v23237_v28  ;;  %v15937_v28 = vsel %vm1754_vm3, 4294967295, %v23853_v1  ;;  %vm17827_vm3 = vcmask 523268  }
 0xa99   : > { %15547 = vmatprep.subr.bf16.mxu1 %v23242_v61 }
 0xa9c   : > { %15548 = vmatpush1.bf16.msra.mxu1 %v23240_v47 }
 0xa9d   : > { %15560 = vmatprep.subr.bf16.mxu1 %v23245_v39 }
 0xa9f   : > { %15550 = vmatmul.mubr.bf16.vlgmr.msra.gmra.mrb[80].mxu1 %v26010_v44  ;;  %v15745_v44 = vrot.slane %v26055_v60, %v27025_v6  ;;  %v27027_v6 = vsub.s32 4, %v24291_v46 }
 0xaa0   : > { %15561 = vmatpush1.bf16.msra.mxu1 %v23243_v55  ;;  %15592 = vmatprep.mubr.bf16.mxu1 %v27021_v13 }
 0xaa1   : > { %15562 = vmatprep.subr.bf16.mxu1 %v23248_v35 }
 0xaa4   : > { %15563 = vmatpush1.bf16.msra.mxu1 %v23246_v17  ;;  %v26144_v17 = vsel %vm1080_vm4, %v15937_v28, 0 }
 0xaa5   : > { %15564 = vmatprep.subr.bf16.mxu1 %v23251_v37 }
 0xaa8   : > { %15565 = vmatpush1.bf16.msra.mxu1 %v23249_v4 }
 0xaa9   : > { %15566 = vmatprep.subr.bf16.mxu1 %v23254_v2 }
 0xaac   : > { %15567 = vmatpush1.bf16.msra.mxu1 %v23252_v48 }
 0xaaf   : > { %19657 = vmatmul.mubr.msk.bf16.vlgmr.msra.gmra.mrb[80].mxu1 %vm7000_vm8, %v26017_v58 }
 0xaf2   : > { %v15336_v43 = vpop.f32.mrb[76].mxu1 }
 0xaf3   : > { %v15777_v33 = vadd.f32 %v15745_v44, %v15336_v43  ;;  %v15338_v22 = vpop.f32.mrb[77].mxu1  ;;  %v26154_v43 = vld [vmem:[#allocation12] sm:$0xf] }
 0xaf4   : > { %v15778_v20 = vadd.f32 %v15749_v36, %v15338_v22  ;;  %v15340_v9 = vpop.f32.mrb[78].mxu1 }
 0xaf5   : > { %v15791_v5 = vmax.f32 %v15777_v33, 0.0  ;;  %v15784_v57 = vadd.f32 %v15745_v44, %v15340_v9  ;;  %v15342_v16 = vpop.f32.mrb[79].mxu1  ;;  %v15761_v44 = vrot.slane %v26055_v60, %v27027_v6 }
 0xaf6   : > { %v15792_v0 = vmax.f32 %v15778_v20, 0.0  ;;  %v15785_v56 = vadd.f32 %v15749_v36, %v15342_v16  ;;  %v15765_v36 = vrot.slane %v26055_v60, %v27028_v34 }
 0xaf7   : > { %v15798_v41 = vmax.f32 %v15784_v57, 0.0  ;;  %v15819_v40 = vrot.slane %v15791_v5, 1 }
 0xaf8   : > { %v15799_v58 = vmax.f32 %v15785_v56, 0.0  ;;  %v15822_v59 = vrot.slane %v15792_v0, 1 }
 0xaf9   : > { %v15820_v8 = vrot.slane %v15798_v41, 1 }
 0xafa   : > { %v15823_v32 = vrot.slane %v15799_v58, 1 }
 0xafb   : > { %v15821_v11 = vsel %vm1080_vm4, %v15819_v40, %v15820_v8  ;;  %v15861_v63 = vmax.f32 %v15798_v41, %v15820_v8 }
 0xafc   : > { %v15862_v24 = vmax.f32 %v15799_v58, %v15823_v32  ;;  %v15824_v62 = vsel %vm1080_vm4, %v15822_v59, %v15823_v32  ;;  %v15854_v3 = vmax.f32 %v15791_v5, %v15821_v11 }
 0xafd   : > { %v15855_v38 = vmax.f32 %v15792_v0, %v15824_v62 }
 0xafe   : > { %v20936_v7 = vpack.i.bf16 %v15861_v63, %v15854_v3 }
 0xaff   : > { %v20931_v31 = vpack.i.bf16 %v15862_v24, %v15855_v38 }
 0xb01   : > { %20932 = vrot.lane.b32.xlu0 %v20931_v31, %s23856_s16  ;;  %v15867_v31 = vmax.f32 %v15804_v19, %v26094_v25 }
 0xb05   : > { %20937 = vrot.lane.b32.xlu0 %v20936_v7, %s23856_s16 }
 0xb73   : > { %v20933_v21 = vpop.permute.xlu0 %20932 }
 0xb74   : > { %v20935_v29 = vunpack.i.h.bf16 %v20933_v21  ;;  %v20934_v10 = vunpack.i.l.bf16 %v20933_v21  ;;  %v20956_v21 = vpack.i.bf16 %v15867_v31, %v26098_v50 }
 0xb76   : > { %v15906_v14 = vsel %vm15896_vm10, %v20935_v29, %v20930_v23  ;;  %v15905_v15 = vsel %vm15896_vm10, %v20934_v10, %v20929_v42 }
 0xb77   : > { %v15919_v51 = vmax.f32 %v15862_v24, %v15906_v14  ;;  %v15912_v12 = vmax.f32 %v15855_v38, %v15905_v15  ;;  %v26129_v30 = vpop.permute.xlu0 %20937 }
 0xb78   : > { %v20940_v61 = vunpack.i.h.bf16 %v26129_v30  ;;  %v20939_v47 = vunpack.i.l.bf16 %v26129_v30  ;;  %v23257_v30 = vld [vmem:[%s26974_s8 + $0x4] ss:$16 sps:$4 sm:$0xff]  }
 0xb79   : > { %v15926_v39 = vpack.c.bf16 %v15919_v51, %v15912_v12 }
 0xb7a   : > { %v15907_v55 = vsel %vm15896_vm10, %v20939_v47, %v20934_v10  ;;  %v15908_v35 = vsel %vm15896_vm10, %v20940_v61, %v20935_v29  ;;  %v20943_v29 = vpop.permute.xlu1 %20942 }
 0xb7b   : > { %v15911_v37 = vmax.f32 %v15854_v3, %v15907_v55  ;;  %v15918_v1 = vmax.f32 %v15861_v63, %v15908_v35  ;;  %v15943_v4 = vand.u32 %v26144_v17, %v15926_v39  ;;  %v20945_v10 = vunpack.i.h.bf16 %v20943_v29 }
 0xb7c   : > { %v20944_v14 = vunpack.i.l.bf16 %v20943_v29  ;;  %v23285_v29 = vld [vmem:[%s26974_s8 + $0x140] ss:$16 sps:$4 sm:$0xff]  }
 0xb7d   : > { %v15925_v2 = vpack.c.bf16 %v15918_v1, %v15911_v37  ;;  %15960 = vmatprep.subr.bf16.mxu0 %v15943_v4  ;;  %v15904_v15 = vsel %vm15896_vm10, %v20930_v23, %v20945_v10 }
 0xb7e   : > { %v15903_v52 = vsel %vm15896_vm10, %v20929_v42, %v20944_v14  ;;  %v15920_v28 = vmax.f32 %v26063_v54, %v15904_v15  ;;  %v23293_v15 = vld [vmem:[%s26974_s8 + $0x184] ss:$16 sps:$4 sm:$0xff]  }
 0xb7f   : > { %v15940_v48 = vand.u32 %v26144_v17, %v15925_v2  ;;  %v15913_v39 = vmax.f32 %v26066_v26, %v15903_v52  ;;  %v23291_v52 = vld [vmem:[%s26974_s8 + $0x180] ss:$16 sps:$4 sm:$0xff]  }
 0xb81   : > { %15961 = vmatpush1.bf16.msra.mxu0 %v15940_v48  ;;  %v15927_v48 = vpack.c.bf16 %v15920_v28, %v15913_v39  ;;  %v23302_v39 = vld [vmem:[%s26974_s8 + $0x1e4] ss:$16 sps:$4 sm:$0xff]  }
 0xb82   : > { %v15594_v33 = vpop.f32.mrb[80].mxu1 }
 0xb83   : > { %v15781_v22 = vadd.f32 %v15761_v44, %v15594_v33  ;;  %v15596_v20 = vpop.f32.mrb[81].mxu1 }
 0xb84   : > { %v15782_v9 = vadd.f32 %v15765_v36, %v15596_v20  ;;  %v15598_v5 = vpop.f32.mrb[82].mxu1  ;;  %19659 = vmatmul.mubr.msk.bf16.vlgmr.msra.gmra.mrb[104].mxu0 %vm15933_vm11, %v26154_v43 }
 0xb85   : > { %v15795_v57 = vmax.f32 %v15781_v22, 0.0  ;;  %v15788_v16 = vadd.f32 %v15761_v44, %v15598_v5  ;;  %v15600_v0 = vpop.f32.mrb[83].mxu1  ;;  %16033 = vmatprep.mubr.bf16.mxu0 %v27021_v13 }
 0xb86   : > { %v15796_v46 = vmax.f32 %v15782_v9, 0.0  ;;  %v15789_v56 = vadd.f32 %v15765_v36, %v15600_v0  ;;  %v15946_v9 = vand.u32 %v26144_v17, %v15927_v48  ;;  %v23309_v48 = vld [vmem:[%s26974_s8 + $0x240] ss:$16 sps:$4 sm:$0xff]  }
 0xb87   : > { %v15802_v60 = vmax.f32 %v15788_v16, 0.0  ;;  %v15831_v58 = vrot.slane %v15795_v57, 1 }
 0xb88   : > { %v15803_v41 = vmax.f32 %v15789_v56, 0.0  ;;  %v15834_v8 = vrot.slane %v15796_v46, 1 }
 0xb89   : > { %v15832_v40 = vrot.slane %v15802_v60, 1 }
 0xb8a   : > { %v15835_v59 = vrot.slane %v15803_v41, 1 }
 0xb8b   : > { %v15865_v32 = vmax.f32 %v15802_v60, %v15832_v40  ;;  %v15833_v11 = vsel %vm1080_vm4, %v15831_v58, %v15832_v40  ;;  %v23264_v58 = vld [vmem:[%s26974_s8 + $0x60] ss:$16 sps:$4 sm:$0xff]   ;;  %v23269_v40 = vld [vmem:[%s26974_s8 + $0x84] ss:$16 sps:$4 sm:$0xff]  }
 0xb8c   : > { %v15866_v24 = vmax.f32 %v15803_v41, %v15835_v59  ;;  %v15858_v62 = vmax.f32 %v15795_v57, %v15833_v11  ;;  %v15836_v3 = vsel %vm1080_vm4, %v15834_v8, %v15835_v59  ;;  %v23261_v41 = vld [vmem:[%s26974_s8 + $0x40] ss:$16 sps:$4 sm:$0xff]   ;;  %v23272_v59 = vld [vmem:[%s26974_s8 + $0xa4] ss:$16 sps:$4 sm:$0xff]   ;;  %vm17828_vm4 = vmand %vm17827_vm3, %vm474_vm0 }
 0xb8d   : > { %v15859_v38 = vmax.f32 %v15796_v46, %v15836_v3  ;;  %v23267_v8 = vld [vmem:[%s26974_s8 + $0x80] ss:$16 sps:$4 sm:$0xff]   ;;  %v23275_v11 = vld [vmem:[%s26974_s8 + $0xc4] ss:$16 sps:$4 sm:$0xff]   ;;  %vm17829_vm5 = vmor %vm17828_vm4, %vm26922_vm1 }
 0xb8e   : > { %v20946_v63 = vpack.i.bf16 %v15865_v32, %v15858_v62  ;;  %v23276_v3 = vld [vmem:[%s26974_s8 + $0xe0] ss:$16 sps:$4 sm:$0xff]  }
 0xb8f   : > { %v20951_v7 = vpack.i.bf16 %v15866_v24, %v15859_v38 }
 0xb90   : > { %20947 = vrot.lane.b32.xlu0 %v20946_v63, %s23856_s16  ;;  %v23279_v63 = vld [vmem:[%s26974_s8 + $0x100] ss:$16 sps:$4 sm:$0xff]  }
 0xb91   : > { %20952 = vrot.lane.b32.xlu1 %v20951_v7, %s23856_s16  ;;  %v23282_v7 = vld [vmem:[%s26974_s8 + $0x120] ss:$16 sps:$4 sm:$0xff]  }
 0xb94   : > { %20957 = vrot.lane.b32.xlu0 %v20956_v21, %s23856_s16  ;;  %v23287_v21 = vld [vmem:[%s26974_s8 + $0x144] ss:$16 sps:$4 sm:$0xff]   ;;  %s27031_s16 = sld [smem:[#allocation17_spill]] }
 0xb9a   : > { %s26920_s25 = scalar_lea.vmem %s27031_s16, %s19892_s20 }
 0xc02   : > { %v20948_v19 = vpop.permute.xlu0 %20947 }
 0xc03   : > { %v20950_v25 = vunpack.i.h.bf16 %v20948_v19  ;;  %v20949_v51 = vunpack.i.l.bf16 %v20948_v19  ;;  %v20953_v12 = vpop.permute.xlu1 %20952  ;;  %v23296_v19 = vld [vmem:[%s26974_s8 + $0x1a4] ss:$16 sps:$4 sm:$0xff]  }
 0xc04   : > { %v20955_v55 = vunpack.i.h.bf16 %v20953_v12  ;;  %v20954_v35 = vunpack.i.l.bf16 %v20953_v12  ;;  %v23297_v12 = vld [vmem:[%s26974_s8 + $0x1c0] ss:$16 sps:$4 sm:$0xff]  }
 0xc05   : > { %v15902_v37 = vsel %vm15896_vm10, %v20945_v10, %v20950_v25  ;;  %v15901_v23 = vsel %vm15896_vm10, %v20944_v14, %v20949_v51  ;;  %v23290_v10 = vld [vmem:[%s26974_s8 + $0x164] ss:$16 sps:$4 sm:$0xff]   ;;  %v23288_v14 = vld [vmem:[%s26974_s8 + $0x160] ss:$16 sps:$4 sm:$0xff]  }
 0xc06   : > { %v15921_v27 = vmax.f32 %v26071_v18, %v15902_v37  ;;  %v15914_v42 = vmax.f32 %v26069_v45, %v15901_v23  ;;  %v15900_v1 = vsel %vm15896_vm10, %v20950_v25, %v20955_v55  ;;  %v15899_v54 = vsel %vm15896_vm10, %v20949_v51, %v20954_v35  ;;  %v20958_v4 = vpop.permute.xlu0 %20957  ;;  %v23294_v25 = vld [vmem:[%s26974_s8 + $0x1a0] ss:$16 sps:$4 sm:$0xff]   ;;  %v23299_v51 = vld [vmem:[%s26974_s8 + $0x1c4] ss:$16 sps:$4 sm:$0xff]  }
 0xc07   : > { %v20960_v26 = vunpack.i.h.bf16 %v20958_v4  ;;  %v20959_v2 = vunpack.i.l.bf16 %v20958_v4  ;;  %v15922_v6 = vmax.f32 %v15865_v32, %v15900_v1  ;;  %v15915_v44 = vmax.f32 %v15858_v62, %v15899_v54  ;;  %v23270_v32 = vld [vmem:[%s26974_s8 + $0xa0] ss:$16 sps:$4 sm:$0xff]   ;;  %v23278_v62 = vld [vmem:[%s26974_s8 + $0xe4] ss:$16 sps:$4 sm:$0xff]  }
 0xc08   : > { %v15928_v34 = vpack.c.bf16 %v15921_v27, %v15914_v42  ;;  %v23300_v23 = vld [vmem:[%s26974_s8 + $0x1e0] ss:$16 sps:$4 sm:$0xff]   ;;  %v23305_v42 = vld [vmem:[%s26974_s8 + $0x204] ss:$16 sps:$4 sm:$0xff]  }
 0xc09   : > { %v15897_v36 = vsel %vm15896_vm10, %v20954_v35, %v20959_v2  ;;  %v15898_v18 = vsel %vm15896_vm10, %v20955_v55, %v20960_v26  ;;  %v15929_v20 = vpack.c.bf16 %v15922_v6, %v15915_v44  ;;  %v15910_v57 = vsel %vm15896_vm10, %v20960_v26, %v20940_v61  ;;  %v23303_v54 = vld [vmem:[%s26974_s8 + $0x200] ss:$16 sps:$4 sm:$0xff]   ;;  %v23308_v4 = vld [vmem:[%s26974_s8 + $0x224] ss:$16 sps:$4 sm:$0xff]  }
 0xc0a   : > { %v15916_v45 = vmax.f32 %v15859_v38, %v15897_v36  ;;  %v15923_v33 = vmax.f32 %v15866_v24, %v15898_v18  ;;  %v15949_v22 = vand.u32 %v26144_v17, %v15928_v34  ;;  %v15909_v16 = vsel %vm15896_vm10, %v20959_v2, %v20939_v47  ;;  %v23260_v47 = vld [vmem:[%s26974_s8 + $0x24] ss:$16 sps:$4 sm:$0xff]   ;;  %v23273_v24 = vld [vmem:[%s26974_s8 + $0xc0] ss:$16 sps:$4 sm:$0xff]  }
 0xc0b   : > { %v15924_v46 = vmax.f32 %v15867_v31, %v15910_v57  ;;  %v15917_v56 = vmax.f32 %v26098_v50, %v15909_v16  ;;  %v15952_v60 = vand.u32 %v26144_v17, %v15929_v20  ;;  %v23255_v50 = vld [vmem:[%s26974_s8] ss:$16 sps:$4 sm:$0xff]   ;;  %v23281_v38 = vld [vmem:[%s26974_s8 + $0x104] ss:$16 sps:$4 sm:$0xff]  }
 0xc0c   : > { %v15930_v5 = vpack.c.bf16 %v15923_v33, %v15916_v45  ;;  %16001 = vmatprep.subr.bf16.mxu0 %v15949_v22  ;;  %v23284_v31 = vld [vmem:[%s26974_s8 + $0x124] ss:$16 sps:$4 sm:$0xff]   ;;  %v23306_v26 = vld [vmem:[%s26974_s8 + $0x220] ss:$16 sps:$4 sm:$0xff]  }
 0xc0d   : > { %16002 = vmatpush1.bf16.msra.mxu0 %v15946_v9  ;;  %v15931_v49 = vpack.c.bf16 %v15924_v46, %v15917_v56  ;;  %v23311_v2 = vld [vmem:[%s26974_s8 + $0x244] ss:$16 sps:$4 sm:$0xff]   ;;  %v23312_v44 = vld [vmem:[%s26974_s8 + $0x260] ss:$16 sps:$4 sm:$0xff]  }
 0xc0e   : > { %v15955_v0 = vand.u32 %v26144_v17, %v15930_v5  ;;  %v23314_v6 = vld [vmem:[%s26974_s8 + $0x264] ss:$16 sps:$4 sm:$0xff]   ;;  %v23315_v36 = vld [vmem:[%s26974_s8 + $0x280] ss:$16 sps:$4 sm:$0xff]  }
 0xc0f   : > { %v15958_v61 = vand.u32 %v26144_v17, %v15931_v49  ;;  %v23258_v17 = vld [vmem:[%s26974_s8 + $0x20] ss:$16 sps:$4 sm:$0xff]   ;;  %v23317_v34 = vld [vmem:[%s26974_s8 + $0x284] ss:$16 sps:$4 sm:$0xff]  }
 0xc10   : > { %16042 = vmatprep.subr.bf16.mxu0 %v15955_v0  ;;  %19660 = vmatmul.mubr.msk.bf16.vlgmr.msra.gmra.mrb[108].mxu0 %vm15933_vm11, %v26154_v43  ;;  %v23320_v18 = vld [vmem:[%s26974_s8 + $0x2a4] ss:$16 sps:$4 sm:$0xff]   ;;  %v23318_v45 = vld [vmem:[%s26974_s8 + $0x2a0] ss:$16 sps:$4 sm:$0xff]  }
 0xc11   : > { %16043 = vmatpush1.bf16.msra.mxu0 %v15952_v60  ;;  %16074 = vmatprep.mubr.bf16.mxu0 %v27021_v13  ;;  %v23323_v33 = vld [vmem:[%s26974_s8 + $0x2c4] ss:$16 sps:$4 sm:$0xff]   ;;  %v23321_v22 = vld [vmem:[%s26974_s8 + $0x2c0] ss:$16 sps:$4 sm:$0xff]  }
 0xc12   : > { %20388 = vmatprep.subr.bf16.mxu0 %v23854_v53  ;;  %v23326_v20 = vld [vmem:[%s26974_s8 + $0x2e4] ss:$16 sps:$4 sm:$0xff]   ;;  %v23324_v9 = vld [vmem:[%s26974_s8 + $0x2e0] ss:$16 sps:$4 sm:$0xff]  }
 0xc13   : > { %v23329_v5 = vld [vmem:[%s26974_s8 + $0x304] ss:$16 sps:$4 sm:$0xff]   ;;  %v23327_v57 = vld [vmem:[%s26974_s8 + $0x300] ss:$16 sps:$4 sm:$0xff]  }
 0xc14   : > { %v23332_v16 = vld [vmem:[%s26974_s8 + $0x324] ss:$16 sps:$4 sm:$0xff]   ;;  %v23330_v0 = vld [vmem:[%s26974_s8 + $0x320] ss:$16 sps:$4 sm:$0xff]  }
 0xc15   : > { %v23335_v46 = vld [vmem:[%s26974_s8 + $0x344] ss:$16 sps:$4 sm:$0xff]   ;;  %v23333_v56 = vld [vmem:[%s26974_s8 + $0x340] ss:$16 sps:$4 sm:$0xff]  }
 0xc16   : > { %v23338_v60 = vld [vmem:[%s26974_s8 + $0x364] ss:$16 sps:$4 sm:$0xff]   ;;  %v23336_v49 = vld [vmem:[%s26974_s8 + $0x360] ss:$16 sps:$4 sm:$0xff]  }
 0xc18   : > { %19661 = vmatmul.mubr.msk.bf16.vlgmr.msra.gmra.mrb[112].mxu0 %vm15933_vm11, %v26154_v43 }
 0xc19   : > { %20389 = vmatpush3.bf16.msra.mxu0 %v15958_v61  ;;  %20390 = vmatprep.mubr.msk.bf16.mxu0 %vm23855_vm9, %v23854_v53  ;;  %v23263_v53 = vld [vmem:[%s26974_s8 + $0x44] ss:$16 sps:$4 sm:$0xff]   ;;  %v23339_v61 = vld [vmem:[%s26974_s8 + $0x380] ss:$16 sps:$4 sm:$0xff]  }
 0xc1a   : > { %17474 = vmatprep.subr.bf16.mxu0 %v23257_v30  ;;  %v23341_v30 = vld [vmem:[%s26974_s8 + $0x384] ss:$16 sps:$4 sm:$0xff]  }
 0xc20   : > { %20391 = vmatmul.mubr.msk.bf16.vlgmr.msra.gmra.mrb[116].mxu0 %vm15933_vm11, %v26154_v43  ;;  %v23266_v43 = vld [vmem:[%s26974_s8 + $0x64] ss:$16 sps:$4 sm:$0xff]  }
 0xc21   : > { %17475 = vmatpush1.bf16.msra.mxu0 %v23255_v50  ;;  %v23344_v50 = vld [vmem:[%s26974_s8 + $0x3a4] ss:$16 sps:$4 sm:$0xff]  }
 0xc22   : > { %17476 = vmatprep.subr.bf16.mxu0 %v23260_v47  ;;  %v23342_v47 = vld [vmem:[%s26974_s8 + $0x3a0] ss:$16 sps:$4 sm:$0xff]  }
 0xc25   : > { %17477 = vmatpush1.bf16.msra.mxu0 %v23258_v17  ;;  %v23347_v17 = vld [vmem:[%s26974_s8 + $0x3c4] ss:$16 sps:$4 sm:$0xff]  }
 0xc26   : > { %17478 = vmatprep.subr.bf16.mxu0 %v23263_v53  ;;  %v23345_v53 = vld [vmem:[%s26974_s8 + $0x3c0] ss:$16 sps:$4 sm:$0xff]  }
 0xc29   : > { %17479 = vmatpush1.bf16.msra.mxu0 %v23261_v41  ;;  %v23350_v41 = vld [vmem:[%s26974_s8 + $0x3e4] ss:$16 sps:$4 sm:$0xff]  }
 0xc2a   : > { %17480 = vmatprep.subr.bf16.mxu0 %v23266_v43  ;;  %v23348_v43 = vld [vmem:[%s26974_s8 + $0x3e0] ss:$16 sps:$4 sm:$0xff]  }
 0xc2d   : > { %17481 = vmatpush1.bf16.msra.mxu0 %v23264_v58  ;;  %v23353_v58 = vld [vmem:[%s26974_s8 + $0x404] ss:$16 sps:$4 sm:$0xff]  }
 0xc2e   : > { %17482 = vmatprep.subr.bf16.mxu0 %v23269_v40 }
 0xc31   : > { %17483 = vmatpush1.bf16.msra.mxu0 %v23267_v8 }
 0xc32   : > { %17484 = vmatprep.subr.bf16.mxu0 %v23272_v59 }
 0xc35   : > { %17485 = vmatpush1.bf16.msra.mxu0 %v23270_v32 }
 0xc36   : > { %17486 = vmatprep.subr.bf16.mxu0 %v23275_v11  ;;  %v23351_v11 = vld [vmem:[%s26974_s8 + $0x400] ss:$16 sps:$4 sm:$0xff]  }
 0xc39   : > { %17487 = vmatpush1.bf16.msra.mxu0 %v23273_v24 }
 0xc3a   : > { %17488 = vmatprep.subr.bf16.mxu0 %v23278_v62 }
 0xc3d   : > { %17489 = vmatpush1.bf16.msra.mxu0 %v23276_v3  ;;  %v23356_v3 = vld [vmem:[%s26974_s8 + $0x424] ss:$16 sps:$4 sm:$0xff]  }
 0xc3e   : > { %17490 = vmatprep.subr.bf16.mxu0 %v23281_v38  ;;  %v23354_v38 = vld [vmem:[%s26974_s8 + $0x420] ss:$16 sps:$4 sm:$0xff]  }
 0xc41   : > { %17491 = vmatpush1.bf16.msra.mxu0 %v23279_v63  ;;  %v23359_v63 = vld [vmem:[%s26974_s8 + $0x444] ss:$16 sps:$4 sm:$0xff]  }
 0xc42   : > { %17492 = vmatprep.subr.bf16.mxu0 %v23284_v31 }
 0xc45   : > { %17493 = vmatpush1.bf16.msra.mxu0 %v23282_v7 }
 0xc46   : > { %17494 = vmatprep.subr.bf16.mxu0 %v23287_v21  ;;  %v23357_v21 = vld [vmem:[%s26974_s8 + $0x440] ss:$16 sps:$4 sm:$0xff]  }
 0xc49   : > { %17495 = vmatpush1.bf16.msra.mxu0 %v23285_v29 }
 0xc4a   : > { %17496 = vmatprep.subr.bf16.mxu0 %v23290_v10 }
 0xc4d   : > { %17497 = vmatpush1.bf16.msra.mxu0 %v23288_v14  ;;  %v23362_v14 = vld [vmem:[%s26974_s8 + $0x464] ss:$16 sps:$4 sm:$0xff]  }
 0xc4e   : > { %17498 = vmatprep.subr.bf16.mxu0 %v23293_v15 }
 0xc51   : > { %17499 = vmatpush1.bf16.msra.mxu0 %v23291_v52  ;;  %v23360_v52 = vld [vmem:[%s26974_s8 + $0x460] ss:$16 sps:$4 sm:$0xff]  }
 0xc52   : > { %17500 = vmatprep.subr.bf16.mxu0 %v23296_v19  ;;  %v23365_v19 = vld [vmem:[%s26974_s8 + $0x484] ss:$16 sps:$4 sm:$0xff]  }
 0xc55   : > { %17501 = vmatpush1.bf16.msra.mxu0 %v23294_v25 }
 0xc56   : > { %17502 = vmatprep.subr.bf16.mxu0 %v23299_v51 }
 0xc57   : > { %v15994_v28 = vpop.f32.mrb[104].mxu0 }
 0xc58   : > { %v15996_v55 = vpop.f32.mrb[105].mxu0  ;;  %v26318_v1 = vpack.c.bf16 %v15994_v28, %v15994_v28 }
 0xc59   : > { %v26309_v35 = vpack.c.bf16 %v15996_v55, %v15996_v55  ;;  %v15998_v37 = vpop.f32.mrb[106].mxu0  ;;  %17503 = vmatpush1.bf16.msra.mxu0 %v23297_v12  ;;  %v23363_v12 = vld [vmem:[%s26974_s8 + $0x480] ss:$16 sps:$4 sm:$0xff]  }
 0xc5a   : > { %v15999_v27 = vpop.f32.mrb[107].mxu0  ;;  %17504 = vmatprep.subr.bf16.mxu0 %v23302_v39  ;;  %v23368_v39 = vld [vmem:[%s26974_s8 + $0x4a4] ss:$16 sps:$4 sm:$0xff]   ;;  %v23366_v37 = vld [vmem:[%s26974_s8 + $0x4a0] ss:$16 sps:$4 sm:$0xff]  }
 0xc5b   : > { %17506 = vmatprep.mubr.bf16.mxu0 %v26309_v35  ;;  %v23369_v27 = vld [vmem:[%s26974_s8 + $0x4c0] ss:$16 sps:$4 sm:$0xff]  }
 0xc5d   : > { %17505 = vmatpush1.bf16.msra.mxu0 %v23300_v23  ;;  %v23371_v23 = vld [vmem:[%s26974_s8 + $0x4c4] ss:$16 sps:$4 sm:$0xff]  }
 0xc5e   : > { %17515 = vmatprep.subr.bf16.mxu0 %v23305_v42  ;;  %v23374_v42 = vld [vmem:[%s26974_s8 + $0x4e4] ss:$16 sps:$4 sm:$0xff]  }
 0xc60   : > { %17507 = vmatmul.mubr.bf16.vlgmr.msra.gmra.mrb[120].mxu0 %v26318_v1 }
 0xc61   : > { %17516 = vmatpush1.bf16.msra.mxu0 %v23303_v54  ;;  %v23372_v54 = vld [vmem:[%s26974_s8 + $0x4e0] ss:$16 sps:$4 sm:$0xff]  }
 0xc62   : > { %17517 = vmatprep.subr.bf16.mxu0 %v23308_v4  ;;  %v23377_v4 = vld [vmem:[%s26974_s8 + $0x504] ss:$16 sps:$4 sm:$0xff]  }
 0xc65   : > { %17518 = vmatpush1.bf16.msra.mxu0 %v23306_v26  ;;  %v23375_v26 = vld [vmem:[%s26974_s8 + $0x500] ss:$16 sps:$4 sm:$0xff]  }
 0xc66   : > { %17519 = vmatprep.subr.bf16.mxu0 %v23311_v2  ;;  %v23380_v2 = vld [vmem:[%s26974_s8 + $0x524] ss:$16 sps:$4 sm:$0xff]  }
 0xc69   : > { %17520 = vmatpush1.bf16.msra.mxu0 %v23309_v48  ;;  %v23378_v48 = vld [vmem:[%s26974_s8 + $0x520] ss:$16 sps:$4 sm:$0xff]  }
 0xc6a   : > { %17521 = vmatprep.subr.bf16.mxu0 %v23314_v6  ;;  %v23383_v6 = vld [vmem:[%s26974_s8 + $0x544] ss:$16 sps:$4 sm:$0xff]  }
 0xc6d   : > { %17522 = vmatpush1.bf16.msra.mxu0 %v23312_v44  ;;  %v23381_v44 = vld [vmem:[%s26974_s8 + $0x540] ss:$16 sps:$4 sm:$0xff]  }
 0xc6e   : > { %17523 = vmatprep.subr.bf16.mxu0 %v23317_v34  ;;  %v23386_v34 = vld [vmem:[%s26974_s8 + $0x564] ss:$16 sps:$4 sm:$0xff]  }
 0xc71   : > { %17524 = vmatpush1.bf16.msra.mxu0 %v23315_v36  ;;  %v23384_v36 = vld [vmem:[%s26974_s8 + $0x560] ss:$16 sps:$4 sm:$0xff]  }
 0xc72   : > { %17525 = vmatprep.subr.bf16.mxu0 %v23320_v18  ;;  %v23389_v18 = vld [vmem:[%s26974_s8 + $0x584] ss:$16 sps:$4 sm:$0xff]  }
 0xc75   : > { %17526 = vmatpush1.bf16.msra.mxu0 %v23318_v45  ;;  %v23387_v45 = vld [vmem:[%s26974_s8 + $0x580] ss:$16 sps:$4 sm:$0xff]  }
 0xc76   : > { %17527 = vmatprep.subr.bf16.mxu0 %v23323_v33  ;;  %v23392_v33 = vld [vmem:[%s26974_s8 + $0x5a4] ss:$16 sps:$4 sm:$0xff]  }
 0xc79   : > { %17528 = vmatpush1.bf16.msra.mxu0 %v23321_v22  ;;  %v23390_v22 = vld [vmem:[%s26974_s8 + $0x5a0] ss:$16 sps:$4 sm:$0xff]  }
 0xc7a   : > { %17529 = vmatprep.subr.bf16.mxu0 %v23326_v20  ;;  %v23395_v20 = vld [vmem:[%s26974_s8 + $0x5c4] ss:$16 sps:$4 sm:$0xff]  }
 0xc7d   : > { %17530 = vmatpush1.bf16.msra.mxu0 %v23324_v9  ;;  %v23393_v9 = vld [vmem:[%s26974_s8 + $0x5c0] ss:$16 sps:$4 sm:$0xff]  }
 0xc7e   : > { %17531 = vmatprep.subr.bf16.mxu0 %v23329_v5  ;;  %v23398_v5 = vld [vmem:[%s26974_s8 + $0x5e4] ss:$16 sps:$4 sm:$0xff]  }
 0xc81   : > { %17532 = vmatpush1.bf16.msra.mxu0 %v23327_v57  ;;  %v23396_v57 = vld [vmem:[%s26974_s8 + $0x5e0] ss:$16 sps:$4 sm:$0xff]  }
 0xc82   : > { %17533 = vmatprep.subr.bf16.mxu0 %v23332_v16  ;;  %v23401_v16 = vld [vmem:[%s26974_s8 + $0x604] ss:$16 sps:$4 sm:$0xff]  }
 0xc85   : > { %17534 = vmatpush1.bf16.msra.mxu0 %v23330_v0 }
 0xc86   : > { %17535 = vmatprep.subr.bf16.mxu0 %v23335_v46  ;;  %v23399_v46 = vld [vmem:[%s26974_s8 + $0x600] ss:$16 sps:$4 sm:$0xff]  }
 0xc89   : > { %17536 = vmatpush1.bf16.msra.mxu0 %v23333_v56  ;;  %v23404_v56 = vld [vmem:[%s26974_s8 + $0x624] ss:$16 sps:$4 sm:$0xff]  }
 0xc8a   : > { %17537 = vmatprep.subr.bf16.mxu0 %v23338_v60  ;;  %v23402_v60 = vld [vmem:[%s26974_s8 + $0x620] ss:$16 sps:$4 sm:$0xff]  }
 0xc8d   : > { %17538 = vmatpush1.bf16.msra.mxu0 %v23336_v49  ;;  %v23407_v49 = vld [vmem:[%s26974_s8 + $0x644] ss:$16 sps:$4 sm:$0xff]  }
 0xc8e   : > { %17539 = vmatprep.subr.bf16.mxu0 %v23341_v30  ;;  %v23405_v30 = vld [vmem:[%s26974_s8 + $0x640] ss:$16 sps:$4 sm:$0xff]  }
 0xc91   : > { %17540 = vmatpush1.bf16.msra.mxu0 %v23339_v61  ;;  %v23410_v61 = vld [vmem:[%s26974_s8 + $0x664] ss:$16 sps:$4 sm:$0xff]  }
 0xc92   : > { %17541 = vmatprep.subr.bf16.mxu0 %v23344_v50  ;;  %v23408_v50 = vld [vmem:[%s26974_s8 + $0x660] ss:$16 sps:$4 sm:$0xff]  }
 0xc95   : > { %17542 = vmatpush1.bf16.msra.mxu0 %v23342_v47  ;;  %v23413_v47 = vld [vmem:[%s26974_s8 + $0x684] ss:$16 sps:$4 sm:$0xff]  }
 0xc96   : > { %17543 = vmatprep.subr.bf16.mxu0 %v23347_v17  ;;  %v23411_v17 = vld [vmem:[%s26974_s8 + $0x680] ss:$16 sps:$4 sm:$0xff]  }
 0xc99   : > { %17544 = vmatpush1.bf16.msra.mxu0 %v23345_v53  ;;  %v23416_v53 = vld [vmem:[%s26974_s8 + $0x6a4] ss:$16 sps:$4 sm:$0xff]  }
 0xc9a   : > { %17545 = vmatprep.subr.bf16.mxu0 %v23350_v41  ;;  %v23414_v41 = vld [vmem:[%s26974_s8 + $0x6a0] ss:$16 sps:$4 sm:$0xff]  }
 0xc9d   : > { %17546 = vmatpush1.bf16.msra.mxu0 %v23348_v43  ;;  %v23419_v43 = vld [vmem:[%s26974_s8 + $0x6c4] ss:$16 sps:$4 sm:$0xff]  }
 0xc9e   : > { %17556 = vmatprep.subr.bf16.mxu0 %v23353_v58  ;;  %v23417_v58 = vld [vmem:[%s26974_s8 + $0x6c0] ss:$16 sps:$4 sm:$0xff]  }
 0xce3   : > { %v16035_v40 = vpop.f32.mrb[108].mxu0 }
 0xce4   : > { %v16037_v8 = vpop.f32.mrb[109].mxu0  ;;  %v26422_v24 = vpack.c.bf16 %v16035_v40, %v16035_v40  ;;  %v23422_v40 = vld [vmem:[%s26974_s8 + $0x6e4] ss:$16 sps:$4 sm:$0xff]  }
 0xce5   : > { %v26417_v59 = vpack.c.bf16 %v16037_v8, %v16037_v8  ;;  %v16039_v32 = vpop.f32.mrb[110].mxu0  ;;  %v23420_v8 = vld [vmem:[%s26974_s8 + $0x6e0] ss:$16 sps:$4 sm:$0xff]  }
 0xce6   : > { %v16040_v62 = vpop.f32.mrb[111].mxu0  ;;  %v23425_v32 = vld [vmem:[%s26974_s8 + $0xc] ss:$16 sps:$4 sm:$0xff]  }
 0xce7   : > { %17547 = vmatprep.mubr.bf16.mxu0 %v26417_v59 }
 0xce8   : > { %17548 = vmatmul.mubr.bf16.vlgmr.msra.gmra.mrb[120].mxu0 %v26422_v24 }
 0xce9   : > { %17557 = vmatpush1.bf16.msra.mxu0 %v23351_v11  ;;  %v23423_v11 = vld [vmem:[%s26974_s8 + $0x8] ss:$16 sps:$4 sm:$0xff]  }
 0xcea   : > { %17558 = vmatprep.subr.bf16.mxu0 %v23356_v3  ;;  %v23428_v3 = vld [vmem:[%s26974_s8 + $0x2c] ss:$16 sps:$4 sm:$0xff]  }
 0xceb   : > { %v26435_v31 = vpop.f32.mrb[112].mxu0 }
 0xcec   : > { %v16078_v7 = vpop.f32.mrb[113].mxu0  ;;  %v26528_v0 = vpack.c.bf16 %v26435_v31, %v26435_v31  ;;  %v23429_v31 = vld [vmem:[%s26974_s8 + $0x48] ss:$16 sps:$4 sm:$0xff]  }
 0xced   : > { %17559 = vmatpush1.bf16.msra.mxu0 %v23354_v38  ;;  %v26440_v29 = vpack.c.bf16 %v16078_v7, %v16078_v7  ;;  %v16080_v10 = vpop.f32.mrb[114].mxu0  ;;  %v23426_v38 = vld [vmem:[%s26974_s8 + $0x28] ss:$16 sps:$4 sm:$0xff]   ;;  %v23434_v7 = vld [vmem:[%s26974_s8 + $0x6c] ss:$16 sps:$4 sm:$0xff]  }
 0xcee   : > { %17560 = vmatprep.subr.bf16.mxu0 %v23359_v63  ;;  %v16081_v15 = vpop.f32.mrb[115].mxu0  ;;  %v23431_v63 = vld [vmem:[%s26974_s8 + $0x4c] ss:$16 sps:$4 sm:$0xff]   ;;  %v23435_v10 = vld [vmem:[%s26974_s8 + $0x88] ss:$16 sps:$4 sm:$0xff]  }
 0xcef   : > { %17588 = vmatprep.mubr.bf16.mxu0 %v26440_v29  ;;  %v23438_v15 = vld [vmem:[%s26974_s8 + $0xa8] ss:$16 sps:$4 sm:$0xff]  }
 0xcf1   : > { %17561 = vmatpush1.bf16.msra.mxu0 %v23357_v21  ;;  %v23437_v21 = vld [vmem:[%s26974_s8 + $0x8c] ss:$16 sps:$4 sm:$0xff]  }
 0xcf2   : > { %17562 = vmatprep.subr.bf16.mxu0 %v23362_v14  ;;  %v23440_v14 = vld [vmem:[%s26974_s8 + $0xac] ss:$16 sps:$4 sm:$0xff]  }
 0xcf3   : > { %v26452_v25 = vpop.f32.mrb[116].mxu0 }
 0xcf4   : > { %v20392_v51 = vpop.f32.mrb[117].mxu0  ;;  %v26585_v62 = vpack.c.bf16 %v26452_v25, %v26452_v25  ;;  %v23446_v25 = vld [vmem:[%s26974_s8 + $0xec] ss:$16 sps:$4 sm:$0xff]  }
 0xcf5   : > { %17563 = vmatpush1.bf16.msra.mxu0 %v23360_v52  ;;  %v16120_v28 = vpop.f32.mrb[118].mxu0  ;;  %v23443_v52 = vld [vmem:[%s26974_s8 + $0xcc] ss:$16 sps:$4 sm:$0xff]   ;;  %v23444_v51 = vld [vmem:[%s26974_s8 + $0xe8] ss:$16 sps:$4 sm:$0xff]  }
 0xcf6   : > { %17564 = vmatprep.subr.bf16.mxu0 %v23365_v19  ;;  %v20393_v55 = vpop.f32.mrb[119].mxu0  ;;  %v23441_v19 = vld [vmem:[%s26974_s8 + $0xc8] ss:$16 sps:$4 sm:$0xff]  }
 0xcf7   : > { %v23447_v28 = vld [vmem:[%s26974_s8 + $0x108] ss:$16 sps:$4 sm:$0xff]  }
 0xcf8   : > { %v23450_v55 = vld [vmem:[%s26974_s8 + $0x128] ss:$16 sps:$4 sm:$0xff]  }
 0xcf9   : > { %17565 = vmatpush1.bf16.msra.mxu0 %v23363_v12  ;;  %v23449_v12 = vld [vmem:[%s26974_s8 + $0x10c] ss:$16 sps:$4 sm:$0xff]  }
 0xcfa   : > { %17566 = vmatprep.subr.bf16.mxu0 %v23368_v39  ;;  %v23452_v39 = vld [vmem:[%s26974_s8 + $0x12c] ss:$16 sps:$4 sm:$0xff]  }
 0xcfd   : > { %17567 = vmatpush1.bf16.msra.mxu0 %v23366_v37  ;;  %v23455_v37 = vld [vmem:[%s26974_s8 + $0x14c] ss:$16 sps:$4 sm:$0xff]  }
 0xcfe   : > { %17568 = vmatprep.subr.bf16.mxu0 %v23371_v23  ;;  %v23453_v23 = vld [vmem:[%s26974_s8 + $0x148] ss:$16 sps:$4 sm:$0xff]  }
 0xd01   : > { %17569 = vmatpush1.bf16.msra.mxu0 %v23369_v27  ;;  %v23458_v27 = vld [vmem:[%s26974_s8 + $0x16c] ss:$16 sps:$4 sm:$0xff]  }
 0xd02   : > { %17570 = vmatprep.subr.bf16.mxu0 %v23374_v42  ;;  %v23456_v42 = vld [vmem:[%s26974_s8 + $0x168] ss:$16 sps:$4 sm:$0xff]  }
 0xd05   : > { %17571 = vmatpush1.bf16.msra.mxu0 %v23372_v54  ;;  %v23461_v54 = vld [vmem:[%s26974_s8 + $0x18c] ss:$16 sps:$4 sm:$0xff]  }
 0xd06   : > { %17572 = vmatprep.subr.bf16.mxu0 %v23377_v4  ;;  %v23459_v4 = vld [vmem:[%s26974_s8 + $0x188] ss:$16 sps:$4 sm:$0xff]  }
 0xd09   : > { %17573 = vmatpush1.bf16.msra.mxu0 %v23375_v26  ;;  %v23464_v26 = vld [vmem:[%s26974_s8 + $0x1ac] ss:$16 sps:$4 sm:$0xff]  }
 0xd0a   : > { %17574 = vmatprep.subr.bf16.mxu0 %v23380_v2  ;;  %v23462_v2 = vld [vmem:[%s26974_s8 + $0x1a8] ss:$16 sps:$4 sm:$0xff]  }
 0xd0d   : > { %17575 = vmatpush1.bf16.msra.mxu0 %v23378_v48  ;;  %v23467_v48 = vld [vmem:[%s26974_s8 + $0x1cc] ss:$16 sps:$4 sm:$0xff]  }
 0xd0e   : > { %17576 = vmatprep.subr.bf16.mxu0 %v23383_v6  ;;  %v23465_v6 = vld [vmem:[%s26974_s8 + $0x1c8] ss:$16 sps:$4 sm:$0xff]  }
 0xd11   : > { %17577 = vmatpush1.bf16.msra.mxu0 %v23381_v44  ;;  %v23470_v44 = vld [vmem:[%s26974_s8 + $0x1ec] ss:$16 sps:$4 sm:$0xff]  }
 0xd12   : > { %17578 = vmatprep.subr.bf16.mxu0 %v23386_v34  ;;  %v23468_v34 = vld [vmem:[%s26974_s8 + $0x1e8] ss:$16 sps:$4 sm:$0xff]  }
 0xd15   : > { %17579 = vmatpush1.bf16.msra.mxu0 %v23384_v36  ;;  %v23473_v36 = vld [vmem:[%s26974_s8 + $0x20c] ss:$16 sps:$4 sm:$0xff]  }
 0xd16   : > { %17580 = vmatprep.subr.bf16.mxu0 %v23389_v18  ;;  %v23471_v18 = vld [vmem:[%s26974_s8 + $0x208] ss:$16 sps:$4 sm:$0xff]  }
 0xd19   : > { %17581 = vmatpush1.bf16.msra.mxu0 %v23387_v45  ;;  %v23476_v45 = vld [vmem:[%s26974_s8 + $0x22c] ss:$16 sps:$4 sm:$0xff]  }
 0xd1a   : > { %17582 = vmatprep.subr.bf16.mxu0 %v23392_v33  ;;  %v23474_v33 = vld [vmem:[%s26974_s8 + $0x228] ss:$16 sps:$4 sm:$0xff]  }
 0xd1d   : > { %17583 = vmatpush1.bf16.msra.mxu0 %v23390_v22  ;;  %v23479_v22 = vld [vmem:[%s26974_s8 + $0x24c] ss:$16 sps:$4 sm:$0xff]  }
 0xd1e   : > { %17584 = vmatprep.subr.bf16.mxu0 %v23395_v20  ;;  %v23477_v20 = vld [vmem:[%s26974_s8 + $0x248] ss:$16 sps:$4 sm:$0xff]  }
 0xd21   : > { %17585 = vmatpush1.bf16.msra.mxu0 %v23393_v9  ;;  %v23485_v9 = vld [vmem:[%s26974_s8 + $0x28c] ss:$16 sps:$4 sm:$0xff]  }
 0xd22   : > { %17586 = vmatprep.subr.bf16.mxu0 %v23398_v5  ;;  %v23483_v5 = vld [vmem:[%s26974_s8 + $0x288] ss:$16 sps:$4 sm:$0xff]  }
 0xd25   : > { %17587 = vmatpush1.bf16.msra.mxu0 %v23396_v57  ;;  %v23488_v57 = vld [vmem:[%s26974_s8 + $0x2ac] ss:$16 sps:$4 sm:$0xff]  }
 0xd26   : > { %17597 = vmatprep.subr.bf16.mxu0 %v23401_v16  ;;  %v23486_v16 = vld [vmem:[%s26974_s8 + $0x2a8] ss:$16 sps:$4 sm:$0xff]  }
 0xd28   : > { %17589 = vmatmul.mubr.bf16.vlgmr.msra.gmra.mrb[120].mxu0 %v26528_v0 }
 0xd29   : > { %17598 = vmatpush1.bf16.msra.mxu0 %v23399_v46  ;;  %17629 = vmatprep.mubr.bf16.mxu0 %v27021_v13  ;;  %v23491_v46 = vld [vmem:[%s26974_s8 + $0x2cc] ss:$16 sps:$4 sm:$0xff]  }
 0xd2a   : > { %17599 = vmatprep.subr.bf16.mxu0 %v23404_v56  ;;  %v23489_v56 = vld [vmem:[%s26974_s8 + $0x2c8] ss:$16 sps:$4 sm:$0xff]  }
 0xd2d   : > { %17600 = vmatpush1.bf16.msra.mxu0 %v23402_v60  ;;  %v23494_v60 = vld [vmem:[%s26974_s8 + $0x2ec] ss:$16 sps:$4 sm:$0xff]  }
 0xd2e   : > { %17601 = vmatprep.subr.bf16.mxu0 %v23407_v49  ;;  %v23492_v49 = vld [vmem:[%s26974_s8 + $0x2e8] ss:$16 sps:$4 sm:$0xff]  }
 0xd31   : > { %17602 = vmatpush1.bf16.msra.mxu0 %v23405_v30  ;;  %v23497_v30 = vld [vmem:[%s26974_s8 + $0x30c] ss:$16 sps:$4 sm:$0xff]  }
 0xd32   : > { %17603 = vmatprep.subr.bf16.mxu0 %v23410_v61  ;;  %v23495_v61 = vld [vmem:[%s26974_s8 + $0x308] ss:$16 sps:$4 sm:$0xff]  }
 0xd35   : > { %17604 = vmatpush1.bf16.msra.mxu0 %v23408_v50  ;;  %v23500_v50 = vld [vmem:[%s26974_s8 + $0x32c] ss:$16 sps:$4 sm:$0xff]  }
 0xd36   : > { %17605 = vmatprep.subr.bf16.mxu0 %v23413_v47  ;;  %v23498_v47 = vld [vmem:[%s26974_s8 + $0x328] ss:$16 sps:$4 sm:$0xff]  }
 0xd39   : > { %17606 = vmatpush1.bf16.msra.mxu0 %v23411_v17  ;;  %v23503_v17 = vld [vmem:[%s26974_s8 + $0x34c] ss:$16 sps:$4 sm:$0xff]  }
 0xd3a   : > { %17607 = vmatprep.subr.bf16.mxu0 %v23416_v53  ;;  %v23501_v53 = vld [vmem:[%s26974_s8 + $0x348] ss:$16 sps:$4 sm:$0xff]  }
 0xd3d   : > { %17608 = vmatpush1.bf16.msra.mxu0 %v23414_v41  ;;  %v23506_v41 = vld [vmem:[%s26974_s8 + $0x36c] ss:$16 sps:$4 sm:$0xff]  }
 0xd3e   : > { %17609 = vmatprep.subr.bf16.mxu0 %v23419_v43  ;;  %v23504_v43 = vld [vmem:[%s26974_s8 + $0x368] ss:$16 sps:$4 sm:$0xff]  }
 0xd41   : > { %17610 = vmatpush1.bf16.msra.mxu0 %v23417_v58  ;;  %v23509_v58 = vld [vmem:[%s26974_s8 + $0x38c] ss:$16 sps:$4 sm:$0xff]  }
 0xd42   : > { %17611 = vmatprep.subr.bf16.mxu0 %v23422_v40  ;;  %v23507_v40 = vld [vmem:[%s26974_s8 + $0x388] ss:$16 sps:$4 sm:$0xff]  }
 0xd45   : > { %17612 = vmatpush1.bf16.msra.mxu0 %v23420_v8  ;;  %v23512_v8 = vld [vmem:[%s26974_s8 + $0x3ac] ss:$16 sps:$4 sm:$0xff]  }
 0xd46   : > { %17638 = vmatprep.subr.bf16.mxu0 %v23425_v32  ;;  %v23510_v32 = vld [vmem:[%s26974_s8 + $0x3a8] ss:$16 sps:$4 sm:$0xff]  }
 0xd48   : > { %17630 = vmatmul.mubr.bf16.vlgmr.msra.gmra.mrb[120].mxu0 %v26585_v62 }
 0xd49   : > { %17639 = vmatpush1.bf16.msra.mxu0 %v23423_v11  ;;  %17670 = vmatprep.mubr.bf16.mxu0 %v26309_v35  ;;  %v23432_v35 = vld [vmem:[%s26974_s8 + $0x68] ss:$16 sps:$4 sm:$0xff]   ;;  %v23515_v11 = vld [vmem:[%s26974_s8 + $0x3cc] ss:$16 sps:$4 sm:$0xff]  }
 0xd4a   : > { %17640 = vmatprep.subr.bf16.mxu0 %v23428_v3  ;;  %v23513_v3 = vld [vmem:[%s26974_s8 + $0x3c8] ss:$16 sps:$4 sm:$0xff]  }
 0xd4d   : > { %17641 = vmatpush1.bf16.msra.mxu0 %v23426_v38  ;;  %v23518_v38 = vld [vmem:[%s26974_s8 + $0x3ec] ss:$16 sps:$4 sm:$0xff]  }
 0xd4e   : > { %17642 = vmatprep.subr.bf16.mxu0 %v23431_v63  ;;  %v23516_v63 = vld [vmem:[%s26974_s8 + $0x3e8] ss:$16 sps:$4 sm:$0xff]  }
 0xd51   : > { %17643 = vmatpush1.bf16.msra.mxu0 %v23429_v31  ;;  %v23521_v31 = vld [vmem:[%s26974_s8 + $0x40c] ss:$16 sps:$4 sm:$0xff]  }
 0xd52   : > { %17644 = vmatprep.subr.bf16.mxu0 %v23434_v7  ;;  %v23519_v7 = vld [vmem:[%s26974_s8 + $0x408] ss:$16 sps:$4 sm:$0xff]  }
 0xd55   : > { %17645 = vmatpush1.bf16.msra.mxu0 %v23432_v35  ;;  %v23524_v35 = vld [vmem:[%s26974_s8 + $0x42c] ss:$16 sps:$4 sm:$0xff]  }
 0xd56   : > { %17646 = vmatprep.subr.bf16.mxu0 %v23437_v21  ;;  %v23522_v21 = vld [vmem:[%s26974_s8 + $0x428] ss:$16 sps:$4 sm:$0xff]  }
 0xd59   : > { %17647 = vmatpush1.bf16.msra.mxu0 %v23435_v10  ;;  %v23527_v10 = vld [vmem:[%s26974_s8 + $0x44c] ss:$16 sps:$4 sm:$0xff]  }
 0xd5a   : > { %17648 = vmatprep.subr.bf16.mxu0 %v23440_v14  ;;  %v23525_v14 = vld [vmem:[%s26974_s8 + $0x448] ss:$16 sps:$4 sm:$0xff]  }
 0xd5d   : > { %17649 = vmatpush1.bf16.msra.mxu0 %v23438_v15  ;;  %v23533_v15 = vld [vmem:[%s26974_s8 + $0x48c] ss:$16 sps:$4 sm:$0xff]  }
 0xd5e   : > { %17650 = vmatprep.subr.bf16.mxu0 %v23443_v52  ;;  %v23531_v52 = vld [vmem:[%s26974_s8 + $0x488] ss:$16 sps:$4 sm:$0xff]  }
 0xd61   : > { %17651 = vmatpush1.bf16.msra.mxu0 %v23441_v19  ;;  %v23536_v19 = vld [vmem:[%s26974_s8 + $0x4ac] ss:$16 sps:$4 sm:$0xff]  }
 0xd62   : > { %17652 = vmatprep.subr.bf16.mxu0 %v23446_v25  ;;  %v23534_v25 = vld [vmem:[%s26974_s8 + $0x4a8] ss:$16 sps:$4 sm:$0xff]  }
 0xd65   : > { %17653 = vmatpush1.bf16.msra.mxu0 %v23444_v51  ;;  %v23539_v51 = vld [vmem:[%s26974_s8 + $0x4cc] ss:$16 sps:$4 sm:$0xff]  }
 0xd66   : > { %17654 = vmatprep.subr.bf16.mxu0 %v23449_v12  ;;  %v23537_v12 = vld [vmem:[%s26974_s8 + $0x4c8] ss:$16 sps:$4 sm:$0xff]  }
 0xd69   : > { %17655 = vmatpush1.bf16.msra.mxu0 %v23447_v28  ;;  %v23542_v28 = vld [vmem:[%s26974_s8 + $0x4ec] ss:$16 sps:$4 sm:$0xff]  }
 0xd6a   : > { %17656 = vmatprep.subr.bf16.mxu0 %v23452_v39  ;;  %v23540_v39 = vld [vmem:[%s26974_s8 + $0x4e8] ss:$16 sps:$4 sm:$0xff]  }
 0xd6d   : > { %17657 = vmatpush1.bf16.msra.mxu0 %v23450_v55  ;;  %v23545_v55 = vld [vmem:[%s26974_s8 + $0x50c] ss:$16 sps:$4 sm:$0xff]  }
 0xd6e   : > { %17658 = vmatprep.subr.bf16.mxu0 %v23455_v37  ;;  %v23543_v37 = vld [vmem:[%s26974_s8 + $0x508] ss:$16 sps:$4 sm:$0xff]  }
 0xd71   : > { %17659 = vmatpush1.bf16.msra.mxu0 %v23453_v23  ;;  %v23548_v23 = vld [vmem:[%s26974_s8 + $0x52c] ss:$16 sps:$4 sm:$0xff]  }
 0xd72   : > { %17660 = vmatprep.subr.bf16.mxu0 %v23458_v27  ;;  %v23546_v27 = vld [vmem:[%s26974_s8 + $0x528] ss:$16 sps:$4 sm:$0xff]  }
 0xd75   : > { %17661 = vmatpush1.bf16.msra.mxu0 %v23456_v42  ;;  %v23551_v42 = vld [vmem:[%s26974_s8 + $0x54c] ss:$16 sps:$4 sm:$0xff]  }
 0xd76   : > { %17662 = vmatprep.subr.bf16.mxu0 %v23461_v54  ;;  %v23549_v54 = vld [vmem:[%s26974_s8 + $0x548] ss:$16 sps:$4 sm:$0xff]  }
 0xd79   : > { %17663 = vmatpush1.bf16.msra.mxu0 %v23459_v4  ;;  %v23554_v4 = vld [vmem:[%s26974_s8 + $0x56c] ss:$16 sps:$4 sm:$0xff]  }
 0xd7a   : > { %17664 = vmatprep.subr.bf16.mxu0 %v23464_v26  ;;  %v23552_v26 = vld [vmem:[%s26974_s8 + $0x568] ss:$16 sps:$4 sm:$0xff]  }
 0xd7d   : > { %17665 = vmatpush1.bf16.msra.mxu0 %v23462_v2  ;;  %v23557_v2 = vld [vmem:[%s26974_s8 + $0x58c] ss:$16 sps:$4 sm:$0xff]  }
 0xd7e   : > { %17666 = vmatprep.subr.bf16.mxu0 %v23467_v48  ;;  %v23555_v48 = vld [vmem:[%s26974_s8 + $0x588] ss:$16 sps:$4 sm:$0xff]  }
 0xd81   : > { %17667 = vmatpush1.bf16.msra.mxu0 %v23465_v6  ;;  %v23560_v6 = vld [vmem:[%s26974_s8 + $0x5ac] ss:$16 sps:$4 sm:$0xff]  }
 0xd82   : > { %17668 = vmatprep.subr.bf16.mxu0 %v23470_v44  ;;  %v23558_v44 = vld [vmem:[%s26974_s8 + $0x5a8] ss:$16 sps:$4 sm:$0xff]  }
 0xd85   : > { %17669 = vmatpush1.bf16.msra.mxu0 %v23468_v34  ;;  %v23563_v34 = vld [vmem:[%s26974_s8 + $0x5cc] ss:$16 sps:$4 sm:$0xff]  }
 0xd86   : > { %17679 = vmatprep.subr.bf16.mxu0 %v23473_v36  ;;  %v23561_v36 = vld [vmem:[%s26974_s8 + $0x5c8] ss:$16 sps:$4 sm:$0xff]  }
 0xd88   : > { %17671 = vmatmul.mubr.bf16.vlgmr.msra.gmra.mrb[124].mxu0 %v26318_v1  ;;  %v23482_v1 = vld [vmem:[%s26974_s8 + $0x26c] ss:$16 sps:$4 sm:$0xff]  }
 0xd89   : > { %17680 = vmatpush1.bf16.msra.mxu0 %v23471_v18  ;;  %17711 = vmatprep.mubr.bf16.mxu0 %v26417_v59  ;;  %v23480_v59 = vld [vmem:[%s26974_s8 + $0x268] ss:$16 sps:$4 sm:$0xff]   ;;  %v23566_v18 = vld [vmem:[%s26974_s8 + $0x5ec] ss:$16 sps:$4 sm:$0xff]  }
 0xd8a   : > { %17681 = vmatprep.subr.bf16.mxu0 %v23476_v45  ;;  %v23564_v45 = vld [vmem:[%s26974_s8 + $0x5e8] ss:$16 sps:$4 sm:$0xff]  }
 0xd8d   : > { %17682 = vmatpush1.bf16.msra.mxu0 %v23474_v33  ;;  %v23569_v33 = vld [vmem:[%s26974_s8 + $0x60c] ss:$16 sps:$4 sm:$0xff]  }
 0xd8e   : > { %17683 = vmatprep.subr.bf16.mxu0 %v23479_v22  ;;  %v23567_v22 = vld [vmem:[%s26974_s8 + $0x608] ss:$16 sps:$4 sm:$0xff]  }
 0xd91   : > { %17684 = vmatpush1.bf16.msra.mxu0 %v23477_v20  ;;  %v23572_v20 = vld [vmem:[%s26974_s8 + $0x62c] ss:$16 sps:$4 sm:$0xff]  }
 0xd92   : > { %17685 = vmatprep.subr.bf16.mxu0 %v23482_v1  ;;  %v23570_v1 = vld [vmem:[%s26974_s8 + $0x628] ss:$16 sps:$4 sm:$0xff]  }
 0xd95   : > { %17686 = vmatpush1.bf16.msra.mxu0 %v23480_v59  ;;  %v23575_v59 = vld [vmem:[%s26974_s8 + $0x64c] ss:$16 sps:$4 sm:$0xff]  }
 0xd96   : > { %17687 = vmatprep.subr.bf16.mxu0 %v23485_v9  ;;  %v23573_v9 = vld [vmem:[%s26974_s8 + $0x648] ss:$16 sps:$4 sm:$0xff]  }
 0xd99   : > { %17688 = vmatpush1.bf16.msra.mxu0 %v23483_v5  ;;  %v23581_v5 = vld [vmem:[%s26974_s8 + $0x68c] ss:$16 sps:$4 sm:$0xff]  }
 0xd9a   : > { %17689 = vmatprep.subr.bf16.mxu0 %v23488_v57  ;;  %v23579_v57 = vld [vmem:[%s26974_s8 + $0x688] ss:$16 sps:$4 sm:$0xff]  }
 0xd9d   : > { %17690 = vmatpush1.bf16.msra.mxu0 %v23486_v16  ;;  %v23584_v16 = vld [vmem:[%s26974_s8 + $0x6ac] ss:$16 sps:$4 sm:$0xff]  }
 0xd9e   : > { %17691 = vmatprep.subr.bf16.mxu0 %v23491_v46 }
 0xda1   : > { %17692 = vmatpush1.bf16.msra.mxu0 %v23489_v56 }
 0xda2   : > { %17693 = vmatprep.subr.bf16.mxu0 %v23494_v60  ;;  %v23582_v60 = vld [vmem:[%s26974_s8 + $0x6a8] ss:$16 sps:$4 sm:$0xff]  }
 0xda5   : > { %17694 = vmatpush1.bf16.msra.mxu0 %v23492_v49  ;;  %v23587_v49 = vld [vmem:[%s26974_s8 + $0x6cc] ss:$16 sps:$4 sm:$0xff]  }
 0xda6   : > { %17695 = vmatprep.subr.bf16.mxu0 %v23497_v30 }
 0xda9   : > { %17696 = vmatpush1.bf16.msra.mxu0 %v23495_v61 }
 0xdaa   : > { %17697 = vmatprep.subr.bf16.mxu0 %v23500_v50  ;;  %v17824_v50 = vld [vmem:[%s26920_s25] sm:$0xff] }
 0xdad   : > { %17698 = vmatpush1.bf16.msra.mxu0 %v23498_v47 }
 0xdae   : > { %17699 = vmatprep.subr.bf16.mxu0 %v23503_v17 }
 0xdb1   : > { %17700 = vmatpush1.bf16.msra.mxu0 %v23501_v53  ;;  %v23585_v53 = vld [vmem:[%s26974_s8 + $0x6c8] ss:$16 sps:$4 sm:$0xff]  }
 0xdb2   : > { %17701 = vmatprep.subr.bf16.mxu0 %v23506_v41 }
 0xdb5   : > { %17702 = vmatpush1.bf16.msra.mxu0 %v23504_v43  ;;  %v23590_v43 = vld [vmem:[%s26974_s8 + $0x6ec] ss:$16 sps:$4 sm:$0xff]  }
 0xdb6   : > { %17703 = vmatprep.subr.bf16.mxu0 %v23509_v58 }
 0xdb9   : > { %17704 = vmatpush1.bf16.msra.mxu0 %v23507_v40  ;;  %v23588_v40 = vld [vmem:[%s26974_s8 + $0x6e8] ss:$16 sps:$4 sm:$0xff]  }
 0xdba   : > { %17705 = vmatprep.subr.bf16.mxu0 %v23512_v8 }
 0xdbd   : > { %17706 = vmatpush1.bf16.msra.mxu0 %v23510_v32 }
 0xdbe   : > { %17707 = vmatprep.subr.bf16.mxu0 %v23515_v11  ;;  %v17830_v11 = vld [vmem:[%s26920_s25 + $0x8] sm:$0xff] }
 0xdc1   : > { %17708 = vmatpush1.bf16.msra.mxu0 %v23513_v3 }
 0xdc2   : > { %17709 = vmatprep.subr.bf16.mxu0 %v23518_v38 }
 0xdc5   : > { %17710 = vmatpush1.bf16.msra.mxu0 %v23516_v63 }
 0xdc6   : > { %17720 = vmatprep.subr.bf16.mxu0 %v23521_v31 }
 0xdc8   : > { %17712 = vmatmul.mubr.bf16.vlgmr.msra.gmra.mrb[124].mxu0 %v26422_v24  ;;  %v23530_v24 = vld [vmem:[%s26974_s8 + $0x46c] ss:$16 sps:$4 sm:$0xff]  }
 0xdc9   : > { %17721 = vmatpush1.bf16.msra.mxu0 %v23519_v7  ;;  %17752 = vmatprep.mubr.bf16.mxu0 %v26440_v29  ;;  %v23528_v29 = vld [vmem:[%s26974_s8 + $0x468] ss:$16 sps:$4 sm:$0xff]  }
 0xdca   : > { %17722 = vmatprep.subr.bf16.mxu0 %v23524_v35 }
 0xdcd   : > { %17723 = vmatpush1.bf16.msra.mxu0 %v23522_v21 }
 0xdce   : > { %17724 = vmatprep.subr.bf16.mxu0 %v23527_v10 }
 0xdd1   : > { %17725 = vmatpush1.bf16.msra.mxu0 %v23525_v14 }
 0xdd2   : > { %17726 = vmatprep.subr.bf16.mxu0 %v23530_v24 }
 0xdd5   : > { %17727 = vmatpush1.bf16.msra.mxu0 %v23528_v29 }
 0xdd6   : > { %17728 = vmatprep.subr.bf16.mxu0 %v23533_v15 }
 0xdd9   : > { %17729 = vmatpush1.bf16.msra.mxu0 %v23531_v52 }
 0xdda   : > { %17730 = vmatprep.subr.bf16.mxu0 %v23536_v19 }
 0xddd   : > { %17731 = vmatpush1.bf16.msra.mxu0 %v23534_v25 }
 0xdde   : > { %17732 = vmatprep.subr.bf16.mxu0 %v23539_v51 }
 0xde1   : > { %17733 = vmatpush1.bf16.msra.mxu0 %v23537_v12 }
 0xde2   : > { %17734 = vmatprep.subr.bf16.mxu0 %v23542_v28 }
 0xde5   : > { %17735 = vmatpush1.bf16.msra.mxu0 %v23540_v39 }
 0xde6   : > { %17736 = vmatprep.subr.bf16.mxu0 %v23545_v55 }
 0xde9   : > { %17737 = vmatpush1.bf16.msra.mxu0 %v23543_v37 }
 0xdea   : > { %17738 = vmatprep.subr.bf16.mxu0 %v23548_v23 }
 0xded   : > { %17739 = vmatpush1.bf16.msra.mxu0 %v23546_v27 }
 0xdee   : > { %17740 = vmatprep.subr.bf16.mxu0 %v23551_v42 }
 0xdf1   : > { %17741 = vmatpush1.bf16.msra.mxu0 %v23549_v54 }
 0xdf2   : > { %17742 = vmatprep.subr.bf16.mxu0 %v23554_v4 }
 0xdf5   : > { %17743 = vmatpush1.bf16.msra.mxu0 %v23552_v26 }
 0xdf6   : > { %17744 = vmatprep.subr.bf16.mxu0 %v23557_v2 }
 0xdf9   : > { %17745 = vmatpush1.bf16.msra.mxu0 %v23555_v48 }
 0xdfa   : > { %17746 = vmatprep.subr.bf16.mxu0 %v23560_v6 }
 0xdfd   : > { %17747 = vmatpush1.bf16.msra.mxu0 %v23558_v44 }
 0xdfe   : > { %17748 = vmatprep.subr.bf16.mxu0 %v23563_v34 }
 0xe01   : > { %17749 = vmatpush1.bf16.msra.mxu0 %v23561_v36 }
 0xe02   : > { %17750 = vmatprep.subr.bf16.mxu0 %v23566_v18 }
 0xe05   : > { %17751 = vmatpush1.bf16.msra.mxu0 %v23564_v45 }
 0xe06   : > { %17761 = vmatprep.subr.bf16.mxu0 %v23569_v33 }
 0xe08   : > { %17753 = vmatmul.mubr.bf16.vlgmr.msra.gmra.mrb[124].mxu0 %v26528_v0  ;;  %v23578_v0 = vld [vmem:[%s26974_s8 + $0x66c] ss:$16 sps:$4 sm:$0xff]  }
 0xe09   : > { %17762 = vmatpush1.bf16.msra.mxu0 %v23567_v22  ;;  %17793 = vmatprep.mubr.bf16.mxu0 %v27021_v13  ;;  %v23576_v13 = vld [vmem:[%s26974_s8 + $0x668] ss:$16 sps:$4 sm:$0xff]  }
 0xe0a   : > { %17763 = vmatprep.subr.bf16.mxu0 %v23572_v20 }
 0xe0d   : > { %17764 = vmatpush1.bf16.msra.mxu0 %v23570_v1 }
 0xe0e   : > { %17765 = vmatprep.subr.bf16.mxu0 %v23575_v59 }
 0xe11   : > { %17766 = vmatpush1.bf16.msra.mxu0 %v23573_v9 }
 0xe12   : > { %17767 = vmatprep.subr.bf16.mxu0 %v23578_v0 }
 0xe15   : > { %17768 = vmatpush1.bf16.msra.mxu0 %v23576_v13 }
 0xe16   : > { %17769 = vmatprep.subr.bf16.mxu0 %v23581_v5 }
 0xe19   : > { %17770 = vmatpush1.bf16.msra.mxu0 %v23579_v57 }
 0xe1a   : > { %17771 = vmatprep.subr.bf16.mxu0 %v23584_v16 }
 0xe1b   : > { %v17631_v30 = vpop.f32.mrb[120].mxu0 }
 0xe1c   : > { %v17633_v61 = vpop.f32.mrb[121].mxu0 }
 0xe1d   : > { %v19893_v47 = vpack.c.bf16 %v17633_v61, %v17631_v30  ;;  %v17635_v17 = vpop.f32.mrb[122].mxu0  ;;  %17772 = vmatpush1.bf16.msra.mxu0 %v23582_v60 }
 0xe1e   : > { %v17636_v41 = vpop.f32.mrb[123].mxu0  ;;  %17773 = vmatprep.subr.bf16.mxu0 %v23587_v49 }
 0xe1f   : > { %v17825_v58 = vsel %vm17823_vm2, %v19893_v47, %v17824_v50 }
 0xe20   : > { %17826 = vst [vmem:[%s26920_s25] sm:$0xff] %v17825_v58 }
 0xe21   : > { %17774 = vmatpush1.bf16.msra.mxu0 %v23585_v53 }
 0xe22   : > { %17775 = vmatprep.subr.bf16.mxu0 %v23590_v43 }
 0xe25   : > { %17776 = vmatpush1.bf16.msra.mxu0 %v23588_v40 }
 0xe28   : > { %17794 = vmatmul.mubr.bf16.vlgmr.msra.gmra.mrb[124].mxu0 %v26585_v62 }
 0xefb   : > { %v17795_v8 = vpop.f32.mrb[124].mxu0 }
 0xefc   : > { %v17797_v32 = vpop.f32.mrb[125].mxu0 }
 0xefd   : > { %v19894_v3 = vpack.c.bf16 %v17797_v32, %v17795_v8  ;;  %v17799_v38 = vpop.f32.mrb[126].mxu0 }
 0xefe   : > { %v17800_v63 = vpop.f32.mrb[127].mxu0 }
 0xeff   : > { %v17831_v31 = vsel %vm17829_vm5, %v19894_v3, %v17830_v11 }
 0xf00   : > { %17832 = vst [vmem:[%s26920_s25 + $0x8] sm:$0xff] %v17831_v31 }
 0xf01 PF: > { %p22_p0 = scmp.ge.s32.totalorder %s24083_s27, 4   ;;  %s27034_s30 = smov %s23828_s10 }
 0xf02   : > { %s27035_s10 = smov %s23832_s11  ;;  %s27036_s11 = smov %s24095_s17 }
 0xf03   : > { %s27037_s12 = smov %s24083_s27  ;;  %24 = sbr.rel (!%p22_p0) target bundleno = 8 (0x8), region = 128 }
 0xf0a   :  { %17854 = vsyncpa [#allocation3], 1 }
 0xf0b   :  { %17856 = vsyncpa [#allocation3 + $0x1], 1 }
 0xf0c   :  { %17857 = vsyncpa [#allocation5], 1 }
 0xf0d   :  { %17858 = vsyncpa [#allocation8], 1 }
 0xf0e   :  { %17859 = vsyncpa [#allocation11], 1 }

</bundles_post_ra>
